<compile_context>
chip_gen: v6e
topology: v6e:2x2x1
jax: 0.10.0
libtpu: 0.0.40
codegen_flags: <defaults>
</compile_context>

<pallas_src>
import jax
import jax.numpy as jnp
from jax import lax
from jax.experimental import pallas as pl
from jax.experimental.pallas import tpu as pltpu

KSIZE = 8      # Conv1d kernel_size
PAD = 4        # Conv1d padding
POOL = 4       # MaxPool1d kernel_size == stride


# --------------------------------------------------------------------------------------
# Fused conv-stack kernel: one grid step == one batch tile of TB samples
# --------------------------------------------------------------------------------------
def _make_conv_stack_kernel(dims):
    TB = dims["TB"]
    L0, CIN = dims["L0"], dims["CIN"]
    C1, C2, C3 = dims["C1"], dims["C2"], dims["C3"]
    L1, L1P = dims["L1"], dims["L1P"]
    L2, L2P = dims["L2"], dims["L2P"]
    L3 = dims["L3"]
    bf16 = jnp.bfloat16

    def im2col(pad_ref, cols_ref, lout, cin):
        # cols[(t*lout + l), k*cin + ci] = pad[t, l + k, ci]
        # K static slice stores per sample; cols is bf16 (MXU operand storage).
        for t in range(TB):
            for k in range(KSIZE):
                cols_ref[t * lout:(t + 1) * lout, k * cin:(k + 1) * cin] = \
                    pad_ref[t, k:k + lout, :]

    def conv_relu(cols_ref, w_ref, b_ref):
        # ONE MXU matmul per layer for the whole batch tile (M = TB * L_layer),
        # bf16 operands with f32 accumulation; bias + ReLU in f32 on the VPU.
        y = jnp.dot(cols_ref[...], w_ref[...],
                    preferred_element_type=jnp.float32)
        return jnp.maximum(y + b_ref[...], 0.0)

    def pool_into_pad(y_ref, pad_ref, lin, lpool, cout):
        # MaxPool1d(4,4) fused directly into the next layer's padded input:
        # stride-4 sublane reads + VPU max; cast to bf16 only at the store.
        pad_ref[:, :PAD, :] = jnp.zeros((TB, PAD, cout), bf16)
        pad_ref[:, PAD + lpool:PAD + lpool + PAD, :] = jnp.zeros((TB, PAD, cout), bf16)
        for t in range(TB):
            a = jnp.maximum(y_ref[pl.ds(t * lin + 0, lpool, stride=POOL), :],
                            y_ref[pl.ds(t * lin + 1, lpool, stride=POOL), :])
            b = jnp.maximum(y_ref[pl.ds(t * lin + 2, lpool, stride=POOL), :],
                            y_ref[pl.ds(t * lin + 3, lpool, stride=POOL), :])
            pad_ref[t, PAD:PAD + lpool, :] = jnp.maximum(a, b).astype(bf16)

    def kernel(x_ref, w1_ref, b1_ref, w2_ref, b2_ref, w3_ref, b3_ref,
               feat_ref, pad1, cols1, ybuf1, pad2, cols2, ybuf2, pad3, cols3):
        # ---- Conv1 -> ReLU -> MaxPool(4)    (Drop1 p=0.2: identity in eval) ----
        pad1[:, :PAD, :] = jnp.zeros((TB, PAD, CIN), bf16)
        pad1[:, PAD + L0:PAD + L0 + PAD, :] = jnp.zeros((TB, PAD, CIN), bf16)
        pad1[:, PAD:PAD + L0, :] = x_ref[...].astype(bf16)
        im2col(pad1, cols1, L1, CIN)
        ybuf1[...] = conv_relu(cols1, w1_ref, b1_ref)          # (TB*L1, C1) f32
        pool_into_pad(ybuf1, pad2, L1, L1P, C1)                # -> pad2 (bf16)

        # ---- Conv2 -> ReLU -> MaxPool(4)    (Drop1 p=0.2: identity in eval) ----
        im2col(pad2, cols2, L2, C1)
        ybuf2[...] = conv_relu(cols2, w2_ref, b2_ref)          # (TB*L2, C2) f32
        pool_into_pad(ybuf2, pad3, L2, L2P, C2)                # -> pad3 (bf16)

        # ---- Conv3 -> ReLU                   (Drop2 p=0.5: identity in eval) ----
        im2col(pad3, cols3, L3, C2)
        y3 = conv_relu(cols3, w3_ref, b3_ref)                  # (TB*L3, C3) f32
        for t in range(TB):
            feat_ref[t] = y3[t * L3:(t + 1) * L3, :].astype(feat_ref.dtype)

    return kernel


# --------------------------------------------------------------------------------------
# FC kernel: K-tiled Linear1 (streamed wl1) + fused ReLU + Linear2 epilogue
# --------------------------------------------------------------------------------------
def _fc_kernel(feat_ref, wl1_ref, bl1_ref, wl2_ref, bl2_ref, out_ref, acc_ref):
    k = pl.program_id(1)

    @pl.when(k == 0)
    def _():
        acc_ref[...] = jnp.zeros_like(acc_ref)

    acc_ref[...] += jnp.dot(feat_ref[...], wl1_ref[...],
                            preferred_element_type=jnp.float32)

    @pl.when(k == pl.num_programs(1) - 1)
    def _():
        h = jnp.maximum(acc_ref[...] + bl1_ref[...], 0.0)       # Linear1 bias + ReLU
        out_ref[...] = (jnp.dot(h.astype(jnp.bfloat16), wl2_ref[...],
                                preferred_element_type=jnp.float32)
                        + bl2_ref[...]).astype(out_ref.dtype)   # Linear2


# --------------------------------------------------------------------------------------
# One-time host-side parameter preparation (transposes / permutation / bf16 casts)
# --------------------------------------------------------------------------------------
def prepare_params(params):
    def conv_w(w):   # PyTorch (Cout, Cin, K) -> im2col (K*Cin, Cout), bf16
        cout, cin, k = w.shape
        return jnp.transpose(w, (2, 1, 0)).reshape(k * cin, cout).astype(jnp.bfloat16)

    def row(b):
        return b.reshape(1, -1).astype(jnp.float32)

    c3 = params["conv3_w"].shape[0]
    h, f = params["fc1_w"].shape
    l3 = f // c3
    assert c3 * l3 == f
    # Permute Linear1's input dim from PyTorch flatten order (c*L3 + l) to the
    # kernel flatten order (l*C3 + c) so no in-kernel transpose is needed.
    wl1 = (params["fc1_w"].reshape(h, c3, l3).transpose(2, 1, 0)
           .reshape(l3 * c3, h).astype(jnp.bfloat16))
    return {
        "w1": conv_w(params["conv1_w"]), "b1": row(params["conv1_b"]),
        "w2": conv_w(params["conv2_w"]), "b2": row(params["conv2_b"]),
        "w3": conv_w(params["conv3_w"]), "b3": row(params["conv3_b"]),
        "wl1": wl1, "bl1": row(params["fc1_b"]),
        "wl2": params["fc2_w"].T.astype(jnp.bfloat16), "bl2": row(params["fc2_b"]),
    }


# --------------------------------------------------------------------------------------
# Forward: conv-stack call (batch-tiled) + FC call (batched, K-tiled over F)
# --------------------------------------------------------------------------------------
def nas_deepsea_forward(x_ncl, prep, *, batch_tile=8, f_tile_target=512):
    """x_ncl: (B, Cin, L) float32 in PyTorch NCL layout."""
    B, CIN, L0 = x_ncl.shape
    C1 = prep["b1"].shape[1]
    C2 = prep["b2"].shape[1]
    C3 = prep["b3"].shape[1]
    H = prep["bl1"].shape[1]
    NCLS = prep["bl2"].shape[1]
    L1 = L0 + 2 * PAD - KSIZE + 1
    L1P = L1 // POOL
    L2 = L1P + 2 * PAD - KSIZE + 1
    L2P = L2 // POOL
    L3 = L2P + 2 * PAD - KSIZE + 1
    F = L3 * C3
    assert prep["wl1"].shape[0] == F, "input length inconsistent with fc1"

    # Batch tile: largest power-of-two divisor of B, capped at batch_tile.
    TB = 1
    while TB * 2 <= batch_tile and B % (TB * 2) == 0:
        TB *= 2
    assert B % TB == 0

    dims = dict(TB=TB, L0=L0, CIN=CIN, C1=C1, C2=C2, C3=C3,
                L1=L1, L1P=L1P, L2=L2, L2P=L2P, L3=L3)
    conv_kernel = _make_conv_stack_kernel(dims)

    # NCL -> NLC once at the boundary (length on sublanes, channels on lanes).
    x_nlc = jnp.transpose(x_ncl, (0, 2, 1)).astype(jnp.float32)

    conv_weights = (prep["w1"], prep["b1"], prep["w2"], prep["b2"],
                    prep["w3"], prep["b3"])

    conv_in_specs = [pl.BlockSpec((TB, L0, CIN), lambda b: (b, 0, 0))]
    conv_in_specs += [pl.BlockSpec(w.shape, lambda b: (0, 0)) for w in conv_weights]

    conv_scratch = [
        pltpu.VMEM((TB, L0 + 2 * PAD, CIN), jnp.bfloat16),   # pad1  (zero halos only)
        pltpu.VMEM((TB * L1, KSIZE * CIN), jnp.bfloat16),    # cols1 (im2col, bf16)
        pltpu.VMEM((TB * L1, C1), jnp.float32),              # ybuf1 (pre-pool, f32)
        pltpu.VMEM((TB, L1P + 2 * PAD, C1), jnp.bfloat16),   # pad2
        pltpu.VMEM((TB * L2, KSIZE * C1), jnp.bfloat16),     # cols2
        pltpu.VMEM((TB * L2, C2), jnp.float32),              # ybuf2
        pltpu.VMEM((TB, L2P + 2 * PAD, C2), jnp.bfloat16),   # pad3
        pltpu.VMEM((TB * L3, KSIZE * C2), jnp.bfloat16),     # cols3
    ]

    conv_flops = 2 * B * KSIZE * (L1 * CIN * C1 + L2 * C1 * C2 + L3 * C2 * C3)
    conv_bytes = (int(x_nlc.size) * 4
                  + sum(int(w.size) * w.dtype.itemsize for w in conv_weights)
                  + B * F * 2)

    feat = pl.pallas_call(
        conv_kernel,
        out_shape=jax.ShapeDtypeStruct((B, L3, C3), jnp.bfloat16),
        grid=(B // TB,),
        in_specs=conv_in_specs,
        out_specs=pl.BlockSpec((TB, L3, C3), lambda b: (b, 0, 0)),
        scratch_shapes=conv_scratch,
        compiler_params=pltpu.CompilerParams(
            dimension_semantics=("parallel",),          # batch splits across v7x TCs
            vmem_limit_bytes=48 * 1024 * 1024),
        cost_estimate=pl.CostEstimate(flops=conv_flops, transcendentals=0,
                                      bytes_accessed=conv_bytes),
    )(x_nlc, *conv_weights)

    # Kernel flatten order is (l*C3 + c); wl1 was pre-permuted to match.
    feat2d = feat.reshape(B, F)

    # ----- FC stage: stream wl1 in (F_tile, H) chunks (K-tiled contraction) -----
    f_tile = F
    for d in range(1, F + 1):
        if F % d == 0:
            c = F // d
            if c % 128 == 0 and c <= f_tile_target:
                f_tile = c
                break
    nk = F // f_tile

    if B <= 256:
        TB2 = B
    else:
        TB2 = 256
        while B % TB2 != 0:
            TB2 //= 2
    assert B % TB2 == 0

    fc_flops = 2 * B * (F * H + H * NCLS)
    fc_bytes = (B * F * 2 + int(prep["wl1"].size) * 2
                + int(prep["wl2"].size) * 2 + B * NCLS * 4)

    out = pl.pallas_call(
        _fc_kernel,
        out_shape=jax.ShapeDtypeStruct((B, NCLS), jnp.float32),
        grid=(B // TB2, nk),
        in_specs=[
            pl.BlockSpec((TB2, f_tile), lambda i, k: (i, k)),   # feature chunk
            pl.BlockSpec((f_tile, H), lambda i, k: (k, 0)),     # streamed wl1 chunk
            pl.BlockSpec((1, H), lambda i, k: (0, 0)),          # bl1
            pl.BlockSpec((H, NCLS), lambda i, k: (0, 0)),       # wl2
            pl.BlockSpec((1, NCLS), lambda i, k: (0, 0)),       # bl2
        ],
        out_specs=pl.BlockSpec((TB2, NCLS), lambda i, k: (i, 0)),
        scratch_shapes=[pltpu.VMEM((TB2, H), jnp.float32)],     # Linear1 accumulator
        compiler_params=pltpu.CompilerParams(
            dimension_semantics=("parallel", "arbitrary"),
            vmem_limit_bytes=48 * 1024 * 1024),
        cost_estimate=pl.CostEstimate(flops=fc_flops, transcendentals=0,
                                      bytes_accessed=fc_bytes),
    )(feat2d, prep["wl1"], prep["bl1"], prep["wl2"], prep["bl2"])

    return out


# --------------------------------------------------------------------------------------
# Pure-JAX fp32 reference mirroring the PyTorch module exactly
# --------------------------------------------------------------------------------------
def ref_forward(x_ncl, params):
    def conv1d(x, w, b):
        y = lax.conv_general_dilated(x, w, window_strides=(1,),
                                     padding=[(PAD, PAD)],
                                     dimension_numbers=("NCH", "OIH", "NCH"))
        return y + b[None, :, None]

    def pool4(x):
        n, c, l = x.shape
        lp = l // POOL
        return x[:, :, :POOL * lp].reshape(n, c, lp, POOL).max(axis=-1)

    x = pool4(jax.nn.relu(conv1d(x_ncl, params["conv1_w"], params["conv1_b"])))
    x = pool4(jax.nn.relu(conv1d(x, params["conv2_w"], params["conv2_b"])))
    x = jax.nn.relu(conv1d(x, params["conv3_w"], params["conv3_b"]))
    x = x.reshape(x.shape[0], -1)                         # channel-major flatten
    x = jax.nn.relu(x @ params["fc1_w"].T + params["fc1_b"])
    return x @ params["fc2_w"].T + params["fc2_b"]


if __name__ == "__main__":
    # Small configuration consistent with NAS_DeepSEA's structure (in_channels=4,
    # kernel=8, pad=4, MaxPool(4), 3 convs, 2 linears, 36 classes); channel /
    # hidden / length sizes are scaled down for a fast self-test.
    B, CIN, L0 = 2, 4, 128
    C1, C2, C3 = 32, 64, 128          # stand-ins for 320 / 480 / 960
    HIDDEN, NCLS = 256, 36            # stand-ins for 925 / 36

    L1 = L0 + 2 * PAD - KSIZE + 1
    L1P = L1 // POOL
    L2 = L1P + 2 * PAD - KSIZE + 1
    L2P = L2 // POOL
    L3 = L2P + 2 * PAD - KSIZE + 1
    F = C3 * L3                       # PyTorch (channel-major) flatten size

    key = jax.random.PRNGKey(0)
    keys = jax.random.split(key, 12)
    ki = iter(keys)

    def nrm(shape, s):
        return s * jax.random.normal(next(ki), shape, jnp.float32)

    params = {
        "conv1_w": nrm((C1, CIN, KSIZE), 0.1), "conv1_b": nrm((C1,), 0.1),
        "conv2_w": nrm((C2, C1, KSIZE), 0.1),  "conv2_b": nrm((C2,), 0.1),
        "conv3_w": nrm((C3, C2, KSIZE), 0.1),  "conv3_b": nrm((C3,), 0.1),
        "fc1_w": nrm((HIDDEN, F), 0.05),       "fc1_b": nrm((HIDDEN,), 0.05),
        "fc2_w": nrm((NCLS, HIDDEN), 0.05),    "fc2_b": nrm((NCLS,), 0.05),
    }
    x = jax.random.normal(next(ki), (B, CIN, L0), jnp.float32)

    prep = prepare_params(params)                   # one-time weight prep (hoisted)
    out = jax.block_until_ready(nas_deepsea_forward(x, prep))
    ref = jax.block_until_ready(ref_forward(x, params))

    assert out.shape == (B, NCLS), out.shape
    max_diff = float(jnp.max(jnp.abs(out - ref)))
    assert jnp.allclose(out, ref, rtol=5e-2, atol=5e-2), (
        "max |diff| = %f" % max_diff)
    print("KERNEL_OK")
</pallas_src>

<mosaic_0001>
module attributes {stable_mosaic.version = 11 : i64} {
  func.func @kernel(%arg0: i32, %arg1: memref<2x128x4xf32, #tpu.memory_space<vmem>>, %arg2: memref<32x32xbf16, #tpu.memory_space<vmem>>, %arg3: memref<1x32xf32, #tpu.memory_space<vmem>>, %arg4: memref<256x64xbf16, #tpu.memory_space<vmem>>, %arg5: memref<1x64xf32, #tpu.memory_space<vmem>>, %arg6: memref<512x128xbf16, #tpu.memory_space<vmem>>, %arg7: memref<1x128xf32, #tpu.memory_space<vmem>>, %arg8: memref<2x9x128xbf16, #tpu.memory_space<vmem>>, %arg9: memref<2x136x4xbf16, #tpu.memory_space<vmem>>, %arg10: memref<258x32xbf16, #tpu.memory_space<vmem>>, %arg11: memref<258x32xf32, #tpu.memory_space<vmem>>, %arg12: memref<2x40x32xbf16, #tpu.memory_space<vmem>>, %arg13: memref<66x256xbf16, #tpu.memory_space<vmem>>, %arg14: memref<66x64xf32, #tpu.memory_space<vmem>>, %arg15: memref<2x16x64xbf16, #tpu.memory_space<vmem>>, %arg16: memref<18x512xbf16, #tpu.memory_space<vmem>>) attributes {dimension_semantics = [#tpu.dimension_semantics<parallel>], iteration_bounds = array<i64: 1>, scalar_prefetch = 0 : i64, scratch_operands = 8 : i64, tpu.core_type = #tpu.core_type<tc>, window_params = [{transform_indices = @transform_0, window_bounds = array<i64: 2, 128, 4>}, {pipeline_mode = #tpu.pipeline_mode<synchronous>, transform_indices = @transform_1, window_bounds = array<i64: 32, 32>}, {pipeline_mode = #tpu.pipeline_mode<synchronous>, transform_indices = @transform_2, window_bounds = array<i64: 1, 32>}, {pipeline_mode = #tpu.pipeline_mode<synchronous>, transform_indices = @transform_3, window_bounds = array<i64: 256, 64>}, {pipeline_mode = #tpu.pipeline_mode<synchronous>, transform_indices = @transform_4, window_bounds = array<i64: 1, 64>}, {pipeline_mode = #tpu.pipeline_mode<synchronous>, transform_indices = @transform_5, window_bounds = array<i64: 512, 128>}, {pipeline_mode = #tpu.pipeline_mode<synchronous>, transform_indices = @transform_6, window_bounds = array<i64: 1, 128>}, {transform_indices = @transform_7, window_bounds = array<i64: 2, 9, 128>}]} {
    %cst = arith.constant 0.000000e+00 : bf16
    %0 = vector.broadcast %cst : bf16 to vector<2x4x4xbf16>
    %c0 = arith.constant 0 : index
    %c0_0 = arith.constant 0 : index
    %c0_1 = arith.constant 0 : index
    %1 = vector.load %arg9[%c0, %c0_0, %c0_1] : memref<2x136x4xbf16, #tpu.memory_space<vmem>>, vector<2x4x4xbf16>
    tpu.vector_store %arg9[%c0, %c0_0, %c0_1], %0 {strides = array<i32>} : memref<2x136x4xbf16, #tpu.memory_space<vmem>>, vector<2x4x4xbf16>,
    %cst_2 = arith.constant 0.000000e+00 : bf16
    %2 = vector.broadcast %cst_2 : bf16 to vector<2x4x4xbf16>
    %c0_3 = arith.constant 0 : index
    %c132 = arith.constant 132 : index
    %c0_4 = arith.constant 0 : index
    %3 = vector.load %arg9[%c0_3, %c132, %c0_4] : memref<2x136x4xbf16, #tpu.memory_space<vmem>>, vector<2x4x4xbf16>
    tpu.vector_store %arg9[%c0_3, %c132, %c0_4], %2 {strides = array<i32>} : memref<2x136x4xbf16, #tpu.memory_space<vmem>>, vector<2x4x4xbf16>,
    %c0_5 = arith.constant 0 : index
    %c0_6 = arith.constant 0 : index
    %c0_7 = arith.constant 0 : index
    %4 = vector.load %arg1[%c0_5, %c0_6, %c0_7] : memref<2x128x4xf32, #tpu.memory_space<vmem>>, vector<2x128x4xf32>
    %5 = arith.truncf %4 : vector<2x128x4xf32> to vector<2x128x4xbf16>
    %c0_8 = arith.constant 0 : index
    %c4 = arith.constant 4 : index
    %c0_9 = arith.constant 0 : index
    %6 = vector.load %arg9[%c0_8, %c4, %c0_9] : memref<2x136x4xbf16, #tpu.memory_space<vmem>>, vector<2x128x4xbf16>
    tpu.vector_store %arg9[%c0_8, %c4, %c0_9], %5 {strides = array<i32>} : memref<2x136x4xbf16, #tpu.memory_space<vmem>>, vector<2x128x4xbf16>,
    %c0_10 = arith.constant 0 : index
    %c0_11 = arith.constant 0 : index
    %c0_12 = arith.constant 0 : index
    %7 = vector.load %arg9[%c0_10, %c0_11, %c0_12] : memref<2x136x4xbf16, #tpu.memory_space<vmem>>, vector<1x129x4xbf16>
    %8 = vector.shape_cast %7 : vector<1x129x4xbf16> to vector<129x4xbf16>
    %c0_13 = arith.constant 0 : index
    %c0_14 = arith.constant 0 : index
    %9 = vector.load %arg10[%c0_13, %c0_14] : memref<258x32xbf16, #tpu.memory_space<vmem>>, vector<129x4xbf16>
    tpu.vector_store %arg10[%c0_13, %c0_14], %8 {strides = array<i32>} : memref<258x32xbf16, #tpu.memory_space<vmem>>, vector<129x4xbf16>,
    %c0_15 = arith.constant 0 : index
    %c1 = arith.constant 1 : index
    %c0_16 = arith.constant 0 : index
    %10 = vector.load %arg9[%c0_15, %c1, %c0_16] : memref<2x136x4xbf16, #tpu.memory_space<vmem>>, vector<1x129x4xbf16>
    %11 = vector.shape_cast %10 : vector<1x129x4xbf16> to vector<129x4xbf16>
    %c0_17 = arith.constant 0 : index
    %c4_18 = arith.constant 4 : index
    %12 = vector.load %arg10[%c0_17, %c4_18] : memref<258x32xbf16, #tpu.memory_space<vmem>>, vector<129x4xbf16>
    tpu.vector_store %arg10[%c0_17, %c4_18], %11 {strides = array<i32>} : memref<258x32xbf16, #tpu.memory_space<vmem>>, vector<129x4xbf16>,
    %c0_19 = arith.constant 0 : index
    %c2 = arith.constant 2 : index
    %c0_20 = arith.constant 0 : index
    %13 = vector.load %arg9[%c0_19, %c2, %c0_20] : memref<2x136x4xbf16, #tpu.memory_space<vmem>>, vector<1x129x4xbf16>
    %14 = vector.shape_cast %13 : vector<1x129x4xbf16> to vector<129x4xbf16>
    %c0_21 = arith.constant 0 : index
    %c8 = arith.constant 8 : index
    %15 = vector.load %arg10[%c0_21, %c8] : memref<258x32xbf16, #tpu.memory_space<vmem>>, vector<129x4xbf16>
    tpu.vector_store %arg10[%c0_21, %c8], %14 {strides = array<i32>} : memref<258x32xbf16, #tpu.memory_space<vmem>>, vector<129x4xbf16>,
    %c0_22 = arith.constant 0 : index
    %c3 = arith.constant 3 : index
    %c0_23 = arith.constant 0 : index
    %16 = vector.load %arg9[%c0_22, %c3, %c0_23] : memref<2x136x4xbf16, #tpu.memory_space<vmem>>, vector<1x129x4xbf16>
    %17 = vector.shape_cast %16 : vector<1x129x4xbf16> to vector<129x4xbf16>
    %c0_24 = arith.constant 0 : index
    %c12 = arith.constant 12 : index
    %18 = vector.load %arg10[%c0_24, %c12] : memref<258x32xbf16, #tpu.memory_space<vmem>>, vector<129x4xbf16>
    tpu.vector_store %arg10[%c0_24, %c12], %17 {strides = array<i32>} : memref<258x32xbf16, #tpu.memory_space<vmem>>, vector<129x4xbf16>,
    %c0_25 = arith.constant 0 : index
    %c4_26 = arith.constant 4 : index
    %c0_27 = arith.constant 0 : index
    %19 = vector.load %arg9[%c0_25, %c4_26, %c0_27] : memref<2x136x4xbf16, #tpu.memory_space<vmem>>, vector<1x129x4xbf16>
    %20 = vector.shape_cast %19 : vector<1x129x4xbf16> to vector<129x4xbf16>
    %c0_28 = arith.constant 0 : index
    %c16 = arith.constant 16 : index
    %21 = vector.load %arg10[%c0_28, %c16] : memref<258x32xbf16, #tpu.memory_space<vmem>>, vector<129x4xbf16>
    tpu.vector_store %arg10[%c0_28, %c16], %20 {strides = array<i32>} : memref<258x32xbf16, #tpu.memory_space<vmem>>, vector<129x4xbf16>,
    %c0_29 = arith.constant 0 : index
    %c5 = arith.constant 5 : index
    %c0_30 = arith.constant 0 : index
    %22 = vector.load %arg9[%c0_29, %c5, %c0_30] : memref<2x136x4xbf16, #tpu.memory_space<vmem>>, vector<1x129x4xbf16>
    %23 = vector.shape_cast %22 : vector<1x129x4xbf16> to vector<129x4xbf16>
    %c0_31 = arith.constant 0 : index
    %c20 = arith.constant 20 : index
    %24 = vector.load %arg10[%c0_31, %c20] : memref<258x32xbf16, #tpu.memory_space<vmem>>, vector<129x4xbf16>
    tpu.vector_store %arg10[%c0_31, %c20], %23 {strides = array<i32>} : memref<258x32xbf16, #tpu.memory_space<vmem>>, vector<129x4xbf16>,
    %c0_32 = arith.constant 0 : index
    %c6 = arith.constant 6 : index
    %c0_33 = arith.constant 0 : index
    %25 = vector.load %arg9[%c0_32, %c6, %c0_33] : memref<2x136x4xbf16, #tpu.memory_space<vmem>>, vector<1x129x4xbf16>
    %26 = vector.shape_cast %25 : vector<1x129x4xbf16> to vector<129x4xbf16>
    %c0_34 = arith.constant 0 : index
    %c24 = arith.constant 24 : index
    %27 = vector.load %arg10[%c0_34, %c24] : memref<258x32xbf16, #tpu.memory_space<vmem>>, vector<129x4xbf16>
    tpu.vector_store %arg10[%c0_34, %c24], %26 {strides = array<i32>} : memref<258x32xbf16, #tpu.memory_space<vmem>>, vector<129x4xbf16>,
    %c0_35 = arith.constant 0 : index
    %c7 = arith.constant 7 : index
    %c0_36 = arith.constant 0 : index
    %28 = vector.load %arg9[%c0_35, %c7, %c0_36] : memref<2x136x4xbf16, #tpu.memory_space<vmem>>, vector<1x129x4xbf16>
    %29 = vector.shape_cast %28 : vector<1x129x4xbf16> to vector<129x4xbf16>
    %c0_37 = arith.constant 0 : index
    %c28 = arith.constant 28 : index
    %30 = vector.load %arg10[%c0_37, %c28] : memref<258x32xbf16, #tpu.memory_space<vmem>>, vector<129x4xbf16>
    tpu.vector_store %arg10[%c0_37, %c28], %29 {strides = array<i32>} : memref<258x32xbf16, #tpu.memory_space<vmem>>, vector<129x4xbf16>,
    %c1_38 = arith.constant 1 : index
    %c0_39 = arith.constant 0 : index
    %c0_40 = arith.constant 0 : index
    %31 = vector.load %arg9[%c1_38, %c0_39, %c0_40] : memref<2x136x4xbf16, #tpu.memory_space<vmem>>, vector<1x129x4xbf16>
    %32 = vector.shape_cast %31 : vector<1x129x4xbf16> to vector<129x4xbf16>
    %c129 = arith.constant 129 : index
    %c0_41 = arith.constant 0 : index
    %33 = vector.load %arg10[%c129, %c0_41] : memref<258x32xbf16, #tpu.memory_space<vmem>>, vector<129x4xbf16>
    tpu.vector_store %arg10[%c129, %c0_41], %32 {strides = array<i32>} : memref<258x32xbf16, #tpu.memory_space<vmem>>, vector<129x4xbf16>,
    %c1_42 = arith.constant 1 : index
    %c1_43 = arith.constant 1 : index
    %c0_44 = arith.constant 0 : index
    %34 = vector.load %arg9[%c1_42, %c1_43, %c0_44] : memref<2x136x4xbf16, #tpu.memory_space<vmem>>, vector<1x129x4xbf16>
    %35 = vector.shape_cast %34 : vector<1x129x4xbf16> to vector<129x4xbf16>
    %c129_45 = arith.constant 129 : index
    %c4_46 = arith.constant 4 : index
    %36 = vector.load %arg10[%c129_45, %c4_46] : memref<258x32xbf16, #tpu.memory_space<vmem>>, vector<129x4xbf16>
    tpu.vector_store %arg10[%c129_45, %c4_46], %35 {strides = array<i32>} : memref<258x32xbf16, #tpu.memory_space<vmem>>, vector<129x4xbf16>,
    %c1_47 = arith.constant 1 : index
    %c2_48 = arith.constant 2 : index
    %c0_49 = arith.constant 0 : index
    %37 = vector.load %arg9[%c1_47, %c2_48, %c0_49] : memref<2x136x4xbf16, #tpu.memory_space<vmem>>, vector<1x129x4xbf16>
    %38 = vector.shape_cast %37 : vector<1x129x4xbf16> to vector<129x4xbf16>
    %c129_50 = arith.constant 129 : index
    %c8_51 = arith.constant 8 : index
    %39 = vector.load %arg10[%c129_50, %c8_51] : memref<258x32xbf16, #tpu.memory_space<vmem>>, vector<129x4xbf16>
    tpu.vector_store %arg10[%c129_50, %c8_51], %38 {strides = array<i32>} : memref<258x32xbf16, #tpu.memory_space<vmem>>, vector<129x4xbf16>,
    %c1_52 = arith.constant 1 : index
    %c3_53 = arith.constant 3 : index
    %c0_54 = arith.constant 0 : index
    %40 = vector.load %arg9[%c1_52, %c3_53, %c0_54] : memref<2x136x4xbf16, #tpu.memory_space<vmem>>, vector<1x129x4xbf16>
    %41 = vector.shape_cast %40 : vector<1x129x4xbf16> to vector<129x4xbf16>
    %c129_55 = arith.constant 129 : index
    %c12_56 = arith.constant 12 : index
    %42 = vector.load %arg10[%c129_55, %c12_56] : memref<258x32xbf16, #tpu.memory_space<vmem>>, vector<129x4xbf16>
    tpu.vector_store %arg10[%c129_55, %c12_56], %41 {strides = array<i32>} : memref<258x32xbf16, #tpu.memory_space<vmem>>, vector<129x4xbf16>,
    %c1_57 = arith.constant 1 : index
    %c4_58 = arith.constant 4 : index
    %c0_59 = arith.constant 0 : index
    %43 = vector.load %arg9[%c1_57, %c4_58, %c0_59] : memref<2x136x4xbf16, #tpu.memory_space<vmem>>, vector<1x129x4xbf16>
    %44 = vector.shape_cast %43 : vector<1x129x4xbf16> to vector<129x4xbf16>
    %c129_60 = arith.constant 129 : index
    %c16_61 = arith.constant 16 : index
    %45 = vector.load %arg10[%c129_60, %c16_61] : memref<258x32xbf16, #tpu.memory_space<vmem>>, vector<129x4xbf16>
    tpu.vector_store %arg10[%c129_60, %c16_61], %44 {strides = array<i32>} : memref<258x32xbf16, #tpu.memory_space<vmem>>, vector<129x4xbf16>,
    %c1_62 = arith.constant 1 : index
    %c5_63 = arith.constant 5 : index
    %c0_64 = arith.constant 0 : index
    %46 = vector.load %arg9[%c1_62, %c5_63, %c0_64] : memref<2x136x4xbf16, #tpu.memory_space<vmem>>, vector<1x129x4xbf16>
    %47 = vector.shape_cast %46 : vector<1x129x4xbf16> to vector<129x4xbf16>
    %c129_65 = arith.constant 129 : index
    %c20_66 = arith.constant 20 : index
    %48 = vector.load %arg10[%c129_65, %c20_66] : memref<258x32xbf16, #tpu.memory_space<vmem>>, vector<129x4xbf16>
    tpu.vector_store %arg10[%c129_65, %c20_66], %47 {strides = array<i32>} : memref<258x32xbf16, #tpu.memory_space<vmem>>, vector<129x4xbf16>,
    %c1_67 = arith.constant 1 : index
    %c6_68 = arith.constant 6 : index
    %c0_69 = arith.constant 0 : index
    %49 = vector.load %arg9[%c1_67, %c6_68, %c0_69] : memref<2x136x4xbf16, #tpu.memory_space<vmem>>, vector<1x129x4xbf16>
    %50 = vector.shape_cast %49 : vector<1x129x4xbf16> to vector<129x4xbf16>
    %c129_70 = arith.constant 129 : index
    %c24_71 = arith.constant 24 : index
    %51 = vector.load %arg10[%c129_70, %c24_71] : memref<258x32xbf16, #tpu.memory_space<vmem>>, vector<129x4xbf16>
    tpu.vector_store %arg10[%c129_70, %c24_71], %50 {strides = array<i32>} : memref<258x32xbf16, #tpu.memory_space<vmem>>, vector<129x4xbf16>,
    %c1_72 = arith.constant 1 : index
    %c7_73 = arith.constant 7 : index
    %c0_74 = arith.constant 0 : index
    %52 = vector.load %arg9[%c1_72, %c7_73, %c0_74] : memref<2x136x4xbf16, #tpu.memory_space<vmem>>, vector<1x129x4xbf16>
    %53 = vector.shape_cast %52 : vector<1x129x4xbf16> to vector<129x4xbf16>
    %c129_75 = arith.constant 129 : index
    %c28_76 = arith.constant 28 : index
    %54 = vector.load %arg10[%c129_75, %c28_76] : memref<258x32xbf16, #tpu.memory_space<vmem>>, vector<129x4xbf16>
    tpu.vector_store %arg10[%c129_75, %c28_76], %53 {strides = array<i32>} : memref<258x32xbf16, #tpu.memory_space<vmem>>, vector<129x4xbf16>,
    %c0_77 = arith.constant 0 : index
    %c0_78 = arith.constant 0 : index
    %55 = vector.load %arg10[%c0_77, %c0_78] : memref<258x32xbf16, #tpu.memory_space<vmem>>, vector<258x32xbf16>
    %c0_79 = arith.constant 0 : index
    %c0_80 = arith.constant 0 : index
    %56 = vector.load %arg2[%c0_79, %c0_80] : memref<32x32xbf16, #tpu.memory_space<vmem>>, vector<32x32xbf16>
    %cst_81 = arith.constant dense<0.000000e+00> : vector<258x32xf32>
    %57 = tpu.matmul %55, %56, %cst_81 {dimension_numbers = #tpu.dot_dimension_numbers<[1], [0], [0], [1], [0, 0, 1, 1], [], []>} : vector<258x32xbf16>, vector<32x32xbf16>, vector<258x32xf32> -> vector<258x32xf32>
    %c0_82 = arith.constant 0 : index
    %c0_83 = arith.constant 0 : index
    %58 = vector.load %arg3[%c0_82, %c0_83] : memref<1x32xf32, #tpu.memory_space<vmem>>, vector<1x32xf32>
    %59 = vector.broadcast %58 : vector<1x32xf32> to vector<258x32xf32>
    %60 = arith.addf %57, %59 : vector<258x32xf32>
    %cst_84 = arith.constant 0.000000e+00 : f32
    %61 = vector.broadcast %cst_84 : f32 to vector<258x32xf32>
    %62 = arith.maximumf %60, %61 : vector<258x32xf32>
    %c0_85 = arith.constant 0 : index
    %c0_86 = arith.constant 0 : index
    %63 = vector.load %arg11[%c0_85, %c0_86] : memref<258x32xf32, #tpu.memory_space<vmem>>, vector<258x32xf32>
    tpu.vector_store %arg11[%c0_85, %c0_86], %62 {strides = array<i32>} : memref<258x32xf32, #tpu.memory_space<vmem>>, vector<258x32xf32>,
    %cst_87 = arith.constant 0.000000e+00 : bf16
    %64 = vector.broadcast %cst_87 : bf16 to vector<2x4x32xbf16>
    %c0_88 = arith.constant 0 : index
    %c0_89 = arith.constant 0 : index
    %c0_90 = arith.constant 0 : index
    %65 = vector.load %arg12[%c0_88, %c0_89, %c0_90] : memref<2x40x32xbf16, #tpu.memory_space<vmem>>, vector<2x4x32xbf16>
    tpu.vector_store %arg12[%c0_88, %c0_89, %c0_90], %64 {strides = array<i32>} : memref<2x40x32xbf16, #tpu.memory_space<vmem>>, vector<2x4x32xbf16>,
    %cst_91 = arith.constant 0.000000e+00 : bf16
    %66 = vector.broadcast %cst_91 : bf16 to vector<2x4x32xbf16>
    %c0_92 = arith.constant 0 : index
    %c36 = arith.constant 36 : index
    %c0_93 = arith.constant 0 : index
    %67 = vector.load %arg12[%c0_92, %c36, %c0_93] : memref<2x40x32xbf16, #tpu.memory_space<vmem>>, vector<2x4x32xbf16>
    tpu.vector_store %arg12[%c0_92, %c36, %c0_93], %66 {strides = array<i32>} : memref<2x40x32xbf16, #tpu.memory_space<vmem>>, vector<2x4x32xbf16>,
    %c0_94 = arith.constant 0 : index
    %c0_95 = arith.constant 0 : index
    %68 = tpu.strided_load %arg11[%c0_94, %c0_95] {strides = array<i32: 4, 1>} : memref<258x32xf32, #tpu.memory_space<vmem>>, vector<32x32xf32>
    %c1_96 = arith.constant 1 : index
    %c0_97 = arith.constant 0 : index
    %69 = tpu.strided_load %arg11[%c1_96, %c0_97] {strides = array<i32: 4, 1>} : memref<258x32xf32, #tpu.memory_space<vmem>>, vector<32x32xf32>
    %70 = arith.maximumf %68, %69 : vector<32x32xf32>
    %c2_98 = arith.constant 2 : index
    %c0_99 = arith.constant 0 : index
    %71 = tpu.strided_load %arg11[%c2_98, %c0_99] {strides = array<i32: 4, 1>} : memref<258x32xf32, #tpu.memory_space<vmem>>, vector<32x32xf32>
    %c3_100 = arith.constant 3 : index
    %c0_101 = arith.constant 0 : index
    %72 = tpu.strided_load %arg11[%c3_100, %c0_101] {strides = array<i32: 4, 1>} : memref<258x32xf32, #tpu.memory_space<vmem>>, vector<32x32xf32>
    %73 = arith.maximumf %71, %72 : vector<32x32xf32>
    %74 = arith.maximumf %70, %73 : vector<32x32xf32>
    %75 = arith.truncf %74 : vector<32x32xf32> to vector<32x32xbf16>
    %c0_102 = arith.constant 0 : index
    %c4_103 = arith.constant 4 : index
    %c0_104 = arith.constant 0 : index
    %76 = vector.load %arg12[%c0_102, %c4_103, %c0_104] : memref<2x40x32xbf16, #tpu.memory_space<vmem>>, vector<1x32x32xbf16>
    %77 = vector.shape_cast %76 : vector<1x32x32xbf16> to vector<32x32xbf16>
    %78 = vector.shape_cast %75 : vector<32x32xbf16> to vector<1x32x32xbf16>
    tpu.vector_store %arg12[%c0_102, %c4_103, %c0_104], %78 {strides = array<i32>} : memref<2x40x32xbf16, #tpu.memory_space<vmem>>, vector<1x32x32xbf16>,
    %c129_105 = arith.constant 129 : index
    %c0_106 = arith.constant 0 : index
    %79 = tpu.strided_load %arg11[%c129_105, %c0_106] {strides = array<i32: 4, 1>} : memref<258x32xf32, #tpu.memory_space<vmem>>, vector<32x32xf32>
    %c130 = arith.constant 130 : index
    %c0_107 = arith.constant 0 : index
    %80 = tpu.strided_load %arg11[%c130, %c0_107] {strides = array<i32: 4, 1>} : memref<258x32xf32, #tpu.memory_space<vmem>>, vector<32x32xf32>
    %81 = arith.maximumf %79, %80 : vector<32x32xf32>
    %c131 = arith.constant 131 : index
    %c0_108 = arith.constant 0 : index
    %82 = tpu.strided_load %arg11[%c131, %c0_108] {strides = array<i32: 4, 1>} : memref<258x32xf32, #tpu.memory_space<vmem>>, vector<32x32xf32>
    %c132_109 = arith.constant 132 : index
    %c0_110 = arith.constant 0 : index
    %83 = tpu.strided_load %arg11[%c132_109, %c0_110] {strides = array<i32: 4, 1>} : memref<258x32xf32, #tpu.memory_space<vmem>>, vector<32x32xf32>
    %84 = arith.maximumf %82, %83 : vector<32x32xf32>
    %85 = arith.maximumf %81, %84 : vector<32x32xf32>
    %86 = arith.truncf %85 : vector<32x32xf32> to vector<32x32xbf16>
    %c1_111 = arith.constant 1 : index
    %c4_112 = arith.constant 4 : index
    %c0_113 = arith.constant 0 : index
    %87 = vector.load %arg12[%c1_111, %c4_112, %c0_113] : memref<2x40x32xbf16, #tpu.memory_space<vmem>>, vector<1x32x32xbf16>
    %88 = vector.shape_cast %87 : vector<1x32x32xbf16> to vector<32x32xbf16>
    %89 = vector.shape_cast %86 : vector<32x32xbf16> to vector<1x32x32xbf16>
    tpu.vector_store %arg12[%c1_111, %c4_112, %c0_113], %89 {strides = array<i32>} : memref<2x40x32xbf16, #tpu.memory_space<vmem>>, vector<1x32x32xbf16>,
    %c0_114 = arith.constant 0 : index
    %c0_115 = arith.constant 0 : index
    %c0_116 = arith.constant 0 : index
    %90 = vector.load %arg12[%c0_114, %c0_115, %c0_116] : memref<2x40x32xbf16, #tpu.memory_space<vmem>>, vector<1x33x32xbf16>
    %91 = vector.shape_cast %90 : vector<1x33x32xbf16> to vector<33x32xbf16>
    %c0_117 = arith.constant 0 : index
    %c0_118 = arith.constant 0 : index
    %92 = vector.load %arg13[%c0_117, %c0_118] : memref<66x256xbf16, #tpu.memory_space<vmem>>, vector<33x32xbf16>
    tpu.vector_store %arg13[%c0_117, %c0_118], %91 {strides = array<i32>} : memref<66x256xbf16, #tpu.memory_space<vmem>>, vector<33x32xbf16>,
    %c0_119 = arith.constant 0 : index
    %c1_120 = arith.constant 1 : index
    %c0_121 = arith.constant 0 : index
    %93 = vector.load %arg12[%c0_119, %c1_120, %c0_121] : memref<2x40x32xbf16, #tpu.memory_space<vmem>>, vector<1x33x32xbf16>
    %94 = vector.shape_cast %93 : vector<1x33x32xbf16> to vector<33x32xbf16>
    %c0_122 = arith.constant 0 : index
    %c32 = arith.constant 32 : index
    %95 = vector.load %arg13[%c0_122, %c32] : memref<66x256xbf16, #tpu.memory_space<vmem>>, vector<33x32xbf16>
    tpu.vector_store %arg13[%c0_122, %c32], %94 {strides = array<i32>} : memref<66x256xbf16, #tpu.memory_space<vmem>>, vector<33x32xbf16>,
    %c0_123 = arith.constant 0 : index
    %c2_124 = arith.constant 2 : index
    %c0_125 = arith.constant 0 : index
    %96 = vector.load %arg12[%c0_123, %c2_124, %c0_125] : memref<2x40x32xbf16, #tpu.memory_space<vmem>>, vector<1x33x32xbf16>
    %97 = vector.shape_cast %96 : vector<1x33x32xbf16> to vector<33x32xbf16>
    %c0_126 = arith.constant 0 : index
    %c64 = arith.constant 64 : index
    %98 = vector.load %arg13[%c0_126, %c64] : memref<66x256xbf16, #tpu.memory_space<vmem>>, vector<33x32xbf16>
    tpu.vector_store %arg13[%c0_126, %c64], %97 {strides = array<i32>} : memref<66x256xbf16, #tpu.memory_space<vmem>>, vector<33x32xbf16>,
    %c0_127 = arith.constant 0 : index
    %c3_128 = arith.constant 3 : index
    %c0_129 = arith.constant 0 : index
    %99 = vector.load %arg12[%c0_127, %c3_128, %c0_129] : memref<2x40x32xbf16, #tpu.memory_space<vmem>>, vector<1x33x32xbf16>
    %100 = vector.shape_cast %99 : vector<1x33x32xbf16> to vector<33x32xbf16>
    %c0_130 = arith.constant 0 : index
    %c96 = arith.constant 96 : index
    %101 = vector.load %arg13[%c0_130, %c96] : memref<66x256xbf16, #tpu.memory_space<vmem>>, vector<33x32xbf16>
    tpu.vector_store %arg13[%c0_130, %c96], %100 {strides = array<i32>} : memref<66x256xbf16, #tpu.memory_space<vmem>>, vector<33x32xbf16>,
    %c0_131 = arith.constant 0 : index
    %c4_132 = arith.constant 4 : index
    %c0_133 = arith.constant 0 : index
    %102 = vector.load %arg12[%c0_131, %c4_132, %c0_133] : memref<2x40x32xbf16, #tpu.memory_space<vmem>>, vector<1x33x32xbf16>
    %103 = vector.shape_cast %102 : vector<1x33x32xbf16> to vector<33x32xbf16>
    %c0_134 = arith.constant 0 : index
    %c128 = arith.constant 128 : index
    %104 = vector.load %arg13[%c0_134, %c128] : memref<66x256xbf16, #tpu.memory_space<vmem>>, vector<33x32xbf16>
    tpu.vector_store %arg13[%c0_134, %c128], %103 {strides = array<i32>} : memref<66x256xbf16, #tpu.memory_space<vmem>>, vector<33x32xbf16>,
    %c0_135 = arith.constant 0 : index
    %c5_136 = arith.constant 5 : index
    %c0_137 = arith.constant 0 : index
    %105 = vector.load %arg12[%c0_135, %c5_136, %c0_137] : memref<2x40x32xbf16, #tpu.memory_space<vmem>>, vector<1x33x32xbf16>
    %106 = vector.shape_cast %105 : vector<1x33x32xbf16> to vector<33x32xbf16>
    %c0_138 = arith.constant 0 : index
    %c160 = arith.constant 160 : index
    %107 = vector.load %arg13[%c0_138, %c160] : memref<66x256xbf16, #tpu.memory_space<vmem>>, vector<33x32xbf16>
    tpu.vector_store %arg13[%c0_138, %c160], %106 {strides = array<i32>} : memref<66x256xbf16, #tpu.memory_space<vmem>>, vector<33x32xbf16>,
    %c0_139 = arith.constant 0 : index
    %c6_140 = arith.constant 6 : index
    %c0_141 = arith.constant 0 : index
    %108 = vector.load %arg12[%c0_139, %c6_140, %c0_141] : memref<2x40x32xbf16, #tpu.memory_space<vmem>>, vector<1x33x32xbf16>
    %109 = vector.shape_cast %108 : vector<1x33x32xbf16> to vector<33x32xbf16>
    %c0_142 = arith.constant 0 : index
    %c192 = arith.constant 192 : index
    %110 = vector.load %arg13[%c0_142, %c192] : memref<66x256xbf16, #tpu.memory_space<vmem>>, vector<33x32xbf16>
    tpu.vector_store %arg13[%c0_142, %c192], %109 {strides = array<i32>} : memref<66x256xbf16, #tpu.memory_space<vmem>>, vector<33x32xbf16>,
    %c0_143 = arith.constant 0 : index
    %c7_144 = arith.constant 7 : index
    %c0_145 = arith.constant 0 : index
    %111 = vector.load %arg12[%c0_143, %c7_144, %c0_145] : memref<2x40x32xbf16, #tpu.memory_space<vmem>>, vector<1x33x32xbf16>
    %112 = vector.shape_cast %111 : vector<1x33x32xbf16> to vector<33x32xbf16>
    %c0_146 = arith.constant 0 : index
    %c224 = arith.constant 224 : index
    %113 = vector.load %arg13[%c0_146, %c224] : memref<66x256xbf16, #tpu.memory_space<vmem>>, vector<33x32xbf16>
    tpu.vector_store %arg13[%c0_146, %c224], %112 {strides = array<i32>} : memref<66x256xbf16, #tpu.memory_space<vmem>>, vector<33x32xbf16>,
    %c1_147 = arith.constant 1 : index
    %c0_148 = arith.constant 0 : index
    %c0_149 = arith.constant 0 : index
    %114 = vector.load %arg12[%c1_147, %c0_148, %c0_149] : memref<2x40x32xbf16, #tpu.memory_space<vmem>>, vector<1x33x32xbf16>
    %115 = vector.shape_cast %114 : vector<1x33x32xbf16> to vector<33x32xbf16>
    %c33 = arith.constant 33 : index
    %c0_150 = arith.constant 0 : index
    %116 = vector.load %arg13[%c33, %c0_150] : memref<66x256xbf16, #tpu.memory_space<vmem>>, vector<33x32xbf16>
    tpu.vector_store %arg13[%c33, %c0_150], %115 {strides = array<i32>} : memref<66x256xbf16, #tpu.memory_space<vmem>>, vector<33x32xbf16>,
    %c1_151 = arith.constant 1 : index
    %c1_152 = arith.constant 1 : index
    %c0_153 = arith.constant 0 : index
    %117 = vector.load %arg12[%c1_151, %c1_152, %c0_153] : memref<2x40x32xbf16, #tpu.memory_space<vmem>>, vector<1x33x32xbf16>
    %118 = vector.shape_cast %117 : vector<1x33x32xbf16> to vector<33x32xbf16>
    %c33_154 = arith.constant 33 : index
    %c32_155 = arith.constant 32 : index
    %119 = vector.load %arg13[%c33_154, %c32_155] : memref<66x256xbf16, #tpu.memory_space<vmem>>, vector<33x32xbf16>
    tpu.vector_store %arg13[%c33_154, %c32_155], %118 {strides = array<i32>} : memref<66x256xbf16, #tpu.memory_space<vmem>>, vector<33x32xbf16>,
    %c1_156 = arith.constant 1 : index
    %c2_157 = arith.constant 2 : index
    %c0_158 = arith.constant 0 : index
    %120 = vector.load %arg12[%c1_156, %c2_157, %c0_158] : memref<2x40x32xbf16, #tpu.memory_space<vmem>>, vector<1x33x32xbf16>
    %121 = vector.shape_cast %120 : vector<1x33x32xbf16> to vector<33x32xbf16>
    %c33_159 = arith.constant 33 : index
    %c64_160 = arith.constant 64 : index
    %122 = vector.load %arg13[%c33_159, %c64_160] : memref<66x256xbf16, #tpu.memory_space<vmem>>, vector<33x32xbf16>
    tpu.vector_store %arg13[%c33_159, %c64_160], %121 {strides = array<i32>} : memref<66x256xbf16, #tpu.memory_space<vmem>>, vector<33x32xbf16>,
    %c1_161 = arith.constant 1 : index
    %c3_162 = arith.constant 3 : index
    %c0_163 = arith.constant 0 : index
    %123 = vector.load %arg12[%c1_161, %c3_162, %c0_163] : memref<2x40x32xbf16, #tpu.memory_space<vmem>>, vector<1x33x32xbf16>
    %124 = vector.shape_cast %123 : vector<1x33x32xbf16> to vector<33x32xbf16>
    %c33_164 = arith.constant 33 : index
    %c96_165 = arith.constant 96 : index
    %125 = vector.load %arg13[%c33_164, %c96_165] : memref<66x256xbf16, #tpu.memory_space<vmem>>, vector<33x32xbf16>
    tpu.vector_store %arg13[%c33_164, %c96_165], %124 {strides = array<i32>} : memref<66x256xbf16, #tpu.memory_space<vmem>>, vector<33x32xbf16>,
    %c1_166 = arith.constant 1 : index
    %c4_167 = arith.constant 4 : index
    %c0_168 = arith.constant 0 : index
    %126 = vector.load %arg12[%c1_166, %c4_167, %c0_168] : memref<2x40x32xbf16, #tpu.memory_space<vmem>>, vector<1x33x32xbf16>
    %127 = vector.shape_cast %126 : vector<1x33x32xbf16> to vector<33x32xbf16>
    %c33_169 = arith.constant 33 : index
    %c128_170 = arith.constant 128 : index
    %128 = vector.load %arg13[%c33_169, %c128_170] : memref<66x256xbf16, #tpu.memory_space<vmem>>, vector<33x32xbf16>
    tpu.vector_store %arg13[%c33_169, %c128_170], %127 {strides = array<i32>} : memref<66x256xbf16, #tpu.memory_space<vmem>>, vector<33x32xbf16>,
    %c1_171 = arith.constant 1 : index
    %c5_172 = arith.constant 5 : index
    %c0_173 = arith.constant 0 : index
    %129 = vector.load %arg12[%c1_171, %c5_172, %c0_173] : memref<2x40x32xbf16, #tpu.memory_space<vmem>>, vector<1x33x32xbf16>
    %130 = vector.shape_cast %129 : vector<1x33x32xbf16> to vector<33x32xbf16>
    %c33_174 = arith.constant 33 : index
    %c160_175 = arith.constant 160 : index
    %131 = vector.load %arg13[%c33_174, %c160_175] : memref<66x256xbf16, #tpu.memory_space<vmem>>, vector<33x32xbf16>
    tpu.vector_store %arg13[%c33_174, %c160_175], %130 {strides = array<i32>} : memref<66x256xbf16, #tpu.memory_space<vmem>>, vector<33x32xbf16>,
    %c1_176 = arith.constant 1 : index
    %c6_177 = arith.constant 6 : index
    %c0_178 = arith.constant 0 : index
    %132 = vector.load %arg12[%c1_176, %c6_177, %c0_178] : memref<2x40x32xbf16, #tpu.memory_space<vmem>>, vector<1x33x32xbf16>
    %133 = vector.shape_cast %132 : vector<1x33x32xbf16> to vector<33x32xbf16>
    %c33_179 = arith.constant 33 : index
    %c192_180 = arith.constant 192 : index
    %134 = vector.load %arg13[%c33_179, %c192_180] : memref<66x256xbf16, #tpu.memory_space<vmem>>, vector<33x32xbf16>
    tpu.vector_store %arg13[%c33_179, %c192_180], %133 {strides = array<i32>} : memref<66x256xbf16, #tpu.memory_space<vmem>>, vector<33x32xbf16>,
    %c1_181 = arith.constant 1 : index
    %c7_182 = arith.constant 7 : index
    %c0_183 = arith.constant 0 : index
    %135 = vector.load %arg12[%c1_181, %c7_182, %c0_183] : memref<2x40x32xbf16, #tpu.memory_space<vmem>>, vector<1x33x32xbf16>
    %136 = vector.shape_cast %135 : vector<1x33x32xbf16> to vector<33x32xbf16>
    %c33_184 = arith.constant 33 : index
    %c224_185 = arith.constant 224 : index
    %137 = vector.load %arg13[%c33_184, %c224_185] : memref<66x256xbf16, #tpu.memory_space<vmem>>, vector<33x32xbf16>
    tpu.vector_store %arg13[%c33_184, %c224_185], %136 {strides = array<i32>} : memref<66x256xbf16, #tpu.memory_space<vmem>>, vector<33x32xbf16>,
    %c0_186 = arith.constant 0 : index
    %c0_187 = arith.constant 0 : index
    %138 = vector.load %arg13[%c0_186, %c0_187] : memref<66x256xbf16, #tpu.memory_space<vmem>>, vector<66x256xbf16>
    %c0_188 = arith.constant 0 : index
    %c0_189 = arith.constant 0 : index
    %139 = vector.load %arg4[%c0_188, %c0_189] : memref<256x64xbf16, #tpu.memory_space<vmem>>, vector<256x64xbf16>
    %cst_190 = arith.constant dense<0.000000e+00> : vector<66x64xf32>
    %140 = tpu.matmul %138, %139, %cst_190 {dimension_numbers = #tpu.dot_dimension_numbers<[1], [0], [0], [1], [0, 0, 1, 1], [], []>} : vector<66x256xbf16>, vector<256x64xbf16>, vector<66x64xf32> -> vector<66x64xf32>
    %c0_191 = arith.constant 0 : index
    %c0_192 = arith.constant 0 : index
    %141 = vector.load %arg5[%c0_191, %c0_192] : memref<1x64xf32, #tpu.memory_space<vmem>>, vector<1x64xf32>
    %142 = vector.broadcast %141 : vector<1x64xf32> to vector<66x64xf32>
    %143 = arith.addf %140, %142 : vector<66x64xf32>
    %cst_193 = arith.constant 0.000000e+00 : f32
    %144 = vector.broadcast %cst_193 : f32 to vector<66x64xf32>
    %145 = arith.maximumf %143, %144 : vector<66x64xf32>
    %c0_194 = arith.constant 0 : index
    %c0_195 = arith.constant 0 : index
    %146 = vector.load %arg14[%c0_194, %c0_195] : memref<66x64xf32, #tpu.memory_space<vmem>>, vector<66x64xf32>
    tpu.vector_store %arg14[%c0_194, %c0_195], %145 {strides = array<i32>} : memref<66x64xf32, #tpu.memory_space<vmem>>, vector<66x64xf32>,
    %cst_196 = arith.constant 0.000000e+00 : bf16
    %147 = vector.broadcast %cst_196 : bf16 to vector<2x4x64xbf16>
    %c0_197 = arith.constant 0 : index
    %c0_198 = arith.constant 0 : index
    %c0_199 = arith.constant 0 : index
    %148 = vector.load %arg15[%c0_197, %c0_198, %c0_199] : memref<2x16x64xbf16, #tpu.memory_space<vmem>>, vector<2x4x64xbf16>
    tpu.vector_store %arg15[%c0_197, %c0_198, %c0_199], %147 {strides = array<i32>} : memref<2x16x64xbf16, #tpu.memory_space<vmem>>, vector<2x4x64xbf16>,
    %cst_200 = arith.constant 0.000000e+00 : bf16
    %149 = vector.broadcast %cst_200 : bf16 to vector<2x4x64xbf16>
    %c0_201 = arith.constant 0 : index
    %c12_202 = arith.constant 12 : index
    %c0_203 = arith.constant 0 : index
    %150 = vector.load %arg15[%c0_201, %c12_202, %c0_203] : memref<2x16x64xbf16, #tpu.memory_space<vmem>>, vector<2x4x64xbf16>
    tpu.vector_store %arg15[%c0_201, %c12_202, %c0_203], %149 {strides = array<i32>} : memref<2x16x64xbf16, #tpu.memory_space<vmem>>, vector<2x4x64xbf16>,
    %c0_204 = arith.constant 0 : index
    %c0_205 = arith.constant 0 : index
    %151 = tpu.strided_load %arg14[%c0_204, %c0_205] {strides = array<i32: 4, 1>} : memref<66x64xf32, #tpu.memory_space<vmem>>, vector<8x64xf32>
    %c1_206 = arith.constant 1 : index
    %c0_207 = arith.constant 0 : index
    %152 = tpu.strided_load %arg14[%c1_206, %c0_207] {strides = array<i32: 4, 1>} : memref<66x64xf32, #tpu.memory_space<vmem>>, vector<8x64xf32>
    %153 = arith.maximumf %151, %152 : vector<8x64xf32>
    %c2_208 = arith.constant 2 : index
    %c0_209 = arith.constant 0 : index
    %154 = tpu.strided_load %arg14[%c2_208, %c0_209] {strides = array<i32: 4, 1>} : memref<66x64xf32, #tpu.memory_space<vmem>>, vector<8x64xf32>
    %c3_210 = arith.constant 3 : index
    %c0_211 = arith.constant 0 : index
    %155 = tpu.strided_load %arg14[%c3_210, %c0_211] {strides = array<i32: 4, 1>} : memref<66x64xf32, #tpu.memory_space<vmem>>, vector<8x64xf32>
    %156 = arith.maximumf %154, %155 : vector<8x64xf32>
    %157 = arith.maximumf %153, %156 : vector<8x64xf32>
    %158 = arith.truncf %157 : vector<8x64xf32> to vector<8x64xbf16>
    %c0_212 = arith.constant 0 : index
    %c4_213 = arith.constant 4 : index
    %c0_214 = arith.constant 0 : index
    %159 = vector.load %arg15[%c0_212, %c4_213, %c0_214] : memref<2x16x64xbf16, #tpu.memory_space<vmem>>, vector<1x8x64xbf16>
    %160 = vector.shape_cast %159 : vector<1x8x64xbf16> to vector<8x64xbf16>
    %161 = vector.shape_cast %158 : vector<8x64xbf16> to vector<1x8x64xbf16>
    tpu.vector_store %arg15[%c0_212, %c4_213, %c0_214], %161 {strides = array<i32>} : memref<2x16x64xbf16, #tpu.memory_space<vmem>>, vector<1x8x64xbf16>,
    %c33_215 = arith.constant 33 : index
    %c0_216 = arith.constant 0 : index
    %162 = tpu.strided_load %arg14[%c33_215, %c0_216] {strides = array<i32: 4, 1>} : memref<66x64xf32, #tpu.memory_space<vmem>>, vector<8x64xf32>
    %c34 = arith.constant 34 : index
    %c0_217 = arith.constant 0 : index
    %163 = tpu.strided_load %arg14[%c34, %c0_217] {strides = array<i32: 4, 1>} : memref<66x64xf32, #tpu.memory_space<vmem>>, vector<8x64xf32>
    %164 = arith.maximumf %162, %163 : vector<8x64xf32>
    %c35 = arith.constant 35 : index
    %c0_218 = arith.constant 0 : index
    %165 = tpu.strided_load %arg14[%c35, %c0_218] {strides = array<i32: 4, 1>} : memref<66x64xf32, #tpu.memory_space<vmem>>, vector<8x64xf32>
    %c36_219 = arith.constant 36 : index
    %c0_220 = arith.constant 0 : index
    %166 = tpu.strided_load %arg14[%c36_219, %c0_220] {strides = array<i32: 4, 1>} : memref<66x64xf32, #tpu.memory_space<vmem>>, vector<8x64xf32>
    %167 = arith.maximumf %165, %166 : vector<8x64xf32>
    %168 = arith.maximumf %164, %167 : vector<8x64xf32>
    %169 = arith.truncf %168 : vector<8x64xf32> to vector<8x64xbf16>
    %c1_221 = arith.constant 1 : index
    %c4_222 = arith.constant 4 : index
    %c0_223 = arith.constant 0 : index
    %170 = vector.load %arg15[%c1_221, %c4_222, %c0_223] : memref<2x16x64xbf16, #tpu.memory_space<vmem>>, vector<1x8x64xbf16>
    %171 = vector.shape_cast %170 : vector<1x8x64xbf16> to vector<8x64xbf16>
    %172 = vector.shape_cast %169 : vector<8x64xbf16> to vector<1x8x64xbf16>
    tpu.vector_store %arg15[%c1_221, %c4_222, %c0_223], %172 {strides = array<i32>} : memref<2x16x64xbf16, #tpu.memory_space<vmem>>, vector<1x8x64xbf16>,
    %c0_224 = arith.constant 0 : index
    %c0_225 = arith.constant 0 : index
    %c0_226 = arith.constant 0 : index
    %173 = vector.load %arg15[%c0_224, %c0_225, %c0_226] : memref<2x16x64xbf16, #tpu.memory_space<vmem>>, vector<1x9x64xbf16>
    %174 = vector.shape_cast %173 : vector<1x9x64xbf16> to vector<9x64xbf16>
    %c0_227 = arith.constant 0 : index
    %c0_228 = arith.constant 0 : index
    %175 = vector.load %arg16[%c0_227, %c0_228] : memref<18x512xbf16, #tpu.memory_space<vmem>>, vector<9x64xbf16>
    tpu.vector_store %arg16[%c0_227, %c0_228], %174 {strides = array<i32>} : memref<18x512xbf16, #tpu.memory_space<vmem>>, vector<9x64xbf16>,
    %c0_229 = arith.constant 0 : index
    %c1_230 = arith.constant 1 : index
    %c0_231 = arith.constant 0 : index
    %176 = vector.load %arg15[%c0_229, %c1_230, %c0_231] : memref<2x16x64xbf16, #tpu.memory_space<vmem>>, vector<1x9x64xbf16>
    %177 = vector.shape_cast %176 : vector<1x9x64xbf16> to vector<9x64xbf16>
    %c0_232 = arith.constant 0 : index
    %c64_233 = arith.constant 64 : index
    %178 = vector.load %arg16[%c0_232, %c64_233] : memref<18x512xbf16, #tpu.memory_space<vmem>>, vector<9x64xbf16>
    tpu.vector_store %arg16[%c0_232, %c64_233], %177 {strides = array<i32>} : memref<18x512xbf16, #tpu.memory_space<vmem>>, vector<9x64xbf16>,
    %c0_234 = arith.constant 0 : index
    %c2_235 = arith.constant 2 : index
    %c0_236 = arith.constant 0 : index
    %179 = vector.load %arg15[%c0_234, %c2_235, %c0_236] : memref<2x16x64xbf16, #tpu.memory_space<vmem>>, vector<1x9x64xbf16>
    %180 = vector.shape_cast %179 : vector<1x9x64xbf16> to vector<9x64xbf16>
    %c0_237 = arith.constant 0 : index
    %c128_238 = arith.constant 128 : index
    %181 = vector.load %arg16[%c0_237, %c128_238] : memref<18x512xbf16, #tpu.memory_space<vmem>>, vector<9x64xbf16>
    tpu.vector_store %arg16[%c0_237, %c128_238], %180 {strides = array<i32>} : memref<18x512xbf16, #tpu.memory_space<vmem>>, vector<9x64xbf16>,
    %c0_239 = arith.constant 0 : index
    %c3_240 = arith.constant 3 : index
    %c0_241 = arith.constant 0 : index
    %182 = vector.load %arg15[%c0_239, %c3_240, %c0_241] : memref<2x16x64xbf16, #tpu.memory_space<vmem>>, vector<1x9x64xbf16>
    %183 = vector.shape_cast %182 : vector<1x9x64xbf16> to vector<9x64xbf16>
    %c0_242 = arith.constant 0 : index
    %c192_243 = arith.constant 192 : index
    %184 = vector.load %arg16[%c0_242, %c192_243] : memref<18x512xbf16, #tpu.memory_space<vmem>>, vector<9x64xbf16>
    tpu.vector_store %arg16[%c0_242, %c192_243], %183 {strides = array<i32>} : memref<18x512xbf16, #tpu.memory_space<vmem>>, vector<9x64xbf16>,
    %c0_244 = arith.constant 0 : index
    %c4_245 = arith.constant 4 : index
    %c0_246 = arith.constant 0 : index
    %185 = vector.load %arg15[%c0_244, %c4_245, %c0_246] : memref<2x16x64xbf16, #tpu.memory_space<vmem>>, vector<1x9x64xbf16>
    %186 = vector.shape_cast %185 : vector<1x9x64xbf16> to vector<9x64xbf16>
    %c0_247 = arith.constant 0 : index
    %c256 = arith.constant 256 : index
    %187 = vector.load %arg16[%c0_247, %c256] : memref<18x512xbf16, #tpu.memory_space<vmem>>, vector<9x64xbf16>
    tpu.vector_store %arg16[%c0_247, %c256], %186 {strides = array<i32>} : memref<18x512xbf16, #tpu.memory_space<vmem>>, vector<9x64xbf16>,
    %c0_248 = arith.constant 0 : index
    %c5_249 = arith.constant 5 : index
    %c0_250 = arith.constant 0 : index
    %188 = vector.load %arg15[%c0_248, %c5_249, %c0_250] : memref<2x16x64xbf16, #tpu.memory_space<vmem>>, vector<1x9x64xbf16>
    %189 = vector.shape_cast %188 : vector<1x9x64xbf16> to vector<9x64xbf16>
    %c0_251 = arith.constant 0 : index
    %c320 = arith.constant 320 : index
    %190 = vector.load %arg16[%c0_251, %c320] : memref<18x512xbf16, #tpu.memory_space<vmem>>, vector<9x64xbf16>
    tpu.vector_store %arg16[%c0_251, %c320], %189 {strides = array<i32>} : memref<18x512xbf16, #tpu.memory_space<vmem>>, vector<9x64xbf16>,
    %c0_252 = arith.constant 0 : index
    %c6_253 = arith.constant 6 : index
    %c0_254 = arith.constant 0 : index
    %191 = vector.load %arg15[%c0_252, %c6_253, %c0_254] : memref<2x16x64xbf16, #tpu.memory_space<vmem>>, vector<1x9x64xbf16>
    %192 = vector.shape_cast %191 : vector<1x9x64xbf16> to vector<9x64xbf16>
    %c0_255 = arith.constant 0 : index
    %c384 = arith.constant 384 : index
    %193 = vector.load %arg16[%c0_255, %c384] : memref<18x512xbf16, #tpu.memory_space<vmem>>, vector<9x64xbf16>
    tpu.vector_store %arg16[%c0_255, %c384], %192 {strides = array<i32>} : memref<18x512xbf16, #tpu.memory_space<vmem>>, vector<9x64xbf16>,
    %c0_256 = arith.constant 0 : index
    %c7_257 = arith.constant 7 : index
    %c0_258 = arith.constant 0 : index
    %194 = vector.load %arg15[%c0_256, %c7_257, %c0_258] : memref<2x16x64xbf16, #tpu.memory_space<vmem>>, vector<1x9x64xbf16>
    %195 = vector.shape_cast %194 : vector<1x9x64xbf16> to vector<9x64xbf16>
    %c0_259 = arith.constant 0 : index
    %c448 = arith.constant 448 : index
    %196 = vector.load %arg16[%c0_259, %c448] : memref<18x512xbf16, #tpu.memory_space<vmem>>, vector<9x64xbf16>
    tpu.vector_store %arg16[%c0_259, %c448], %195 {strides = array<i32>} : memref<18x512xbf16, #tpu.memory_space<vmem>>, vector<9x64xbf16>,
    %c1_260 = arith.constant 1 : index
    %c0_261 = arith.constant 0 : index
    %c0_262 = arith.constant 0 : index
    %197 = vector.load %arg15[%c1_260, %c0_261, %c0_262] : memref<2x16x64xbf16, #tpu.memory_space<vmem>>, vector<1x9x64xbf16>
    %198 = vector.shape_cast %197 : vector<1x9x64xbf16> to vector<9x64xbf16>
    %c9 = arith.constant 9 : index
    %c0_263 = arith.constant 0 : index
    %199 = vector.load %arg16[%c9, %c0_263] : memref<18x512xbf16, #tpu.memory_space<vmem>>, vector<9x64xbf16>
    tpu.vector_store %arg16[%c9, %c0_263], %198 {strides = array<i32>} : memref<18x512xbf16, #tpu.memory_space<vmem>>, vector<9x64xbf16>,
    %c1_264 = arith.constant 1 : index
    %c1_265 = arith.constant 1 : index
    %c0_266 = arith.constant 0 : index
    %200 = vector.load %arg15[%c1_264, %c1_265, %c0_266] : memref<2x16x64xbf16, #tpu.memory_space<vmem>>, vector<1x9x64xbf16>
    %201 = vector.shape_cast %200 : vector<1x9x64xbf16> to vector<9x64xbf16>
    %c9_267 = arith.constant 9 : index
    %c64_268 = arith.constant 64 : index
    %202 = vector.load %arg16[%c9_267, %c64_268] : memref<18x512xbf16, #tpu.memory_space<vmem>>, vector<9x64xbf16>
    tpu.vector_store %arg16[%c9_267, %c64_268], %201 {strides = array<i32>} : memref<18x512xbf16, #tpu.memory_space<vmem>>, vector<9x64xbf16>,
    %c1_269 = arith.constant 1 : index
    %c2_270 = arith.constant 2 : index
    %c0_271 = arith.constant 0 : index
    %203 = vector.load %arg15[%c1_269, %c2_270, %c0_271] : memref<2x16x64xbf16, #tpu.memory_space<vmem>>, vector<1x9x64xbf16>
    %204 = vector.shape_cast %203 : vector<1x9x64xbf16> to vector<9x64xbf16>
    %c9_272 = arith.constant 9 : index
    %c128_273 = arith.constant 128 : index
    %205 = vector.load %arg16[%c9_272, %c128_273] : memref<18x512xbf16, #tpu.memory_space<vmem>>, vector<9x64xbf16>
    tpu.vector_store %arg16[%c9_272, %c128_273], %204 {strides = array<i32>} : memref<18x512xbf16, #tpu.memory_space<vmem>>, vector<9x64xbf16>,
    %c1_274 = arith.constant 1 : index
    %c3_275 = arith.constant 3 : index
    %c0_276 = arith.constant 0 : index
    %206 = vector.load %arg15[%c1_274, %c3_275, %c0_276] : memref<2x16x64xbf16, #tpu.memory_space<vmem>>, vector<1x9x64xbf16>
    %207 = vector.shape_cast %206 : vector<1x9x64xbf16> to vector<9x64xbf16>
    %c9_277 = arith.constant 9 : index
    %c192_278 = arith.constant 192 : index
    %208 = vector.load %arg16[%c9_277, %c192_278] : memref<18x512xbf16, #tpu.memory_space<vmem>>, vector<9x64xbf16>
    tpu.vector_store %arg16[%c9_277, %c192_278], %207 {strides = array<i32>} : memref<18x512xbf16, #tpu.memory_space<vmem>>, vector<9x64xbf16>,
    %c1_279 = arith.constant 1 : index
    %c4_280 = arith.constant 4 : index
    %c0_281 = arith.constant 0 : index
    %209 = vector.load %arg15[%c1_279, %c4_280, %c0_281] : memref<2x16x64xbf16, #tpu.memory_space<vmem>>, vector<1x9x64xbf16>
    %210 = vector.shape_cast %209 : vector<1x9x64xbf16> to vector<9x64xbf16>
    %c9_282 = arith.constant 9 : index
    %c256_283 = arith.constant 256 : index
    %211 = vector.load %arg16[%c9_282, %c256_283] : memref<18x512xbf16, #tpu.memory_space<vmem>>, vector<9x64xbf16>
    tpu.vector_store %arg16[%c9_282, %c256_283], %210 {strides = array<i32>} : memref<18x512xbf16, #tpu.memory_space<vmem>>, vector<9x64xbf16>,
    %c1_284 = arith.constant 1 : index
    %c5_285 = arith.constant 5 : index
    %c0_286 = arith.constant 0 : index
    %212 = vector.load %arg15[%c1_284, %c5_285, %c0_286] : memref<2x16x64xbf16, #tpu.memory_space<vmem>>, vector<1x9x64xbf16>
    %213 = vector.shape_cast %212 : vector<1x9x64xbf16> to vector<9x64xbf16>
    %c9_287 = arith.constant 9 : index
    %c320_288 = arith.constant 320 : index
    %214 = vector.load %arg16[%c9_287, %c320_288] : memref<18x512xbf16, #tpu.memory_space<vmem>>, vector<9x64xbf16>
    tpu.vector_store %arg16[%c9_287, %c320_288], %213 {strides = array<i32>} : memref<18x512xbf16, #tpu.memory_space<vmem>>, vector<9x64xbf16>,
    %c1_289 = arith.constant 1 : index
    %c6_290 = arith.constant 6 : index
    %c0_291 = arith.constant 0 : index
    %215 = vector.load %arg15[%c1_289, %c6_290, %c0_291] : memref<2x16x64xbf16, #tpu.memory_space<vmem>>, vector<1x9x64xbf16>
    %216 = vector.shape_cast %215 : vector<1x9x64xbf16> to vector<9x64xbf16>
    %c9_292 = arith.constant 9 : index
    %c384_293 = arith.constant 384 : index
    %217 = vector.load %arg16[%c9_292, %c384_293] : memref<18x512xbf16, #tpu.memory_space<vmem>>, vector<9x64xbf16>
    tpu.vector_store %arg16[%c9_292, %c384_293], %216 {strides = array<i32>} : memref<18x512xbf16, #tpu.memory_space<vmem>>, vector<9x64xbf16>,
    %c1_294 = arith.constant 1 : index
    %c7_295 = arith.constant 7 : index
    %c0_296 = arith.constant 0 : index
    %218 = vector.load %arg15[%c1_294, %c7_295, %c0_296] : memref<2x16x64xbf16, #tpu.memory_space<vmem>>, vector<1x9x64xbf16>
    %219 = vector.shape_cast %218 : vector<1x9x64xbf16> to vector<9x64xbf16>
    %c9_297 = arith.constant 9 : index
    %c448_298 = arith.constant 448 : index
    %220 = vector.load %arg16[%c9_297, %c448_298] : memref<18x512xbf16, #tpu.memory_space<vmem>>, vector<9x64xbf16>
    tpu.vector_store %arg16[%c9_297, %c448_298], %219 {strides = array<i32>} : memref<18x512xbf16, #tpu.memory_space<vmem>>, vector<9x64xbf16>,
    %c0_299 = arith.constant 0 : index
    %c0_300 = arith.constant 0 : index
    %221 = vector.load %arg16[%c0_299, %c0_300] : memref<18x512xbf16, #tpu.memory_space<vmem>>, vector<18x512xbf16>
    %c0_301 = arith.constant 0 : index
    %c0_302 = arith.constant 0 : index
    %222 = vector.load %arg6[%c0_301, %c0_302] : memref<512x128xbf16, #tpu.memory_space<vmem>>, vector<512x128xbf16>
    %cst_303 = arith.constant dense<0.000000e+00> : vector<18x128xf32>
    %223 = tpu.matmul %221, %222, %cst_303 {dimension_numbers = #tpu.dot_dimension_numbers<[1], [0], [0], [1], [0, 0, 1, 1], [], []>} : vector<18x512xbf16>, vector<512x128xbf16>, vector<18x128xf32> -> vector<18x128xf32>
    %c0_304 = arith.constant 0 : index
    %c0_305 = arith.constant 0 : index
    %224 = vector.load %arg7[%c0_304, %c0_305] : memref<1x128xf32, #tpu.memory_space<vmem>>, vector<1x128xf32>
    %225 = vector.broadcast %224 : vector<1x128xf32> to vector<18x128xf32>
    %226 = arith.addf %223, %225 : vector<18x128xf32>
    %cst_306 = arith.constant 0.000000e+00 : f32
    %227 = vector.broadcast %cst_306 : f32 to vector<18x128xf32>
    %228 = arith.maximumf %226, %227 : vector<18x128xf32>
    %229 = vector.extract_strided_slice %228 {offsets = [0, 0], sizes = [9, 128], strides = [1, 1]} : vector<18x128xf32> to vector<9x128xf32>
    %230 = arith.truncf %229 : vector<9x128xf32> to vector<9x128xbf16>
    %c0_307 = arith.constant 0 : index
    %c0_308 = arith.constant 0 : index
    %c0_309 = arith.constant 0 : index
    %231 = vector.load %arg8[%c0_307, %c0_308, %c0_309] : memref<2x9x128xbf16, #tpu.memory_space<vmem>>, vector<1x9x128xbf16>
    %232 = vector.shape_cast %231 : vector<1x9x128xbf16> to vector<9x128xbf16>
    %233 = vector.shape_cast %230 : vector<9x128xbf16> to vector<1x9x128xbf16>
    tpu.vector_store %arg8[%c0_307, %c0_308, %c0_309], %233 {strides = array<i32>} : memref<2x9x128xbf16, #tpu.memory_space<vmem>>, vector<1x9x128xbf16>,
    %234 = vector.extract_strided_slice %228 {offsets = [9, 0], sizes = [9, 128], strides = [1, 1]} : vector<18x128xf32> to vector<9x128xf32>
    %235 = arith.truncf %234 : vector<9x128xf32> to vector<9x128xbf16>
    %c1_310 = arith.constant 1 : index
    %c0_311 = arith.constant 0 : index
    %c0_312 = arith.constant 0 : index
    %236 = vector.load %arg8[%c1_310, %c0_311, %c0_312] : memref<2x9x128xbf16, #tpu.memory_space<vmem>>, vector<1x9x128xbf16>
    %237 = vector.shape_cast %236 : vector<1x9x128xbf16> to vector<9x128xbf16>
    %238 = vector.shape_cast %235 : vector<9x128xbf16> to vector<1x9x128xbf16>
    tpu.vector_store %arg8[%c1_310, %c0_311, %c0_312], %238 {strides = array<i32>} : memref<2x9x128xbf16, #tpu.memory_space<vmem>>, vector<1x9x128xbf16>,
    return
  }
  func.func @transform_0(%arg0: i32) -> (i32, i32, i32) {
    %c0_i32 = arith.constant 0 : i32
    %c0_i32_0 = arith.constant 0 : i32
    %c0_i32_1 = arith.constant 0 : i32
    return %arg0, %c0_i32, %c0_i32_0 : i32, i32, i32
  }
  func.func @transform_1(%arg0: i32) -> (i32, i32) {
    %c0_i32 = arith.constant 0 : i32
    %c0_i32_0 = arith.constant 0 : i32
    %c0_i32_1 = arith.constant 0 : i32
    return %c0_i32, %c0_i32_0 : i32, i32
  }
  func.func @transform_2(%arg0: i32) -> (i32, i32) {
    %c0_i32 = arith.constant 0 : i32
    %c0_i32_0 = arith.constant 0 : i32
    %c0_i32_1 = arith.constant 0 : i32
    return %c0_i32, %c0_i32_0 : i32, i32
  }
  func.func @transform_3(%arg0: i32) -> (i32, i32) {
    %c0_i32 = arith.constant 0 : i32
    %c0_i32_0 = arith.constant 0 : i32
    %c0_i32_1 = arith.constant 0 : i32
    return %c0_i32, %c0_i32_0 : i32, i32
  }
  func.func @transform_4(%arg0: i32) -> (i32, i32) {
    %c0_i32 = arith.constant 0 : i32
    %c0_i32_0 = arith.constant 0 : i32
    %c0_i32_1 = arith.constant 0 : i32
    return %c0_i32, %c0_i32_0 : i32, i32
  }
  func.func @transform_5(%arg0: i32) -> (i32, i32) {
    %c0_i32 = arith.constant 0 : i32
    %c0_i32_0 = arith.constant 0 : i32
    %c0_i32_1 = arith.constant 0 : i32
    return %c0_i32, %c0_i32_0 : i32, i32
  }
  func.func @transform_6(%arg0: i32) -> (i32, i32) {
    %c0_i32 = arith.constant 0 : i32
    %c0_i32_0 = arith.constant 0 : i32
    %c0_i32_1 = arith.constant 0 : i32
    return %c0_i32, %c0_i32_0 : i32, i32
  }
  func.func @transform_7(%arg0: i32) -> (i32, i32, i32) {
    %c0_i32 = arith.constant 0 : i32
    %c0_i32_0 = arith.constant 0 : i32
    %c0_i32_1 = arith.constant 0 : i32
    return %arg0, %c0_i32, %c0_i32_0 : i32, i32, i32
  }
}

</mosaic_0001>

<bundles_post_ra>
// kernel: tpu_custom_call.1
= control target key start
LH: loop header
LB: loop body
LE: loop exit
PB: predicated region body
PF: predicated region fallthrough
CT: control target
= control target key end

     0   :  { %vm9962_vm0 = vcmask 25600   ;;  %vm30_vm1 = vcmask 27650   ;;  %v9955_v1 = vmov 0   ;;  %vm161_vm2 = vcmask 1041408   ;;  %s6577_s15 = smov 4   ;;  %s6578_s16 = smov 16   ;;  %s9946_s0 = inlined_call_operand.vmem [shape: f32[2,128,4], index: 0, kind: input, shape index: {}]   ;;  %s9947_s1 = inlined_call_operand.vmem [shape: bf16[32,32], index: 1, kind: input, shape index: {}]   ;;  %s9948_s2 = inlined_call_operand.vmem [shape: f32[1,32], index: 2, kind: input, shape index: {}]   ;;  %s9949_s3 = inlined_call_operand.vmem [shape: bf16[256,64], index: 3, kind: input, shape index: {}]   ;;  %s9950_s4 = inlined_call_operand.vmem [shape: f32[1,64], index: 4, kind: input, shape index: {}]   ;;  %s9951_s5 = inlined_call_operand.vmem [shape: bf16[512,128], index: 5, kind: input, shape index: {}]   ;;  %s9952_s6 = inlined_call_operand.vmem [shape: f32[1,128], index: 6, kind: input, shape index: {}]   ;;  %s9953_s7 = inlined_call_operand.vmem [shape: bf16[2,9,128], index: 7, kind: output, shape index: {}]  }
   0x1   :  { %v48_v0 = vld [vmem:[%s9946_s0 + $0x78] sm:$0xff]  ;;  %31 = vst.msk [vmem:[#allocation2 + $0x40] sm:$0xc] %vm30_vm1, %v9955_v1  ;;  %32 = vst.msk [vmem:[#allocation2 + $0x84] sm:$0xc] %vm30_vm1, %v9955_v1  ;;  %v33_v2 = vld [vmem:[%s9946_s0] sm:$0xff] }
   0x2   :  { %28 = vst.msk [vmem:[#allocation2] sm:$0x3] %vm9962_vm0, %v9955_v1  ;;  %29 = vst.msk [vmem:[#allocation2 + $0x44] sm:$0x3] %vm9962_vm0, %v9955_v1  ;;  %v34_v3 = vld [vmem:[%s9946_s0 + $0x8] sm:$0xff]  ;;  %v6244_v4 = vpack.c.bf16 %v48_v0, %v48_v0  ;;  %v6229_v5 = vpack.c.bf16 %v33_v2, %v33_v2  ;;  %vm162_vm3 = vcmask 1045508  }
   0x3   :  { %v6230_v6 = vpack.c.bf16 %v34_v3, %v34_v3  ;;  %v35_v7 = vld [vmem:[%s9946_s0 + $0x10] sm:$0xff]  ;;  %v36_v12 = vld [vmem:[%s9946_s0 + $0x18] sm:$0xff]  ;;  %vm6654_vm4 = vmor %vm161_vm2, %vm162_vm3  ;;  %vm293_vm5 = vcmask 27648   ;;  %vm661_vm6 = vcmask 1042432   ;;  %vm662_vm7 = vcmask 1046532   ;;  %s6579_s17 = smov 8  }
   0x4   :  { %v6231_v8 = vpack.c.bf16 %v35_v7, %v35_v7  ;;  %v6649_v9 = vrot.slane %v6244_v4, 6  ;;  %v164_v10 = vrot.slane %v6229_v5, 6  ;;  %v37_v18 = vld [vmem:[%s9946_s0 + $0x20] sm:$0xff]  ;;  %v6232_v20 = vpack.c.bf16 %v36_v12, %v36_v12  ;;  %vm6708_vm9 = vmor %vm661_vm6, %vm662_vm7  ;;  %s6580_s18 = smov 24   ;;  %s6581_s19 = smov 20  }
   0x5   :  { %v166_v11 = vrot.slane %v6230_v6, 6  ;;  %v49_v19 = vld [vmem:[%s9946_s0 + $0x80] sm:$0xff]  ;;  %v6233_v25 = vpack.c.bf16 %v37_v18, %v37_v18  ;;  %vm383_vm8 = vsmask.f32 3328  ;;  %vm384_vm10 = vsmask.f32 7440 }
   0x6   :  { %v169_v14 = vrot.slane %v6231_v8, 6  ;;  %v210_v15 = vrot.slane %v6649_v9, 4  ;;  %v165_v16 = vrot.slane %v164_v10, 4  ;;  %292 = vst.msk [vmem:[#allocation2] sm:$0xc] %vm30_vm1, %v164_v10  ;;  %v172_v24 = vrot.slane %v6232_v20, 6  ;;  %vm6749_vm11 = vmor %vm383_vm8, %vm384_vm10 }
   0x7   :  { %v168_v17 = vrot.slane %v166_v11, 4  ;;  %v6245_v26 = vpack.c.bf16 %v49_v19, %v49_v19  ;;  %v6675_v29 = vrot.slane %v6233_v25, 6  ;;  %s6582_s20 = smov 28   ;;  %vm804_vm12 = vsmask.f32 2304  ;;  %s6583_s21 = smov 12  }
   0x8   :  { %309 = vst.msk [vmem:[#allocation2 + $0x40] sm:$0x3] %vm9962_vm0, %v210_v15  ;;  %v167_v21 = vsel %vm6654_vm4, %v165_v16, %v166_v11  ;;  %v171_v23 = vrot.slane %v169_v14, 4  ;;  %v174_v28 = vrot.slane %v172_v24, 4  ;;  %vm805_vm13 = vsmask.f32 6416 }
   0x9   :  { %v170_v22 = vsel %vm6654_vm4, %v168_v17, %v169_v14  ;;  %294 = vst.msk [vmem:[#allocation2 + $0x4] sm:$0xf] %vm293_vm5, %v167_v21  ;;  %v6677_v30 = vrot.slane %v6245_v26, 6  ;;  %vm6767_vm14 = vmor %vm804_vm12, %vm805_vm13  ;;  %vm1223_vm15 = vsmask.f32 1280  ;;  %vm9954_vm2 = vcmask 1040384  }
   0xa   :  { %295 = vst.msk [vmem:[#allocation2 + $0x8] sm:$0xf] %vm293_vm5, %v170_v22  ;;  %v173_v27 = vsel %vm6654_vm4, %v171_v23, %v172_v24  ;;  %v176_v31 = vsel %vm6654_vm4, %v174_v28, %v6675_v29  ;;  %vm1503_vm6 = vcmask 1044484   ;;  %vm9972_vm7 = vsmask.f32 256 }
   0xb   :  { %296 = vst.msk [vmem:[#allocation2 + $0xc] sm:$0xf] %vm293_vm5, %v173_v27  ;;  %297 = vst.msk [vmem:[#allocation2 + $0x10] sm:$0xf] %vm293_vm5, %v176_v31  ;;  %vm1645_vm8 = vsmask.f32 4368 }
   0xc   :  { %310 = vst.msk [vmem:[#allocation2 + $0x44] sm:$0xc] %vm30_vm1, %v6677_v30  ;;  %vm1224_vm1 = vsmask.f32 5392  ;;  %vm6810_vm10 = vmor %vm9954_vm2, %vm1503_vm6  ;;  %vm9961_vm13 = vcmask 24576  }
   0xd   :  { %v627_v32 = vld [vmem:[#allocation2] sm:$0xe]  ;;  %vm6795_vm3 = vmor %vm1223_vm15, %vm1224_vm1  ;;  %vm9960_vm1 = vcmask 57376  }
   0xe   :  { %v366_v33 = vld [vmem:[#allocation2] sm:$0xf]  ;;  %v6083_v49 = vrot.slane %v627_v32, 9  ;;  %vm6846_vm12 = vmor %vm9972_vm7, %vm1645_vm8  ;;  %vm9965_vm8 = vmmov 0  }
   0xf   :  { %v382_v34 = vld [vmem:[#allocation2 + $0x40] sm:$0x1]  ;;  %v1049_v41 = vld [vmem:[#allocation2] sm:$0xc]  ;;  %v387_v52 = vshrl.u32 %v366_v33, 16  ;;  %v390_v56 = vshll.u32 %v366_v33, 16  ;;  %vm362_vm15 = vmand %vm9961_vm13, %vm9972_vm7 }
  0x10   :  { %v6686_v35 = vld [vmem:[#allocation2 + $0x40] sm:$0x7]  ;;  %v550_v37 = vshrl.u32 %v382_v34, 16  ;;  %v628_v44 = vld [vmem:[#allocation2 + $0x4] sm:$0xf]  ;;  %v6084_v58 = vrot.slane %v1049_v41, 10  ;;  %vm7170_vm6 = vmand %vm9960_vm1, %vm9972_vm7 }
  0x11   :  { %v6688_v36 = vld [vmem:[#allocation2 + $0x40] sm:$0x3]  ;;  %v1130_v38 = vrot.slane %v6686_v35, 6  ;;  %v6700_v51 = vld [vmem:[#allocation2 + $0x4] sm:$0xf]  ;;  %v666_v55 = vrot.slane %v628_v44, 5 }
  0x12   :  { %v711_v39 = vrot.slane %v6688_v36, 5  ;;  %v6692_v40 = vld [vmem:[#allocation2 + $0x40] sm:$0xf]  ;;  %586 = vrot.lane.b32.xlu0 %v550_v37, %s6577_s15  ;;  %v1085_v59 = vrot.slane %v6700_v51, 6  ;;  %v6717_v63 = vld [vmem:[#allocation2 + $0x8] sm:$0xf] }
  0x13   :  { %v9959_v42 = vrot.slane %v6692_v40, 7  ;;  %v1222_v43 = vld [vmem:[#allocation2 + $0x40] sm:$0x7]  ;;  %v1132_v45 = vrot.slane %v1130_v38, 4  ;;  %v367_v0 = vld [vmem:[#allocation2 + $0x4] sm:$0xf]  ;;  %v667_v7 = vsel %vm6708_vm9, %v6083_v49, %v666_v55 }
  0x14   :  { %v713_v46 = vrot.slane %v711_v39, 4  ;;  %v1386_v47 = vshrl.u32 %v1222_v43, 16  ;;  %v1644_v48 = vld [vmem:[#allocation2 + $0x40] sm:$0xf]  ;;  %v6719_v3 = vld [vmem:[#allocation2 + $0x8] sm:$0xf]  ;;  %v1086_v14 = vsel %vm6654_vm4, %v6084_v58, %v1085_v59 }
  0x15   :  { %v1788_v50 = vshrl.u32 %v1644_v48, 16  ;;  %1165 = vrot.lane.b32.xlu1 %v1132_v45, %s6578_s16  ;;  %v1554_v53 = vrot.slane %v9959_v42, 4  ;;  %v803_v60 = vld [vmem:[#allocation2 + $0x40] sm:$0x3]  ;;  %v396_v4 = vshll.u32 %v367_v0, 16  ;;  %v400_v5 = vshrl.u32 %v367_v0, 16 }
  0x16   :  { %v6705_v54 = vrot.slane %v1386_v47, 6  ;;  %746 = vrot.lane.b32.xlu0 %v713_v46, %s6579_s17  ;;  %v967_v2 = vshrl.u32 %v803_v60, 16  ;;  %v787_v6 = vld [vmem:[#allocation2] sm:$0xe]  ;;  %v668_v8 = vrot.slane %v666_v55, 4  ;;  %v389_v10 = vrot.slane %v387_v52, 4 }
  0x17   :  { %v6715_v62 = vrot.slane %v1788_v50, 7  ;;  %v392_v11 = vrot.slane %v390_v56, 5  ;;  %v788_v12 = vld [vmem:[#allocation2 + $0x4] sm:$0xf]  ;;  %v6728_v15 = vrot.slane %v396_v4, 5  ;;  %v402_v16 = vrot.slane %v400_v5, 4 }
  0x18   :  { %v1394_v61 = vrot.slane %v6705_v54, 4  ;;  %v406_v17 = vshll.u32 %v6719_v3, 16  ;;  %v789_v18 = vld [vmem:[#allocation2 + $0x8] sm:$0xf]  ;;  %v669_v20 = vrot.slane %v6717_v63, 5  ;;  %v817_v21 = vshrl.u32 %v788_v12, 16 }
  0x19   :  { %1587 = vrot.lane.b32.xlu1 %v1554_v53, %s6580_s18  ;;  %v1795_v19 = vrot.slane %v6715_v62, 4  ;;  %v820_v22 = vshll.u32 %v788_v12, 16  ;;  %v6734_v23 = vrot.slane %v967_v2, 5  ;;  %v403_v24 = vor.u32 %v402_v16, %v6728_v15  ;;  %v1206_v33 = vld [vmem:[#allocation2] sm:$0xc]  ;;  %v58_v35 = vld [vmem:[%s9946_s0 + $0xc8] sm:$0xff] }
  0x1a   :  { %1427 = vrot.lane.b32.xlu0 %v1394_v61, %s6581_s19  ;;  %v827_v25 = vshrl.u32 %v789_v18, 16  ;;  %v830_v26 = vshll.u32 %v789_v18, 16  ;;  %v819_v27 = vrot.slane %v817_v21, 5  ;;  %v808_v31 = vshrl.u32 %v787_v6, 16  ;;  %v1207_v44 = vld [vmem:[#allocation2 + $0x4] sm:$0xf] }
  0x1b   :  { %v822_v28 = vrot.slane %v820_v22, 6  ;;  %v811_v32 = vshll.u32 %v787_v6, 16  ;;  %v404_v34 = vrot.slane %v403_v24, 4  ;;  %v6738_v37 = vrot.slane %v406_v17, 5  ;;  %v1208_v58 = vld [vmem:[#allocation2 + $0x8] sm:$0xf] }
  0x1c   :  { %v393_v41 = vor.u32 %v392_v11, %v389_v10  ;;  %v829_v43 = vrot.slane %v827_v25, 5  ;;  %v832_v46 = vrot.slane %v830_v26, 6  ;;  %v810_v47 = vrot.slane %v808_v31, 5  ;;  %v1629_v24 = vld [vmem:[#allocation2 + $0x4] sm:$0xf]  ;;  %v6550_v16 = vld [vmem:[%s9951_s5 + $0xf0] sm:$0xff]  }
  0x1d   :  { %714 = vrot.lane.b32.xlu1 %v667_v7, %s6579_s17  ;;  %v6741_v45 = vor.u32 %v822_v28, %v819_v27  ;;  %v813_v48 = vrot.slane %v811_v32, 6  ;;  %v670_v49 = vsel %vm6708_vm9, %v668_v8, %v669_v20  ;;  %v1227_v52 = vshrl.u32 %v1206_v33, 16  ;;  %v6762_v8 = vld [vmem:[#allocation2 + $0x8] sm:$0xf]  ;;  %v369_v51 = vld [vmem:[#allocation2 + $0xc] sm:$0xf] }
  0x1e   :  { %1828 = vrot.lane.b32.xlu0 %v1795_v19, %s6582_s20  ;;  %v975_v53 = vrot.slane %v6734_v23, 4  ;;  %v1230_v55 = vshll.u32 %v1206_v33, 16  ;;  %v1236_v56 = vshrl.u32 %v1207_v44, 16  ;;  %v394_v60 = vrot.slane %v393_v41, 4  ;;  %v6781_v31 = vld [vmem:[#allocation2 + $0x8] sm:$0xf] }
  0x1f   :  { %v814_v61 = vor.u32 %v813_v48, %v810_v47  ;;  %v1229_v0 = vrot.slane %v1227_v52, 6  ;;  %v1239_v2 = vshll.u32 %v1207_v44, 16  ;;  %v409_v4 = vsel %vm6749_vm11, %v404_v34, %v6738_v37  ;;  %v1468_v34 = vld [vmem:[#allocation2] sm:$0x8] }
  0x20   :  { %v825_v5 = vrot.slane %v6741_v45, 4  ;;  %v6760_v6 = vor.u32 %v832_v46, %v829_v43  ;;  %v1232_v7 = vrot.slane %v1230_v55, 7  ;;  %v1238_v10 = vrot.slane %v1236_v56, 6  ;;  %v1628_v41 = vld [vmem:[#allocation2] sm:$0x8] }
  0x21   :  { %1133 = vrot.lane.b32.xlu1 %v1086_v14, %s6578_s16  ;;  %v1241_v11 = vrot.slane %v1239_v2, 7  ;;  %v1246_v12 = vshrl.u32 %v1208_v58, 16  ;;  %v1249_v14 = vshll.u32 %v1208_v58, 16  ;;  %v399_v17 = vsel %vm6749_vm11, %v394_v60, %v6728_v15  ;;  %v1469_v15 = vld [vmem:[#allocation2 + $0x4] sm:$0xf] }
  0x22   :  { %716 = vrot.lane.b32.xlu0 %v670_v49, %s6579_s17  ;;  %v815_v18 = vrot.slane %v814_v61, 4  ;;  %v1233_v19 = vor.u32 %v1232_v7, %v1229_v0  ;;  %v1087_v21 = vrot.slane %v1085_v59, 4  ;;  %v1088_v22 = vrot.slane %v6762_v8, 6  ;;  %v6802_v49 = vld [vmem:[#allocation2 + $0x8] sm:$0xf] }
  0x23   :  { %v834_v25 = vsel %vm6767_vm14, %v825_v5, %v6760_v6  ;;  %v1242_v26 = vor.u32 %v1241_v11, %v1238_v10  ;;  %v1248_v27 = vrot.slane %v1246_v12, 6  ;;  %v1251_v28 = vrot.slane %v1249_v14, 7  ;;  %v790_v11 = vld [vmem:[#allocation2 + $0xc] sm:$0xf] }
  0x24   :  { %v410_v32 = vshrl.u32 %v6719_v3, 16  ;;  %v824_v59 = vsel %vm6767_vm14, %v815_v18, %v6741_v45  ;;  %v1234_v33 = vrot.slane %v1233_v19, 4  ;;  %v1653_v43 = vshrl.u32 %v1629_v24, 16  ;;  %v328_v18 = vld [vmem:[#allocation2 + $0x4] sm:$0xf] }
  0x25   :  { %1008 = vrot.lane.b32.xlu1 %v975_v53, %s6583_s21  ;;  %v1089_v44 = vsel %vm6654_vm4, %v1087_v21, %v1088_v22  ;;  %v1507_v46 = vrot.slane %v1469_v15, 7  ;;  %v1662_v45 = vshrl.u32 %v6781_v31, 16  ;;  %v1244_v47 = vrot.slane %v1242_v26, 4  ;;  %v327_v19 = vld [vmem:[#allocation2] sm:$0xf] }
  0x26   :  { %556 = vrot.lane.b32.xlu0 %v409_v4, %s6577_s15  ;;  %v6800_v48 = vor.u32 %v1251_v28, %v1248_v27  ;;  %v416_v52 = vshll.u32 %v369_v51, 16  ;;  %v420_v53 = vshrl.u32 %v369_v51, 16  ;;  %v6085_v55 = vrot.slane %v1468_v34, 11  ;;  %v6824_v21 = vld [vmem:[#allocation2 + $0x10] sm:$0xf] }
  0x27   :  { %v1648_v56 = vshrl.u32 %v1628_v41, 16  ;;  %v1243_v58 = vsel %vm6795_vm3, %v1234_v33, %v1242_v26  ;;  %v1655_v60 = vrot.slane %v1653_v43, 7  ;;  %v1656_v61 = vshll.u32 %v1629_v24, 16  ;;  %v38_v24 = vld [vmem:[%s9946_s0 + $0x28] sm:$0xff]  ;;  %345 = vst.msk [vmem:[#allocation3 + $0x4] sm:$0xf] %vm293_vm5, %v328_v18 }
  0x28   :  { %v412_v0 = vrot.slane %v410_v32, 4  ;;  %v1509_v4 = vrot.slane %v1507_v46, 4  ;;  %v1510_v5 = vrot.slane %v6802_v49, 7  ;;  %v6815_v7 = vrot.slane %v1662_v45, 7  ;;  %344 = vst.msk [vmem:[#allocation3] sm:$0xf] %vm293_vm5, %v327_v19 }
  0x29   :  { %554 = vrot.lane.b32.xlu1 %v399_v17, %s6577_s15  ;;  %v1665_v10 = vshll.u32 %v6781_v31, 16  ;;  %v1253_v12 = vsel %vm6795_vm3, %v1244_v47, %v6800_v48  ;;  %v6821_v14 = vrot.slane %v416_v52, 5  ;;  %v422_v17 = vrot.slane %v420_v53, 4  ;;  %v6834_v15 = vld [vmem:[#allocation2 + $0xc] sm:$0xf]  ;;  %v39_v31 = vld [vmem:[%s9946_s0 + $0x30] sm:$0xff] }
  0x2a   :  { %978 = vrot.lane.b32.xlu0 %v834_v25, %s6583_s21  ;;  %v1508_v25 = vsel %vm6810_vm10, %v6085_v55, %v1507_v46  ;;  %v6086_v26 = vrot.slane %v1648_v56, 11  ;;  %v1658_v27 = vor.u32 %v1656_v61, %v1655_v60  ;;  %v413_v28 = vor.u32 %v412_v0, %v6738_v37  ;;  %v329_v32 = vld [vmem:[#allocation2 + $0x8] sm:$0xf]  ;;  %v791_v46 = vld [vmem:[#allocation2 + $0x10] sm:$0xf] }
  0x2b   :  { %v1511_v51 = vsel %vm6810_vm10, %v1509_v4, %v1510_v5  ;;  %v837_v37 = vshrl.u32 %v790_v11, 16  ;;  %v840_v33 = vshll.u32 %v790_v11, 16  ;;  %346 = vst.msk [vmem:[#allocation3 + $0x8] sm:$0xf] %vm293_vm5, %v329_v32  ;;  %v1660_v34 = vrot.slane %v1655_v60, 4  ;;  %v41_v60 = vld [vmem:[%s9946_s0 + $0x40] sm:$0xff] }
  0x2c   :  { %v1667_v41 = vor.u32 %v1665_v10, %v6815_v7  ;;  %v423_v43 = vor.u32 %v422_v17, %v6821_v14  ;;  %v330_v45 = vld [vmem:[#allocation2 + $0xc] sm:$0xf]  ;;  %v6234_v47 = vpack.c.bf16 %v38_v24, %v38_v24  ;;  %v1659_v52 = vsel %vm6846_vm12, %v6086_v26, %v1658_v27  ;;  %v6869_v0 = vld [vmem:[#allocation2 + $0x10] sm:$0xf] }
  0x2d   :  { %976 = vrot.lane.b32.xlu1 %v824_v59, %s6583_s21  ;;  %347 = vst.msk [vmem:[#allocation3 + $0xc] sm:$0xf] %vm293_vm5, %v330_v45  ;;  %v414_v53 = vrot.slane %v413_v28, 4  ;;  %v672_v55 = vrot.slane %v6834_v15, 5  ;;  %v6235_v56 = vpack.c.bf16 %v39_v31, %v39_v31  ;;  %v50_v61 = vld [vmem:[%s9946_s0 + $0x88] sm:$0xff]  ;;  %v839_v4 = vrot.slane %v837_v37, 5 }
  0x2e   :  { %1135 = vrot.lane.b32.xlu0 %v1089_v44, %s6578_s16  ;;  %v426_v44 = vshll.u32 %v6824_v21, 16  ;;  %v842_v10 = vrot.slane %v840_v33, 6  ;;  %v847_v11 = vshrl.u32 %v791_v46, 16  ;;  %v1668_v17 = vsel %vm6846_vm12, %v1660_v34, %v1667_v41  ;;  %v1209_v24 = vld [vmem:[#allocation2 + $0xc] sm:$0xf] }
  0x2f   :  { %v424_v18 = vrot.slane %v423_v43, 4  ;;  %v6237_v27 = vpack.c.bf16 %v41_v60, %v41_v60  ;;  %v6246_v28 = vpack.c.bf16 %v50_v61, %v50_v61  ;;  %v419_v15 = vsel %vm6749_vm11, %v414_v53, %v6821_v14  ;;  %v1052_v41 = vld [vmem:[#allocation2 + $0xc] sm:$0xf] }
  0x30   :  { %v6873_v19 = vrot.slane %v426_v44, 5  ;;  %v671_v31 = vrot.slane %v669_v20, 4  ;;  %v674_v32 = vrot.slane %v672_v55, 4  ;;  %v843_v37 = vor.u32 %v842_v10, %v839_v4  ;;  %v1210_v20 = vld [vmem:[#allocation2 + $0x10] sm:$0xf] }
  0x31   :  { %1395 = vrot.lane.b32.xlu1 %v1243_v58, %s6581_s19  ;;  %v40_v58 = vld [vmem:[%s9946_s0 + $0x38] sm:$0xff]  ;;  %v849_v33 = vrot.slane %v847_v11, 5  ;;  %v181_v43 = vrot.slane %v6235_v56, 6  ;;  %v1259_v45 = vshll.u32 %v1209_v24, 16  ;;  %v177_v14 = vrot.slane %v6675_v29, 4 }
  0x32   :  { %1397 = vrot.lane.b32.xlu0 %v1253_v12, %s6581_s19  ;;  %v850_v12 = vshll.u32 %v791_v46, 16  ;;  %v6236_v26 = vpack.c.bf16 %v40_v58, %v40_v58  ;;  %v429_v44 = vsel %vm6749_vm11, %v424_v18, %v6873_v19  ;;  %v1256_v46 = vshrl.u32 %v1209_v24, 16  ;;  %v6902_v4 = vld [vmem:[#allocation2 + $0x10] sm:$0xf]  ;;  %v363_v24 = vld [vmem:[#allocation3 + $0x40] sm:$0x1] }
  0x33   :  { %v835_v63 = vrot.slane %v6760_v6, 4  ;;  %v6889_v53 = vrot.slane %v6237_v27, 6  ;;  %v673_v56 = vsel %vm6708_vm9, %v671_v31, %v672_v55  ;;  %v1091_v60 = vrot.slane %v1052_v41, 6  ;;  %v1631_v8 = vld [vmem:[#allocation2 + $0xc] sm:$0xf] }
  0x34   :  { %v852_v34 = vrot.slane %v850_v12, 6  ;;  %v845_v6 = vrot.slane %v843_v37, 4  ;;  %v212_v10 = vrot.slane %v6677_v30, 4  ;;  %v1258_v11 = vrot.slane %v1256_v46, 6  ;;  %v1632_v46 = vld [vmem:[#allocation2 + $0x10] sm:$0xf] }
  0x35   :  { %1555 = vrot.lane.b32.xlu1 %v1508_v25, %s6580_s18  ;;  %v178_v25 = vrot.slane %v6234_v47, 6  ;;  %v1261_v12 = vrot.slane %v1259_v45, 7  ;;  %v1269_v18 = vshll.u32 %v1210_v20, 16  ;;  %v6912_v30 = vrot.slane %v6246_v28, 6 }
  0x36   :  { %1557 = vrot.lane.b32.xlu0 %v1511_v51, %s6580_s18  ;;  %v675_v51 = vrot.slane %v6869_v0, 5  ;;  %v6900_v61 = vor.u32 %v852_v34, %v849_v33  ;;  %v844_v31 = vsel %vm6767_vm14, %v835_v63, %v843_v37  ;;  %v1094_v33 = vrot.slane %v6902_v4, 6 }
  0x37   :  { %v180_v47 = vrot.slane %v178_v25, 4  ;;  %v179_v29 = vsel %vm6654_vm4, %v177_v14, %v178_v25  ;;  %v1090_v25 = vrot.slane %v1088_v22, 4  ;;  %v214_v37 = vsel %vm6654_vm4, %v212_v10, %v6912_v30  ;;  %v1471_v14 = vld [vmem:[#allocation2 + $0xc] sm:$0xf] }
  0x38   :  { %v676_v58 = vsel %vm6708_vm9, %v674_v32, %v675_v51  ;;  %298 = vst.msk [vmem:[#allocation2 + $0x14] sm:$0xf] %vm293_vm5, %v179_v29  ;;  %v1093_v32 = vrot.slane %v1091_v60, 4  ;;  %v854_v34 = vsel %vm6767_vm14, %v845_v6, %v6900_v61  ;;  %v1262_v41 = vor.u32 %v1261_v12, %v1258_v11  ;;  %311 = vst.msk [vmem:[#allocation2 + $0x48] sm:$0xf] %vm293_vm5, %v214_v37 }
  0x39   :  { %1796 = vrot.lane.b32.xlu1 %v1659_v52, %s6582_s20  ;;  %v184_v52 = vrot.slane %v6236_v26, 6  ;;  %v182_v55 = vsel %vm6654_vm4, %v180_v47, %v181_v43  ;;  %v183_v26 = vrot.slane %v181_v43, 4  ;;  %v1092_v63 = vsel %vm6654_vm4, %v1090_v25, %v1091_v60  ;;  %v6949_v60 = vld [vmem:[#allocation2 + $0x10] sm:$0xf] }
  0x3a   :  { %1798 = vrot.lane.b32.xlu0 %v1668_v17, %s6582_s20  ;;  %v1266_v17 = vshrl.u32 %v1210_v20, 16  ;;  %299 = vst.msk [vmem:[#allocation2 + $0x18] sm:$0xf] %vm293_vm5, %v182_v55  ;;  %v1254_v20 = vrot.slane %v6800_v48, 4  ;;  %v1671_v47 = vshrl.u32 %v1631_v8, 16  ;;  %v1095_v29 = vsel %vm6654_vm4, %v1093_v32, %v1094_v33 }
  0x3b   :  { %v186_v27 = vrot.slane %v184_v52, 4  ;;  %v185_v22 = vsel %vm6654_vm4, %v183_v26, %v184_v52  ;;  %v430_v52 = vshrl.u32 %v6824_v21, 16  ;;  %v1264_v6 = vrot.slane %v1262_v41, 4 }
  0x3c   :  { %v1268_v43 = vrot.slane %v1266_v17, 6  ;;  %300 = vst.msk [vmem:[#allocation2 + $0x1c] sm:$0xf] %vm293_vm5, %v185_v22  ;;  %v1513_v55 = vrot.slane %v1471_v14, 7  ;;  %v1512_v48 = vrot.slane %v1510_v5, 4  ;;  %v1674_v21 = vshll.u32 %v1631_v8, 16 }
  0x3d   :  { %558 = vrot.lane.b32.xlu1 %v419_v15, %s6577_s15  ;;  %v343_v15 = vld [vmem:[#allocation2 + $0x40] sm:$0x1]  ;;  %v188_v28 = vsel %vm6654_vm4, %v186_v27, %v6889_v53  ;;  %v1263_v11 = vsel %vm6795_vm3, %v1254_v20, %v1262_v41  ;;  %v1673_v12 = vrot.slane %v1671_v47, 7  ;;  %v1683_v25 = vshll.u32 %v1632_v46, 16 }
  0x3e   :  { %560 = vrot.lane.b32.xlu0 %v429_v44, %s6577_s15  ;;  %v1271_v44 = vrot.slane %v1269_v18, 7  ;;  %301 = vst.msk [vmem:[#allocation2 + $0x20] sm:$0xf] %vm293_vm5, %v188_v28  ;;  %v364_v45 = vsel %vm362_vm15, %v343_v15, %v363_v24  ;;  %v1515_v49 = vrot.slane %v1513_v55, 4  ;;  %v1516_v5 = vrot.slane %v6949_v60, 7 }
  0x3f   :  { %365 = vst [vmem:[#allocation3 + $0x40] sm:$0x1] %v364_v45  ;;  %v432_v27 = vrot.slane %v430_v52, 4  ;;  %v1669_v15 = vrot.slane %v6815_v7, 4  ;;  %v1514_v32 = vsel %vm6810_vm10, %v1512_v48, %v1513_v55  ;;  %v1678_v28 = vrot.slane %v1673_v12, 4 }
  0x40   :  { %v6944_v10 = vor.u32 %v1271_v44, %v1268_v43  ;;  %v1517_v43 = vsel %vm6810_vm10, %v1515_v49, %v1516_v5  ;;  %v632_v45 = vld [vmem:[#allocation2 + $0x14] sm:$0xf]  ;;  %vm9958_vm15 = vcmask 90176   ;;  %vm9977_vm1 = vcmask 126048  }
  0x41   :  { %718 = vrot.lane.b32.xlu1 %v673_v56, %s6579_s17  ;;  %v1680_v56 = vshrl.u32 %v1632_v46, 16  ;;  %v6966_v41 = vld [vmem:[#allocation2 + $0x18] sm:$0xf]  ;;  %v433_v7 = vor.u32 %v432_v27, %v6873_v19  ;;  %v1054_v0 = vld [vmem:[#allocation2 + $0x14] sm:$0xf]  ;;  %vm9964_vm13 = vcmask 158848  }
  0x42   :  { %720 = vrot.lane.b32.xlu0 %v676_v58, %s6579_s17  ;;  %v371_v58 = vld [vmem:[#allocation2 + $0x14] sm:$0xf]  ;;  %v1273_v26 = vsel %vm6795_vm3, %v1264_v6, %v6944_v10  ;;  %v446_v20 = vshll.u32 %v6966_v41, 16  ;;  %v793_v47 = vld [vmem:[#allocation2 + $0x18] sm:$0xf] }
  0x43   :  { %v436_v17 = vshll.u32 %v371_v58, 16  ;;  %v440_v18 = vshrl.u32 %v371_v58, 16  ;;  %v6954_v24 = vrot.slane %v1680_v56, 7  ;;  %v434_v56 = vrot.slane %v433_v7, 4  ;;  %v6981_v6 = vld [vmem:[#allocation2 + $0x18] sm:$0xf] }
  0x44   :  { %v678_v58 = vrot.slane %v632_v45, 5  ;;  %v867_v55 = vshrl.u32 %v793_v47, 16  ;;  %v870_v48 = vshll.u32 %v793_v47, 16  ;;  %v681_v27 = vrot.slane %v6981_v6, 5  ;;  %v1473_v4 = vld [vmem:[#allocation2 + $0x14] sm:$0xf] }
  0x45   :  { %980 = vrot.lane.b32.xlu1 %v844_v31, %s6583_s21  ;;  %v792_v31 = vld [vmem:[#allocation2 + $0x14] sm:$0xf]  ;;  %v438_v8 = vrot.slane %v436_v17, 5  ;;  %v442_v22 = vrot.slane %v440_v18, 4  ;;  %v1685_v37 = vor.u32 %v1683_v25, %v6954_v24  ;;  %v2182_v17 = vld [vmem:[#allocation2 + $0x48] sm:$0xf] }
  0x46   :  { %982 = vrot.lane.b32.xlu0 %v854_v34, %s6583_s21  ;;  %v1676_v34 = vor.u32 %v1674_v21, %v1673_v12  ;;  %v857_v44 = vshrl.u32 %v792_v31, 16  ;;  %v860_v46 = vshll.u32 %v792_v31, 16  ;;  %v2074_v21 = vld [vmem:[#allocation2 + $0x44] sm:$0xf]  ;;  %v6983_v12 = vrot.slane %v446_v20, 5 }
  0x47   :  { %v1686_v52 = vsel %vm6846_vm12, %v1678_v28, %v1685_v37  ;;  %v677_v18 = vrot.slane %v675_v51, 4  ;;  %v1211_v25 = vld [vmem:[#allocation2 + $0x14] sm:$0xf]  ;;  %v680_v49 = vrot.slane %v678_v58, 4  ;;  %v869_v31 = vrot.slane %v867_v55, 5 }
  0x48   :  { %v1677_v14 = vsel %vm6846_vm12, %v1669_v15, %v1676_v34  ;;  %v859_v19 = vrot.slane %v857_v44, 5  ;;  %v2208_v34 = vshll.u32 %v2182_v17, 16  ;;  %v1276_v51 = vshrl.u32 %v1211_v25, 16 }
  0x49   :  { %1137 = vrot.lane.b32.xlu1 %v1092_v63, %s6578_s16  ;;  %v443_v63 = vor.u32 %v442_v22, %v438_v8  ;;  %v2212_v22 = vshrl.u32 %v2182_v17, 16  ;;  %v1279_v37 = vshll.u32 %v1211_v25, 16  ;;  %v679_v44 = vsel %vm6708_vm9, %v677_v18, %v678_v58  ;;  %v332_v58 = vld [vmem:[#allocation2 + $0x14] sm:$0xf] }
  0x4a   :  { %1139 = vrot.lane.b32.xlu0 %v1095_v29, %s6578_s16  ;;  %v862_v29 = vrot.slane %v860_v46, 6  ;;  %v682_v46 = vsel %vm6708_vm9, %v680_v49, %v681_v27  ;;  %v855_v45 = vrot.slane %v6900_v61, 4  ;;  %v1097_v47 = vrot.slane %v1054_v0, 6  ;;  %349 = vst.msk [vmem:[#allocation3 + $0x14] sm:$0xf] %vm293_vm5, %v332_v58  ;;  %v43_v49 = vld [vmem:[%s9946_s0 + $0x50] sm:$0xff] }
  0x4b   :  { %v6998_v7 = vrot.slane %v2212_v22, 4  ;;  %v1278_v61 = vrot.slane %v1276_v51, 6  ;;  %v1633_v17 = vld [vmem:[#allocation2 + $0x14] sm:$0xf]  ;;  %v1274_v22 = vrot.slane %v6944_v10, 4  ;;  %v450_v51 = vshrl.u32 %v6966_v41, 16 }
  0x4c   :  { %v863_v15 = vor.u32 %v862_v29, %v859_v19  ;;  %v7016_v19 = vld [vmem:[#allocation2 + $0x18] sm:$0xf]  ;;  %v1281_v29 = vrot.slane %v1279_v37, 7  ;;  %v1099_v25 = vrot.slane %v1097_v47, 4  ;;  %v373_v0 = vld [vmem:[#allocation2 + $0x1c] sm:$0xf] }
  0x4d   :  { %1399 = vrot.lane.b32.xlu1 %v1263_v11, %s6581_s19  ;;  %v444_v11 = vrot.slane %v443_v63, 4  ;;  %v7045_v41 = vld [vmem:[#allocation2 + $0x18] sm:$0xf] }
  0x4e   :  { %1401 = vrot.lane.b32.xlu0 %v1273_v26, %s6581_s19  ;;  %v439_v26 = vsel %vm6749_vm11, %v434_v56, %v438_v8  ;;  %v1212_v8 = vld [vmem:[#allocation2 + $0x18] sm:$0xf]  ;;  %v865_v63 = vrot.slane %v863_v15, 4  ;;  %v42_v56 = vld [vmem:[%s9946_s0 + $0x48] sm:$0xff] }
  0x4f   :  { %v449_v28 = vsel %vm6749_vm11, %v444_v11, %v6983_v12  ;;  %v1286_v55 = vshrl.u32 %v1212_v8, 16  ;;  %v1096_v11 = vrot.slane %v1094_v33, 4  ;;  %v6238_v18 = vpack.c.bf16 %v42_v56, %v42_v56  ;;  %v1634_v33 = vld [vmem:[#allocation2 + $0x18] sm:$0xf] }
  0x50   :  { %v1698_v10 = vshrl.u32 %v1634_v33, 16  ;;  %v1701_v60 = vshll.u32 %v1634_v33, 16 }
  0x51   :  { %1559 = vrot.lane.b32.xlu1 %v1514_v32, %s6580_s18  ;;  %v872_v32 = vrot.slane %v870_v48, 6  ;;  %v1289_v48 = vshll.u32 %v1212_v8, 16  ;;  %v1098_v37 = vsel %vm6654_vm4, %v1096_v11, %v1097_v47  ;;  %v2181_v8 = vld [vmem:[#allocation2 + $0x44] sm:$0xe]  ;;  %v456_v47 = vshll.u32 %v373_v0, 16 }
  0x52   :  { %1561 = vrot.lane.b32.xlu0 %v1517_v43, %s6580_s18  ;;  %v6996_v43 = vrot.slane %v2208_v34, 5  ;;  %v1692_v11 = vshll.u32 %v1633_v17, 16 }
  0x53   :  { %v7008_v20 = vor.u32 %v872_v32, %v869_v31  ;;  %v1282_v32 = vor.u32 %v1281_v29, %v1278_v61  ;;  %v1291_v34 = vrot.slane %v1289_v48, 7  ;;  %v460_v61 = vshrl.u32 %v373_v0, 16 }
  0x54   :  { %v2202_v48 = vshll.u32 %v2181_v8, 16 }
  0x55   :  { %1800 = vrot.lane.b32.xlu1 %v1677_v14, %s6582_s20  ;;  %v331_v14 = vld [vmem:[#allocation2 + $0x10] sm:$0xf]  ;;  %v874_v31 = vsel %vm6767_vm14, %v865_v63, %v7008_v20  ;;  %v6239_v63 = vpack.c.bf16 %v43_v49, %v43_v49  ;;  %v1284_v56 = vrot.slane %v1282_v32, 4  ;;  %v333_v49 = vld [vmem:[#allocation2 + $0x18] sm:$0xf] }
  0x56   :  { %1802 = vrot.lane.b32.xlu0 %v1686_v52, %s6582_s20  ;;  %348 = vst.msk [vmem:[#allocation3 + $0x10] sm:$0xf] %vm293_vm5, %v331_v14  ;;  %v1519_v14 = vrot.slane %v1473_v4, 7  ;;  %350 = vst.msk [vmem:[#allocation3 + $0x18] sm:$0xf] %vm293_vm5, %v333_v49 }
  0x59   :  { %2108 = vrot.lane.b32.xlu1 %v2074_v21, %s6577_s15  ;;  %v864_v21 = vsel %vm6767_vm14, %v855_v45, %v863_v15  ;;  %v1288_v15 = vrot.slane %v1286_v55, 6  ;;  %v2199_v55 = vshrl.u32 %v2181_v8, 16  ;;  %v1687_v8 = vrot.slane %v6954_v24, 4 }
  0x5a   :  { %562 = vrot.lane.b32.xlu0 %v439_v26, %s6577_s15  ;;  %v1100_v26 = vrot.slane %v7016_v19, 6 }
  0x5b   :  { %v7043_v58 = vor.u32 %v1291_v34, %v1288_v15  ;;  %v1522_v15 = vrot.slane %v7045_v41, 7  ;;  %v7056_v34 = vrot.slane %v1698_v10, 7  ;;  %v2201_v0 = vrot.slane %v2199_v55, 4  ;;  %v794_v10 = vld [vmem:[#allocation2 + $0x1c] sm:$0xf] }
  0x5c   :  { %v1101_v45 = vsel %vm6654_vm4, %v1099_v25, %v1100_v26 }
  0x5d   :  { %564 = vrot.lane.b32.xlu1 %v449_v28, %s6577_s15  ;;  %v1689_v28 = vshrl.u32 %v1633_v17, 16  ;;  %v458_v17 = vrot.slane %v456_v47, 5 }
  0x5e   :  { %722 = vrot.lane.b32.xlu0 %v679_v44, %s6579_s17  ;;  %v189_v44 = vrot.slane %v6889_v53, 4  ;;  %v1518_v53 = vrot.slane %v1516_v5, 4  ;;  %v1293_v5 = vsel %vm6795_vm3, %v1284_v56, %v7043_v58 }
  0x5f   :  { %v1691_v29 = vrot.slane %v1689_v28, 7  ;;  %v7064_v28 = vld [vmem:[#allocation2 + $0x20] sm:$0xf] }
  0x60   :  { %v1520_v33 = vsel %vm6810_vm10, %v1518_v53, %v1519_v14  ;;  %v466_v24 = vshll.u32 %v7064_v28, 16 }
  0x61   :  { %724 = vrot.lane.b32.xlu1 %v682_v46, %s6579_s17  ;;  %v190_v46 = vrot.slane %v6238_v18, 6  ;;  %v452_v18 = vrot.slane %v450_v51, 4  ;;  %v2204_v51 = vrot.slane %v2202_v48, 5  ;;  %v1696_v56 = vrot.slane %v1691_v29, 4 }
  0x62   :  { %984 = vrot.lane.b32.xlu0 %v864_v21, %s6583_s21  ;;  %v1283_v21 = vsel %vm6795_vm3, %v1274_v22, %v1282_v32  ;;  %v462_v32 = vrot.slane %v460_v61, 4  ;;  %v334_v22 = vld [vmem:[#allocation2 + $0x1c] sm:$0xf]  ;;  %v877_v48 = vshrl.u32 %v794_v10, 16 }
  0x63   :  { %v191_v25 = vsel %vm6654_vm4, %v189_v44, %v190_v46  ;;  %v192_v4 = vrot.slane %v190_v46, 4  ;;  %351 = vst.msk [vmem:[#allocation3 + $0x1c] sm:$0xf] %vm293_vm5, %v334_v22  ;;  %v1694_v44 = vor.u32 %v1692_v11, %v1691_v29  ;;  %v634_v61 = vld [vmem:[#allocation2 + $0x1c] sm:$0xf] }
  0x64   :  { %302 = vst.msk [vmem:[#allocation2 + $0x24] sm:$0xf] %vm293_vm5, %v191_v25  ;;  %v463_v47 = vor.u32 %v462_v32, %v458_v17  ;;  %v795_v11 = vld [vmem:[#allocation2 + $0x20] sm:$0xf]  ;;  %v7090_v25 = vrot.slane %v466_v24, 5 }
  0x65   :  { %986 = vrot.lane.b32.xlu1 %v874_v31, %s6583_s21  ;;  %v1521_v31 = vrot.slane %v1519_v14, 4  ;;  %v1703_v14 = vor.u32 %v1701_v60, %v7056_v34  ;;  %v1695_v53 = vsel %vm6846_vm12, %v1687_v8, %v1694_v44  ;;  %v887_v60 = vshrl.u32 %v795_v11, 16  ;;  %v7095_v32 = vld [vmem:[#allocation2 + $0x20] sm:$0xf] }
  0x66   :  { %1141 = vrot.lane.b32.xlu0 %v1098_v37, %s6578_s16  ;;  %v7066_v37 = vrot.slane %v6239_v63, 6  ;;  %v683_v8 = vrot.slane %v681_v27, 4  ;;  %v1214_v24 = vld [vmem:[#allocation2 + $0x20] sm:$0xf]  ;;  %v875_v27 = vrot.slane %v7008_v20, 4 }
  0x67   :  { %v1523_v46 = vsel %vm6810_vm10, %v1521_v31, %v1522_v15  ;;  %v1704_v29 = vsel %vm6846_vm12, %v1696_v56, %v1703_v14  ;;  %v684_v31 = vrot.slane %v634_v61, 5  ;;  %v44_v61 = vld [vmem:[%s9946_s0 + $0x58] sm:$0xff]  ;;  %v1309_v20 = vshll.u32 %v1214_v24, 16 }
  0x68   :  { %v194_v63 = vsel %vm6654_vm4, %v192_v4, %v7066_v37  ;;  %v879_v4 = vrot.slane %v877_v48, 5  ;;  %v7123_v48 = vld [vmem:[#allocation2 + $0x20] sm:$0xf] }
  0x69   :  { %1143 = vrot.lane.b32.xlu1 %v1101_v45, %s6578_s16  ;;  %v453_v45 = vor.u32 %v452_v18, %v6983_v12  ;;  %303 = vst.msk [vmem:[#allocation2 + $0x28] sm:$0xf] %vm293_vm5, %v194_v63  ;;  %v2205_v12 = vor.u32 %v2204_v51, %v2201_v0  ;;  %v464_v18 = vrot.slane %v463_v47, 4  ;;  %v890_v0 = vshll.u32 %v795_v11, 16  ;;  %v1213_v51 = vld [vmem:[#allocation2 + $0x1c] sm:$0xf] }
  0x6a   :  { %1403 = vrot.lane.b32.xlu0 %v1283_v21, %s6581_s19  ;;  %v880_v21 = vshll.u32 %v794_v10, 16  ;;  %v686_v44 = vrot.slane %v684_v31, 4  ;;  %v1056_v10 = vld [vmem:[#allocation2 + $0x1c] sm:$0xf]  ;;  %v1296_v14 = vshrl.u32 %v1213_v51, 16  ;;  %v1299_v47 = vshll.u32 %v1213_v51, 16 }
  0x6b   :  { %v454_v55 = vrot.slane %v453_v45, 4  ;;  %v2206_v49 = vrot.slane %v2205_v12, 4  ;;  %v687_v45 = vrot.slane %v7095_v32, 5  ;;  %v892_v56 = vrot.slane %v890_v0, 6 }
  0x6c   :  { %v882_v22 = vrot.slane %v880_v21, 6  ;;  %v685_v6 = vsel %vm6708_vm9, %v683_v8, %v684_v31  ;;  %v1103_v12 = vrot.slane %v1056_v10, 6  ;;  %v1306_v21 = vshrl.u32 %v1214_v24, 16  ;;  %v6481_v31 = vld [vmem:[%s9947_s1 + $0x8] sm:$0xff]   ;;  %v7147_v10 = vld [vmem:[#allocation2 + $0x20] sm:$0xf] }
  0x6d   :  { %1405 = vrot.lane.b32.xlu1 %v1293_v5, %s6581_s19  ;;  %v459_v5 = vsel %vm6749_vm11, %v454_v55, %v458_v17  ;;  %v2211_v17 = vsel %vm6749_vm11, %v2206_v49, %v6996_v43  ;;  %v688_v55 = vsel %vm6708_vm9, %v686_v44, %v687_v45  ;;  %v1301_v49 = vrot.slane %v1299_v47, 7  ;;  %v6482_v44 = vld [vmem:[%s9947_s1] sm:$0xff]  }
  0x6e   :  { %1563 = vrot.lane.b32.xlu0 %v1520_v33, %s6580_s18  ;;  %v469_v33 = vsel %vm6749_vm11, %v464_v18, %v7090_v25  ;;  %v883_v63 = vor.u32 %v882_v22, %v879_v4  ;;  %v1298_v18 = vrot.slane %v1296_v14, 6  ;;  %v1102_v22 = vrot.slane %v1100_v26, 4  ;;  %v7145_v26 = vld [vmem:[#allocation2 + $0x1c] sm:$0xf]  ;;  %v375_v24 = vld [vmem:[#allocation2 + $0x24] sm:$0xf] }
  0x6f   :  { %v1105_v0 = vrot.slane %v1103_v12, 4  ;;  %v1106_v51 = vrot.slane %v7123_v48, 6  ;;  %v1311_v8 = vrot.slane %v1309_v20, 7  ;;  %v470_v14 = vshrl.u32 %v7064_v28, 16 }
  0x70   :  { %v885_v11 = vrot.slane %v883_v63, 4  ;;  %v884_v4 = vsel %vm6767_vm14, %v875_v27, %v883_v63  ;;  %v1302_v19 = vor.u32 %v1301_v49, %v1298_v18  ;;  %v6584_v63 = vmov 0.0   ;;  %v7181_v49 = vld [vmem:[#allocation2 + $0x20] sm:$0xf]  ;;  %v7212_v28 = vld [vmem:[#allocation2 + $0x28] sm:$0xf] }
  0x71   :  { %1565 = vrot.lane.b32.xlu1 %v1523_v46, %s6580_s18  ;;  %v889_v46 = vrot.slane %v887_v60, 5  ;;  %v6240_v60 = vpack.c.bf16 %v44_v61, %v44_v61  ;;  %6396 = vmatprep.subr.bf16.mxu0 %v6584_v63  ;;  %v1294_v47 = vrot.slane %v7043_v58, 4  ;;  %v1104_v61 = vsel %vm6654_vm4, %v1102_v22, %v1103_v12  ;;  %v46_v58 = vld [vmem:[%s9946_s0 + $0x68] sm:$0xff] }
  0x72   :  { %1804 = vrot.lane.b32.xlu0 %v1695_v53, %s6582_s20  ;;  %v45_v53 = vld [vmem:[%s9946_s0 + $0x60] sm:$0xff]  ;;  %6397 = vmatpush3.bf16.msra.mxu0 %v6481_v31  ;;  %v624_v12 = vld [vmem:[#allocation3 + $0x40] sm:$0x1]  ;;  %v1304_v18 = vrot.slane %v1302_v19, 4  ;;  %v1716_v31 = vshrl.u32 %v7147_v10, 16 }
  0x73   :  { %6398 = vmatprep.subr.bf16.mxu0 %v6584_v63  ;;  %6400 = vmatprep.mubr.msk.bf16.mxu0 %vm9965_vm8, %v6584_v63  ;;  %v1303_v22 = vsel %vm6795_vm3, %v1294_v47, %v1302_v19 }
  0x75   :  { %1806 = vrot.lane.b32.xlu1 %v1704_v29, %s6582_s20  ;;  %v7125_v29 = vor.u32 %v892_v56, %v889_v46  ;;  %v195_v56 = vrot.slane %v7066_v37, 4 }
  0x76   :  { %566 = vrot.lane.b32.xlu0 %v459_v5, %s6577_s15  ;;  %v6241_v5 = vpack.c.bf16 %v45_v53, %v45_v53  ;;  %v1107_v53 = vsel %vm6654_vm4, %v1105_v0, %v1106_v51  ;;  %v1524_v0 = vrot.slane %v1522_v15, 4  ;;  %6399 = vmatpush3.bf16.msra.mxu0 %v6482_v44  ;;  %v1528_v15 = vrot.slane %v7181_v49, 7 }
  0x77   :  { %v894_v46 = vsel %vm6767_vm14, %v885_v11, %v7125_v29  ;;  %v1719_v44 = vshll.u32 %v7147_v10, 16 }
  0x78   :  { %v7154_v27 = vrot.slane %v6241_v5, 6  ;;  %v480_v5 = vshrl.u32 %v375_v24, 16 }
  0x79   :  { %568 = vrot.lane.b32.xlu1 %v469_v33, %s6577_s15  ;;  %v1308_v33 = vrot.slane %v1306_v21, 6  ;;  %v1525_v21 = vrot.slane %v7145_v26, 7 }
  0x7a   :  { %2367 = vrot.lane.b32.xlu0 %v2211_v17, %s6579_s17  ;;  %v7137_v17 = vld [vmem:[#allocation2 + $0x1c] sm:$0xf]  ;;  %v201_v10 = vrot.slane %v7154_v27, 4 }
  0x7b   :  { %v1707_v37 = vshrl.u32 %v7137_v17, 16  ;;  %v1527_v41 = vrot.slane %v1525_v21, 4 }
  0x7d   :  { %726 = vrot.lane.b32.xlu1 %v685_v6, %s6579_s17  ;;  %v196_v6 = vrot.slane %v6240_v60, 6  ;;  %v476_v60 = vshll.u32 %v375_v24, 16  ;;  %v1709_v26 = vrot.slane %v1707_v37, 7  ;;  %v472_v24 = vrot.slane %v470_v14, 4  ;;  %v336_v37 = vld [vmem:[#allocation2 + $0x24] sm:$0xf] }
  0x7e   :  { %728 = vrot.lane.b32.xlu0 %v688_v55, %s6579_s17  ;;  %v7174_v55 = vor.u32 %v1311_v8, %v1308_v33  ;;  %v6242_v8 = vpack.c.bf16 %v46_v58, %v46_v58  ;;  %v7206_v14 = vrot.slane %v1716_v31, 7  ;;  %353 = vst.msk [vmem:[#allocation3 + $0x24] sm:$0xf] %vm293_vm5, %v336_v37 }
  0x7f   :  { %v197_v20 = vsel %vm6654_vm4, %v195_v56, %v196_v6  ;;  %v198_v11 = vrot.slane %v196_v6, 4  ;;  %v1710_v56 = vshll.u32 %v7137_v17, 16  ;;  %v335_v6 = vld [vmem:[#allocation2 + $0x20] sm:$0xf]  ;;  %v7208_v47 = vrot.slane %v476_v60, 5 }
  0x80   :  { %304 = vst.msk [vmem:[#allocation2 + $0x2c] sm:$0xf] %vm293_vm5, %v197_v20  ;;  %352 = vst.msk [vmem:[#allocation3 + $0x20] sm:$0xf] %vm293_vm5, %v335_v6  ;;  %v1313_v17 = vsel %vm6795_vm3, %v1304_v18, %v7174_v55  ;;  %v796_v18 = vld [vmem:[#allocation2 + $0x24] sm:$0xf] }
  0x81   :  { %988 = vrot.lane.b32.xlu1 %v884_v4, %s6583_s21  ;;  %v200_v33 = vsel %vm6654_vm4, %v198_v11, %v7154_v27  ;;  %v1712_v20 = vor.u32 %v1710_v56, %v1709_v26  ;;  %v473_v11 = vor.u32 %v472_v24, %v7090_v25  ;;  %v7219_v31 = vrot.slane %v6242_v8, 6 }
  0x82   :  { %990 = vrot.lane.b32.xlu0 %v894_v46, %s6583_s21  ;;  %305 = vst.msk [vmem:[#allocation2 + $0x30] sm:$0xf] %vm293_vm5, %v200_v33  ;;  %v1721_v25 = vor.u32 %v1719_v44, %v7206_v14  ;;  %v897_v33 = vshrl.u32 %v796_v18, 16  ;;  %v900_v8 = vshll.u32 %v796_v18, 16  ;;  %v2440_v44 = vld [vmem:[#allocation2 + $0x44] sm:$0xe] }
  0x83   :  { %v474_v24 = vrot.slane %v473_v11, 4  ;;  %v7262_v11 = vld [vmem:[#allocation2 + $0x28] sm:$0xf] }
  0x84   :  { %v587_v4 = vpop.permute.xlu0 %586  ;;  %v899_v18 = vrot.slane %v897_v33, 5  ;;  %v693_v33 = vrot.slane %v7262_v11, 5 }
  0x85   :  { %1145 = vrot.lane.b32.xlu1 %v1104_v61, %s6578_s16  ;;  %v625_v46 = vsel %vm7170_vm6, %v587_v4, %v624_v12  ;;  %v482_v61 = vrot.slane %v480_v5, 4  ;;  %v1526_v12 = vsel %vm6810_vm10, %v1524_v0, %v1525_v21  ;;  %vm7230_vm6 = vmand %vm9958_vm15, %vm9972_vm7  ;;  %v1714_v21 = vrot.slane %v1709_v26, 4  ;;  %v636_v0 = vld [vmem:[#allocation2 + $0x24] sm:$0xf] }
  0x86   :  { %626 = vst [vmem:[#allocation3 + $0x40] sm:$0x1] %v625_v46  ;;  %1147 = vrot.lane.b32.xlu0 %v1107_v53, %s6578_s16  ;;  %v1705_v53 = vrot.slane %v7056_v34, 4  ;;  %v1529_v34 = vsel %vm6810_vm10, %v1527_v41, %v1528_v15  ;;  %v486_v4 = vshll.u32 %v7212_v28, 16  ;;  %v203_v46 = vsel %vm6654_vm4, %v201_v10, %v7219_v31 }
  0x87   :  { %v7197_v19 = vpop.permute.xlu1 %1165  ;;  %v483_v5 = vor.u32 %v482_v61, %v7208_v47  ;;  %306 = vst.msk [vmem:[#allocation2 + $0x34] sm:$0xf] %vm293_vm5, %v203_v46  ;;  %v1722_v61 = vsel %vm6846_vm12, %v1714_v21, %v1721_v25  ;;  %v479_v27 = vsel %vm6749_vm11, %v474_v24, %v7208_v47  ;;  %v7284_v24 = vld [vmem:[#allocation2 + $0x24] sm:$0xf]  ;;  %vm9970_vm15 = vcmask 93248  }
  0x88   :  { %v747_v58 = vpop.permute.xlu0 %746  ;;  %v1713_v26 = vsel %vm6846_vm12, %v1705_v53, %v1712_v20  ;;  %v7253_v10 = vrot.slane %v486_v4, 5  ;;  %v690_v53 = vrot.slane %v636_v0, 5  ;;  %v6087_v4 = vrot.slane %v2440_v44, 9  ;;  %v1215_v0 = vld [vmem:[#allocation2 + $0x24] sm:$0xf] }
  0x89   :  { %1407 = vrot.lane.b32.xlu1 %v1303_v22, %s6581_s19  ;;  %v484_v37 = vrot.slane %v483_v5, 4 }
  0x8a   :  { %1409 = vrot.lane.b32.xlu0 %v1313_v17, %s6581_s19  ;;  %v797_v17 = vld [vmem:[#allocation2 + $0x28] sm:$0xf] }
  0x8b   :  { %v7221_v60 = vpop.permute.xlu1 %1587  ;;  %v907_v21 = vshrl.u32 %v797_v17, 16  ;;  %v910_v25 = vshll.u32 %v797_v17, 16  ;;  %v489_v32 = vsel %vm6749_vm11, %v484_v37, %v7253_v10  ;;  %v1319_v37 = vshll.u32 %v1215_v0, 16 }
  0x8c   :  { %v7237_v22 = vpop.permute.xlu0 %1427 }
  0x8d   :  { %1567 = vrot.lane.b32.xlu1 %v1526_v12, %s6580_s18  ;;  %v784_v56 = vld [vmem:[#allocation3 + $0x40] sm:$0x1]  ;;  %v909_v44 = vrot.slane %v907_v21, 5  ;;  %v912_v17 = vrot.slane %v910_v25, 6  ;;  %v1321_v42 = vrot.slane %v1319_v37, 7  ;;  %v204_v37 = vrot.slane %v7219_v31, 4 }
  0x8e   :  { %v785_v6 = vsel %vm7230_vm6, %v747_v58, %v784_v56  ;;  %1569 = vrot.lane.b32.xlu0 %v1529_v34, %s6580_s18  ;;  %v7255_v12 = vld [vmem:[#allocation2 + $0x48] sm:$0xf]  ;;  %v689_v58 = vrot.slane %v687_v45, 4  ;;  %v902_v34 = vrot.slane %v900_v8, 6  ;;  %vm9957_vm6 = vcmask 122976  }
  0x8f   :  { %v7248_v41 = vpop.permute.xlu1 %714  ;;  %786 = vst [vmem:[#allocation3 + $0x40] sm:$0x1] %v785_v6  ;;  %v692_v45 = vrot.slane %v690_v53, 4  ;;  %v2476_v8 = vrot.slane %v7255_v12, 5  ;;  %vm7278_vm2 = vmand %vm9957_vm6, %vm9972_vm7  ;;  %v47_v6 = vld [vmem:[%s9946_s0 + $0x70] sm:$0xff]  ;;  %vm9976_vm6 = vcmask 60448  }
  0x90   :  { %v7257_v20 = vpop.permute.xlu0 %1828  ;;  %v691_v56 = vsel %vm6708_vm9, %v689_v58, %v690_v53 }
  0x91   :  { %1808 = vrot.lane.b32.xlu1 %v1713_v26, %s6582_s20  ;;  %v903_v26 = vor.u32 %v902_v34, %v899_v18  ;;  %v694_v58 = vsel %vm6708_vm9, %v692_v45, %v693_v33  ;;  %v2477_v18 = vsel %vm6708_vm9, %v6087_v4, %v2476_v8  ;;  %v895_v34 = vrot.slane %v7125_v29, 4  ;;  %v7306_v45 = vld [vmem:[#allocation2 + $0x28] sm:$0xf] }
  0x92   :  { %1810 = vrot.lane.b32.xlu0 %v1722_v61, %s6582_s20  ;;  %v1316_v61 = vshrl.u32 %v1215_v0, 16  ;;  %v1109_v0 = vrot.slane %v7284_v24, 6  ;;  %v1108_v24 = vrot.slane %v1106_v51, 4 }
  0x93   :  { %v7267_v5 = vpop.permute.xlu1 %1133  ;;  %v905_v25 = vrot.slane %v903_v26, 4 }
  0x94   :  { %v717_v46 = vpop.permute.xlu0 %716  ;;  %v1318_v47 = vrot.slane %v1316_v61, 6  ;;  %v1112_v61 = vrot.slane %v7306_v45, 6 }
  0x95   :  { %570 = vrot.lane.b32.xlu1 %v479_v27, %s6577_s15  ;;  %v1216_v27 = vld [vmem:[#allocation2 + $0x28] sm:$0xf] }
  0x96   :  { %v1046_v1 = vld [vmem:[#allocation3 + $0x40] sm:$0x1]  ;;  %572 = vrot.lane.b32.xlu0 %v489_v32, %s6577_s15  ;;  %v7304_v32 = vor.u32 %v912_v17, %v909_v44  ;;  %v1329_v4 = vshll.u32 %v1216_v27, 16 }
  0x97   :  { %v1009_v52 = vpop.permute.xlu1 %1008  ;;  %v7317_v44 = vld [vmem:[#allocation2 + $0x28] sm:$0xf] }
  0x98   :  { %v1047_v53 = vsel %vm7278_vm2, %v1009_v52, %v1046_v1  ;;  %v557_v21 = vpop.permute.xlu0 %556  ;;  %v1326_v1 = vshrl.u32 %v1216_v27, 16  ;;  %v6243_v52 = vpack.c.bf16 %v47_v6, %v47_v6  ;;  %vm9963_vm2 = vcmask 155776   ;;  %v7315_v6 = vld [vmem:[#allocation2 + $0x24] sm:$0xf] }
  0x99   :  { %1048 = vst [vmem:[#allocation3 + $0x40] sm:$0x1] %v1047_v53  ;;  %730 = vrot.lane.b32.xlu1 %v691_v56, %s6579_s17  ;;  %607 = vst.msk [vmem:[#allocation3 + $0x4] sm:$0xf] %vm9976_vm6, %v557_v21  ;;  %v904_v56 = vsel %vm6767_vm14, %v895_v34, %v903_v26  ;;  %v914_v51 = vsel %vm6767_vm14, %v905_v25, %v7304_v32  ;;  %v1331_v53 = vrot.slane %v1329_v4, 7  ;;  %v1734_v34 = vshrl.u32 %v7317_v44, 16 }
  0x9a   :  { %732 = vrot.lane.b32.xlu0 %v694_v58, %s6579_s17  ;;  %767 = vst.msk [vmem:[#allocation3 + $0x4] sm:$0xf] %vm9970_vm15, %v717_v46  ;;  %v1111_v46 = vrot.slane %v1109_v0, 4  ;;  %v7324_v26 = vrot.slane %v6243_v52, 6  ;;  %vm7328_vm0 = vmand %vm9963_vm2, %vm9972_vm7  ;;  %v1328_v27 = vrot.slane %v1326_v1, 6  ;;  %v490_v25 = vshrl.u32 %v7212_v28, 16 }
  0x9b   :  { %v555_v29 = vpop.permute.xlu1 %554  ;;  %v7336_v58 = vld [vmem:[#allocation2 + $0x24] sm:$0xf]  ;;  %v377_v21 = vld [vmem:[#allocation2 + $0x2c] sm:$0xf]  ;;  %v1314_v1 = vrot.slane %v7174_v55, 4  ;;  %vm9968_vm2 = vcmask 191648  }
  0x9c   :  { %606 = vst.msk [vmem:[#allocation3] sm:$0xf] %vm9976_vm6, %v555_v29  ;;  %v979_v17 = vpop.permute.xlu0 %978  ;;  %v206_v52 = vsel %vm6654_vm4, %v204_v37, %v7324_v26  ;;  %v1113_v28 = vsel %vm6654_vm4, %v1111_v46, %v1112_v61  ;;  %v1531_v55 = vrot.slane %v7336_v58, 7  ;;  %v1728_v48 = vshll.u32 %v7315_v6, 16 }
  0x9d   :  { %766 = vst.msk [vmem:[#allocation3] sm:$0xf] %vm9970_vm15, %v7248_v41  ;;  %2524 = vrot.lane.b32.xlu1 %v2477_v18, %s6583_s21  ;;  %v1322_v41 = vor.u32 %v1321_v42, %v1318_v47  ;;  %v1725_v18 = vshrl.u32 %v7315_v6, 16  ;;  %v1110_v42 = vsel %vm6654_vm4, %v1108_v24, %v1109_v0  ;;  %v496_v24 = vshll.u32 %v377_v21, 16 }
  0x9e   :  { %1029 = vst.msk [vmem:[#allocation3 + $0x4] sm:$0xf] %vm9977_vm1, %v979_v17  ;;  %992 = vrot.lane.b32.xlu0 %v904_v56, %s6583_s21  ;;  %v7362_v56 = vor.u32 %v1331_v53, %v1328_v27  ;;  %v1737_v46 = vshll.u32 %v7317_v44, 16  ;;  %v1530_v53 = vrot.slane %v1528_v15, 4  ;;  %v492_v58 = vrot.slane %v490_v25, 4 }
  0x9f   :  { %v977_v31 = vpop.permute.xlu1 %976  ;;  %307 = vst.msk [vmem:[#allocation2 + $0x38] sm:$0xf] %vm293_vm5, %v206_v52  ;;  %v1324_v0 = vrot.slane %v1322_v41, 4  ;;  %v1727_v37 = vrot.slane %v1725_v18, 7  ;;  %v1323_v27 = vsel %vm6795_vm3, %v1314_v1, %v1322_v41  ;;  %v1533_v6 = vrot.slane %v1531_v55, 4 }
  0xa0   :  { %v1203_v29 = vld [vmem:[#allocation3 + $0x40] sm:$0x1]  ;;  %1028 = vst.msk [vmem:[#allocation3] sm:$0xf] %vm9977_vm1, %v977_v31  ;;  %v1136_v4 = vpop.permute.xlu0 %1135  ;;  %v7383_v49 = vrot.slane %v496_v24, 5  ;;  %v493_v24 = vor.u32 %v492_v58, %v7253_v10 }
  0xa1   :  { %v1204_v47 = vsel %vm7328_vm0, %v7197_v19, %v1203_v29  ;;  %1185 = vst.msk [vmem:[#allocation3] sm:$0xf] %vm9964_vm13, %v7267_v5  ;;  %994 = vrot.lane.b32.xlu1 %v914_v51, %s6583_s21  ;;  %1186 = vst.msk [vmem:[#allocation3 + $0x4] sm:$0xf] %vm9964_vm13, %v1136_v4  ;;  %v7364_v19 = vld [vmem:[#allocation2 + $0x28] sm:$0xf]  ;;  %v1333_v44 = vsel %vm6795_vm3, %v1324_v0, %v7362_v56  ;;  %v1730_v1 = vor.u32 %v1728_v48, %v1727_v37 }
  0xa2   :  { %1205 = vst [vmem:[#allocation3 + $0x40] sm:$0x1] %v1204_v47  ;;  %v500_v5 = vshrl.u32 %v377_v21, 16  ;;  %1149 = vrot.lane.b32.xlu0 %v1110_v42, %s6578_s16  ;;  %v7368_v51 = vrot.slane %v1734_v34, 7  ;;  %vm9967_vm0 = vcmask 188576   ;;  %vm1606_vm13 = vcmask 224448  }
  0xa3   :  { %v1396_v17 = vpop.permute.xlu1 %1395  ;;  %v337_v31 = vld [vmem:[#allocation2 + $0x28] sm:$0xf]  ;;  %v1534_v18 = vrot.slane %v7364_v19, 7  ;;  %v2597_v34 = vld [vmem:[#allocation2 + $0x44] sm:$0xc]  ;;  %vm7387_vm8 = vmand %vm9967_vm0, %vm9972_vm7  ;;  %v1723_v42 = vrot.slane %v7206_v14, 4  ;;  %v1532_v0 = vsel %vm6810_vm10, %v1530_v53, %v1531_v55 }
  0xa4   :  { %1447 = vst.msk [vmem:[#allocation3] sm:$0xf] %vm9968_vm2, %v1396_v17  ;;  %v1398_v21 = vpop.permute.xlu0 %1397  ;;  %v502_v15 = vrot.slane %v500_v5, 4  ;;  %v798_v41 = vld [vmem:[#allocation2 + $0x2c] sm:$0xf]  ;;  %v1732_v47 = vrot.slane %v1727_v37, 4  ;;  %v1739_v4 = vor.u32 %v1737_v46, %v7368_v51 }
  0xa5   :  { %1151 = vrot.lane.b32.xlu1 %v1113_v28, %s6578_s16  ;;  %354 = vst.msk [vmem:[#allocation3 + $0x28] sm:$0xf] %vm293_vm5, %v337_v31  ;;  %v338_v52 = vld [vmem:[#allocation2 + $0x2c] sm:$0xf]  ;;  %v7394_v28 = vld [vmem:[#allocation2 + $0x30] sm:$0xf]  ;;  %v1535_v10 = vsel %vm6810_vm10, %v1533_v6, %v1534_v18 }
  0xa6   :  { %1448 = vst.msk [vmem:[#allocation3 + $0x4] sm:$0xf] %vm9968_vm2, %v1398_v21  ;;  %1411 = vrot.lane.b32.xlu0 %v1323_v27, %s6581_s19  ;;  %v2598_v5 = vld [vmem:[#allocation2 + $0x48] sm:$0xf]  ;;  %v2615_v17 = vshrl.u32 %v2597_v34, 16  ;;  %vm9979_vm0 = vcmask 257248   ;;  %v503_v55 = vor.u32 %v502_v15, %v7383_v49 }
  0xa7   :  { %v1556_v25 = vpop.permute.xlu1 %1555  ;;  %355 = vst.msk [vmem:[#allocation3 + $0x2c] sm:$0xf] %vm293_vm5, %v338_v52  ;;  %v917_v14 = vshrl.u32 %v798_v41, 16  ;;  %v920_v37 = vshll.u32 %v798_v41, 16  ;;  %v2618_v48 = vshll.u32 %v2597_v34, 16  ;;  %v506_v53 = vshll.u32 %v7394_v28, 16 }
  0xa8   :  { %1607 = vst.msk [vmem:[#allocation3] sm:$0xf] %vm1606_vm13, %v1556_v25  ;;  %v1558_v31 = vpop.permute.xlu0 %1557  ;;  %v638_v58 = vld [vmem:[#allocation2 + $0x2c] sm:$0xf]  ;;  %vm9969_vm2 = vcmask 221376   ;;  %v1740_v34 = vsel %vm6846_vm12, %v1732_v47, %v1739_v4  ;;  %v494_v6 = vrot.slane %v493_v24, 4 }
  0xa9   :  { %v1465_v27 = vld [vmem:[#allocation3 + $0x40] sm:$0x1]  ;;  %1413 = vrot.lane.b32.xlu1 %v1333_v44, %s6581_s19  ;;  %1608 = vst.msk [vmem:[#allocation3 + $0x4] sm:$0xf] %vm1606_vm13, %v1558_v31  ;;  %v799_v44 = vld [vmem:[#allocation2 + $0x30] sm:$0xf] }
  0xaa   :  { %v1466_v46 = vsel %vm7387_vm8, %v7237_v22, %v1465_v27  ;;  %1571 = vrot.lane.b32.xlu0 %v1532_v0, %s6580_s18  ;;  %v1731_v22 = vsel %vm6846_vm12, %v1723_v42, %v1730_v1  ;;  %v2617_v41 = vrot.slane %v2615_v17, 5  ;;  %v2624_v15 = vshrl.u32 %v2598_v5, 16  ;;  %v7422_v47 = vld [vmem:[#allocation2 + $0x30] sm:$0xf]  ;;  %vm7429_vm8 = vmand %vm9969_vm2, %vm9972_vm7  ;;  %v7471_v17 = vld [vmem:[#allocation2 + $0x44] sm:$0xf] }
  0xab   :  { %1467 = vst [vmem:[#allocation3 + $0x40] sm:$0x1] %v1466_v46  ;;  %v1797_v21 = vpop.permute.xlu1 %1796  ;;  %v2627_v52 = vshll.u32 %v2598_v5, 16  ;;  %v696_v25 = vrot.slane %v638_v58, 5  ;;  %v919_v27 = vrot.slane %v917_v14, 5  ;;  %v922_v0 = vrot.slane %v920_v37, 6 }
  0xac   :  { %1848 = vst.msk [vmem:[#allocation3] sm:$0xf] %vm9979_vm0, %v1797_v21  ;;  %v1799_v29 = vpop.permute.xlu0 %1798  ;;  %v2620_v31 = vrot.slane %v2618_v48, 6  ;;  %v504_v42 = vrot.slane %v503_v55, 4  ;;  %v7420_v1 = vrot.slane %v506_v53, 5  ;;  %v927_v4 = vshrl.u32 %v799_v44, 16 }
  0xad   :  { %1573 = vrot.lane.b32.xlu1 %v1535_v10, %s6580_s18  ;;  %1849 = vst.msk [vmem:[#allocation3 + $0x4] sm:$0xf] %vm9979_vm0, %v1799_v29  ;;  %v930_v46 = vshll.u32 %v799_v44, 16  ;;  %v695_v5 = vrot.slane %v693_v33, 4  ;;  %v499_v14 = vsel %vm6749_vm11, %v494_v6, %v7383_v49  ;;  %v2626_v37 = vrot.slane %v2624_v15, 5 }
  0xae   :  { %1812 = vrot.lane.b32.xlu0 %v1731_v22, %s6582_s20  ;;  %v2629_v48 = vrot.slane %v2627_v52, 6  ;;  %v1217_v10 = vld [vmem:[#allocation2 + $0x2c] sm:$0xf]  ;;  %v207_v55 = vrot.slane %v7324_v26, 4  ;;  %v698_v11 = vrot.slane %v696_v25, 4  ;;  %v699_v33 = vrot.slane %v7422_v47, 5 }
  0xaf   :  { %v559_v24 = vpop.permute.xlu1 %558  ;;  %v923_v58 = vor.u32 %v922_v0, %v919_v27  ;;  %v2621_v21 = vor.u32 %v2620_v31, %v2617_v41  ;;  %v51_v22 = vld [vmem:[%s9946_s0 + $0x90] sm:$0xff]  ;;  %v509_v49 = vsel %vm6749_vm11, %v504_v42, %v7420_v1  ;;  %v929_v26 = vrot.slane %v927_v4, 5  ;;  %v56_v47 = vld [vmem:[%s9946_s0 + $0xb8] sm:$0xff] }
  0xb0   :  { %608 = vst.msk [vmem:[#allocation3 + $0x8] sm:$0xf] %vm9976_vm6, %v559_v24  ;;  %v561_v53 = vpop.permute.xlu0 %560  ;;  %v932_v6 = vrot.slane %v930_v46, 6  ;;  %v915_v52 = vrot.slane %v7304_v32, 4  ;;  %v1336_v29 = vshrl.u32 %v1217_v10, 16  ;;  %v697_v27 = vsel %vm6708_vm9, %v695_v5, %v696_v25 }
  0xb1   :  { %1814 = vrot.lane.b32.xlu1 %v1740_v34, %s6582_s20  ;;  %609 = vst.msk [vmem:[#allocation3 + $0xc] sm:$0xf] %vm9976_vm6, %v561_v53  ;;  %v209_v34 = vsel %vm6654_vm4, %v207_v55, %v6649_v9  ;;  %vm9971_vm2 = vcmask 261120   ;;  %v7459_v9 = vld [vmem:[#allocation2 + $0x2c] sm:$0xf]  ;;  %v1339_v0 = vshll.u32 %v1217_v10, 16  ;;  %v6247_v31 = vpack.c.bf16 %v51_v22, %v51_v22 }
  0xb2   :  { %v1625_v44 = vld [vmem:[#allocation3 + $0x40] sm:$0x1]  ;;  %574 = vrot.lane.b32.xlu0 %v499_v14, %s6577_s15  ;;  %308 = vst.msk [vmem:[#allocation2 + $0x3c] sm:$0xf] %vm293_vm5, %v209_v34  ;;  %v7462_v32 = vor.u32 %v2629_v48, %v2626_v37  ;;  %v1218_v4 = vld [vmem:[#allocation2 + $0x30] sm:$0xf]  ;;  %v700_v25 = vsel %vm6708_vm9, %v698_v11, %v699_v33  ;;  %v7469_v24 = vor.u32 %v932_v6, %v929_v26 }
  0xb3   :  { %v1626_v41 = vsel %vm7429_vm8, %v7221_v60, %v1625_v44  ;;  %v719_v15 = vpop.permute.xlu1 %718  ;;  %vm9973_vm8 = vcmask 254176   ;;  %v925_v46 = vrot.slane %v923_v58, 4  ;;  %v2622_v5 = vrot.slane %v2621_v21, 4  ;;  %v7480_v53 = vld [vmem:[#allocation2 + $0x30] sm:$0xf] }
  0xb4   :  { %1627 = vst [vmem:[#allocation3 + $0x40] sm:$0x1] %v1626_v41  ;;  %768 = vst.msk [vmem:[#allocation3 + $0x8] sm:$0xf] %vm9970_vm15, %v719_v15  ;;  %v721_v60 = vpop.permute.xlu0 %720  ;;  %v6483_v42 = vld [vmem:[#allocation3] sm:$0xff]   ;;  %v924_v37 = vsel %vm6767_vm14, %v915_v52, %v923_v58  ;;  %v1115_v48 = vrot.slane %v7459_v9, 6 }
  0xb5   :  { %576 = vrot.lane.b32.xlu1 %v509_v49, %s6577_s15  ;;  %769 = vst.msk [vmem:[#allocation3 + $0xc] sm:$0xf] %vm9970_vm15, %v721_v60  ;;  %6401 = vmatmul.mubr.msk.bf16.vlgmr.msra.gmra.mxu0 %vm9971_vm2, %v6483_v42  ;;  %v1338_v10 = vrot.slane %v1336_v29, 6  ;;  %v215_v55 = vrot.slane %v6912_v30, 4  ;;  %v1341_v11 = vrot.slane %v1339_v0, 7  ;;  %v1346_v21 = vshrl.u32 %v1218_v4, 16  ;;  %vm7488_vm2 = vmand %vm9973_vm8, %vm9972_vm7 }
  0xb6   :  { %734 = vrot.lane.b32.xlu0 %v697_v27, %s6579_s17  ;;  %v1349_v22 = vshll.u32 %v1218_v4, 16  ;;  %vm10010_vm15 = vmmov 0   ;;  %v7484_v44 = vrot.slane %v6247_v31, 6  ;;  %v1888_v30 = vshrl.u32 %v7471_v17, 16  ;;  %v7500_v34 = vld [vmem:[#allocation2 + $0x2c] sm:$0xf] }
  0xb7   :  { %v981_v14 = vpop.permute.xlu1 %980  ;;  %6404 = vmatprep.mubr.msk.bf16.mxu0 %vm10010_vm15, %v6584_v63  ;;  %v934_v26 = vsel %vm6767_vm14, %v925_v46, %v7469_v24  ;;  %v1114_v6 = vrot.slane %v1112_v61, 4  ;;  %v2631_v29 = vsel %vm6767_vm14, %v2622_v5, %v7462_v32  ;;  %v1117_v27 = vrot.slane %v1115_v48, 4  ;;  %v7510_v0 = vld [vmem:[#allocation2 + $0x30] sm:$0xf]  ;;  %v1479_v42 = vld [vmem:[#allocation2 + $0x2c] sm:$0xf] }
  0xb8   :  { %1030 = vst.msk [vmem:[#allocation3 + $0x8] sm:$0xf] %vm9977_vm1, %v981_v14  ;;  %v983_v49 = vpop.permute.xlu0 %982  ;;  %v217_v41 = vsel %vm6654_vm4, %v215_v55, %v7484_v44  ;;  %v1118_v9 = vrot.slane %v7480_v53, 6  ;;  %vm10013_vm7 = vcmask 158848   ;;  %v1342_v61 = vor.u32 %v1341_v11, %v1338_v10  ;;  %v379_v14 = vld [vmem:[#allocation2 + $0x34] sm:$0xf] }
  0xb9   :  { %736 = vrot.lane.b32.xlu1 %v700_v25, %s6579_s17  ;;  %1031 = vst.msk [vmem:[#allocation3 + $0xc] sm:$0xf] %vm9977_vm1, %v983_v49  ;;  %v1348_v31 = vrot.slane %v1346_v21, 6  ;;  %v1351_v60 = vrot.slane %v1349_v22, 7  ;;  %v7518_v25 = vrot.slane %v1888_v30, 7  ;;  %v1891_v46 = vshll.u32 %v7471_v17, 16 }
  0xba   :  { %996 = vrot.lane.b32.xlu0 %v924_v37, %s6583_s21  ;;  %312 = vst.msk [vmem:[#allocation2 + $0x4c] sm:$0xf] %vm293_vm5, %v217_v41  ;;  %v1743_v5 = vshrl.u32 %v7500_v34, 16  ;;  %v510_v37 = vshrl.u32 %v7394_v28, 16  ;;  %v1334_v10 = vrot.slane %v7362_v56, 4  ;;  %v1752_v55 = vshrl.u32 %v7510_v0, 16 }
  0xbb   :  { %v1866_v15 = vld [vmem:[#allocation3 + $0x40] sm:$0x1]  ;;  %v1138_v52 = vpop.permute.xlu1 %1137  ;;  %v1119_v17 = vsel %vm6654_vm4, %v1117_v27, %v1118_v9  ;;  %v1537_v21 = vrot.slane %v1479_v42, 7  ;;  %vm10015_vm8 = vcmask 191648   ;;  %v1344_v28 = vrot.slane %v1342_v61, 4 }
  0xbc   :  { %v1867_v45 = vsel %vm7488_vm2, %v7257_v20, %v1866_v15  ;;  %1187 = vst.msk [vmem:[#allocation3 + $0x8] sm:$0xf] %vm10013_vm7, %v1138_v52  ;;  %v1140_v4 = vpop.permute.xlu0 %1139  ;;  %vm10014_vm2 = vmmov %vm10013_vm7  ;;  %v1116_v20 = vsel %vm6654_vm4, %v1114_v6, %v1115_v48  ;;  %vm9978_vm7 = vsmask.f32 7938  ;;  %v7534_v22 = vor.u32 %v1351_v60, %v1348_v31  ;;  %v7536_v48 = vld [vmem:[#allocation2 + $0x30] sm:$0xf] }
  0xbd   :  { %1868 = vst [vmem:[#allocation3 + $0x40] sm:$0x1] %v1867_v45  ;;  %998 = vrot.lane.b32.xlu1 %v934_v26, %s6583_s21  ;;  %1188 = vst.msk [vmem:[#allocation3 + $0xc] sm:$0xf] %vm10014_vm2, %v1140_v4  ;;  %v516_v56 = vshll.u32 %v379_v14, 16  ;;  %v520_v58 = vshrl.u32 %v379_v14, 16  ;;  %v1893_v26 = vor.u32 %v1891_v46, %v7518_v25  ;;  %v1343_v15 = vsel %vm6795_vm3, %v1334_v10, %v1342_v61 }
  0xbe   :  { %2783 = vrot.lane.b32.xlu0 %v2631_v29, %s6578_s16  ;;  %v1536_v30 = vrot.slane %v1534_v18, 4  ;;  %v1745_v6 = vrot.slane %v1743_v5, 7  ;;  %v1746_v41 = vshll.u32 %v7500_v34, 16  ;;  %vm10016_vm2 = vmmov %vm10015_vm8  ;;  %v7552_v29 = vrot.slane %v1752_v55, 7  ;;  %v800_v45 = vld [vmem:[#allocation2 + $0x34] sm:$0xf] }
  0xbf   :  { %v1400_v11 = vpop.permute.xlu1 %1399  ;;  %v1755_v19 = vshll.u32 %v7510_v0, 16  ;;  %v512_v18 = vrot.slane %v510_v37, 4  ;;  %v1540_v34 = vrot.slane %v7536_v48, 7  ;;  %v1353_v61 = vsel %vm6795_vm3, %v1344_v28, %v7534_v22  ;;  %v52_v0 = vld [vmem:[%s9946_s0 + $0x98] sm:$0xff]  ;;  %v53_v28 = vld [vmem:[%s9946_s0 + $0xa0] sm:$0xff] }
  0xc0   :  { %1449 = vst.msk [vmem:[#allocation3 + $0x8] sm:$0xf] %vm10015_vm8, %v1400_v11  ;;  %v1402_v49 = vpop.permute.xlu0 %1401  ;;  %vm7548_vm8 = vmand %vm293_vm5, %vm9978_vm7  ;;  %v1539_v31 = vrot.slane %v1537_v21, 4  ;;  %v7561_v42 = vrot.slane %v516_v56, 5  ;;  %v522_v4 = vrot.slane %v520_v58, 4  ;;  %v1741_v14 = vrot.slane %v7368_v51, 4 }
  0xc1   :  { %1153 = vrot.lane.b32.xlu1 %v1116_v20, %s6578_s16  ;;  %1450 = vst.msk [vmem:[#allocation3 + $0xc] sm:$0xf] %vm10016_vm2, %v1402_v49  ;;  %v1748_v37 = vor.u32 %v1746_v41, %v1745_v6  ;;  %v7570_v20 = vld [vmem:[#allocation2 + $0x38] sm:$0xf]  ;;  %v1538_v10 = vsel %vm6810_vm10, %v1536_v30, %v1537_v21  ;;  %v1750_v55 = vrot.slane %v1745_v6, 4  ;;  %v1757_v11 = vor.u32 %v1755_v19, %v7552_v29  ;;  %vm7607_vm2 = vmand %vm9976_vm6, %vm9978_vm7 }
  0xc2   :  { %1155 = vrot.lane.b32.xlu0 %v1119_v17, %s6578_s16  ;;  %v513_v17 = vor.u32 %v512_v18, %v7420_v1  ;;  %v7581_v56 = vld [vmem:[#allocation2 + $0x34] sm:$0xf]  ;;  %v937_v58 = vshrl.u32 %v800_v45, 16  ;;  %v940_v49 = vshll.u32 %v800_v45, 16  ;;  %v339_v41 = vld [vmem:[#allocation2 + $0x30] sm:$0xf]  ;;  %v1541_v1 = vsel %vm6810_vm10, %v1539_v31, %v1540_v34 }
  0xc3   :  { %v1560_v27 = vpop.permute.xlu1 %1559  ;;  %v523_v21 = vor.u32 %v522_v4, %v7561_v42  ;;  %v526_v30 = vshll.u32 %v7570_v20, 16  ;;  %356 = vst.msk [vmem:[#allocation3 + $0x30] sm:$0xf] %vm293_vm5, %v339_v41  ;;  %v340_v6 = vld [vmem:[#allocation2 + $0x34] sm:$0xf]  ;;  %v1749_v52 = vsel %vm6846_vm12, %v1741_v14, %v1748_v37  ;;  %v1758_v18 = vsel %vm6846_vm12, %v1750_v55, %v1757_v11 }
  0xc4   :  { %1609 = vst.msk [vmem:[#allocation3 + $0x8] sm:$0xf] %vm1606_vm13, %v1560_v27  ;;  %v2054_v60 = vld [vmem:[#allocation3 + $0x40] sm:$0xf]  ;;  %v1562_v46 = vpop.permute.xlu0 %1561  ;;  %v801_v19 = vld [vmem:[#allocation2 + $0x38] sm:$0xf]  ;;  %v6249_v31 = vpack.c.bf16 %v53_v28, %v53_v28 }
  0xc5   :  { %1415 = vrot.lane.b32.xlu1 %v1343_v15, %s6581_s19  ;;  %v2055_v5 = vsel %vm7548_vm8, %v1893_v26, %v2054_v60  ;;  %1610 = vst.msk [vmem:[#allocation3 + $0xc] sm:$0xf] %vm1606_vm13, %v1562_v46  ;;  %v6248_v26 = vpack.c.bf16 %v52_v0, %v52_v0  ;;  %v514_v27 = vrot.slane %v513_v17, 4  ;;  %v702_v45 = vrot.slane %v7581_v56, 5  ;;  %v54_v60 = vld [vmem:[%s9946_s0 + $0xa8] sm:$0xff] }
  0xc6   :  { %2056 = vst [vmem:[#allocation3 + $0x40] sm:$0xf] %v2055_v5  ;;  %1417 = vrot.lane.b32.xlu0 %v1353_v61, %s6581_s19  ;;  %357 = vst.msk [vmem:[#allocation3 + $0x34] sm:$0xf] %vm293_vm5, %v340_v6  ;;  %v7599_v61 = vld [vmem:[#allocation2 + $0x34] sm:$0xf] }
  0xc7   :  { %v1801_v51 = vpop.permute.xlu1 %1800  ;;  %v939_v46 = vrot.slane %v937_v58, 5  ;;  %v942_v5 = vrot.slane %v940_v49, 6  ;;  %v218_v14 = vrot.slane %v7484_v44, 4  ;;  %v219_v37 = vrot.slane %v6248_v26, 6  ;;  %v7617_v17 = vld [vmem:[#allocation2 + $0x38] sm:$0xf] }
  0xc8   :  { %1850 = vst.msk [vmem:[#allocation3 + $0x8] sm:$0xf] %vm9979_vm0, %v1801_v51  ;;  %v1803_v15 = vpop.permute.xlu0 %1802  ;;  %v524_v55 = vrot.slane %v523_v21, 4  ;;  %v7615_v11 = vrot.slane %v526_v30, 5  ;;  %v947_v28 = vshrl.u32 %v801_v19, 16  ;;  %v950_v51 = vshll.u32 %v801_v19, 16 }
  0xc9   :  { %1575 = vrot.lane.b32.xlu1 %v1538_v10, %s6580_s18  ;;  %1851 = vst.msk [vmem:[#allocation3 + $0xc] sm:$0xf] %vm9979_vm0, %v1803_v15  ;;  %v55_v10 = vld [vmem:[%s9946_s0 + $0xb0] sm:$0xff]  ;;  %v701_v58 = vrot.slane %v699_v33, 4  ;;  %v220_v44 = vsel %vm6654_vm4, %v218_v14, %v219_v37  ;;  %v221_v49 = vrot.slane %v219_v37, 4  ;;  %v6250_v26 = vpack.c.bf16 %v54_v60, %v54_v60 }
  0xca   :  { %1577 = vrot.lane.b32.xlu0 %v1541_v1, %s6580_s18  ;;  %v519_v21 = vsel %vm6749_vm11, %v514_v27, %v7561_v42  ;;  %313 = vst.msk [vmem:[#allocation2 + $0x50] sm:$0xf] %vm293_vm5, %v220_v44  ;;  %v222_v30 = vrot.slane %v6249_v31, 6  ;;  %v6251_v6 = vpack.c.bf16 %v55_v10, %v55_v10  ;;  %v704_v15 = vrot.slane %v702_v45, 4  ;;  %v1062_v4 = vld [vmem:[#allocation2 + $0x34] sm:$0xf] }
  0xcb   :  { %v2109_v0 = vpop.permute.xlu1 %2108  ;;  %v943_v19 = vor.u32 %v942_v5, %v939_v46  ;;  %v1356_v60 = vshrl.u32 %v7599_v61, 16  ;;  %v529_v42 = vsel %vm6749_vm11, %v524_v55, %v7615_v11  ;;  %v949_v27 = vrot.slane %v947_v28, 5 }
  0xcc   :  { %v563_v41 = vpop.permute.xlu0 %562  ;;  %v952_v31 = vrot.slane %v950_v51, 6  ;;  %v1359_v46 = vshll.u32 %v7599_v61, 16  ;;  %v224_v5 = vrot.slane %v222_v30, 4  ;;  %v225_v37 = vrot.slane %v6250_v26, 6  ;;  %v1220_v61 = vld [vmem:[#allocation2 + $0x38] sm:$0xf] }
  0xcd   :  { %v2161_v56 = vld [vmem:[#allocation3 + $0x40] sm:$0xf]  ;;  %1816 = vrot.lane.b32.xlu1 %v1749_v52, %s6582_s20  ;;  %610 = vst.msk [vmem:[#allocation3 + $0x10] sm:$0xf] %vm9976_vm6, %v563_v41  ;;  %v705_v52 = vrot.slane %v7617_v17, 5  ;;  %v6252_v10 = vpack.c.bf16 %v56_v47, %v56_v47  ;;  %vm10021_vm8 = vcmask 93248   ;;  %v703_v55 = vsel %vm6708_vm9, %v701_v58, %v702_v45 }
  0xce   :  { %v2162_v1 = vsel %vm7607_vm2, %v2109_v0, %v2161_v56  ;;  %1818 = vrot.lane.b32.xlu0 %v1758_v18, %s6582_s20  ;;  %v223_v0 = vsel %vm6654_vm4, %v221_v49, %v222_v30  ;;  %v935_v28 = vrot.slane %v7469_v24, 4  ;;  %v228_v51 = vrot.slane %v6251_v6, 6  ;;  %v7669_v6 = vld [vmem:[#allocation2 + $0x38] sm:$0xf] }
  0xcf   :  { %2163 = vst [vmem:[#allocation3 + $0x40] sm:$0xf] %v2162_v1  ;;  %v565_v33 = vpop.permute.xlu1 %564  ;;  %314 = vst.msk [vmem:[#allocation2 + $0x54] sm:$0xf] %vm293_vm5, %v223_v0  ;;  %vm10022_vm2 = vcmask 261120   ;;  %v1121_v41 = vrot.slane %v1062_v4, 6  ;;  %v226_v44 = vsel %vm6654_vm4, %v224_v5, %v225_v37  ;;  %v706_v24 = vsel %vm6708_vm9, %v704_v15, %v705_v52 }
  0xd0   :  { %611 = vst.msk [vmem:[#allocation3 + $0x14] sm:$0xf] %vm9976_vm6, %v565_v33  ;;  %v723_v18 = vpop.permute.xlu0 %722  ;;  %v6484_v14 = vld [vmem:[#allocation3 + $0x8] sm:$0xff]   ;;  %v227_v49 = vrot.slane %v225_v37, 4  ;;  %v7654_v26 = vrot.slane %v6252_v10, 6  ;;  %v945_v45 = vrot.slane %v943_v19, 4  ;;  %v7661_v58 = vor.u32 %v952_v31, %v949_v27 }
  0xd1   :  { %578 = vrot.lane.b32.xlu1 %v519_v21, %s6577_s15  ;;  %770 = vst.msk [vmem:[#allocation3 + $0x10] sm:$0xf] %vm10021_vm8, %v723_v18  ;;  %6405 = vmatmul.mubr.msk.bf16.gmra.mxu0 %vm10022_vm2, %v6484_v14  ;;  %v230_v1 = vrot.slane %v228_v51, 4  ;;  %v1120_v30 = vrot.slane %v1118_v9, 4  ;;  %v1358_v47 = vrot.slane %v1356_v60, 6  ;;  %v1361_v33 = vrot.slane %v1359_v46, 7 }
  0xd2   :  { %580 = vrot.lane.b32.xlu0 %v529_v42, %s6577_s15  ;;  %6408 = vmatprep.mubr.msk.bf16.mxu0 %vm10010_vm15, %v6584_v63  ;;  %315 = vst.msk [vmem:[#allocation2 + $0x58] sm:$0xf] %vm293_vm5, %v226_v44  ;;  %v229_v15 = vsel %vm6654_vm4, %v227_v49, %v228_v51  ;;  %v944_v42 = vsel %vm6767_vm14, %v935_v28, %v943_v19  ;;  %v2856_v27 = vld [vmem:[#allocation2 + $0x44] sm:$0xc]  ;;  %v7676_v31 = vld [vmem:[#allocation2 + $0x48] sm:$0xf] }
  0xd3   :  { %v725_v56 = vpop.permute.xlu1 %724  ;;  %v1366_v4 = vshrl.u32 %v1220_v61, 16  ;;  %v1369_v0 = vshll.u32 %v1220_v61, 16  ;;  %316 = vst.msk [vmem:[#allocation2 + $0x5c] sm:$0xf] %vm293_vm5, %v229_v15  ;;  %v232_v53 = vsel %vm6654_vm4, %v230_v1, %v7654_v26  ;;  %v954_v19 = vsel %vm6767_vm14, %v945_v45, %v7661_v58  ;;  %v1641_v10 = vld [vmem:[#allocation2 + $0x34] sm:$0xf] }
  0xd4   :  { %771 = vst.msk [vmem:[#allocation3 + $0x14] sm:$0xf] %vm10021_vm8, %v725_v56  ;;  %v985_v21 = vpop.permute.xlu0 %984  ;;  %v1123_v60 = vrot.slane %v1121_v41, 4  ;;  %v1124_v18 = vrot.slane %v7669_v6, 6  ;;  %v6088_v46 = vrot.slane %v2856_v27, 10  ;;  %v2892_v5 = vrot.slane %v7676_v31, 6 }
  0xd5   :  { %738 = vrot.lane.b32.xlu1 %v703_v55, %s6579_s17  ;;  %1032 = vst.msk [vmem:[#allocation3 + $0x10] sm:$0xf] %vm9977_vm1, %v985_v21  ;;  %v1362_v37 = vor.u32 %v1361_v33, %v1358_v47  ;;  %vm10023_vm2 = vcmask 158848   ;;  %v1122_v55 = vsel %vm6654_vm4, %v1120_v30, %v1121_v41  ;;  %v1368_v28 = vrot.slane %v1366_v4, 6  ;;  %v1481_v56 = vld [vmem:[#allocation2 + $0x34] sm:$0xf] }
  0xd6   :  { %740 = vrot.lane.b32.xlu0 %v706_v24, %s6579_s17  ;;  %317 = vst.msk [vmem:[#allocation2 + $0x60] sm:$0xf] %vm293_vm5, %v232_v53  ;;  %v1371_v51 = vrot.slane %v1369_v0, 7  ;;  %v1642_v44 = vld [vmem:[#allocation2 + $0x38] sm:$0xf]  ;;  %v530_v24 = vshrl.u32 %v7570_v20, 16  ;;  %vm10024_vm8 = vmmov %vm10023_vm2  ;;  %v1125_v45 = vsel %vm6654_vm4, %v1123_v60, %v1124_v18  ;;  %v2893_v30 = vsel %vm6654_vm4, %v6088_v46, %v2892_v5 }
  0xd7   :  { %v987_v9 = vpop.permute.xlu1 %986  ;;  %v381_v49 = vld [vmem:[#allocation2 + $0x3c] sm:$0xf]  ;;  %v1354_v1 = vrot.slane %v7534_v22, 4  ;;  %v1761_v41 = vshrl.u32 %v1641_v10, 16  ;;  %v1364_v47 = vrot.slane %v1362_v37, 4  ;;  %v1543_v20 = vrot.slane %v1481_v56, 7 }
  0xd8   :  { %1033 = vst.msk [vmem:[#allocation3 + $0x14] sm:$0xf] %vm9977_vm1, %v987_v9  ;;  %v1142_v14 = vpop.permute.xlu0 %1141  ;;  %v7708_v33 = vor.u32 %v1371_v51, %v1368_v28  ;;  %v7710_v15 = vld [vmem:[#allocation2 + $0x38] sm:$0xf]  ;;  %v536_v27 = vshll.u32 %v381_v49, 16  ;;  %v540_v22 = vshrl.u32 %v381_v49, 16 }
  0xd9   :  { %1000 = vrot.lane.b32.xlu1 %v944_v42, %s6583_s21  ;;  %1189 = vst.msk [vmem:[#allocation3 + $0x10] sm:$0xf] %vm10023_vm2, %v1142_v14  ;;  %vm10025_vm2 = vcmask 191648   ;;  %v1770_v42 = vshrl.u32 %v1642_v44, 16  ;;  %v1542_v0 = vrot.slane %v1540_v34, 4  ;;  %v532_v53 = vrot.slane %v530_v24, 4 }
  0xda   :  { %1002 = vrot.lane.b32.xlu0 %v954_v19, %s6583_s21  ;;  %v1363_v9 = vsel %vm6795_vm3, %v1354_v1, %v1362_v37  ;;  %v1763_v19 = vrot.slane %v1761_v41, 7  ;;  %v1764_v60 = vshll.u32 %v1641_v10, 16  ;;  %v1545_v46 = vrot.slane %v1543_v20, 4  ;;  %v802_v56 = vld [vmem:[#allocation2 + $0x3c] sm:$0xf] }
  0xdb   :  { %v1144_v61 = vpop.permute.xlu1 %1143  ;;  %v1773_v28 = vshll.u32 %v1642_v44, 16  ;;  %v1373_v48 = vsel %vm6795_vm3, %v1364_v47, %v7708_v33  ;;  %v7724_v34 = vrot.slane %v1770_v42, 7  ;;  %v7726_v51 = vrot.slane %v536_v27, 5  ;;  %v2443_v31 = vld [vmem:[#allocation2 + $0x50] sm:$0xf] }
  0xdc   :  { %1190 = vst.msk [vmem:[#allocation3 + $0x14] sm:$0xf] %vm10024_vm8, %v1144_v61  ;;  %v1404_v21 = vpop.permute.xlu0 %1403  ;;  %vm10026_vm8 = vmmov %vm10025_vm2  ;;  %v542_v37 = vrot.slane %v540_v22, 4  ;;  %v533_v61 = vor.u32 %v532_v53, %v7615_v11  ;;  %v1544_v44 = vsel %vm6810_vm10, %v1542_v0, %v1543_v20  ;;  %v1759_v49 = vrot.slane %v7552_v29, 4  ;;  %v642_v20 = vld [vmem:[#allocation2 + $0x3c] sm:$0xf] }
  0xdd   :  { %1157 = vrot.lane.b32.xlu1 %v1122_v55, %s6578_s16  ;;  %1451 = vst.msk [vmem:[#allocation3 + $0x10] sm:$0xf] %vm10025_vm2, %v1404_v21  ;;  %v1546_v55 = vrot.slane %v7710_v15, 7  ;;  %v1766_v24 = vor.u32 %v1764_v60, %v1763_v19  ;;  %v1775_v11 = vor.u32 %v1773_v28, %v7724_v34  ;;  %v957_v29 = vshrl.u32 %v802_v56, 16  ;;  %v6571_v22 = vld [vmem:[#allocation2 + $0x40] sm:$0x3] }
  0xde   :  { %1159 = vrot.lane.b32.xlu0 %v1125_v45, %s6578_s16  ;;  %v6570_v45 = vld [vmem:[#allocation2 + $0x40] sm:$0x1]  ;;  %v543_v47 = vor.u32 %v542_v37, %v7726_v51  ;;  %v960_v42 = vshll.u32 %v802_v56, 16  ;;  %v534_v53 = vrot.slane %v533_v61, 4  ;;  %v708_v60 = vrot.slane %v642_v20, 5 }
  0xdf   :  { %v1406_v4 = vpop.permute.xlu1 %1405  ;;  %v546_v1 = vshll.u32 %v6570_v45, 16  ;;  %v1547_v21 = vsel %vm6810_vm10, %v1545_v46, %v1546_v55  ;;  %v1767_v0 = vsel %vm6846_vm12, %v1759_v49, %v1766_v24  ;;  %v341_v46 = vld [vmem:[#allocation2 + $0x38] sm:$0xf]  ;;  %v959_v37 = vrot.slane %v957_v29, 5  ;;  %v1221_v56 = vld [vmem:[#allocation2 + $0x3c] sm:$0xf] }
  0xe0   :  { %1452 = vst.msk [vmem:[#allocation3 + $0x14] sm:$0xf] %vm10026_vm8, %v1406_v4  ;;  %v1564_v14 = vpop.permute.xlu0 %1563  ;;  %v970_v4 = vshll.u32 %v6571_v22, 16  ;;  %vm10027_vm2 = vcmask 93248   ;;  %v342_v49 = vld [vmem:[#allocation2 + $0x3c] sm:$0xf]  ;;  %v539_v45 = vsel %vm6749_vm11, %v534_v53, %v7726_v51 }
  0xe1   :  { %2940 = vrot.lane.b32.xlu1 %v2893_v30, %s6581_s19  ;;  %1611 = vst.msk [vmem:[#allocation3 + $0x10] sm:$0xf] %vm1606_vm13, %v1564_v14  ;;  %v1768_v30 = vrot.slane %v1763_v19, 4  ;;  %v57_v14 = vld [vmem:[%s9946_s0 + $0xc0] sm:$0xff]  ;;  %vm7757_vm8 = vmand %vm10027_vm2, %vm9978_vm7  ;;  %v1376_v20 = vshrl.u32 %v1221_v56, 16  ;;  %v1379_v17 = vshll.u32 %v1221_v56, 16 }
  0xe2   :  { %1419 = vrot.lane.b32.xlu0 %v1363_v9, %s6581_s19  ;;  %v548_v9 = vrot.slane %v546_v1, 5  ;;  %358 = vst.msk [vmem:[#allocation3 + $0x38] sm:$0xf] %vm293_vm5, %v341_v46  ;;  %v972_v24 = vrot.slane %v970_v4, 6  ;;  %v707_v1 = vrot.slane %v705_v52, 4  ;;  %v955_v4 = vrot.slane %v7661_v58, 4 }
  0xe3   :  { %v1566_v10 = vpop.permute.xlu1 %1565  ;;  %v1776_v28 = vsel %vm6846_vm12, %v1768_v30, %v1775_v11  ;;  %359 = vst.msk [vmem:[#allocation3 + $0x3c] sm:$0xf] %vm293_vm5, %v342_v49  ;;  %v2420_v11 = vld [vmem:[#allocation3 + $0x40] sm:$0xf] }
  0xe4   :  { %1612 = vst.msk [vmem:[#allocation3 + $0x14] sm:$0xf] %vm1606_vm13, %v1566_v10  ;;  %v1805_v41 = vpop.permute.xlu0 %1804  ;;  %v962_v10 = vrot.slane %v960_v42, 6  ;;  %v3014_v53 = vld [vmem:[#allocation2 + $0x48] sm:$0xf] }
  0xe5   :  { %1421 = vrot.lane.b32.xlu1 %v1373_v48, %s6581_s19  ;;  %1852 = vst.msk [vmem:[#allocation3 + $0x10] sm:$0xf] %vm9979_vm0, %v1805_v41  ;;  %v544_v48 = vrot.slane %v543_v47, 4  ;;  %v3013_v41 = vld [vmem:[#allocation2 + $0x44] sm:$0x8]  ;;  %v710_v47 = vrot.slane %v708_v60, 4 }
  0xe6   :  { %1579 = vrot.lane.b32.xlu0 %v1544_v44, %s6580_s18  ;;  %v963_v51 = vor.u32 %v962_v10, %v959_v37  ;;  %v973_v37 = vor.u32 %v972_v24, %v6734_v23  ;;  %v233_v10 = vrot.slane %v7654_v26, 4  ;;  %v1381_v44 = vrot.slane %v1379_v17, 7 }
  0xe7   :  { %v1807_v27 = vpop.permute.xlu1 %1806  ;;  %v549_v42 = vsel %vm6749_vm11, %v544_v48, %v548_v9  ;;  %v6572_v9 = vld [vmem:[#allocation2 + $0x40] sm:$0x7]  ;;  %v1126_v23 = vrot.slane %v1124_v18, 4  ;;  %v3040_v26 = vshrl.u32 %v3014_v53, 16  ;;  %v3043_v24 = vshll.u32 %v3014_v53, 16 }
  0xe8   :  { %1853 = vst.msk [vmem:[#allocation3 + $0x14] sm:$0xf] %vm9979_vm0, %v1807_v27  ;;  %v567_v19 = vpop.permute.xlu0 %566  ;;  %v1064_v27 = vld [vmem:[#allocation2 + $0x3c] sm:$0xf]  ;;  %v965_v56 = vrot.slane %v963_v51, 4  ;;  %v964_v36 = vsel %vm6767_vm14, %v955_v4, %v963_v51 }
  0xe9   :  { %1581 = vrot.lane.b32.xlu1 %v1547_v21, %s6580_s18  ;;  %612 = vst.msk [vmem:[#allocation3 + $0x18] sm:$0xf] %vm9976_vm6, %v567_v19  ;;  %v6253_v21 = vpack.c.bf16 %v57_v14, %v57_v14  ;;  %v3031_v19 = vshrl.u32 %v3013_v41, 16  ;;  %v3034_v14 = vshll.u32 %v3013_v41, 16  ;;  %v1127_v58 = vrot.slane %v1064_v27, 6 }
  0xea   :  { %1820 = vrot.lane.b32.xlu0 %v1767_v0, %s6582_s20  ;;  %v709_v0 = vsel %vm6708_vm9, %v707_v1, %v708_v60  ;;  %v712_v60 = vsel %vm6708_vm9, %v710_v47, %v711_v39  ;;  %v974_v18 = vsel %vm6767_vm14, %v965_v56, %v973_v37  ;;  %v1374_v47 = vrot.slane %v7708_v33, 4  ;;  %v7836_v56 = vld [vmem:[#allocation2 + $0x4c] sm:$0xf] }
  0xeb   :  { %v569_v61 = vpop.permute.xlu1 %568  ;;  %v7778_v46 = vrot.slane %v6253_v21, 6  ;;  %v3033_v39 = vrot.slane %v3031_v19, 6  ;;  %v1129_v21 = vrot.slane %v1127_v58, 4  ;;  %v3042_v51 = vrot.slane %v3040_v26, 6 }
  0xec   :  { %613 = vst.msk [vmem:[#allocation3 + $0x1c] sm:$0xf] %vm9976_vm6, %v569_v61  ;;  %v2368_v30 = vpop.permute.xlu0 %2367  ;;  %v1378_v61 = vrot.slane %v1376_v20, 6  ;;  %v1643_v20 = vld [vmem:[#allocation2 + $0x3c] sm:$0xf]  ;;  %v3045_v27 = vrot.slane %v3043_v24, 7 }
  0xed   :  { %1822 = vrot.lane.b32.xlu1 %v1776_v28, %s6582_s20  ;;  %v2421_v29 = vsel %vm7757_vm8, %v2368_v30, %v2420_v11  ;;  %v1389_v28 = vshll.u32 %v6572_v9, 16  ;;  %vm10030_vm8 = vcmask 261120   ;;  %v235_v1 = vsel %vm6654_vm4, %v233_v10, %v7778_v46  ;;  %v59_v10 = vld [vmem:[%s9946_s0 + $0xd0] sm:$0xff] }
  0xee   :  { %2422 = vst [vmem:[#allocation3 + $0x40] sm:$0xf] %v2421_v29  ;;  %582 = vrot.lane.b32.xlu0 %v539_v45, %s6577_s15  ;;  %v3036_v45 = vrot.slane %v3034_v14, 7  ;;  %318 = vst.msk [vmem:[#allocation2 + $0x64] sm:$0xf] %vm293_vm5, %v235_v1  ;;  %v1382_v30 = vor.u32 %v1381_v44, %v1378_v61  ;;  %v1128_v29 = vsel %vm6654_vm4, %v1126_v23, %v1127_v58  ;;  %v1782_v58 = vshll.u32 %v1643_v20, 16 }
  0xef   :  { %v727_v52 = vpop.permute.xlu1 %726  ;;  %v6485_v22 = vld [vmem:[#allocation3 + $0x10] sm:$0xff]   ;;  %v1391_v6 = vrot.slane %v1389_v28, 7  ;;  %v1131_v33 = vsel %vm6654_vm4, %v1129_v21, %v1130_v38  ;;  %v7821_v9 = vor.u32 %v3045_v27, %v3042_v51  ;;  %v2599_v61 = vld [vmem:[#allocation2 + $0x4c] sm:$0xf]  ;;  %v6254_v44 = vpack.c.bf16 %v58_v35, %v58_v35 }
  0xf0   :  { %772 = vst.msk [vmem:[#allocation3 + $0x18] sm:$0xf] %vm10027_vm2, %v727_v52  ;;  %v729_v48 = vpop.permute.xlu0 %728  ;;  %6409 = vmatmul.mubr.msk.bf16.gmra.mxu0 %vm10030_vm8, %v6485_v22  ;;  %vm10031_vm8 = vcmask 158848   ;;  %v1483_v52 = vld [vmem:[#allocation2 + $0x3c] sm:$0xf]  ;;  %v1384_v22 = vrot.slane %v1382_v30, 4  ;;  %v1383_v19 = vsel %vm6795_vm3, %v1374_v47, %v1382_v30  ;;  %v10036_v51 = vor.u32 %v6998_v7, %v6996_v43 }
  0xf1   :  { %584 = vrot.lane.b32.xlu1 %v549_v42, %s6577_s15  ;;  %773 = vst.msk [vmem:[#allocation3 + $0x1c] sm:$0xf] %vm10027_vm2, %v729_v48  ;;  %6412 = vmatprep.mubr.msk.bf16.mxu0 %vm10010_vm15, %v6584_v63  ;;  %v3037_v42 = vor.u32 %v3036_v45, %v3033_v39  ;;  %vm10032_vm2 = vmmov %vm10031_vm8  ;;  %v1392_v4 = vor.u32 %v1391_v6, %v6705_v54  ;;  %v1549_v28 = vrot.slane %v1483_v52, 7  ;;  %v1548_v48 = vrot.slane %v1546_v55, 4 }
  0xf2   :  { %742 = vrot.lane.b32.xlu0 %v709_v0, %s6579_s17  ;;  %v1779_v0 = vshrl.u32 %v1643_v20, 16  ;;  %v1777_v24 = vrot.slane %v7724_v34, 4  ;;  %v2218_v1 = vshll.u32 %v7836_v56, 16  ;;  %v236_v21 = vrot.slane %v7778_v46, 4  ;;  %v3015_v46 = vld [vmem:[#allocation2 + $0x4c] sm:$0xf] }
  0xf3   :  { %v989_v49 = vpop.permute.xlu1 %988  ;;  %v3038_v14 = vrot.slane %v3037_v42, 4  ;;  %v1393_v54 = vsel %vm6795_vm3, %v1384_v22, %v1392_v4  ;;  %v1551_v55 = vrot.slane %v1549_v28, 4  ;;  %v1550_v39 = vsel %vm6810_vm10, %v1548_v48, %v1549_v28  ;;  %v61_v4 = vld [vmem:[%s9946_s0 + $0xe0] sm:$0xff] }
  0xf4   :  { %1034 = vst.msk [vmem:[#allocation3 + $0x18] sm:$0xf] %vm9977_vm1, %v989_v49  ;;  %v991_v41 = vpop.permute.xlu0 %990  ;;  %v1781_v37 = vrot.slane %v1779_v0, 7  ;;  %v6573_v49 = vld [vmem:[#allocation2 + $0x40] sm:$0xf]  ;;  %v237_v30 = vrot.slane %v6254_v44, 6 }
  0xf5   :  { %744 = vrot.lane.b32.xlu1 %v712_v60, %s6579_s17  ;;  %1035 = vst.msk [vmem:[#allocation3 + $0x1c] sm:$0xf] %vm9977_vm1, %v991_v41  ;;  %v1791_v23 = vshll.u32 %v6573_v49, 16  ;;  %v3047_v15 = vsel %vm6795_vm3, %v3038_v14, %v7821_v9  ;;  %v2634_v41 = vshrl.u32 %v2599_v61, 16  ;;  %v10035_v34 = vrot.slane %v6692_v40, 7 }
  0xf6   :  { %1004 = vrot.lane.b32.xlu0 %v964_v36, %s6583_s21  ;;  %v6255_v36 = vpack.c.bf16 %v59_v10, %v59_v10  ;;  %v1784_v45 = vor.u32 %v1782_v58, %v1781_v37  ;;  %v1786_v47 = vrot.slane %v1781_v37, 4  ;;  %v7860_v27 = vrot.slane %v10036_v51, 4  ;;  %v2075_v37 = vld [vmem:[#allocation2 + $0x48] sm:$0xf] }
  0xf7   :  { %v1146_v11 = vpop.permute.xlu1 %1145  ;;  %v1793_v20 = vor.u32 %v1791_v23, %v6715_v62  ;;  %v239_v40 = vrot.slane %v237_v30, 4  ;;  %v7870_v22 = vrot.slane %v2218_v1, 5  ;;  %v2478_v43 = vrot.slane %v2476_v8, 4  ;;  %v3273_v1 = vld [vmem:[#allocation2 + $0x48] sm:$0xf] }
  0xf8   :  { %1191 = vst.msk [vmem:[#allocation3 + $0x18] sm:$0xf] %vm10031_vm8, %v1146_v11  ;;  %v1148_v17 = vpop.permute.xlu0 %1147  ;;  %vm10033_vm8 = vcmask 191648   ;;  %v1553_v11 = vsel %vm6810_vm10, %v1551_v55, %v10035_v34  ;;  %v240_v52 = vrot.slane %v6255_v36, 6  ;;  %v1785_v62 = vsel %vm6846_vm12, %v1777_v24, %v1784_v45  ;;  %v7896_v55 = vld [vmem:[#allocation2 + $0x4c] sm:$0xf] }
  0xf9   :  { %1006 = vrot.lane.b32.xlu1 %v974_v18, %s6583_s21  ;;  %1192 = vst.msk [vmem:[#allocation3 + $0x1c] sm:$0xf] %vm10032_vm2, %v1148_v17  ;;  %vm10034_vm2 = vmmov %vm10033_vm8  ;;  %v2637_v18 = vshll.u32 %v2599_v61, 16  ;;  %v238_v17 = vsel %vm6654_vm4, %v236_v21, %v237_v30  ;;  %v2636_v7 = vrot.slane %v2634_v41, 5  ;;  %v1794_v12 = vsel %vm6846_vm12, %v1786_v47, %v1793_v20  ;;  %v7905_v36 = vld [vmem:[#allocation2 + $0x4c] sm:$0xf] }
  0xfa   :  { %1161 = vrot.lane.b32.xlu0 %v1128_v29, %s6578_s16  ;;  %v1871_v29 = vld [vmem:[#allocation2 + $0x48] sm:$0xf]  ;;  %319 = vst.msk [vmem:[#allocation2 + $0x68] sm:$0xf] %vm293_vm5, %v238_v17  ;;  %v241_v14 = vsel %vm6654_vm4, %v239_v40, %v240_v52  ;;  %v3050_v8 = vshrl.u32 %v3015_v46, 16  ;;  %v1894_v58 = vrot.slane %v7518_v25, 4  ;;  %v6257_v61 = vpack.c.bf16 %v61_v4, %v61_v4 }
  0xfb   :  { %v1408_v53 = vpop.permute.xlu1 %1407  ;;  %v1896_v28 = vshrl.u32 %v1871_v29, 16  ;;  %v1899_v35 = vshll.u32 %v1871_v29, 16  ;;  %320 = vst.msk [vmem:[#allocation2 + $0x6c] sm:$0xf] %vm293_vm5, %v241_v14  ;;  %v2632_v49 = vrot.slane %v7462_v32, 4  ;;  %v2894_v23 = vrot.slane %v2892_v5, 4 }
  0xfc   :  { %1453 = vst.msk [vmem:[#allocation3 + $0x18] sm:$0xf] %vm10033_vm8, %v1408_v53  ;;  %v1410_v38 = vpop.permute.xlu0 %1409  ;;  %v7879_v53 = vld [vmem:[#allocation2 + $0x4c] sm:$0xf]  ;;  %v2221_v25 = vsel %vm6749_vm11, %v7860_v27, %v7870_v22  ;;  %vm10037_vm8 = vcmask 93248   ;;  %v3052_v5 = vrot.slane %v3050_v8, 6 }
  0xfd   :  { %1163 = vrot.lane.b32.xlu1 %v1131_v33, %s6578_s16  ;;  %1454 = vst.msk [vmem:[#allocation3 + $0x1c] sm:$0xf] %vm10034_vm2, %v1410_v38  ;;  %v60_v33 = vld [vmem:[%s9946_s0 + $0xd8] sm:$0xff]  ;;  %v3053_v38 = vshll.u32 %v3015_v46, 16  ;;  %v7889_v10 = vrot.slane %v1896_v28, 7  ;;  %v2479_v44 = vrot.slane %v7879_v53, 5  ;;  %vm7913_vm2 = vmand %vm9977_vm1, %vm9978_vm7 }
  0xfe   :  { %1423 = vrot.lane.b32.xlu0 %v1383_v19, %s6581_s19  ;;  %v2639_v19 = vrot.slane %v2637_v18, 6  ;;  %v2184_v30 = vld [vmem:[#allocation2 + $0x50] sm:$0xf]  ;;  %v2222_v47 = vshrl.u32 %v7836_v56, 16  ;;  %v2895_v29 = vrot.slane %v7905_v36, 6  ;;  %v3048_v46 = vrot.slane %v7821_v9, 4 }
  0xff   :  { %v1568_v60 = vpop.permute.xlu1 %1567  ;;  %v1901_v32 = vor.u32 %v1899_v35, %v7889_v10  ;;  %v3055_v45 = vrot.slane %v3053_v38, 7  ;;  %v2480_v20 = vsel %vm6708_vm9, %v2478_v43, %v2479_v44  ;;  %v2577_v51 = vld [vmem:[#allocation3 + $0x40] sm:$0xf]  ;;  %v3272_v17 = vld [vmem:[#allocation2 + $0x44] sm:$0x8]  ;;  %v3308_v40 = vrot.slane %v3273_v1, 7 }
 0x100   :  { %1613 = vst.msk [vmem:[#allocation3 + $0x18] sm:$0xf] %vm1606_vm13, %v1568_v60  ;;  %v1570_v26 = vpop.permute.xlu0 %1569  ;;  %v242_v60 = vrot.slane %v240_v52, 4  ;;  %v7903_v24 = vor.u32 %v2639_v19, %v2636_v7  ;;  %v2228_v43 = vshll.u32 %v2184_v30, 16  ;;  %v2232_v7 = vshrl.u32 %v2184_v30, 16  ;;  %v62_v36 = vld [vmem:[%s9946_s0 + $0xe8] sm:$0xff] }
 0x101   :  { %1425 = vrot.lane.b32.xlu1 %v1393_v54, %s6581_s19  ;;  %1614 = vst.msk [vmem:[#allocation3 + $0x1c] sm:$0xf] %vm1606_vm13, %v1570_v26  ;;  %v6256_v54 = vpack.c.bf16 %v60_v33, %v60_v33  ;;  %v1902_v34 = vsel %vm6846_vm12, %v1894_v58, %v1901_v32  ;;  %v7944_v33 = vor.u32 %v3055_v45, %v3052_v5  ;;  %v6089_v14 = vrot.slane %v3272_v17, 11  ;;  %v1873_v35 = vld [vmem:[#allocation2 + $0x50] sm:$0xf] }
 0x102   :  { %3199 = vrot.lane.b32.xlu0 %v3047_v15, %s6580_s18  ;;  %2057 = vst.msk [vmem:[#allocation3 + $0x44] sm:$0xf] %vm293_vm5, %v1902_v34  ;;  %v2641_v56 = vsel %vm6767_vm14, %v2632_v49, %v7903_v24  ;;  %v2896_v19 = vsel %vm6654_vm4, %v2894_v23, %v2895_v29  ;;  %v2224_v28 = vrot.slane %v2222_v47, 4  ;;  %v2234_v58 = vrot.slane %v2232_v7, 4  ;;  %v2077_v30 = vld [vmem:[#allocation2 + $0x50] sm:$0xf] }
 0x103   :  { %v1809_v6 = vpop.permute.xlu1 %1808  ;;  %v243_v15 = vrot.slane %v6256_v54, 6  ;;  %v3057_v38 = vsel %vm6795_vm3, %v3048_v46, %v7944_v33  ;;  %v3310_v54 = vrot.slane %v3308_v40, 4  ;;  %v1903_v49 = vrot.slane %v7889_v10, 4  ;;  %v7996_v17 = vld [vmem:[#allocation2 + $0x54] sm:$0xf] }
 0x104   :  { %1854 = vst.msk [vmem:[#allocation3 + $0x18] sm:$0xf] %vm9979_vm0, %v1809_v6  ;;  %v1811_v42 = vpop.permute.xlu0 %1810 }
 0x105   :  { %1583 = vrot.lane.b32.xlu1 %v1550_v39, %s6580_s18  ;;  %1855 = vst.msk [vmem:[#allocation3 + $0x1c] sm:$0xf] %vm9979_vm0, %v1811_v42  ;;  %v7908_v39 = vrot.slane %v6257_v61, 6  ;;  %v244_v41 = vsel %vm6654_vm4, %v242_v60, %v243_v15  ;;  %v245_v6 = vrot.slane %v243_v15, 4  ;;  %v2600_v61 = vld [vmem:[#allocation2 + $0x50] sm:$0xf] }
 0x106   :  { %1585 = vrot.lane.b32.xlu0 %v1553_v11, %s6580_s18  ;;  %321 = vst.msk [vmem:[#allocation2 + $0x70] sm:$0xf] %vm293_vm5, %v244_v41  ;;  %v1905_v11 = vshrl.u32 %v7896_v55, 16  ;;  %v1914_v15 = vshrl.u32 %v1873_v35, 16  ;;  %v2644_v45 = vshrl.u32 %v2600_v61, 16  ;;  %v2647_v1 = vshll.u32 %v2600_v61, 16 }
 0x107   :  { %v571_v0 = vpop.permute.xlu1 %570  ;;  %v247_v42 = vsel %vm6654_vm4, %v245_v6, %v7908_v39  ;;  %v2601_v41 = vld [vmem:[#allocation2 + $0x54] sm:$0xf] }
 0x108   :  { %614 = vst.msk [vmem:[#allocation3 + $0x20] sm:$0xf] %vm9976_vm6, %v571_v0  ;;  %v573_v48 = vpop.permute.xlu0 %572  ;;  %v7951_v9 = vrot.slane %v1905_v11, 7  ;;  %v1908_v0 = vshll.u32 %v7896_v55, 16  ;;  %v3309_v55 = vsel %vm6810_vm10, %v6089_v14, %v3308_v40  ;;  %v2482_v11 = vrot.slane %v2443_v31, 5 }
 0x109   :  { %1824 = vrot.lane.b32.xlu1 %v1785_v62, %s6582_s20  ;;  %615 = vst.msk [vmem:[#allocation3 + $0x24] sm:$0xf] %vm9976_vm6, %v573_v48  ;;  %v7946_v62 = vld [vmem:[#allocation2 + $0x4c] sm:$0xf]  ;;  %v7965_v48 = vrot.slane %v2228_v43, 5  ;;  %v2646_v40 = vrot.slane %v2644_v45, 5 }
 0x10a   :  { %1826 = vrot.lane.b32.xlu0 %v1794_v12, %s6582_s20  ;;  %322 = vst.msk [vmem:[#allocation2 + $0x74] sm:$0xf] %vm293_vm5, %v247_v42  ;;  %v3311_v8 = vrot.slane %v7946_v62, 7  ;;  %v1910_v23 = vor.u32 %v1908_v0, %v7951_v9  ;;  %v2654_v42 = vshrl.u32 %v2601_v41, 16  ;;  %v2657_v43 = vshll.u32 %v2601_v41, 16 }
 0x10b   :  { %v731_v26 = vpop.permute.xlu1 %730  ;;  %v2235_v5 = vor.u32 %v2234_v58, %v7965_v48  ;;  %v2481_v0 = vrot.slane %v2479_v44, 4 }
 0x10c   :  { %774 = vst.msk [vmem:[#allocation3 + $0x20] sm:$0xf] %vm10037_vm8, %v731_v26  ;;  %v733_v18 = vpop.permute.xlu0 %732  ;;  %v6486_v21 = vld [vmem:[#allocation3 + $0x18] sm:$0xff]   ;;  %v2225_v26 = vor.u32 %v2224_v28, %v7870_v22  ;;  %v3312_v10 = vsel %vm6810_vm10, %v3310_v54, %v3311_v8  ;;  %v1911_v22 = vsel %vm6846_vm12, %v1903_v49, %v1910_v23  ;;  %v2485_v28 = vrot.slane %v7996_v17, 5 }
 0x10d   :  { %2110 = vrot.lane.b32.xlu1 %v2075_v37, %s6577_s15  ;;  %775 = vst.msk [vmem:[#allocation3 + $0x24] sm:$0xf] %vm10037_vm8, %v733_v18  ;;  %vm10040_vm8 = vcmask 261120   ;;  %v7967_v37 = vld [vmem:[#allocation2 + $0x54] sm:$0xf]  ;;  %v7987_v18 = vrot.slane %v1914_v15, 7  ;;  %v2483_v49 = vsel %vm6708_vm9, %v2481_v0, %v2482_v11  ;;  %v6258_v0 = vpack.c.bf16 %v62_v36, %v62_v36 }
 0x10e   :  { %2369 = vrot.lane.b32.xlu0 %v2221_v25, %s6579_s17  ;;  %6413 = vmatmul.mubr.msk.bf16.gmra.mxu0 %vm10040_vm8, %v6486_v21  ;;  %v2238_v32 = vshll.u32 %v7967_v37, 16  ;;  %v2076_v21 = vld [vmem:[#allocation2 + $0x4c] sm:$0xf]  ;;  %v2226_v34 = vrot.slane %v2225_v26, 4  ;;  %2058 = vst.msk [vmem:[#allocation3 + $0x48] sm:$0xf] %vm293_vm5, %v1911_v22 }
 0x10f   :  { %v2525_v27 = vpop.permute.xlu1 %2524  ;;  %6416 = vmatprep.mubr.msk.bf16.mxu0 %vm10010_vm15, %v6584_v63  ;;  %v2236_v46 = vrot.slane %v2235_v5, 4  ;;  %v2656_v44 = vrot.slane %v2654_v42, 5  ;;  %v2659_v58 = vrot.slane %v2657_v43, 6  ;;  %v2642_v23 = vrot.slane %v7903_v24, 4 }
 0x110   :  { %v2578_v52 = vsel %vm7913_vm2, %v2525_v27, %v2577_v51  ;;  %v993_v4 = vpop.permute.xlu0 %992  ;;  %vm10041_vm2 = vcmask 158848   ;;  %v3016_v51 = vld [vmem:[#allocation2 + $0x50] sm:$0xf]  ;;  %v1912_v27 = vrot.slane %v7951_v9, 4  ;;  %v2231_v9 = vsel %vm6749_vm11, %v2226_v34, %v7965_v48 }
 0x111   :  { %2579 = vst [vmem:[#allocation3 + $0x40] sm:$0xf] %v2578_v52  ;;  %2526 = vrot.lane.b32.xlu1 %v2480_v20, %s6583_s21  ;;  %1036 = vst.msk [vmem:[#allocation3 + $0x20] sm:$0xf] %vm9977_vm1, %v993_v4  ;;  %v7992_v20 = vrot.slane %v2238_v32, 5  ;;  %v2649_v52 = vrot.slane %v2647_v1, 6  ;;  %v8032_v1 = vor.u32 %v2659_v58, %v2656_v44 }
 0x112   :  { %2785 = vrot.lane.b32.xlu0 %v2641_v56, %s6578_s16  ;;  %vm10042_vm8 = vmmov %vm10041_vm2  ;;  %v1917_v56 = vshll.u32 %v1873_v35, 16  ;;  %v2859_v35 = vld [vmem:[#allocation2 + $0x50] sm:$0xf]  ;;  %v249_v62 = vrot.slane %v6258_v0, 6 }
 0x113   :  { %v995_v12 = vpop.permute.xlu1 %994  ;;  %v2241_v48 = vsel %vm6749_vm11, %v2236_v46, %v7992_v20  ;;  %v2650_v53 = vor.u32 %v2649_v52, %v2646_v40  ;;  %v2898_v15 = vrot.slane %v2859_v35, 6  ;;  %v8041_v34 = vld [vmem:[#allocation2 + $0x50] sm:$0xf]  ;;  %v3058_v46 = vrot.slane %v7944_v33, 4  ;;  %v8053_v40 = vld [vmem:[#allocation2 + $0x54] sm:$0xf] }
 0x114   :  { %1037 = vst.msk [vmem:[#allocation3 + $0x24] sm:$0xf] %vm9977_vm1, %v995_v12  ;;  %v1150_v60 = vpop.permute.xlu0 %1149  ;;  %v1919_v4 = vor.u32 %v1917_v56, %v7987_v18  ;;  %v3060_v12 = vshrl.u32 %v3016_v51, 16  ;;  %v3314_v43 = vrot.slane %v8041_v34, 7  ;;  %v3313_v33 = vrot.slane %v3311_v8, 4 }
 0x115   :  { %2942 = vrot.lane.b32.xlu1 %v2896_v19, %s6581_s19  ;;  %1193 = vst.msk [vmem:[#allocation3 + $0x20] sm:$0xf] %vm10041_vm2, %v1150_v60  ;;  %vm10043_vm2 = vcmask 191648   ;;  %v2484_v19 = vrot.slane %v2482_v11, 4  ;;  %v3017_v60 = vld [vmem:[#allocation2 + $0x54] sm:$0xf]  ;;  %v2651_v22 = vsel %vm6767_vm14, %v2642_v23, %v2650_v53 }
 0x116   :  { %3201 = vrot.lane.b32.xlu0 %v3057_v38, %s6580_s18  ;;  %v3063_v38 = vshll.u32 %v3016_v51, 16  ;;  %v1920_v54 = vsel %vm6846_vm12, %v1912_v27, %v1919_v4  ;;  %v3062_v32 = vrot.slane %v3060_v12, 6  ;;  %v3073_v5 = vshll.u32 %v3017_v60, 16  ;;  %v2186_v11 = vld [vmem:[#allocation2 + $0x58] sm:$0xf] }
 0x117   :  { %v1152_v25 = vpop.permute.xlu1 %1151  ;;  %2059 = vst.msk [vmem:[#allocation3 + $0x4c] sm:$0xf] %vm293_vm5, %v1920_v54  ;;  %v2486_v24 = vsel %vm6708_vm9, %v2484_v19, %v2485_v28  ;;  %v2652_v45 = vrot.slane %v2650_v53, 4  ;;  %v1874_v4 = vld [vmem:[#allocation2 + $0x54] sm:$0xf]  ;;  %v2252_v54 = vshrl.u32 %v2186_v11, 16 }
 0x118   :  { %1194 = vst.msk [vmem:[#allocation3 + $0x24] sm:$0xf] %vm10042_vm8, %v1152_v25  ;;  %v1412_v6 = vpop.permute.xlu0 %1411  ;;  %vm10044_vm8 = vmmov %vm10043_vm2  ;;  %v8025_v25 = vld [vmem:[#allocation2 + $0x54] sm:$0xf]  ;;  %v3065_v31 = vrot.slane %v3063_v38, 7  ;;  %v3075_v27 = vrot.slane %v3073_v5, 7 }
 0x119   :  { %3356 = vrot.lane.b32.xlu1 %v3309_v55, %s6582_s20  ;;  %1455 = vst.msk [vmem:[#allocation3 + $0x20] sm:$0xf] %vm10043_vm2, %v1412_v6  ;;  %vm9974_vm2 = vcmask 257026   ;;  %v10045_v55 = vmov 0   ;;  %v2897_v6 = vrot.slane %v2895_v29, 4  ;;  %v2242_v29 = vshrl.u32 %v7967_v37, 16 }
 0x11a   :  { %3358 = vrot.lane.b32.xlu0 %v3312_v10, %s6582_s20  ;;  %3858 = vst.msk [vmem:[#allocation5 + $0x10] sm:$0xc] %vm9974_vm2, %v10045_v55  ;;  %3859 = vst.msk [vmem:[#allocation5 + $0x24] sm:$0xc] %vm9974_vm2, %v10045_v55  ;;  %v3070_v10 = vshrl.u32 %v3017_v60, 16  ;;  %v3066_v42 = vor.u32 %v3065_v31, %v3062_v32  ;;  %v2661_v56 = vsel %vm6767_vm14, %v2652_v45, %v8032_v1  ;;  %v3317_v53 = vrot.slane %v8053_v40, 7 }
 0x11b   :  { %v1414_v47 = vpop.permute.xlu1 %1413  ;;  %v2899_v37 = vsel %vm6654_vm4, %v2897_v6, %v2898_v15  ;;  %v1875_v19 = vld [vmem:[#allocation2 + $0x58] sm:$0xf]  ;;  %v8072_v44 = vrot.slane %v2242_v29, 4  ;;  %v1923_v8 = vshrl.u32 %v1874_v4, 16  ;;  %vm10047_vm2 = vcmask 261120  }
 0x11c   :  { %1456 = vst.msk [vmem:[#allocation3 + $0x24] sm:$0xf] %vm10044_vm8, %v1414_v47  ;;  %v1572_v7 = vpop.permute.xlu0 %1571  ;;  %v3072_v51 = vrot.slane %v3070_v10, 6  ;;  %vm10046_vm8 = vcmask 93248   ;;  %v3068_v12 = vrot.slane %v3066_v42, 4  ;;  %v3316_v60 = vrot.slane %v3314_v43, 4 }
 0x11d   :  { %2112 = vrot.lane.b32.xlu1 %v2076_v21, %s6577_s15  ;;  %1615 = vst.msk [vmem:[#allocation3 + $0x20] sm:$0xf] %vm1606_vm13, %v1572_v7  ;;  %v2900_v21 = vrot.slane %v2898_v15, 4  ;;  %v2248_v7 = vshll.u32 %v2186_v11, 16  ;;  %v1932_v23 = vshrl.u32 %v1875_v19, 16  ;;  %v3067_v15 = vsel %vm6795_vm3, %v3058_v46, %v3066_v42 }
 0x11e   :  { %2114 = vrot.lane.b32.xlu0 %v2077_v30, %s6577_s15  ;;  %v2901_v30 = vrot.slane %v8025_v25, 6  ;;  %v8067_v38 = vor.u32 %v3075_v27, %v3072_v51  ;;  %v1921_v32 = vrot.slane %v7987_v18, 4  ;;  %v1925_v31 = vrot.slane %v1923_v8, 7  ;;  %v8103_v6 = vld [vmem:[#allocation2 + $0x5c] sm:$0xf] }
 0x11f   :  { %v1574_v14 = vpop.permute.xlu1 %1573  ;;  %v2254_v45 = vrot.slane %v2252_v54, 4  ;;  %v1935_v18 = vshll.u32 %v1875_v19, 16  ;;  %v2836_v42 = vld [vmem:[#allocation3 + $0x40] sm:$0xf]  ;;  %v3315_v51 = vsel %vm6810_vm10, %v3313_v33, %v3314_v43  ;;  %v2602_v27 = vld [vmem:[#allocation2 + $0x58] sm:$0xf] }
 0x120   :  { %1616 = vst.msk [vmem:[#allocation3 + $0x24] sm:$0xf] %vm1606_vm13, %v1574_v14  ;;  %v1813_v61 = vpop.permute.xlu0 %1812  ;;  %v1930_v34 = vrot.slane %v1925_v31, 4  ;;  %v2664_v33 = vshrl.u32 %v2602_v27, 16  ;;  %v2667_v0 = vshll.u32 %v2602_v27, 16 }
 0x121   :  { %2371 = vrot.lane.b32.xlu1 %v2231_v9, %s6579_s17  ;;  %1856 = vst.msk [vmem:[#allocation3 + $0x20] sm:$0xf] %vm9979_vm0, %v1813_v61  ;;  %v2902_v9 = vsel %vm6654_vm4, %v2900_v21, %v2901_v30  ;;  %v8076_v61 = vrot.slane %v2248_v7, 5  ;;  %v3019_v27 = vld [vmem:[#allocation2 + $0x5c] sm:$0xf] }
 0x122   :  { %2373 = vrot.lane.b32.xlu0 %v2241_v48, %s6579_s17  ;;  %v248_v48 = vrot.slane %v7908_v39, 4  ;;  %v63_v39 = vld [vmem:[%s9946_s0 + $0xf0] sm:$0xff] }
 0x123   :  { %v1815_v26 = vpop.permute.xlu1 %1814  ;;  %v6259_v11 = vpack.c.bf16 %v63_v39, %v63_v39  ;;  %v2255_v7 = vor.u32 %v2254_v45, %v8076_v61  ;;  %v2669_v39 = vrot.slane %v2667_v0, 6  ;;  %v2861_v45 = vld [vmem:[#allocation2 + $0x58] sm:$0xf] }
 0x124   :  { %1857 = vst.msk [vmem:[#allocation3 + $0x24] sm:$0xf] %vm9979_vm0, %v1815_v26  ;;  %v575_v41 = vpop.permute.xlu0 %574  ;;  %v250_v26 = vsel %vm6654_vm4, %v248_v48, %v249_v62  ;;  %v3018_v48 = vld [vmem:[#allocation2 + $0x58] sm:$0xf]  ;;  %v2904_v17 = vrot.slane %v2861_v45, 6 }
 0x125   :  { %2528 = vrot.lane.b32.xlu1 %v2483_v49, %s6583_s21  ;;  %616 = vst.msk [vmem:[#allocation3 + $0x28] sm:$0xf] %vm9976_vm6, %v575_v41  ;;  %v1926_v49 = vshll.u32 %v1874_v4, 16  ;;  %v8100_v41 = vrot.slane %v1932_v23, 7  ;;  %v2258_v4 = vshll.u32 %v8103_v6, 16  ;;  %v2256_v8 = vrot.slane %v2255_v7, 4 }
 0x126   :  { %2530 = vrot.lane.b32.xlu0 %v2486_v24, %s6583_s21  ;;  %v3077_v24 = vsel %vm6795_vm3, %v3068_v12, %v8067_v38  ;;  %323 = vst.msk [vmem:[#allocation2 + $0x78] sm:$0xf] %vm293_vm5, %v250_v26  ;;  %v2078_v12 = vld [vmem:[#allocation2 + $0x54] sm:$0xf]  ;;  %v2666_v23 = vrot.slane %v2664_v33, 5  ;;  %v2906_v0 = vrot.slane %v2904_v17, 4 }
 0x127   :  { %v577_v47 = vpop.permute.xlu1 %576  ;;  %v1928_v21 = vor.u32 %v1926_v49, %v1925_v31  ;;  %v1937_v36 = vor.u32 %v1935_v18, %v8100_v41  ;;  %v8143_v49 = vld [vmem:[#allocation2 + $0x5c] sm:$0xf]  ;;  %v3080_v31 = vshrl.u32 %v3018_v48, 16 }
 0x128   :  { %617 = vst.msk [vmem:[#allocation3 + $0x2c] sm:$0xf] %vm9976_vm6, %v577_v47  ;;  %v735_v52 = vpop.permute.xlu0 %734 }
 0x129   :  { %2787 = vrot.lane.b32.xlu1 %v2651_v22, %s6578_s16  ;;  %776 = vst.msk [vmem:[#allocation3 + $0x28] sm:$0xf] %vm10046_vm8, %v735_v52  ;;  %v251_v22 = vrot.slane %v249_v62, 4  ;;  %v1929_v46 = vsel %vm6846_vm12, %v1921_v32, %v1928_v21  ;;  %v8115_v52 = vrot.slane %v6259_v11, 6  ;;  %v2079_v62 = vld [vmem:[#allocation2 + $0x58] sm:$0xf]  ;;  %v2670_v11 = vor.u32 %v2669_v39, %v2666_v23 }
 0x12a   :  { %2789 = vrot.lane.b32.xlu0 %v2661_v56, %s6578_s16  ;;  %v2245_v56 = vor.u32 %v8072_v44, %v7992_v20  ;;  %2060 = vst.msk [vmem:[#allocation3 + $0x50] sm:$0xf] %vm293_vm5, %v1929_v46  ;;  %v1938_v20 = vsel %vm6846_vm12, %v1930_v34, %v1937_v36  ;;  %v2491_v21 = vrot.slane %v8143_v49, 5  ;;  %v64_v46 = vld [vmem:[%s9946_s0 + $0xf8] sm:$0xff]  ;;  %v3021_v49 = vld [vmem:[#allocation2 + $0x64] sm:$0xf] }
 0x12b   :  { %v737_v14 = vpop.permute.xlu1 %736  ;;  %v6487_v35 = vld [vmem:[#allocation3 + $0x20] sm:$0xff]   ;;  %2061 = vst.msk [vmem:[#allocation3 + $0x54] sm:$0xf] %vm293_vm5, %v1938_v20  ;;  %v253_v19 = vsel %vm6654_vm4, %v251_v22, %v8115_v52 }
 0x12c   :  { %777 = vst.msk [vmem:[#allocation3 + $0x2c] sm:$0xf] %vm10046_vm8, %v737_v14  ;;  %v997_v58 = vpop.permute.xlu0 %996  ;;  %6417 = vmatmul.mubr.msk.bf16.gmra.mxu0 %vm10047_vm2, %v6487_v35  ;;  %vm10048_vm2 = vcmask 158848   ;;  %v2603_v35 = vld [vmem:[#allocation2 + $0x5c] sm:$0xf]  ;;  %v2246_v54 = vrot.slane %v2245_v56, 4 }
 0x12d   :  { %2944 = vrot.lane.b32.xlu1 %v2899_v37, %s6581_s19  ;;  %1038 = vst.msk [vmem:[#allocation3 + $0x28] sm:$0xf] %vm9977_vm1, %v997_v58  ;;  %6420 = vmatprep.mubr.msk.bf16.mxu0 %vm10010_vm15, %v6584_v63  ;;  %vm8092_vm8 = vmand %vm10048_vm2, %vm9978_vm7  ;;  %vm9975_vm2 = vcmask 254976   ;;  %v3318_v37 = vsel %vm6810_vm10, %v3316_v60, %v3317_v53  ;;  %v8140_v58 = vrot.slane %v2258_v4, 5  ;;  %v2677_v26 = vshll.u32 %v2603_v35, 16 }
 0x12e   :  { %2946 = vrot.lane.b32.xlu0 %v2902_v9, %s6581_s19  ;;  %3855 = vst.msk [vmem:[#allocation5] sm:$0x3] %vm9975_vm2, %v10045_v55  ;;  %3856 = vst.msk [vmem:[#allocation5 + $0x14] sm:$0x3] %vm9975_vm2, %v10045_v55  ;;  %v2445_v9 = vld [vmem:[#allocation2 + $0x58] sm:$0xf]  ;;  %v2251_v5 = vsel %vm6749_vm11, %v2246_v54, %v8076_v61 }
 0x12f   :  { %v999_v10 = vpop.permute.xlu1 %998  ;;  %324 = vst.msk [vmem:[#allocation2 + $0x7c] sm:$0xf] %vm293_vm5, %v253_v19  ;;  %v2488_v60 = vrot.slane %v2445_v9, 5  ;;  %vm10052_vm2 = vcmask 191648   ;;  %v2261_v34 = vsel %vm6749_vm11, %v2256_v8, %v8140_v58  ;;  %v8163_v56 = vld [vmem:[#allocation2 + $0x5c] sm:$0xf] }
 0x130   :  { %1039 = vst.msk [vmem:[#allocation3 + $0x2c] sm:$0xf] %vm9977_vm1, %v999_v10  ;;  %v2784_v47 = vpop.permute.xlu0 %2783  ;;  %v3083_v10 = vshll.u32 %v3018_v48, 16  ;;  %v2903_v4 = vrot.slane %v2901_v30, 4  ;;  %v3093_v9 = vshll.u32 %v3019_v27, 16  ;;  %v2907_v19 = vrot.slane %v8163_v56, 6 }
 0x131   :  { %3203 = vrot.lane.b32.xlu1 %v3067_v15, %s6580_s18  ;;  %v2837_v29 = vsel %vm8092_vm8, %v2784_v47, %v2836_v42  ;;  %vm10051_vm8 = vcmask 158848   ;;  %v2674_v15 = vshrl.u32 %v2603_v35, 16  ;;  %v2490_v22 = vrot.slane %v2488_v60, 4  ;;  %v8184_v30 = vld [vmem:[#allocation2 + $0x58] sm:$0xf] }
 0x132   :  { %2838 = vst [vmem:[#allocation3 + $0x40] sm:$0xf] %v2837_v29  ;;  %3205 = vrot.lane.b32.xlu0 %v3077_v24, %s6580_s18  ;;  %v2487_v24 = vrot.slane %v2485_v28, 4  ;;  %v2679_v42 = vrot.slane %v2677_v26, 6  ;;  %v3082_v28 = vrot.slane %v3080_v31, 6  ;;  %v2662_v29 = vrot.slane %v8032_v1, 4 }
 0x133   :  { %v1154_v43 = vpop.permute.xlu1 %1153  ;;  %v2676_v47 = vrot.slane %v2674_v15, 5  ;;  %v2492_v7 = vsel %vm6708_vm9, %v2490_v22, %v2491_v21  ;;  %v2672_v1 = vrot.slane %v2670_v11, 4  ;;  %v6260_v35 = vpack.c.bf16 %v64_v46, %v64_v46  ;;  %v1877_v8 = vld [vmem:[#allocation2 + $0x60] sm:$0xf] }
 0x134   :  { %1195 = vst.msk [vmem:[#allocation3 + $0x28] sm:$0xf] %vm10051_vm8, %v1154_v43  ;;  %v1156_v14 = vpop.permute.xlu0 %1155  ;;  %v2489_v36 = vsel %vm6708_vm9, %v2487_v24, %v2488_v60  ;;  %v2671_v25 = vsel %vm6767_vm14, %v2662_v29, %v2670_v11  ;;  %v3078_v48 = vrot.slane %v8067_v38, 4  ;;  %v2905_v60 = vsel %vm6654_vm4, %v2903_v4, %v2904_v17  ;;  %v2188_v15 = vld [vmem:[#allocation2 + $0x60] sm:$0xf] }
 0x135   :  { %3360 = vrot.lane.b32.xlu1 %v3315_v51, %s6582_s20  ;;  %1196 = vst.msk [vmem:[#allocation3 + $0x2c] sm:$0xf] %vm10051_vm8, %v1156_v14  ;;  %vm10053_vm8 = vmmov %vm10052_vm2  ;;  %v3085_v51 = vrot.slane %v3083_v10, 7  ;;  %v8176_v20 = vor.u32 %v2679_v42, %v2676_v47  ;;  %v3095_v39 = vrot.slane %v3093_v9, 7  ;;  %v2908_v38 = vsel %vm6654_vm4, %v2906_v0, %v2907_v19  ;;  %v2604_v0 = vld [vmem:[#allocation2 + $0x60] sm:$0xf] }
 0x136   :  { %3362 = vrot.lane.b32.xlu0 %v3318_v37, %s6582_s20  ;;  %v3090_v37 = vshrl.u32 %v3019_v27, 16  ;;  %v255_v31 = vrot.slane %v6260_v35, 6  ;;  %v1950_v24 = vshrl.u32 %v1877_v8, 16  ;;  %v1953_v45 = vshll.u32 %v1877_v8, 16 }
 0x137   :  { %v1416_v44 = vpop.permute.xlu1 %1415  ;;  %v3086_v14 = vor.u32 %v3085_v51, %v3082_v28  ;;  %v2268_v22 = vshll.u32 %v2188_v15, 16  ;;  %v1939_v17 = vrot.slane %v8100_v41, 4  ;;  %v3319_v29 = vrot.slane %v3317_v53, 4 }
 0x138   :  { %1457 = vst.msk [vmem:[#allocation3 + $0x28] sm:$0xf] %vm10052_vm2, %v1416_v44  ;;  %v1418_v32 = vpop.permute.xlu0 %1417  ;;  %v254_v44 = vrot.slane %v8115_v52, 4  ;;  %v3092_v23 = vrot.slane %v3090_v37, 6  ;;  %v257_v47 = vrot.slane %v255_v31, 4  ;;  %vm10054_vm2 = vcmask 93248  }
 0x139   :  { %2116 = vrot.lane.b32.xlu1 %v2078_v12, %s6577_s15  ;;  %1458 = vst.msk [vmem:[#allocation3 + $0x2c] sm:$0xf] %vm10053_vm8, %v1418_v32  ;;  %v2262_v12 = vshrl.u32 %v8103_v6, 16  ;;  %v2681_v6 = vsel %vm6767_vm14, %v2672_v1, %v8176_v20  ;;  %v3088_v52 = vrot.slane %v3086_v14, 4  ;;  %v3320_v32 = vrot.slane %v8184_v30, 7 }
 0x13a   :  { %2118 = vrot.lane.b32.xlu0 %v2079_v62, %s6577_s15  ;;  %v1876_v62 = vld [vmem:[#allocation2 + $0x5c] sm:$0xf]  ;;  %v256_v11 = vsel %vm6654_vm4, %v254_v44, %v255_v31  ;;  %v8206_v42 = vor.u32 %v3095_v39, %v3092_v23  ;;  %v8212_v51 = vrot.slane %v1950_v24, 7  ;;  %vm10055_vm8 = vcmask 25600   ;;  %v2447_v23 = vld [vmem:[#allocation2 + $0x60] sm:$0xf] }
 0x13b   :  { %v1576_v18 = vpop.permute.xlu1 %1575  ;;  %v1941_v10 = vshrl.u32 %v1876_v62, 16  ;;  %325 = vst.msk [vmem:[#allocation2 + $0x80] sm:$0xf] %vm293_vm5, %v256_v11  ;;  %v2264_v46 = vrot.slane %v2262_v12, 4  ;;  %v8225_v53 = vrot.slane %v2268_v22, 5  ;;  %v3321_v30 = vsel %vm6810_vm10, %v3319_v29, %v3320_v32 }
 0x13c   :  { %1617 = vst.msk [vmem:[#allocation3 + $0x28] sm:$0xf] %vm1606_vm13, %v1576_v18  ;;  %v1578_v61 = vpop.permute.xlu0 %1577  ;;  %v1955_v4 = vor.u32 %v1953_v45, %v8212_v51  ;;  %v3097_v9 = vsel %vm6795_vm3, %v3088_v52, %v8206_v42  ;;  %v2687_v8 = vshll.u32 %v2604_v0, 16 }
 0x13d   :  { %2375 = vrot.lane.b32.xlu1 %v2251_v5, %s6579_s17  ;;  %1618 = vst.msk [vmem:[#allocation3 + $0x2c] sm:$0xf] %vm1606_vm13, %v1578_v61  ;;  %v1944_v5 = vshll.u32 %v1876_v62, 16  ;;  %v8208_v61 = vld [vmem:[#allocation2 + $0x5c] sm:$0xf]  ;;  %v1943_v28 = vrot.slane %v1941_v10, 7 }
 0x13e   :  { %2377 = vrot.lane.b32.xlu0 %v2261_v34, %s6579_s17  ;;  %v2272_v34 = vshrl.u32 %v2188_v15, 16  ;;  %326 = vst.msk [vmem:[#allocation2 + $0x84] sm:$0x3] %vm10055_vm8, %v257_v47  ;;  %v3323_v40 = vrot.slane %v8208_v61, 7  ;;  %v2684_v62 = vshrl.u32 %v2604_v0, 16  ;;  %vm10058_vm8 = vcmask 191648  }
 0x13f   :  { %v1817_v43 = vpop.permute.xlu1 %1816  ;;  %v1948_v41 = vrot.slane %v1943_v28, 4  ;;  %v2605_v15 = vld [vmem:[#allocation2 + $0x64] sm:$0xf]  ;;  %v2689_v45 = vrot.slane %v2687_v8, 6  ;;  %v3020_v47 = vld [vmem:[#allocation2 + $0x60] sm:$0xf] }
 0x140   :  { %1858 = vst.msk [vmem:[#allocation3 + $0x28] sm:$0xf] %vm9979_vm0, %v1817_v43  ;;  %v1819_v33 = vpop.permute.xlu0 %1818  ;;  %v3087_v43 = vsel %vm6795_vm3, %v3078_v48, %v3086_v14  ;;  %v2274_v37 = vrot.slane %v2272_v34, 4  ;;  %v2686_v24 = vrot.slane %v2684_v62, 5  ;;  %v2694_v34 = vshrl.u32 %v2605_v15, 16 }
 0x141   :  { %2532 = vrot.lane.b32.xlu1 %v2489_v36, %s6583_s21  ;;  %1859 = vst.msk [vmem:[#allocation3 + $0x2c] sm:$0xf] %vm9979_vm0, %v1819_v33  ;;  %v3322_v33 = vrot.slane %v3320_v32, 4  ;;  %v1956_v35 = vsel %vm6846_vm12, %v1948_v41, %v1955_v4  ;;  %v2993_v32 = vld [vmem:[#allocation3 + $0x40] sm:$0xf]  ;;  %v2697_v11 = vshll.u32 %v2605_v15, 16 }
 0x142   :  { %2534 = vrot.lane.b32.xlu0 %v2492_v7, %s6583_s21  ;;  %v1946_v7 = vor.u32 %v1944_v5, %v1943_v28  ;;  %2063 = vst.msk [vmem:[#allocation3 + $0x5c] sm:$0xf] %vm293_vm5, %v1956_v35  ;;  %v2275_v44 = vor.u32 %v2274_v37, %v8225_v53  ;;  %v2494_v5 = vrot.slane %v2447_v23, 5  ;;  %v8268_v28 = vld [vmem:[#allocation2 + $0x64] sm:$0xf]  ;;  %v3100_v41 = vshrl.u32 %v3020_v47, 16 }
 0x143   :  { %v579_v54 = vpop.permute.xlu1 %578  ;;  %v3103_v4 = vshll.u32 %v3020_v47, 16  ;;  %v2497_v37 = vrot.slane %v8268_v28, 5  ;;  %v2682_v0 = vrot.slane %v8176_v20, 4  ;;  %v1878_v23 = vld [vmem:[#allocation2 + $0x64] sm:$0xf]  ;;  %v3098_v47 = vrot.slane %v8206_v42, 4 }
 0x144   :  { %618 = vst.msk [vmem:[#allocation3 + $0x30] sm:$0xf] %vm9976_vm6, %v579_v54  ;;  %v581_v26 = vpop.permute.xlu0 %580  ;;  %v1947_v14 = vsel %vm6846_vm12, %v1939_v17, %v1946_v7  ;;  %v2265_v54 = vor.u32 %v2264_v46, %v8140_v58  ;;  %v2276_v10 = vrot.slane %v2275_v44, 4  ;;  %v2496_v46 = vrot.slane %v2494_v5, 4  ;;  %v2863_v7 = vld [vmem:[#allocation2 + $0x60] sm:$0xf] }
 0x145   :  { %2791 = vrot.lane.b32.xlu1 %v2671_v25, %s6578_s16  ;;  %619 = vst.msk [vmem:[#allocation3 + $0x34] sm:$0xf] %vm9976_vm6, %v581_v26  ;;  %vm10056_vm6 = vcmask 261120   ;;  %v8238_v25 = vld [vmem:[#allocation2 + $0x64] sm:$0xf]  ;;  %v3113_v44 = vshll.u32 %v3021_v49, 16 }
 0x146   :  { %2793 = vrot.lane.b32.xlu0 %v2681_v6, %s6578_s16  ;;  %2062 = vst.msk [vmem:[#allocation3 + $0x58] sm:$0xf] %vm293_vm5, %v1947_v14  ;;  %v3324_v6 = vsel %vm6810_vm10, %v3322_v33, %v3323_v40  ;;  %v2080_v26 = vld [vmem:[#allocation2 + $0x5c] sm:$0xf]  ;;  %v2266_v52 = vrot.slane %v2265_v54, 4  ;;  %v2910_v14 = vrot.slane %v2863_v7, 6  ;;  %v2498_v62 = vsel %vm6708_vm9, %v2496_v46, %v2497_v37 }
 0x147   :  { %v739_v18 = vpop.permute.xlu1 %738  ;;  %v3105_v54 = vrot.slane %v3103_v4, 7  ;;  %v1962_v56 = vshll.u32 %v1878_v23, 16 }
 0x148   :  { %778 = vst.msk [vmem:[#allocation3 + $0x30] sm:$0xf] %vm10054_vm2, %v739_v18  ;;  %v741_v27 = vpop.permute.xlu0 %740  ;;  %v6488_v36 = vld [vmem:[#allocation3 + $0x28] sm:$0xff]   ;;  %v2912_v58 = vrot.slane %v2910_v14, 4 }
 0x149   :  { %2948 = vrot.lane.b32.xlu1 %v2905_v60, %s6581_s19  ;;  %779 = vst.msk [vmem:[#allocation3 + $0x34] sm:$0xf] %vm10054_vm2, %v741_v27  ;;  %6421 = vmatmul.mubr.msk.bf16.gmra.mxu0 %vm10056_vm6, %v6488_v36  ;;  %vm10057_vm6 = vcmask 158848   ;;  %v2278_v60 = vshll.u32 %v8238_v25, 16  ;;  %vm8257_vm2 = vmand %vm10058_vm8, %vm9978_vm7  ;;  %v2271_v27 = vsel %vm6749_vm11, %v2266_v52, %v8225_v53  ;;  %v2493_v36 = vrot.slane %v2491_v21, 4 }
 0x14a   :  { %2950 = vrot.lane.b32.xlu0 %v2908_v38, %s6581_s19  ;;  %6424 = vmatprep.mubr.msk.bf16.mxu0 %vm10010_vm15, %v6584_v63  ;;  %v2081_v38 = vld [vmem:[#allocation2 + $0x60] sm:$0xf]  ;;  %v2696_v53 = vrot.slane %v2694_v34, 5 }
 0x14b   :  { %v1001_v1 = vpop.permute.xlu1 %1000  ;;  %v8265_v22 = vrot.slane %v2278_v60, 5  ;;  %v2495_v33 = vsel %vm6708_vm9, %v2493_v36, %v2494_v5  ;;  %v2909_v60 = vrot.slane %v2907_v19, 4  ;;  %v1879_v19 = vld [vmem:[#allocation2 + $0x68] sm:$0xf]  ;;  %v2282_v36 = vshrl.u32 %v8238_v25, 16 }
 0x14c   :  { %1040 = vst.msk [vmem:[#allocation3 + $0x30] sm:$0xf] %vm9977_vm1, %v1001_v1  ;;  %v1003_v12 = vpop.permute.xlu0 %1002 }
 0x14d   :  { %3207 = vrot.lane.b32.xlu1 %v3087_v43, %s6580_s18  ;;  %1041 = vst.msk [vmem:[#allocation3 + $0x34] sm:$0xf] %vm9977_vm1, %v1003_v12  ;;  %vm10061_vm1 = vmmov %vm10057_vm6  ;;  %v2690_v43 = vor.u32 %v2689_v45, %v2686_v24  ;;  %v2281_v1 = vsel %vm6749_vm11, %v2276_v10, %v8265_v22  ;;  %v8288_v12 = vld [vmem:[#allocation2 + $0x64] sm:$0xf]  ;;  %v3115_v10 = vrot.slane %v3113_v44, 7 }
 0x14e   :  { %3209 = vrot.lane.b32.xlu0 %v3097_v9, %s6580_s18  ;;  %v2699_v9 = vrot.slane %v2697_v11, 6  ;;  %v2913_v15 = vrot.slane %v8288_v12, 6  ;;  %v2190_v24 = vld [vmem:[#allocation2 + $0x68] sm:$0xf]  ;;  %v2911_v11 = vsel %vm6654_vm4, %v2909_v60, %v2910_v14  ;;  %v2284_v14 = vrot.slane %v2282_v36, 4 }
 0x14f   :  { %v1158_v48 = vpop.permute.xlu1 %1157  ;;  %v2692_v8 = vrot.slane %v2690_v43, 4  ;;  %v2292_v25 = vshrl.u32 %v2190_v24, 16  ;;  %v8352_v60 = vld [vmem:[#allocation2 + $0x6c] sm:$0xf] }
 0x150   :  { %1197 = vst.msk [vmem:[#allocation3 + $0x30] sm:$0xf] %vm10057_vm6, %v1158_v48  ;;  %v1160_v39 = vpop.permute.xlu0 %1159  ;;  %v3110_v48 = vshrl.u32 %v3021_v49, 16  ;;  %v2914_v42 = vsel %vm6654_vm4, %v2912_v58, %v2913_v15 }
 0x151   :  { %3364 = vrot.lane.b32.xlu1 %v3321_v30, %s6582_s20  ;;  %1198 = vst.msk [vmem:[#allocation3 + $0x34] sm:$0xf] %vm10061_vm1, %v1160_v39  ;;  %vm10062_vm1 = vmmov %vm10058_vm8  ;;  %v3102_v30 = vrot.slane %v3100_v41, 6  ;;  %v2691_v39 = vsel %vm6767_vm14, %v2682_v0, %v2690_v43  ;;  %vm10064_vm8 = vcmask 60448   ;;  %v1971_v43 = vshll.u32 %v1879_v19, 16 }
 0x152   :  { %3366 = vrot.lane.b32.xlu0 %v3324_v6, %s6582_s20  ;;  %vm10063_vm6 = vmmov %vm10062_vm1  ;;  %v8295_v6 = vor.u32 %v2699_v9, %v2696_v53  ;;  %v3325_v0 = vrot.slane %v3323_v40, 4 }
 0x153   :  { %v2941_v31 = vpop.permute.xlu1 %2940 }
 0x154   :  { %v2994_v18 = vsel %vm8257_vm2, %v2941_v31, %v2993_v32  ;;  %v1420_v17 = vpop.permute.xlu0 %1419  ;;  %v3106_v32 = vor.u32 %v3105_v54, %v3102_v30  ;;  %v3112_v31 = vrot.slane %v3110_v48, 6  ;;  %v2701_v5 = vsel %vm6767_vm14, %v2692_v8, %v8295_v6  ;;  %vm10065_vm2 = vmmov %vm10064_vm8  ;;  %v2606_v8 = vld [vmem:[#allocation2 + $0x68] sm:$0xf] }
 0x155   :  { %2995 = vst [vmem:[#allocation3 + $0x40] sm:$0xf] %v2994_v18  ;;  %2120 = vrot.lane.b32.xlu1 %v2080_v26, %s6577_s15  ;;  %1459 = vst.msk [vmem:[#allocation3 + $0x30] sm:$0xf] %vm10062_vm1, %v1420_v17  ;;  %v8304_v26 = vld [vmem:[#allocation2 + $0x60] sm:$0xf] }
 0x156   :  { %2122 = vrot.lane.b32.xlu0 %v2081_v38, %s6577_s15  ;;  %v1959_v38 = vshrl.u32 %v1878_v23, 16  ;;  %v1968_v18 = vshrl.u32 %v1879_v19, 16  ;;  %v3326_v17 = vrot.slane %v8304_v26, 7  ;;  %v3108_v41 = vrot.slane %v3106_v32, 4  ;;  %v2449_v26 = vld [vmem:[#allocation2 + $0x68] sm:$0xf] }
 0x157   :  { %v1422_v29 = vpop.permute.xlu1 %1421  ;;  %v8326_v4 = vor.u32 %v3115_v10, %v3112_v31  ;;  %vm10066_vm1 = vcmask 93248   ;;  %v2298_v10 = vshll.u32 %v8352_v60, 16  ;;  %v2082_v19 = vld [vmem:[#allocation2 + $0x64] sm:$0xf] }
 0x158   :  { %1460 = vst.msk [vmem:[#allocation3 + $0x34] sm:$0xf] %vm10063_vm6, %v1422_v29  ;;  %v1580_v21 = vpop.permute.xlu0 %1579  ;;  %v1961_v45 = vrot.slane %v1959_v38, 7  ;;  %v8319_v46 = vrot.slane %v1968_v18, 7  ;;  %v3328_v48 = vrot.slane %v3326_v17, 4  ;;  %vm10067_vm6 = vmmov %vm10066_vm1  ;;  %v3327_v23 = vsel %vm6810_vm10, %v3325_v0, %v3326_v17 }
 0x159   :  { %2379 = vrot.lane.b32.xlu1 %v2271_v27, %s6579_s17  ;;  %1619 = vst.msk [vmem:[#allocation3 + $0x30] sm:$0xf] %vm1606_vm13, %v1580_v21  ;;  %v1957_v27 = vrot.slane %v8212_v51, 4  ;;  %v2288_v51 = vshll.u32 %v2190_v24, 16  ;;  %v8333_v21 = vld [vmem:[#allocation2 + $0x64] sm:$0xf]  ;;  %v3117_v44 = vsel %vm6795_vm3, %v3108_v41, %v8326_v4 }
 0x15a   :  { %2381 = vrot.lane.b32.xlu0 %v2281_v1, %s6579_s17  ;;  %v1964_v29 = vor.u32 %v1962_v56, %v1961_v45  ;;  %v1966_v53 = vrot.slane %v1961_v45, 4  ;;  %v1973_v9 = vor.u32 %v1971_v43, %v8319_v46  ;;  %v3329_v61 = vrot.slane %v8333_v21, 7  ;;  %v2083_v17 = vld [vmem:[#allocation2 + $0x68] sm:$0xf] }
 0x15b   :  { %v1582_v35 = vpop.permute.xlu1 %1581  ;;  %v2290_v40 = vrot.slane %v2288_v51, 5  ;;  %v2704_v38 = vshrl.u32 %v2606_v8, 16  ;;  %v2500_v24 = vrot.slane %v2449_v26, 5  ;;  %v8371_v36 = vrot.slane %v2298_v10, 5  ;;  %v2865_v0 = vld [vmem:[#allocation2 + $0x68] sm:$0xf] }
 0x15c   :  { %1620 = vst.msk [vmem:[#allocation3 + $0x34] sm:$0xf] %vm1606_vm13, %v1582_v35  ;;  %v1821_v20 = vpop.permute.xlu0 %1820  ;;  %v1965_v1 = vsel %vm6846_vm12, %v1957_v27, %v1964_v29  ;;  %v1974_v35 = vsel %vm6846_vm12, %v1966_v53, %v1973_v9  ;;  %v8373_v29 = vld [vmem:[#allocation2 + $0x6c] sm:$0xf]  ;;  %v2499_v41 = vrot.slane %v2497_v37, 4 }
 0x15d   :  { %2536 = vrot.lane.b32.xlu1 %v2495_v33, %s6583_s21  ;;  %1860 = vst.msk [vmem:[#allocation3 + $0x30] sm:$0xf] %vm9979_vm0, %v1821_v20  ;;  %v3107_v33 = vsel %vm6795_vm3, %v3098_v47, %v3106_v32  ;;  %v3330_v32 = vsel %vm6810_vm10, %v3328_v48, %v3329_v61  ;;  %v2706_v18 = vrot.slane %v2704_v38, 5  ;;  %v2502_v51 = vrot.slane %v2500_v24, 4  ;;  %v8397_v48 = vld [vmem:[%s9948_s2] ss:$0 sm:$0xff] }
 0x15e   :  { %2538 = vrot.lane.b32.xlu0 %v2498_v62, %s6583_s21  ;;  %2064 = vst.msk [vmem:[#allocation3 + $0x60] sm:$0xf] %vm293_vm5, %v1965_v1  ;;  %2065 = vst.msk [vmem:[#allocation3 + $0x64] sm:$0xf] %vm293_vm5, %v1974_v35  ;;  %v2294_v62 = vrot.slane %v2292_v25, 4  ;;  %v2503_v53 = vrot.slane %v8373_v29, 5 }
 0x15f   :  { %v1823_v52 = vpop.permute.xlu1 %1822  ;;  %v3023_v35 = vld [vmem:[#allocation2 + $0x6c] sm:$0xf]  ;;  %v2192_v1 = vld [vmem:[#allocation2 + $0x70] sm:$0xf] }
 0x160   :  { %1861 = vst.msk [vmem:[#allocation3 + $0x34] sm:$0xf] %vm9979_vm0, %v1823_v52  ;;  %v583_v34 = vpop.permute.xlu0 %582  ;;  %v2707_v52 = vshll.u32 %v2606_v8, 16  ;;  %v2295_v31 = vor.u32 %v2294_v62, %v2290_v40  ;;  %v2702_v62 = vrot.slane %v8295_v6, 4  ;;  %v2916_v8 = vrot.slane %v2865_v0, 6 }
 0x161   :  { %2795 = vrot.lane.b32.xlu1 %v2691_v39, %s6578_s16  ;;  %620 = vst.msk [vmem:[#allocation3 + $0x38] sm:$0xf] %vm10064_vm8, %v583_v34  ;;  %vm10068_vm8 = vcmask 261120   ;;  %v2285_v39 = vor.u32 %v2284_v14, %v8265_v22  ;;  %v2607_v22 = vld [vmem:[#allocation2 + $0x6c] sm:$0xf]  ;;  %v3133_v10 = vshll.u32 %v3023_v35, 16 }
 0x162   :  { %2797 = vrot.lane.b32.xlu0 %v2701_v5, %s6578_s16  ;;  %v2709_v34 = vrot.slane %v2707_v52, 6  ;;  %v2717_v47 = vshll.u32 %v2607_v22, 16  ;;  %v2296_v27 = vrot.slane %v2295_v31, 4  ;;  %v8411_v38 = vld [vmem:[#allocation2 + $0x6c] sm:$0xf]  ;;  %v3130_v52 = vshrl.u32 %v3023_v35, 16 }
 0x163   :  { %v585_v7 = vpop.permute.xlu1 %584  ;;  %v2286_v5 = vrot.slane %v2285_v39, 4  ;;  %v2504_v39 = vsel %vm6708_vm9, %v2502_v51, %v2503_v53  ;;  %v3135_v51 = vrot.slane %v3133_v10, 7 }
 0x164   :  { %621 = vst.msk [vmem:[#allocation3 + $0x3c] sm:$0xf] %vm10065_vm2, %v585_v7  ;;  %v743_v49 = vpop.permute.xlu0 %742  ;;  %vm10069_vm2 = vcmask 126048   ;;  %v3022_v7 = vld [vmem:[#allocation2 + $0x68] sm:$0xf]  ;;  %v2710_v9 = vor.u32 %v2709_v34, %v2706_v18  ;;  %v2301_v28 = vsel %vm6749_vm11, %v2296_v27, %v8371_v36 }
 0x165   :  { %2952 = vrot.lane.b32.xlu1 %v2911_v11, %s6581_s19  ;;  %780 = vst.msk [vmem:[#allocation3 + $0x38] sm:$0xf] %vm10066_vm1, %v743_v49  ;;  %vm10070_vm1 = vmmov %vm10069_vm2  ;;  %v2714_v11 = vshrl.u32 %v2607_v22, 16  ;;  %v3120_v37 = vshrl.u32 %v3022_v7, 16  ;;  %v3123_v14 = vshll.u32 %v3022_v7, 16 }
 0x166   :  { %2954 = vrot.lane.b32.xlu0 %v2914_v42, %s6581_s19  ;;  %v2291_v42 = vsel %vm6749_vm11, %v2286_v5, %v2290_v40  ;;  %v2501_v40 = vsel %vm6708_vm9, %v2499_v41, %v2500_v24  ;;  %v1880_v22 = vld [vmem:[#allocation2 + $0x6c] sm:$0xf]  ;;  %v2915_v5 = vrot.slane %v2913_v15, 4  ;;  %v3118_v24 = vrot.slane %v8326_v4, 4  ;;  %v1881_v7 = vld [vmem:[#allocation2 + $0x70] sm:$0xf] }
 0x167   :  { %v745_v30 = vpop.permute.xlu1 %744  ;;  %v6489_v54 = vld [vmem:[#allocation3 + $0x30] sm:$0xff]   ;;  %v2716_v49 = vrot.slane %v2714_v11, 5  ;;  %v3125_v31 = vrot.slane %v3123_v14, 7  ;;  %v2711_v34 = vsel %vm6767_vm14, %v2702_v62, %v2710_v9  ;;  %v2918_v11 = vrot.slane %v2916_v8, 4 }
 0x168   :  { %781 = vst.msk [vmem:[#allocation3 + $0x3c] sm:$0xf] %vm10067_vm6, %v745_v30  ;;  %v1005_v20 = vpop.permute.xlu0 %1004  ;;  %6425 = vmatmul.mubr.msk.bf16.gmra.mxu0 %vm10068_vm8, %v6489_v54  ;;  %vm10071_vm6 = vcmask 158848   ;;  %v3252_v54 = vld [vmem:[#allocation3 + $0x40] sm:$0xf]  ;;  %v3132_v15 = vrot.slane %v3130_v52, 6 }
 0x169   :  { %3211 = vrot.lane.b32.xlu1 %v3107_v33, %s6580_s18  ;;  %1042 = vst.msk [vmem:[#allocation3 + $0x38] sm:$0xf] %vm10069_vm2, %v1005_v20  ;;  %6428 = vmatprep.mubr.msk.bf16.mxu0 %vm10010_vm15, %v6584_v63  ;;  %vm10072_vm8 = vmmov %vm10071_vm6  ;;  %vm10073_vm2 = vcmask 191648   ;;  %v2719_v33 = vrot.slane %v2717_v47, 6  ;;  %v2919_v47 = vrot.slane %v8411_v38, 6  ;;  %v2308_v62 = vshll.u32 %v2192_v1, 16 }
 0x16a   :  { %3213 = vrot.lane.b32.xlu0 %v3117_v44, %s6580_s18 }
 0x16b   :  { %v1007_v58 = vpop.permute.xlu1 %1006  ;;  %v8409_v26 = vor.u32 %v2719_v33, %v2716_v49  ;;  %v2302_v49 = vshrl.u32 %v8352_v60, 16  ;;  %v1989_v60 = vshll.u32 %v1881_v7, 16 }
 0x16c   :  { %1043 = vst.msk [vmem:[#allocation3 + $0x3c] sm:$0xf] %vm10070_vm1, %v1007_v58  ;;  %v1162_v56 = vpop.permute.xlu0 %1161  ;;  %vm8384_vm1 = vmand %vm1606_vm13, %vm9978_vm7  ;;  %v2712_v58 = vrot.slane %v2710_v9, 4  ;;  %v1986_v9 = vshrl.u32 %v1881_v7, 16 }
 0x16d   :  { %3368 = vrot.lane.b32.xlu1 %v3327_v23, %s6582_s20  ;;  %1199 = vst.msk [vmem:[#allocation3 + $0x38] sm:$0xf] %vm10071_vm6, %v1162_v56  ;;  %vm10076_vm6 = vmmov %vm10073_vm2  ;;  %v2304_v10 = vrot.slane %v2302_v49, 4 }
 0x16e   :  { %3370 = vrot.lane.b32.xlu0 %v3330_v32, %s6582_s20  ;;  %v3122_v32 = vrot.slane %v3120_v37, 6  ;;  %v2721_v12 = vsel %vm6767_vm14, %v2712_v58, %v8409_v26  ;;  %v1975_v37 = vrot.slane %v8319_v46, 4 }
 0x16f   :  { %v1164_v45 = vpop.permute.xlu1 %1163 }
 0x170   :  { %1200 = vst.msk [vmem:[#allocation3 + $0x3c] sm:$0xf] %vm10072_vm8, %v1164_v45  ;;  %v1424_v43 = vpop.permute.xlu0 %1423  ;;  %v1977_v45 = vshrl.u32 %v1880_v22, 16  ;;  %vm10077_vm8 = vcmask 261120   ;;  %v3126_v41 = vor.u32 %v3125_v31, %v3122_v32  ;;  %v3331_v31 = vrot.slane %v3329_v61, 4 }
 0x171   :  { %2124 = vrot.lane.b32.xlu1 %v2082_v19, %s6577_s15  ;;  %1461 = vst.msk [vmem:[#allocation3 + $0x38] sm:$0xf] %vm10073_vm2, %v1424_v43  ;;  %v1980_v43 = vshll.u32 %v1880_v22, 16  ;;  %vm10078_vm2 = vmmov %vm10077_vm8 }
 0x172   :  { %2126 = vrot.lane.b32.xlu0 %v2083_v17, %s6577_s15  ;;  %v1979_v4 = vrot.slane %v1977_v45, 7  ;;  %v3127_v32 = vsel %vm6795_vm3, %v3118_v24, %v3126_v41  ;;  %v8470_v45 = vld [vmem:[#allocation2 + $0x74] sm:$0xf] }
 0x173   :  { %v1426_v25 = vpop.permute.xlu1 %1425 }
 0x174   :  { %1462 = vst.msk [vmem:[#allocation3 + $0x3c] sm:$0xf] %vm10076_vm6, %v1426_v25  ;;  %v3200_v30 = vpop.permute.xlu0 %3199  ;;  %v3281_v25 = vld [vmem:[#allocation2 + $0x68] sm:$0xf]  ;;  %v1982_v14 = vor.u32 %v1980_v43, %v1979_v4  ;;  %vm10080_vm6 = vcmask 93248  }
 0x175   :  { %2383 = vrot.lane.b32.xlu1 %v2291_v42, %s6579_s17  ;;  %v3253_v44 = vsel %vm8384_vm1, %v3200_v30, %v3252_v54  ;;  %v3654_v23 = vpop.f32.mrf.mxu0  ;;  %v2920_v30 = vsel %vm6654_vm4, %v2918_v11, %v2919_v47  ;;  %v8440_v54 = vrot.slane %v1986_v9, 7  ;;  %vm10079_vm1 = vcmask 60448   ;;  %v2085_v9 = vld [vmem:[#allocation2 + $0x70] sm:$0xf] }
 0x176   :  { %3254 = vst [vmem:[#allocation3 + $0x40] sm:$0xf] %v3253_v44  ;;  %2385 = vrot.lane.b32.xlu0 %v2301_v28, %s6579_s17  ;;  %v3655_v6 = vadd.f32 %v8397_v48, %v3654_v23  ;;  %v2917_v28 = vsel %vm6654_vm4, %v2915_v5, %v2916_v8  ;;  %v2312_v8 = vshrl.u32 %v2192_v1, 16  ;;  %v1983_v46 = vsel %vm6846_vm12, %v1975_v37, %v1982_v14  ;;  %v2609_v1 = vld [vmem:[#allocation2 + $0x74] sm:$0xf] }
 0x177   :  { %v1584_v20 = vpop.permute.xlu1 %1583  ;;  %v6402_v19 = vpop.f32.mrf.mxu0  ;;  %v8447_v23 = vor.u32 %v3135_v51, %v3132_v15  ;;  %2066 = vst.msk [vmem:[#allocation3 + $0x68] sm:$0xf] %vm293_vm5, %v1983_v46  ;;  %v1991_v58 = vor.u32 %v1989_v60, %v8440_v54 }
 0x178   :  { %1621 = vst.msk [vmem:[#allocation3 + $0x38] sm:$0xf] %vm1606_vm13, %v1584_v20  ;;  %v1586_v56 = vpop.permute.xlu0 %1585  ;;  %v3788_v18 = vmax.f32 %v3655_v6, 0.0  ;;  %v3128_v20 = vrot.slane %v3126_v41, 4  ;;  %v8452_v6 = vld [vmem:[#allocation2 + $0x6c] sm:$0xf] }
 0x179   :  { %2540 = vrot.lane.b32.xlu1 %v2501_v40, %s6583_s21  ;;  %1622 = vst.msk [vmem:[#allocation3 + $0x3c] sm:$0xf] %vm1606_vm13, %v1586_v56  ;;  %v3657_v27 = vpop.f32.mrf.mxu0  ;;  %v3332_v40 = vrot.slane %v3281_v25, 7  ;;  %v8462_v19 = vrot.slane %v2308_v62, 5  ;;  %v2314_v5 = vrot.slane %v2312_v8, 4  ;;  %v3335_v61 = vrot.slane %v8452_v6, 7 }
 0x17a   :  { %2542 = vrot.lane.b32.xlu0 %v2504_v39, %s6583_s21  ;;  %3821 = vst.msk [vmem:[#allocation4] sm:$0xff] %vm10077_vm8, %v3788_v18  ;;  %v3658_v42 = vadd.f32 %v8397_v48, %v3657_v27  ;;  %v1984_v39 = vrot.slane %v1979_v4, 4  ;;  %vm10081_vm8 = vcmask 126048   ;;  %v3137_v24 = vsel %vm6795_vm3, %v3128_v20, %v8447_v23  ;;  %v2608_v18 = vld [vmem:[#allocation2 + $0x70] sm:$0xf] }
 0x17b   :  { %v1825_v17 = vpop.permute.xlu1 %1824  ;;  %v6403_v0 = vpop.f32.mrf.mxu0  ;;  %v3334_v21 = vrot.slane %v3332_v40, 4  ;;  %v2305_v27 = vor.u32 %v2304_v10, %v8371_v36  ;;  %v2315_v15 = vor.u32 %v2314_v5, %v8462_v19  ;;  %v2318_v4 = vshll.u32 %v8470_v45, 16  ;;  %v2084_v25 = vld [vmem:[#allocation2 + $0x6c] sm:$0xf]  ;;  %v3024_v8 = vld [vmem:[#allocation2 + $0x70] sm:$0xf] }
 0x17c   :  { %1862 = vst.msk [vmem:[#allocation3 + $0x38] sm:$0xf] %vm9979_vm0, %v1825_v17  ;;  %v1827_v33 = vpop.permute.xlu0 %1826  ;;  %v3789_v35 = vmax.f32 %v3658_v42, 0.0  ;;  %v1992_v22 = vsel %vm6846_vm12, %v1984_v39, %v1991_v58  ;;  %v3333_v17 = vsel %vm6810_vm10, %v3331_v31, %v3332_v40  ;;  %v2724_v43 = vshrl.u32 %v2608_v18, 16  ;;  %v2451_v42 = vld [vmem:[#allocation2 + $0x70] sm:$0xf] }
 0x17d   :  { %2799 = vrot.lane.b32.xlu1 %v2711_v34, %s6578_s16  ;;  %1863 = vst.msk [vmem:[#allocation3 + $0x3c] sm:$0xf] %vm9979_vm0, %v1827_v33  ;;  %v3336_v7 = vsel %vm6810_vm10, %v3334_v21, %v3335_v61  ;;  %v2727_v36 = vshll.u32 %v2608_v18, 16  ;;  %v2306_v49 = vrot.slane %v2305_v27, 4  ;;  %v8496_v33 = vld [vmem:[#allocation2 + $0x74] sm:$0xf] }
 0x17e   :  { %2801 = vrot.lane.b32.xlu0 %v2721_v12, %s6578_s16  ;;  %3822 = vst.msk [vmem:[#allocation4 + $0x8] sm:$0xff] %vm10078_vm2, %v3789_v35  ;;  %vm10082_vm2 = vcmask 158848   ;;  %v3409_v0 = vld [vmem:[#allocation3 + $0x40] sm:$0xf]  ;;  %v2316_v37 = vrot.slane %v2315_v15, 4  ;;  %v8499_v14 = vrot.slane %v2318_v4, 5 }
 0x17f   :  { %v2111_v44 = vpop.permute.xlu1 %2110  ;;  %2067 = vst.msk [vmem:[#allocation3 + $0x6c] sm:$0xf] %vm293_vm5, %v1992_v22  ;;  %v2506_v35 = vrot.slane %v2451_v42, 5  ;;  %v2734_v40 = vshrl.u32 %v2609_v1, 16  ;;  %v2737_v62 = vshll.u32 %v2609_v1, 16  ;;  %v2311_v20 = vsel %vm6749_vm11, %v2306_v49, %v8462_v19 }
 0x180   :  { %2164 = vst.msk [vmem:[#allocation3 + $0x44] sm:$0xf] %vm10079_vm1, %v2111_v44  ;;  %v2370_v52 = vpop.permute.xlu0 %2369  ;;  %vm10083_vm1 = vcmask 261120   ;;  %v2729_v44 = vrot.slane %v2727_v36, 6  ;;  %v2505_v39 = vrot.slane %v2503_v53, 4  ;;  %v2509_v31 = vrot.slane %v8496_v33, 5 }
 0x181   :  { %2956 = vrot.lane.b32.xlu1 %v2917_v28, %s6581_s19  ;;  %2423 = vst.msk [vmem:[#allocation3 + $0x44] sm:$0xf] %vm10080_vm6, %v2370_v52  ;;  %vm10084_vm6 = vcmask 191648   ;;  %v8510_v58 = vld [vmem:[#allocation2 + $0x70] sm:$0xf]  ;;  %v3140_v10 = vshrl.u32 %v3024_v8, 16  ;;  %v2321_v19 = vsel %vm6749_vm11, %v2316_v37, %v8499_v14 }
 0x182   :  { %2958 = vrot.lane.b32.xlu0 %v2920_v30, %s6581_s19  ;;  %v2726_v30 = vrot.slane %v2724_v43, 5  ;;  %v3143_v22 = vshll.u32 %v3024_v8, 16  ;;  %v2736_v29 = vrot.slane %v2734_v40, 5  ;;  %v2739_v53 = vrot.slane %v2737_v62, 6  ;;  %v1883_v8 = vld [vmem:[#allocation2 + $0x78] sm:$0xf] }
 0x183   :  { %v2527_v56 = vpop.permute.xlu1 %2526  ;;  %v2507_v21 = vsel %vm6708_vm9, %v2505_v39, %v2506_v35  ;;  %v2722_v18 = vrot.slane %v8409_v26, 4  ;;  %v3142_v15 = vrot.slane %v3140_v10, 6 }
 0x184   :  { %2580 = vst.msk [vmem:[#allocation3 + $0x44] sm:$0xf] %vm10081_vm8, %v2527_v56  ;;  %v2786_v34 = vpop.permute.xlu0 %2785  ;;  %v6490_v11 = vld [vmem:[#allocation3 + $0x38] sm:$0xff]   ;;  %vm8491_vm8 = vmand %vm9979_vm0, %vm9978_vm7  ;;  %v3025_v56 = vld [vmem:[#allocation2 + $0x74] sm:$0xf]  ;;  %v2730_v5 = vor.u32 %v2729_v44, %v2726_v30  ;;  %v3145_v4 = vrot.slane %v3143_v22, 7  ;;  %v8533_v36 = vor.u32 %v2739_v53, %v2736_v29 }
 0x185   :  { %3215 = vrot.lane.b32.xlu1 %v3127_v32, %s6580_s18  ;;  %2839 = vst.msk [vmem:[#allocation3 + $0x44] sm:$0xf] %vm10082_vm2, %v2786_v34  ;;  %6429 = vmatmul.mubr.msk.bf16.gmra.mxu0 %vm10083_vm1, %v6490_v11  ;;  %v2508_v32 = vrot.slane %v2506_v35, 4  ;;  %vm10087_vm2 = vcmask 60448   ;;  %v2922_v34 = vrot.slane %v8510_v58, 6  ;;  %v3153_v43 = vshll.u32 %v3025_v56, 16 }
 0x186   :  { %3217 = vrot.lane.b32.xlu0 %v3137_v24, %s6580_s18  ;;  %6432 = vmatprep.mubr.msk.bf16.mxu0 %vm10010_vm15, %v6584_v63  ;;  %vm10088_vm1 = vmmov %vm10087_vm2  ;;  %v8524_v11 = vld [vmem:[#allocation2 + $0x74] sm:$0xf]  ;;  %v2732_v42 = vrot.slane %v2730_v5, 4  ;;  %v2731_v37 = vsel %vm6767_vm14, %v2722_v18, %v2730_v5  ;;  %v3146_v40 = vor.u32 %v3145_v4, %v3142_v15  ;;  %v3283_v58 = vld [vmem:[#allocation2 + $0x70] sm:$0xf]  ;;  %v3138_v22 = vrot.slane %v8447_v23, 4 }
 0x187   :  { %v2943_v12 = vpop.permute.xlu1 %2942  ;;  %v2510_v26 = vsel %vm6708_vm9, %v2508_v32, %v2509_v31  ;;  %v2925_v49 = vrot.slane %v8524_v11, 6  ;;  %v2924_v35 = vrot.slane %v2922_v34, 4  ;;  %v3155_v38 = vrot.slane %v3153_v43, 7 }
 0x188   :  { %2996 = vst.msk [vmem:[#allocation3 + $0x44] sm:$0xf] %vm10084_vm6, %v2943_v12  ;;  %v3202_v41 = vpop.permute.xlu0 %3201  ;;  %vm10089_vm6 = vcmask 93248   ;;  %v2741_v39 = vsel %vm6767_vm14, %v2732_v42, %v8533_v36  ;;  %v3337_v42 = vrot.slane %v3335_v61, 4  ;;  %vm10135_vm7 = vcmask 191648  }
 0x189   :  { %3372 = vrot.lane.b32.xlu1 %v3333_v17, %s6582_s20  ;;  %3255 = vst.msk [vmem:[#allocation3 + $0x44] sm:$0xf] %vm1606_vm13, %v3202_v41  ;;  %v3150_v17 = vshrl.u32 %v3025_v56, 16  ;;  %v1882_v41 = vld [vmem:[#allocation2 + $0x74] sm:$0xf]  ;;  %v2926_v53 = vsel %vm6654_vm4, %v2924_v35, %v2925_v49 }
 0x18a   :  { %3374 = vrot.lane.b32.xlu0 %v3336_v7, %s6582_s20  ;;  %v1998_v62 = vshll.u32 %v1882_v41, 16  ;;  %v2194_v56 = vld [vmem:[#allocation2 + $0x78] sm:$0xf]  ;;  %v8594_v35 = vld [vmem:[#allocation2 + $0x7c] sm:$0xf] }
 0x18b   :  { %v3357_v28 = vpop.permute.xlu1 %3356  ;;  %v3152_v30 = vrot.slane %v3150_v17, 6  ;;  %v3338_v17 = vrot.slane %v3283_v58, 7  ;;  %v2332_v15 = vshrl.u32 %v2194_v56, 16 }
 0x18c   :  { %v3410_v60 = vsel %vm8491_vm8, %v3357_v28, %v3409_v0  ;;  %v3359_v46 = vpop.permute.xlu0 %3358  ;;  %v1995_v0 = vshrl.u32 %v1882_v41, 16  ;;  %vm10090_vm8 = vmmov %vm10089_vm6 }
 0x18d   :  { %3411 = vst [vmem:[#allocation3 + $0x40] sm:$0xf] %v3410_v60  ;;  %2128 = vrot.lane.b32.xlu1 %v2084_v25, %s6577_s15  ;;  %3412 = vst.msk [vmem:[#allocation3 + $0x44] sm:$0xf] %vm9979_vm0, %v3359_v46  ;;  %v2322_v46 = vshrl.u32 %v8470_v45, 16  ;;  %v8566_v23 = vor.u32 %v3155_v38, %v3152_v30  ;;  %v3340_v6 = vrot.slane %v3338_v17, 4  ;;  %v3339_v30 = vsel %vm6810_vm10, %v3337_v42, %v3338_v17 }
 0x18e   :  { %2130 = vrot.lane.b32.xlu0 %v2085_v9, %s6577_s15  ;;  %v2921_v9 = vrot.slane %v2919_v47, 4  ;;  %v1997_v47 = vrot.slane %v1995_v0, 7  ;;  %v2511_v42 = vrot.slane %v2509_v31, 4 }
 0x18f   :  { %v2113_v52 = vpop.permute.xlu1 %2112  ;;  %v2324_v41 = vrot.slane %v2322_v46, 4  ;;  %v3158_v11 = vrot.slane %v8566_v23, 4 }
 0x190   :  { %2165 = vst.msk [vmem:[#allocation3 + $0x48] sm:$0xf] %vm10087_vm2, %v2113_v52  ;;  %v2115_v24 = vpop.permute.xlu0 %2114  ;;  %vm10091_vm2 = vcmask 261120   ;;  %v2004_v52 = vshrl.u32 %v1883_v8, 16  ;;  %v2923_v45 = vsel %vm6654_vm4, %v2921_v9, %v2922_v34  ;;  %v2000_v5 = vor.u32 %v1998_v62, %v1997_v47  ;;  %v2610_v9 = vld [vmem:[#allocation2 + $0x78] sm:$0xf] }
 0x191   :  { %2387 = vrot.lane.b32.xlu1 %v2311_v20, %s6579_s17  ;;  %2166 = vst.msk [vmem:[#allocation3 + $0x4c] sm:$0xf] %vm10088_vm1, %v2115_v24  ;;  %v3662_v12 = vpop.f32.mrf.mxu0  ;;  %vm10092_vm1 = vmmov %vm10091_vm2  ;;  %v3148_v34 = vrot.slane %v3146_v40, 4  ;;  %v2002_v4 = vrot.slane %v1997_v47, 4 }
 0x192   :  { %2389 = vrot.lane.b32.xlu0 %v2321_v19, %s6579_s17  ;;  %v3663_v7 = vadd.f32 %v8397_v48, %v3662_v12  ;;  %v1993_v19 = vrot.slane %v8440_v54, 4  ;;  %v8563_v24 = vrot.slane %v2004_v52, 7  ;;  %v2328_v12 = vshll.u32 %v2194_v56, 16  ;;  %v2453_v52 = vld [vmem:[#allocation2 + $0x78] sm:$0xf] }
 0x193   :  { %v2372_v27 = vpop.permute.xlu1 %2371  ;;  %v6406_v25 = vpop.f32.mrf.mxu0  ;;  %v3157_v0 = vsel %vm6795_vm3, %v3148_v34, %v8566_v23  ;;  %v2087_v34 = vld [vmem:[#allocation2 + $0x78] sm:$0xf] }
 0x194   :  { %2424 = vst.msk [vmem:[#allocation3 + $0x48] sm:$0xf] %vm10089_vm6, %v2372_v27  ;;  %v2374_v51 = vpop.permute.xlu0 %2373  ;;  %v6491_v1 = vld [vmem:[#allocation3 + $0x40] sm:$0xff]   ;;  %v3790_v28 = vmax.f32 %v3663_v7, 0.0  ;;  %vm10093_vm6 = vcmask 126048   ;;  %v2001_v54 = vsel %vm6846_vm12, %v1993_v19, %v2000_v5  ;;  %v8591_v61 = vrot.slane %v2328_v12, 5 }
 0x195   :  { %2544 = vrot.lane.b32.xlu1 %v2507_v21, %s6583_s21  ;;  %2425 = vst.msk [vmem:[#allocation3 + $0x4c] sm:$0xf] %vm10090_vm8, %v2374_v51  ;;  %v3665_v44 = vpop.f32.mrf.mxu0  ;;  %6433 = vmatmul.mubr.msk.bf16.gmra.mxu0 %vm10091_vm2, %v6491_v1  ;;  %vm10094_vm8 = vmmov %vm10093_vm6  ;;  %v2007_v21 = vshll.u32 %v1883_v8, 16  ;;  %v8572_v27 = vld [vmem:[#allocation2 + $0x74] sm:$0xf] }
 0x196   :  { %2546 = vrot.lane.b32.xlu0 %v2510_v26, %s6583_s21  ;;  %3823 = vst.msk [vmem:[#allocation4 + $0x10] sm:$0xff] %vm10092_vm1, %v3790_v28  ;;  %v3666_v20 = vadd.f32 %v8397_v48, %v3665_v44  ;;  %6436 = vmatprep.mubr.msk.bf16.mxu0 %vm10010_vm15, %v6584_v63  ;;  %vm10095_vm2 = vmmov %vm10092_vm1  ;;  %vm10096_vm1 = vcmask 158848   ;;  %v3147_v26 = vsel %vm6795_vm3, %v3138_v22, %v3146_v40  ;;  %v3341_v1 = vrot.slane %v8572_v27, 7  ;;  %v2086_v22 = vld [vmem:[#allocation2 + $0x74] sm:$0xf] }
 0x197   :  { %v2529_v60 = vpop.permute.xlu1 %2528  ;;  %v6407_v10 = vpop.f32.mrf.mxu0  ;;  %2068 = vst.msk [vmem:[#allocation3 + $0x70] sm:$0xf] %vm293_vm5, %v2001_v54  ;;  %v2009_v43 = vor.u32 %v2007_v21, %v8563_v24  ;;  %v2334_v28 = vrot.slane %v2332_v15, 4  ;;  %v2744_v44 = vshrl.u32 %v2610_v9, 16  ;;  %v2747_v40 = vshll.u32 %v2610_v9, 16 }
 0x198   :  { %2581 = vst.msk [vmem:[#allocation3 + $0x48] sm:$0xf] %vm10093_vm6, %v2529_v60  ;;  %v2531_v32 = vpop.permute.xlu0 %2530  ;;  %v3791_v29 = vmax.f32 %v3666_v20, 0.0  ;;  %vm10097_vm6 = vmmov %vm10096_vm1  ;;  %v2325_v60 = vor.u32 %v2324_v41, %v8499_v14  ;;  %v2338_v14 = vshll.u32 %v8594_v35, 16  ;;  %v2869_v41 = vld [vmem:[#allocation2 + $0x78] sm:$0xf] }
 0x199   :  { %2803 = vrot.lane.b32.xlu1 %v2731_v37, %s6578_s16  ;;  %2582 = vst.msk [vmem:[#allocation3 + $0x4c] sm:$0xf] %vm10094_vm8, %v2531_v32  ;;  %v2010_v51 = vsel %vm6846_vm12, %v2002_v4, %v2009_v43  ;;  %vm10098_vm8 = vcmask 191648   ;;  %v2335_v58 = vor.u32 %v2334_v28, %v8591_v61  ;;  %v2749_v21 = vrot.slane %v2747_v40, 6 }
 0x19a   :  { %2805 = vrot.lane.b32.xlu0 %v2741_v39, %s6578_s16  ;;  %3824 = vst.msk [vmem:[#allocation4 + $0x18] sm:$0xff] %vm10095_vm2, %v3791_v29  ;;  %vm10099_vm2 = vmmov %vm10098_vm8  ;;  %v3342_v39 = vsel %vm6810_vm10, %v3340_v6, %v3341_v1  ;;  %v2326_v56 = vrot.slane %v2325_v60, 4  ;;  %v2512_v29 = vrot.slane %v2453_v52, 5  ;;  %v8612_v54 = vrot.slane %v2338_v14, 5 }
 0x19b   :  { %v2788_v18 = vpop.permute.xlu1 %2787  ;;  %2069 = vst.msk [vmem:[#allocation3 + $0x74] sm:$0xf] %vm293_vm5, %v2010_v51  ;;  %v2336_v17 = vrot.slane %v2335_v58, 4  ;;  %v2928_v40 = vrot.slane %v2869_v41, 6 }
 0x19c   :  { %2840 = vst.msk [vmem:[#allocation3 + $0x48] sm:$0xf] %vm10096_vm1, %v2788_v18  ;;  %v2790_v7 = vpop.permute.xlu0 %2789  ;;  %v3026_v18 = vld [vmem:[#allocation2 + $0x78] sm:$0xf]  ;;  %v2514_v6 = vrot.slane %v2512_v29, 4  ;;  %vm10100_vm1 = vcmask 60448  }
 0x19d   :  { %2960 = vrot.lane.b32.xlu1 %v2923_v45, %s6581_s19  ;;  %2841 = vst.msk [vmem:[#allocation3 + $0x4c] sm:$0xf] %vm10097_vm6, %v2790_v7  ;;  %v2611_v45 = vld [vmem:[#allocation2 + $0x7c] sm:$0xf]  ;;  %v3160_v51 = vshrl.u32 %v3026_v18, 16  ;;  %vm10101_vm6 = vcmask 257026  }
 0x19e   :  { %2962 = vrot.lane.b32.xlu0 %v2926_v53, %s6581_s19  ;;  %v2746_v53 = vrot.slane %v2744_v44, 5  ;;  %v2754_v12 = vshrl.u32 %v2611_v45, 16  ;;  %v2757_v15 = vshll.u32 %v2611_v45, 16  ;;  %v8615_v7 = vld [vmem:[#allocation2 + $0x7c] sm:$0xf]  ;;  %v2742_v44 = vrot.slane %v8533_v36, 4 }
 0x19f   :  { %v2945_v25 = vpop.permute.xlu1 %2944 }
 0x1a0   :  { %2997 = vst.msk [vmem:[#allocation3 + $0x48] sm:$0xf] %vm10098_vm8, %v2945_v25  ;;  %v2947_v37 = vpop.permute.xlu0 %2946  ;;  %v3163_v25 = vshll.u32 %v3026_v18, 16  ;;  %v2750_v28 = vor.u32 %v2749_v21, %v2746_v53  ;;  %v2756_v33 = vrot.slane %v2754_v12, 5  ;;  %v2759_v31 = vrot.slane %v2757_v15, 6  ;;  %vm10102_vm8 = vmmov %vm10100_vm1 }
 0x1a1   :  { %3219 = vrot.lane.b32.xlu1 %v3147_v26, %s6580_s18  ;;  %2998 = vst.msk [vmem:[#allocation3 + $0x4c] sm:$0xf] %vm10099_vm2, %v2947_v37  ;;  %v3860_v38 = vld [vmem:[#allocation4] ss:$4 sm:$0xff]  ;;  %v3868_v47 = vld [vmem:[#allocation4 + $0x1] ss:$4 sm:$0xff]  ;;  %v2331_v26 = vsel %vm6749_vm11, %v2326_v56, %v8591_v61  ;;  %v2341_v37 = vsel %vm6749_vm11, %v2336_v17, %v8612_v54 }
 0x1a2   :  { %v3880_v62 = vld [vmem:[#allocation4 + $0x2] ss:$4 sm:$0xff]  ;;  %3221 = vrot.lane.b32.xlu0 %v3157_v0, %s6580_s18  ;;  %v3875_v46 = vmax.f32 %v3860_v38, %v3868_v47  ;;  %v3888_v20 = vld [vmem:[#allocation4 + $0x3] ss:$4 sm:$0xff]  ;;  %v2515_v61 = vrot.slane %v8615_v7, 5  ;;  %v2513_v38 = vsel %vm6708_vm9, %v2511_v42, %v2512_v29  ;;  %v2927_v47 = vrot.slane %v2925_v49, 4 }
 0x1a3   :  { %v3204_v8 = vpop.permute.xlu1 %3203  ;;  %v3895_v32 = vmax.f32 %v3880_v62, %v3888_v20  ;;  %v8640_v62 = vld [vmem:[#allocation2 + $0x7c] sm:$0xf]  ;;  %vm10103_vm2 = vcmask 93248   ;;  %v2752_v14 = vrot.slane %v2750_v28, 4  ;;  %v8648_v52 = vor.u32 %v2759_v31, %v2756_v33  ;;  %v8659_v18 = vld [vmem:[#allocation2 + $0x78] sm:$0xf] }
 0x1a4   :  { %3256 = vst.msk [vmem:[#allocation3 + $0x48] sm:$0xf] %vm1606_vm13, %v3204_v8  ;;  %v3206_v10 = vpop.permute.xlu0 %3205  ;;  %v3162_v8 = vrot.slane %v3160_v51, 6  ;;  %v2516_v36 = vsel %vm6708_vm9, %v2514_v6, %v2515_v61  ;;  %v1884_v49 = vld [vmem:[#allocation2 + $0x7c] sm:$0xf]  ;;  %v2931_v56 = vrot.slane %v8640_v62, 6  ;;  %v2751_v29 = vsel %vm6767_vm14, %v2742_v44, %v2750_v28 }
 0x1a5   :  { %3376 = vrot.lane.b32.xlu1 %v3339_v30, %s6582_s20  ;;  %3257 = vst.msk [vmem:[#allocation3 + $0x4c] sm:$0xf] %vm1606_vm13, %v3206_v10  ;;  %v3899_v19 = vmax.f32 %v3875_v46, %v3895_v32  ;;  %v3027_v30 = vld [vmem:[#allocation2 + $0x7c] sm:$0xf]  ;;  %v3165_v46 = vrot.slane %v3163_v25, 7  ;;  %v2929_v53 = vsel %vm6654_vm4, %v2927_v47, %v2928_v40  ;;  %v2342_v42 = vshrl.u32 %v8594_v35, 16 }
 0x1a6   :  { %3378 = vrot.lane.b32.xlu0 %v3342_v39, %s6582_s20  ;;  %v3170_v39 = vshrl.u32 %v3027_v30, 16  ;;  %v3173_v58 = vshll.u32 %v3027_v30, 16  ;;  %v2761_v51 = vsel %vm6767_vm14, %v2752_v14, %v8648_v52  ;;  %v2196_v25 = vld [vmem:[#allocation2 + $0x80] sm:$0xf]  ;;  %v2011_v33 = vrot.slane %v8563_v24, 4 }
 0x1a7   :  { %v3361_v5 = vpop.permute.xlu1 %3360  ;;  %v6261_v4 = vpack.c.bf16 %v3899_v19, %v3899_v19  ;;  %v2013_v19 = vshrl.u32 %v1884_v49, 16  ;;  %v3166_v21 = vor.u32 %v3165_v46, %v3162_v8  ;;  %v2348_v46 = vshll.u32 %v2196_v25, 16 }
 0x1a8   :  { %3413 = vst.msk [vmem:[#allocation3 + $0x48] sm:$0xf] %vm9979_vm0, %v3361_v5  ;;  %v3363_v43 = vpop.permute.xlu0 %3362  ;;  %v3172_v12 = vrot.slane %v3170_v39, 6  ;;  %v3175_v15 = vrot.slane %v3173_v58, 7  ;;  %v8688_v39 = vld [vmem:[#allocation2 + $0x7c] sm:$0xf] }
 0x1a9   :  { %2132 = vrot.lane.b32.xlu1 %v2086_v22, %s6577_s15  ;;  %3414 = vst.msk [vmem:[#allocation3 + $0x4c] sm:$0xf] %vm9979_vm0, %v3363_v43  ;;  %v8623_v9 = vrot.slane %v6261_v4, 6  ;;  %v2930_v22 = vrot.slane %v2928_v40, 4  ;;  %v2015_v4 = vrot.slane %v2013_v19, 7  ;;  %v2016_v43 = vshll.u32 %v1884_v49, 16 }
 0x1aa   :  { %2134 = vrot.lane.b32.xlu0 %v2087_v34, %s6577_s15  ;;  %v8683_v8 = vor.u32 %v3175_v15, %v3172_v12  ;;  %v2352_v58 = vshrl.u32 %v2196_v25, 16  ;;  %v2455_v15 = vld [vmem:[#allocation2 + $0x80] sm:$0xf] }
 0x1ab   :  { %v2117_v0 = vpop.permute.xlu1 %2116  ;;  %3931 = vst.msk [vmem:[#allocation5] sm:$0xc] %vm10101_vm6, %v8623_v9  ;;  %vm10105_vm6 = vcmask 261120   ;;  %v2932_v35 = vsel %vm6654_vm4, %v2930_v22, %v2931_v56  ;;  %v2018_v31 = vor.u32 %v2016_v43, %v2015_v4  ;;  %v2344_v22 = vrot.slane %v2342_v42, 4 }
 0x1ac   :  { %2167 = vst.msk [vmem:[#allocation3 + $0x50] sm:$0xf] %vm10100_vm1, %v2117_v0  ;;  %v2119_v60 = vpop.permute.xlu0 %2118  ;;  %vm10104_vm1 = vmmov %vm10103_vm2 }
 0x1ad   :  { %2391 = vrot.lane.b32.xlu1 %v2331_v26, %s6579_s17  ;;  %2168 = vst.msk [vmem:[#allocation3 + $0x54] sm:$0xf] %vm10102_vm8, %v2119_v60  ;;  %v1885_v26 = vld [vmem:[#allocation2 + $0x80] sm:$0xf]  ;;  %vm10106_vm8 = vcmask 126048   ;;  %v3168_v60 = vrot.slane %v3166_v21, 4  ;;  %v2019_v24 = vsel %vm6846_vm12, %v2011_v33, %v2018_v31 }
 0x1ae   :  { %2393 = vrot.lane.b32.xlu0 %v2341_v37, %s6579_s17  ;;  %v2022_v0 = vshrl.u32 %v1885_v26, 16  ;;  %v3344_v37 = vrot.slane %v8659_v18, 7  ;;  %v2025_v40 = vshll.u32 %v1885_v26, 16  ;;  %2070 = vst.msk [vmem:[#allocation3 + $0x78] sm:$0xf] %vm293_vm5, %v2019_v24 }
 0x1af   :  { %v2376_v20 = vpop.permute.xlu1 %2375  ;;  %v3177_v23 = vsel %vm6795_vm3, %v3168_v60, %v8683_v8  ;;  %v8712_v18 = vld [vmem:[#allocation2 + $0x84] sm:$0x3] }
 0x1b0   :  { %2426 = vst.msk [vmem:[#allocation3 + $0x50] sm:$0xf] %vm10103_vm2, %v2376_v20  ;;  %v2378_v32 = vpop.permute.xlu0 %2377  ;;  %v3670_v10 = vpop.f32.mrf.mxu0  ;;  %v6492_v45 = vld [vmem:[#allocation3 + $0x48] sm:$0xff]   ;;  %vm10107_vm2 = vmmov %vm10105_vm6  ;;  %v8680_v44 = vrot.slane %v2022_v0, 7  ;;  %v3346_v27 = vrot.slane %v3344_v37, 4 }
 0x1b1   :  { %2548 = vrot.lane.b32.xlu1 %v2513_v38, %s6583_s21  ;;  %2427 = vst.msk [vmem:[#allocation3 + $0x54] sm:$0xf] %vm10104_vm1, %v2378_v32  ;;  %v3671_v5 = vadd.f32 %v8397_v48, %v3670_v10  ;;  %6437 = vmatmul.mubr.msk.bf16.gmra.mxu0 %vm10105_vm6, %v6492_v45  ;;  %vm10108_vm1 = vmmov %vm10106_vm8  ;;  %vm9980_vm6 = vcmask 257024   ;;  %v3167_v10 = vsel %vm6795_vm3, %v3158_v11, %v3166_v21  ;;  %v3343_v45 = vrot.slane %v3341_v1, 4 }
 0x1b2   :  { %2550 = vrot.lane.b32.xlu0 %v2516_v36, %s6583_s21  ;;  %v6410_v17 = vpop.f32.mrf.mxu0  ;;  %6440 = vmatprep.mubr.msk.bf16.mxu0 %vm10010_vm15, %v6584_v63  ;;  %v2020_v36 = vrot.slane %v2015_v4, 4  ;;  %v2027_v14 = vor.u32 %v2025_v40, %v8680_v44  ;;  %v4015_v32 = vld [vmem:[#allocation5] sm:$0xf]  ;;  %v2350_v1 = vrot.slane %v2348_v46, 5  ;;  %v2354_v11 = vrot.slane %v2352_v58, 4 }
 0x1b3   :  { %v2533_v34 = vpop.permute.xlu1 %2532  ;;  %v3792_v41 = vmax.f32 %v3671_v5, 0.0  ;;  %4020 = vst.msk [vmem:[#allocation6] sm:$0xf] %vm9980_vm6, %v4015_v32  ;;  %v2345_v17 = vor.u32 %v2344_v22, %v8612_v54  ;;  %v2088_v54 = vld [vmem:[#allocation2 + $0x7c] sm:$0xf] }
 0x1b4   :  { %2583 = vst.msk [vmem:[#allocation3 + $0x50] sm:$0xf] %vm10106_vm8, %v2533_v34  ;;  %v2535_v6 = vpop.permute.xlu0 %2534  ;;  %v3673_v28 = vpop.f32.mrf.mxu0  ;;  %vm10109_vm8 = vcmask 158848   ;;  %v2028_v19 = vsel %vm6846_vm12, %v2020_v36, %v2027_v14  ;;  %v3345_v34 = vsel %vm6810_vm10, %v3343_v45, %v3344_v37  ;;  %v2355_v42 = vor.u32 %v2354_v11, %v2350_v1  ;;  %v3028_v46 = vld [vmem:[#allocation2 + $0x80] sm:$0xf] }
 0x1b5   :  { %2807 = vrot.lane.b32.xlu1 %v2751_v29, %s6578_s16  ;;  %3825 = vst.msk [vmem:[#allocation4 + $0x20] sm:$0xff] %vm10107_vm2, %v3792_v41  ;;  %v3674_v30 = vadd.f32 %v8397_v48, %v3673_v28  ;;  %v3347_v29 = vrot.slane %v8688_v39, 7  ;;  %v2358_v41 = vshll.u32 %v8712_v18, 16  ;;  %v2346_v0 = vrot.slane %v2345_v17, 4  ;;  %v2871_v22 = vld [vmem:[#allocation2 + $0x80] sm:$0xf] }
 0x1b6   :  { %2584 = vst.msk [vmem:[#allocation3 + $0x54] sm:$0xf] %vm10108_vm1, %v2535_v6  ;;  %2809 = vrot.lane.b32.xlu0 %v2761_v51, %s6578_s16  ;;  %v6411_v47 = vpop.f32.mrf.mxu0  ;;  %vm10110_vm1 = vmmov %vm10109_vm8  ;;  %v2613_v51 = vld [vmem:[#allocation2 + $0x84] sm:$0x7]  ;;  %v2518_v6 = vrot.slane %v2455_v15, 5  ;;  %v2356_v60 = vrot.slane %v2355_v42, 4 }
 0x1b7   :  { %v2792_v38 = vpop.permute.xlu1 %2791  ;;  %v3793_v20 = vmax.f32 %v3674_v30, 0.0  ;;  %2071 = vst.msk [vmem:[#allocation3 + $0x7c] sm:$0xf] %vm293_vm5, %v2028_v19  ;;  %v3348_v26 = vsel %vm6810_vm10, %v3346_v27, %v3347_v29  ;;  %v2774_v33 = vshrl.u32 %v2613_v51, 16  ;;  %v2777_v31 = vshll.u32 %v2613_v51, 16 }
 0x1b8   :  { %2842 = vst.msk [vmem:[#allocation3 + $0x50] sm:$0xf] %vm10109_vm8, %v2792_v38  ;;  %v2794_v49 = vpop.permute.xlu0 %2793  ;;  %vm10111_vm8 = vcmask 191648   ;;  %v2089_v30 = vld [vmem:[#allocation2 + $0x80] sm:$0xf]  ;;  %v8729_v40 = vrot.slane %v2358_v41, 5  ;;  %v2351_v24 = vsel %vm6749_vm11, %v2346_v0, %v2350_v1 }
 0x1b9   :  { %2964 = vrot.lane.b32.xlu1 %v2929_v53, %s6581_s19  ;;  %3826 = vst.msk [vmem:[#allocation4 + $0x28] sm:$0xff] %vm10107_vm2, %v3793_v20  ;;  %v2612_v53 = vld [vmem:[#allocation2 + $0x80] sm:$0xf]  ;;  %vm10112_vm2 = vmmov %vm10111_vm8  ;;  %v8731_v38 = vld [vmem:[#allocation2 + $0x84] sm:$0x3]  ;;  %v2517_v20 = vrot.slane %v2515_v61, 4 }
 0x1ba   :  { %2843 = vst.msk [vmem:[#allocation3 + $0x54] sm:$0xf] %vm10110_vm1, %v2794_v49  ;;  %2966 = vrot.lane.b32.xlu0 %v2932_v35, %s6581_s19  ;;  %v2764_v4 = vshrl.u32 %v2612_v53, 16  ;;  %v2767_v43 = vshll.u32 %v2612_v53, 16  ;;  %v2520_v58 = vrot.slane %v2518_v6, 4  ;;  %v2521_v14 = vrot.slane %v8731_v38, 5 }
 0x1bb   :  { %v2949_v5 = vpop.permute.xlu1 %2948  ;;  %v2776_v32 = vrot.slane %v2774_v33, 5  ;;  %vm10113_vm5 = vcmask 60448   ;;  %v2361_v45 = vsel %vm6749_vm11, %v2356_v60, %v8729_v40  ;;  %v3180_v19 = vshrl.u32 %v3028_v46, 16  ;;  %v3029_v61 = vld [vmem:[#allocation2 + $0x84] sm:$0xf] }
 0x1bc   :  { %2999 = vst.msk [vmem:[#allocation3 + $0x50] sm:$0xf] %vm10111_vm8, %v2949_v5  ;;  %v2951_v21 = vpop.permute.xlu0 %2950  ;;  %v2766_v35 = vrot.slane %v2764_v4, 5  ;;  %v2769_v37 = vrot.slane %v2767_v43, 6  ;;  %v3183_v5 = vshll.u32 %v3028_v46, 16  ;;  %vm10114_vm1 = vmmov %vm10113_vm5  ;;  %v2762_v27 = vrot.slane %v8648_v52, 4 }
 0x1bd   :  { %3223 = vrot.lane.b32.xlu1 %v3167_v10, %s6580_s18  ;;  %3000 = vst.msk [vmem:[#allocation3 + $0x54] sm:$0xf] %vm10112_vm2, %v2951_v21  ;;  %v2779_v10 = vrot.slane %v2777_v31, 6  ;;  %v2522_v11 = vsel %vm6708_vm9, %v2520_v58, %v2521_v14  ;;  %vm10115_vm8 = vcmask 93248   ;;  %v8758_v17 = vld [vmem:[#allocation2 + $0x84] sm:$0x7] }
 0x1be   :  { %3225 = vrot.lane.b32.xlu0 %v3177_v23, %s6580_s18  ;;  %v2770_v49 = vor.u32 %v2769_v37, %v2766_v35  ;;  %v2519_v23 = vsel %vm6708_vm9, %v2517_v20, %v2518_v6  ;;  %v3185_v15 = vrot.slane %v3183_v5, 7  ;;  %v3190_v4 = vshrl.u32 %v3029_v61, 16  ;;  %vm10116_vm2 = vmmov %vm10115_vm8  ;;  %v1886_v37 = vld [vmem:[#allocation2 + $0x84] sm:$0x1] }
 0x1bf   :  { %v3208_v12 = vpop.permute.xlu1 %3207  ;;  %v8755_v21 = vor.u32 %v2779_v10, %v2776_v32  ;;  %v3193_v52 = vshll.u32 %v3029_v61, 16  ;;  %v2933_v41 = vrot.slane %v2931_v56, 4  ;;  %v2937_v6 = vrot.slane %v8758_v17, 6  ;;  %v3288_v5 = vld [vmem:[#allocation2 + $0x84] sm:$0xf] }
 0x1c0   :  { %3258 = vst.msk [vmem:[#allocation3 + $0x50] sm:$0xf] %vm1606_vm13, %v3208_v12  ;;  %v3210_v25 = vpop.permute.xlu0 %3209  ;;  %v2772_v53 = vrot.slane %v2770_v49, 4  ;;  %v3182_v12 = vrot.slane %v3180_v19, 6  ;;  %v2771_v42 = vsel %vm6767_vm14, %v2762_v27, %v2770_v49  ;;  %v3192_v62 = vrot.slane %v3190_v4, 6 }
 0x1c1   :  { %3380 = vrot.lane.b32.xlu1 %v3345_v34, %s6582_s20  ;;  %3259 = vst.msk [vmem:[#allocation3 + $0x54] sm:$0xf] %vm1606_vm13, %v3210_v25  ;;  %v2934_v34 = vrot.slane %v2871_v22, 6  ;;  %v3195_v56 = vrot.slane %v3193_v52, 7  ;;  %v2029_v60 = vrot.slane %v8680_v44, 4  ;;  %v2362_v20 = vshrl.u32 %v8712_v18, 16 }
 0x1c2   :  { %3382 = vrot.lane.b32.xlu0 %v3348_v26, %s6582_s20  ;;  %v3186_v35 = vor.u32 %v3185_v15, %v3182_v12  ;;  %v3916_v38 = vrot.slane %v8623_v9, 4 }
 0x1c3   :  { %v3365_v28 = vpop.permute.xlu1 %3364  ;;  %v2936_v0 = vrot.slane %v2934_v34, 4  ;;  %v8798_v10 = vor.u32 %v3195_v56, %v3192_v62  ;;  %v2364_v27 = vrot.slane %v2362_v20, 4 }
 0x1c4   :  { %3415 = vst.msk [vmem:[#allocation3 + $0x50] sm:$0xf] %vm9979_vm0, %v3365_v28  ;;  %v3367_v47 = vpop.permute.xlu0 %3366  ;;  %v3188_v32 = vrot.slane %v3186_v35, 4 }
 0x1c5   :  { %2136 = vrot.lane.b32.xlu1 %v2088_v54, %s6577_s15  ;;  %3416 = vst.msk [vmem:[#allocation3 + $0x54] sm:$0xf] %vm9979_vm0, %v3367_v47  ;;  %v2781_v54 = vsel %vm6767_vm14, %v2772_v53, %v8755_v21  ;;  %v2031_v47 = vshll.u32 %v1886_v37, 16  ;;  %v2938_v44 = vsel %vm6654_vm4, %v2936_v0, %v2937_v6  ;;  %v2782_v37 = vrot.slane %v8755_v21, 4 }
 0x1c6   :  { %2138 = vrot.lane.b32.xlu0 %v2089_v30, %s6577_s15  ;;  %v3287_v30 = vld [vmem:[#allocation2 + $0x80] sm:$0xf]  ;;  %v3198_v21 = vrot.slane %v8798_v10, 4 }
 0x1c7   :  { %v2121_v36 = vpop.permute.xlu1 %2120  ;;  %v2033_v49 = vsel %vm6846_vm12, %v2029_v60, %v2031_v47 }
 0x1c8   :  { %2169 = vst.msk [vmem:[#allocation3 + $0x58] sm:$0xf] %vm10113_vm5, %v2121_v36  ;;  %v2123_v7 = vpop.permute.xlu0 %2122  ;;  %vm10117_vm5 = vcmask 261120  }
 0x1c9   :  { %2395 = vrot.lane.b32.xlu1 %v2351_v24, %s6579_s17  ;;  %2170 = vst.msk [vmem:[#allocation3 + $0x5c] sm:$0xf] %vm10114_vm1, %v2123_v7  ;;  %vm10118_vm1 = vcmask 126048   ;;  %v3178_v24 = vrot.slane %v8683_v8, 4  ;;  %v8795_v8 = vld [vmem:[%s9948_s2] ss:$0 sm:$0xff] }
 0x1ca   :  { %2397 = vrot.lane.b32.xlu0 %v2361_v45, %s6579_s17  ;;  %v3350_v45 = vrot.slane %v3287_v30, 7  ;;  %v2939_v30 = vrot.slane %v2937_v6, 4 }
 0x1cb   :  { %v2380_v1 = vpop.permute.xlu1 %2379  ;;  %v3187_v61 = vsel %vm6795_vm3, %v3178_v24, %v3186_v35  ;;  %v2523_v35 = vrot.slane %v2521_v14, 4 }
 0x1cc   :  { %2428 = vst.msk [vmem:[#allocation3 + $0x58] sm:$0xf] %vm10115_vm8, %v2380_v1  ;;  %v2382_v43 = vpop.permute.xlu0 %2381  ;;  %v6493_v26 = vld [vmem:[#allocation3 + $0x50] sm:$0xff]   ;;  %vm10119_vm8 = vmmov %vm10118_vm1  ;;  %v3352_v53 = vrot.slane %v3350_v45, 4 }
 0x1cd   :  { %2552 = vrot.lane.b32.xlu1 %v2519_v23, %s6583_s21  ;;  %2429 = vst.msk [vmem:[#allocation3 + $0x5c] sm:$0xf] %vm10116_vm2, %v2382_v43  ;;  %6441 = vmatmul.mubr.msk.bf16.gmra.mxu0 %vm10117_vm5, %v6493_v26  ;;  %vm10120_vm2 = vmmov %vm10117_vm5  ;;  %vm10121_vm5 = vcmask 158848   ;;  %v3349_v23 = vrot.slane %v3347_v29, 4  ;;  %v2365_v29 = vor.u32 %v2364_v27, %v8729_v40  ;;  %v2090_v43 = vld [vmem:[#allocation2 + $0x84] sm:$0x1] }
 0x1ce   :  { %2554 = vrot.lane.b32.xlu0 %v2522_v11, %s6583_s21  ;;  %v3678_v25 = vpop.f32.mrf.mxu0  ;;  %6444 = vmatprep.mubr.msk.bf16.mxu0 %vm10010_vm15, %v6584_v63  ;;  %v3197_v11 = vsel %vm6795_vm3, %v3188_v32, %v8798_v10 }
 0x1cf   :  { %v2537_v51 = vpop.permute.xlu1 %2536  ;;  %v3679_v28 = vadd.f32 %v8397_v48, %v3678_v25  ;;  %v2935_v48 = vsel %vm6654_vm4, %v2933_v41, %v2934_v34  ;;  %v3353_v34 = vrot.slane %v3288_v5, 7  ;;  %v3351_v39 = vsel %vm6810_vm10, %v3349_v23, %v3350_v45 }
 0x1d0   :  { %2585 = vst.msk [vmem:[#allocation3 + $0x58] sm:$0xf] %vm10118_vm1, %v2537_v51  ;;  %v2539_v33 = vpop.permute.xlu0 %2538  ;;  %v6414_v31 = vpop.f32.mrf.mxu0  ;;  %vm10122_vm1 = vcmask 24576   ;;  %v2366_v26 = vrot.slane %v2365_v29, 4 }
 0x1d1   :  { %2811 = vrot.lane.b32.xlu1 %v2771_v42, %s6578_s16  ;;  %v3794_v46 = vmax.f32 %v3679_v28, 0.0  ;;  %2586 = vst.msk [vmem:[#allocation3 + $0x5c] sm:$0xf] %vm10119_vm8, %v2539_v33  ;;  %vm10123_vm8 = vmmov %vm10121_vm5  ;;  %v3354_v4 = vsel %vm6810_vm10, %v3352_v53, %v3353_v34 }
 0x1d2   :  { %2813 = vrot.lane.b32.xlu0 %v2781_v54, %s6578_s16  ;;  %v3681_v36 = vpop.f32.mrf.mxu0  ;;  %2073 = vst.msk [vmem:[#allocation3 + $0x80] sm:$0x1] %vm10122_vm1, %v2033_v49 }
 0x1d3   :  { %v2796_v58 = vpop.permute.xlu1 %2795  ;;  %3827 = vst.msk [vmem:[#allocation4 + $0x30] sm:$0xff] %vm10120_vm2, %v3794_v46  ;;  %v3682_v18 = vadd.f32 %v8795_v8, %v3681_v36 }
 0x1d4   :  { %2844 = vst.msk [vmem:[#allocation3 + $0x58] sm:$0xf] %vm10121_vm5, %v2796_v58  ;;  %v2798_v22 = vpop.permute.xlu0 %2797  ;;  %v6415_v19 = vpop.f32.mrf.mxu0  ;;  %vm10124_vm5 = vcmask 191648  }
 0x1d5   :  { %2968 = vrot.lane.b32.xlu1 %v2935_v48, %s6581_s19  ;;  %v3795_v7 = vmax.f32 %v3682_v18, 0.0  ;;  %2845 = vst.msk [vmem:[#allocation3 + $0x5c] sm:$0xf] %vm10123_vm8, %v2798_v22  ;;  %vm10125_vm1 = vmmov %vm10124_vm5  ;;  %vm10126_vm8 = vcmask 60448   ;;  %v3355_v48 = vrot.slane %v3353_v34, 4 }
 0x1d6   :  { %2970 = vrot.lane.b32.xlu0 %v2938_v44, %s6581_s19 }
 0x1d7   :  { %v2953_v1 = vpop.permute.xlu1 %2952  ;;  %3828 = vst.msk [vmem:[#allocation4 + $0x38] sm:$0xff] %vm10120_vm2, %v3795_v7  ;;  %vm10127_vm2 = vmmov %vm10126_vm8  ;;  %v4235_v7 = vld [vmem:[#allocation5] sm:$0xc] }
 0x1d8   :  { %3001 = vst.msk [vmem:[#allocation3 + $0x58] sm:$0xf] %vm10124_vm5, %v2953_v1  ;;  %v2955_v12 = vpop.permute.xlu0 %2954  ;;  %vm10128_vm5 = vcmask 93248   ;;  %v6137_v27 = vrot.slane %v4235_v7, 10 }
 0x1d9   :  { %3227 = vrot.lane.b32.xlu1 %v3187_v61, %s6580_s18  ;;  %3002 = vst.msk [vmem:[#allocation3 + $0x5c] sm:$0xf] %vm10125_vm1, %v2955_v12  ;;  %vm10129_vm1 = vmmov %vm10128_vm5 }
 0x1da   :  { %3229 = vrot.lane.b32.xlu0 %v3197_v11, %s6580_s18 }
 0x1db   :  { %v3212_v15 = vpop.permute.xlu1 %3211 }
 0x1dc   :  { %3260 = vst.msk [vmem:[#allocation3 + $0x58] sm:$0xf] %vm1606_vm13, %v3212_v15  ;;  %v3214_v52 = vpop.permute.xlu0 %3213 }
 0x1dd   :  { %3384 = vrot.lane.b32.xlu1 %v3351_v39, %s6582_s20  ;;  %3261 = vst.msk [vmem:[#allocation3 + $0x5c] sm:$0xf] %vm1606_vm13, %v3214_v52 }
 0x1de   :  { %v3862_v42 = vld [vmem:[#allocation4 + $0x20] ss:$4 sm:$0xff]  ;;  %v3870_v41 = vld [vmem:[#allocation4 + $0x21] ss:$4 sm:$0xff]  ;;  %v3882_v51 = vld [vmem:[#allocation4 + $0x22] ss:$4 sm:$0xff]  ;;  %3386 = vrot.lane.b32.xlu0 %v3354_v4, %s6582_s20 }
 0x1df   :  { %v3369_v40 = vpop.permute.xlu1 %3368  ;;  %v3876_v25 = vmax.f32 %v3862_v42, %v3870_v41  ;;  %v3890_v54 = vld [vmem:[#allocation4 + $0x23] ss:$4 sm:$0xff] }
 0x1e0   :  { %3417 = vst.msk [vmem:[#allocation3 + $0x58] sm:$0xf] %vm9979_vm0, %v3369_v40  ;;  %v3896_v0 = vmax.f32 %v3882_v51, %v3890_v54  ;;  %v3371_v28 = vpop.permute.xlu0 %3370 }
 0x1e1   :  { %2140 = vrot.lane.b32.xlu1 %v2090_v43, %s6577_s15  ;;  %3418 = vst.msk [vmem:[#allocation3 + $0x5c] sm:$0xf] %vm9979_vm0, %v3371_v28  ;;  %vm10137_vm0 = vmmov %vm10135_vm7  ;;  %s6586_s15 = smov 32  }
 0x1e2   :  { %v3900_v62 = vmax.f32 %v3876_v25, %v3896_v0  ;;  %2399 = vrot.lane.b32.xlu0 %v2366_v26, %s6579_s17  ;;  %s6588_s17 = smov 96  }
 0x1e3   :  { %v2125_v56 = vpop.permute.xlu1 %2124 }
 0x1e4   :  { %2171 = vst.msk [vmem:[#allocation3 + $0x60] sm:$0xf] %vm10126_vm8, %v2125_v56  ;;  %v6262_v33 = vpack.c.bf16 %v3900_v62, %v3900_v62  ;;  %v2127_v31 = vpop.permute.xlu0 %2126  ;;  %vm10130_vm8 = vcmask 261120  }
 0x1e5   :  { %2556 = vrot.lane.b32.xlu1 %v2523_v35, %s6583_s21  ;;  %2172 = vst.msk [vmem:[#allocation3 + $0x64] sm:$0xf] %vm10127_vm2, %v2127_v31  ;;  %vm10131_vm2 = vcmask 126048  }
 0x1e6   :  { %v8838_v14 = vrot.slane %v6262_v33, 6  ;;  %2815 = vrot.lane.b32.xlu0 %v2782_v37, %s6578_s16  ;;  %s6587_s16 = smov 64  }
 0x1e7   :  { %v2384_v60 = vpop.permute.xlu1 %2383 }
 0x1e8   :  { %2430 = vst.msk [vmem:[#allocation3 + $0x60] sm:$0xf] %vm10128_vm5, %v2384_v60  ;;  %v2386_v47 = vpop.permute.xlu0 %2385  ;;  %v6494_v46 = vld [vmem:[#allocation3 + $0x58] sm:$0xff]   ;;  %v3918_v17 = vsel %vm6654_vm4, %v3916_v38, %v8838_v14  ;;  %vm10132_vm5 = vmmov %vm10131_vm2 }
 0x1e9   :  { %2972 = vrot.lane.b32.xlu1 %v2939_v30, %s6581_s19  ;;  %2431 = vst.msk [vmem:[#allocation3 + $0x64] sm:$0xf] %vm10129_vm1, %v2386_v47  ;;  %6445 = vmatmul.mubr.msk.bf16.gmra.mxu0 %vm10130_vm8, %v6494_v46  ;;  %vm10133_vm1 = vcmask 158848  }
 0x1ea   :  { %3933 = vst.msk [vmem:[#allocation5 + $0x4] sm:$0xf] %vm9980_vm6, %v3918_v17  ;;  %3231 = vrot.lane.b32.xlu0 %v3198_v21, %s6580_s18  ;;  %6448 = vmatprep.mubr.msk.bf16.mxu0 %vm10010_vm15, %v6584_v63 }
 0x1eb   :  { %v2541_v9 = vpop.permute.xlu1 %2540 }
 0x1ec   :  { %2587 = vst.msk [vmem:[#allocation3 + $0x60] sm:$0xf] %vm10131_vm2, %v2541_v9  ;;  %v2543_v6 = vpop.permute.xlu0 %2542  ;;  %v3686_v24 = vpop.f32.mrf.mxu0  ;;  %vm10134_vm2 = vmmov %vm10133_vm1 }
 0x1ed   :  { %3388 = vrot.lane.b32.xlu1 %v3355_v48, %s6582_s20  ;;  %2588 = vst.msk [vmem:[#allocation3 + $0x64] sm:$0xf] %vm10132_vm5, %v2543_v6  ;;  %v3687_v20 = vadd.f32 %v8795_v8, %v3686_v24  ;;  %vm10136_vm5 = vmmov %vm10130_vm8 }
 0x1ee   :  { %v6418_v36 = vpop.f32.mrf.mxu0 }
 0x1ef   :  { %v2800_v58 = vpop.permute.xlu1 %2799  ;;  %v3796_v44 = vmax.f32 %v3687_v20, 0.0 }
 0x1f0   :  { %2846 = vst.msk [vmem:[#allocation3 + $0x60] sm:$0xf] %vm10133_vm1, %v2800_v58  ;;  %v2802_v49 = vpop.permute.xlu0 %2801  ;;  %v3689_v18 = vpop.f32.mrf.mxu0  ;;  %vm10140_vm1 = vcmask 60448  }
 0x1f1   :  { %3829 = vst.msk [vmem:[#allocation4 + $0x40] sm:$0xff] %vm10130_vm8, %v3796_v44  ;;  %v3690_v32 = vadd.f32 %v8795_v8, %v3689_v18  ;;  %v4016_v5 = vld [vmem:[#allocation5 + $0x4] sm:$0xf]  ;;  %vm10141_vm8 = vmmov %vm10140_vm1 }
 0x1f2   :  { %2847 = vst.msk [vmem:[#allocation3 + $0x64] sm:$0xf] %vm10134_vm2, %v2802_v49  ;;  %v6419_v45 = vpop.f32.mrf.mxu0  ;;  %v8865_v61 = vld [vmem:[#allocation5 + $0x4] sm:$0xf]  ;;  %vm10142_vm2 = vcmask 93248   ;;  %v3919_v49 = vrot.slane %v8838_v14, 4 }
 0x1f3   :  { %v2957_v10 = vpop.permute.xlu1 %2956  ;;  %v3797_v22 = vmax.f32 %v3690_v32, 0.0  ;;  %4021 = vst.msk [vmem:[#allocation6 + $0x8] sm:$0xf] %vm9980_vm6, %v4016_v5  ;;  %v4247_v1 = vrot.slane %v8865_v61, 6 }
 0x1f4   :  { %3003 = vst.msk [vmem:[#allocation3 + $0x60] sm:$0xf] %vm10135_vm7, %v2957_v10  ;;  %v2959_v19 = vpop.permute.xlu0 %2958 }
 0x1f5   :  { %3830 = vst.msk [vmem:[#allocation4 + $0x48] sm:$0xff] %vm10136_vm5, %v3797_v22  ;;  %v4248_v53 = vsel %vm6654_vm4, %v6137_v27, %v4247_v1  ;;  %vm10143_vm5 = vmmov %vm10142_vm2 }
 0x1f6   :  { %3004 = vst.msk [vmem:[#allocation3 + $0x64] sm:$0xf] %vm10137_vm0, %v2959_v19  ;;  %vm10138_vm0 = vcmask 257248  }
 0x1f7   :  { %v3216_v23 = vpop.permute.xlu1 %3215  ;;  %4264 = vst.msk [vmem:[#allocation6 + $0x4] sm:$0xf] %vm9980_vm6, %v4248_v53  ;;  %vm10139_vm7 = vmmov %vm10138_vm0  ;;  %vm10144_vm6 = vcmask 261120  }
 0x1f8   :  { %3262 = vst.msk [vmem:[#allocation3 + $0x60] sm:$0xf] %vm1606_vm13, %v3216_v23  ;;  %v3218_v11 = vpop.permute.xlu0 %3217 }
 0x1f9   :  { %3263 = vst.msk [vmem:[#allocation3 + $0x64] sm:$0xf] %vm1606_vm13, %v3218_v11 }
 0x1fb   :  { %v3373_v34 = vpop.permute.xlu1 %3372 }
 0x1fc   :  { %3419 = vst.msk [vmem:[#allocation3 + $0x60] sm:$0xf] %vm10138_vm0, %v3373_v34  ;;  %v3375_v12 = vpop.permute.xlu0 %3374  ;;  %vm10145_vm0 = vcmask 126048  }
 0x1fd   :  { %3420 = vst.msk [vmem:[#allocation3 + $0x64] sm:$0xf] %vm10139_vm7, %v3375_v12  ;;  %vm10146_vm7 = vmmov %vm10145_vm0 }
 0x1ff   :  { %v2129_v39 = vpop.permute.xlu1 %2128 }
 0x200   :  { %2173 = vst.msk [vmem:[#allocation3 + $0x68] sm:$0xf] %vm10140_vm1, %v2129_v39  ;;  %v2131_v29 = vpop.permute.xlu0 %2130  ;;  %vm10147_vm1 = vcmask 158848  }
 0x201   :  { %2174 = vst.msk [vmem:[#allocation3 + $0x6c] sm:$0xf] %vm10141_vm8, %v2131_v29  ;;  %vm10148_vm8 = vmmov %vm10147_vm1 }
 0x203   :  { %v2388_v15 = vpop.permute.xlu1 %2387 }
 0x204   :  { %2432 = vst.msk [vmem:[#allocation3 + $0x68] sm:$0xf] %vm10142_vm2, %v2388_v15  ;;  %v2390_v4 = vpop.permute.xlu0 %2389  ;;  %v6495_v52 = vld [vmem:[#allocation3 + $0x60] sm:$0xff]   ;;  %vm10149_vm2 = vcmask 191648  }
 0x205   :  { %2433 = vst.msk [vmem:[#allocation3 + $0x6c] sm:$0xf] %vm10143_vm5, %v2390_v4  ;;  %6449 = vmatmul.mubr.msk.bf16.gmra.mxu0 %vm10144_vm6, %v6495_v52  ;;  %vm10150_vm5 = vmmov %vm10149_vm2 }
 0x206   :  { %6452 = vmatprep.mubr.msk.bf16.mxu0 %vm10010_vm15, %v6584_v63 }
 0x207   :  { %v2545_v43 = vpop.permute.xlu1 %2544 }
 0x208   :  { %2589 = vst.msk [vmem:[#allocation3 + $0x68] sm:$0xf] %vm10145_vm0, %v2545_v43  ;;  %v2547_v26 = vpop.permute.xlu0 %2546  ;;  %vm10151_vm0 = vmmov %vm10144_vm6 }
 0x209   :  { %2590 = vst.msk [vmem:[#allocation3 + $0x6c] sm:$0xf] %vm10146_vm7, %v2547_v26  ;;  %v3694_v41 = vpop.f32.mrf.mxu0  ;;  %vm10152_vm7 = vcmask 257248   ;;  %v4249_v26 = vrot.slane %v4247_v1, 4 }
 0x20a   :  { %v3695_v51 = vadd.f32 %v8795_v8, %v3694_v41 }
 0x20b   :  { %v2804_v42 = vpop.permute.xlu1 %2803  ;;  %v6422_v25 = vpop.f32.mrf.mxu0 }
 0x20c   :  { %2848 = vst.msk [vmem:[#allocation3 + $0x68] sm:$0xf] %vm10147_vm1, %v2804_v42  ;;  %v2806_v40 = vpop.permute.xlu0 %2805  ;;  %v3798_v54 = vmax.f32 %v3695_v51, 0.0  ;;  %vm10153_vm1 = vmmov %vm10152_vm7 }
 0x20d   :  { %2849 = vst.msk [vmem:[#allocation3 + $0x6c] sm:$0xf] %vm10148_vm8, %v2806_v40  ;;  %v3697_v28 = vpop.f32.mrf.mxu0  ;;  %vm10154_vm8 = vcmask 60448  }
 0x20e   :  { %3831 = vst.msk [vmem:[#allocation4 + $0x50] sm:$0xff] %vm10144_vm6, %v3798_v54  ;;  %v3698_v35 = vadd.f32 %v8795_v8, %v3697_v28  ;;  %vm10155_vm6 = vmmov %vm10154_vm8 }
 0x20f   :  { %v2961_v0 = vpop.permute.xlu1 %2960  ;;  %v6423_v56 = vpop.f32.mrf.mxu0 }
 0x210   :  { %3005 = vst.msk [vmem:[#allocation3 + $0x68] sm:$0xf] %vm10149_vm2, %v2961_v0  ;;  %v2963_v62 = vpop.permute.xlu0 %2962  ;;  %v3799_v37 = vmax.f32 %v3698_v35, 0.0  ;;  %vm10156_vm2 = vcmask 93248  }
 0x211   :  { %3006 = vst.msk [vmem:[#allocation3 + $0x6c] sm:$0xf] %vm10150_vm5, %v2963_v62  ;;  %vm10157_vm5 = vmmov %vm10156_vm2 }
 0x212   :  { %3832 = vst.msk [vmem:[#allocation4 + $0x58] sm:$0xff] %vm10151_vm0, %v3799_v37 }
 0x213   :  { %v3220_v33 = vpop.permute.xlu1 %3219 }
 0x214   :  { %3264 = vst.msk [vmem:[#allocation3 + $0x68] sm:$0xf] %vm1606_vm13, %v3220_v33  ;;  %v3222_v31 = vpop.permute.xlu0 %3221 }
 0x215   :  { %3265 = vst.msk [vmem:[#allocation3 + $0x6c] sm:$0xf] %vm1606_vm13, %v3222_v31 }
 0x217   :  { %v3377_v30 = vpop.permute.xlu1 %3376 }
 0x218   :  { %3421 = vst.msk [vmem:[#allocation3 + $0x68] sm:$0xf] %vm10152_vm7, %v3377_v30  ;;  %v3379_v38 = vpop.permute.xlu0 %3378  ;;  %vm10158_vm7 = vcmask 126048  }
 0x219   :  { %3422 = vst.msk [vmem:[#allocation3 + $0x6c] sm:$0xf] %vm10153_vm1, %v3379_v38  ;;  %v3864_v60 = vld [vmem:[#allocation4 + $0x40] ss:$4 sm:$0xff]  ;;  %v3872_v21 = vld [vmem:[#allocation4 + $0x41] ss:$4 sm:$0xff]  ;;  %vm10159_vm1 = vmmov %vm10158_vm7 }
 0x21a   :  { %v3884_v47 = vld [vmem:[#allocation4 + $0x42] ss:$4 sm:$0xff]  ;;  %v3877_v48 = vmax.f32 %v3864_v60, %v3872_v21  ;;  %v3892_v17 = vld [vmem:[#allocation4 + $0x43] ss:$4 sm:$0xff] }
 0x21b   :  { %v2133_v46 = vpop.permute.xlu1 %2132  ;;  %v3897_v9 = vmax.f32 %v3884_v47, %v3892_v17 }
 0x21c   :  { %2175 = vst.msk [vmem:[#allocation3 + $0x70] sm:$0xf] %vm10154_vm8, %v2133_v46  ;;  %v2135_v6 = vpop.permute.xlu0 %2134  ;;  %vm10160_vm8 = vcmask 257024  }
 0x21d   :  { %2176 = vst.msk [vmem:[#allocation3 + $0x74] sm:$0xf] %vm10155_vm6, %v2135_v6  ;;  %v3901_v24 = vmax.f32 %v3877_v48, %v3897_v9  ;;  %vm10161_vm6 = vcmask 158848  }
 0x21f   :  { %v2392_v20 = vpop.permute.xlu1 %2391  ;;  %v6263_v58 = vpack.c.bf16 %v3901_v24, %v3901_v24 }
 0x220   :  { %2434 = vst.msk [vmem:[#allocation3 + $0x70] sm:$0xf] %vm10156_vm2, %v2392_v20  ;;  %v2394_v36 = vpop.permute.xlu0 %2393  ;;  %v6496_v44 = vld [vmem:[#allocation3 + $0x68] sm:$0xff]   ;;  %vm10162_vm2 = vmmov %vm10161_vm6 }
 0x221   :  { %2435 = vst.msk [vmem:[#allocation3 + $0x74] sm:$0xf] %vm10157_vm5, %v2394_v36  ;;  %v8903_v18 = vrot.slane %v6263_v58, 6  ;;  %6453 = vmatmul.mubr.msk.bf16.gmra.mxu0 %vm10151_vm0, %v6496_v44  ;;  %vm10163_vm5 = vcmask 191648  }
 0x222   :  { %6456 = vmatprep.mubr.msk.bf16.mxu0 %vm10010_vm15, %v6584_v63 }
 0x223   :  { %v2549_v32 = vpop.permute.xlu1 %2548  ;;  %v3921_v45 = vsel %vm6654_vm4, %v3919_v49, %v8903_v18 }
 0x224   :  { %2591 = vst.msk [vmem:[#allocation3 + $0x70] sm:$0xf] %vm10158_vm7, %v2549_v32  ;;  %v2551_v10 = vpop.permute.xlu0 %2550  ;;  %vm10164_vm7 = vmmov %vm10163_vm5 }
 0x225   :  { %2592 = vst.msk [vmem:[#allocation3 + $0x74] sm:$0xf] %vm10159_vm1, %v2551_v10  ;;  %vm10165_vm1 = vmmov %vm10151_vm0 }
 0x226   :  { %3934 = vst.msk [vmem:[#allocation5 + $0x8] sm:$0xf] %vm10160_vm8, %v3921_v45 }
 0x227   :  { %v2808_v14 = vpop.permute.xlu1 %2807 }
 0x228   :  { %2850 = vst.msk [vmem:[#allocation3 + $0x70] sm:$0xf] %vm10161_vm6, %v2808_v14  ;;  %v2810_v22 = vpop.permute.xlu0 %2809  ;;  %v3702_v19 = vpop.f32.mrf.mxu0  ;;  %vm10166_vm6 = vcmask 257248  }
 0x229   :  { %2851 = vst.msk [vmem:[#allocation3 + $0x74] sm:$0xf] %vm10162_vm2, %v2810_v22  ;;  %v3703_v5 = vadd.f32 %v8795_v8, %v3702_v19  ;;  %vm10167_vm2 = vmmov %vm10166_vm6 }
 0x22a   :  { %v6426_v23 = vpop.f32.mrf.mxu0 }
 0x22b   :  { %v2965_v7 = vpop.permute.xlu1 %2964  ;;  %v3800_v27 = vmax.f32 %v3703_v5, 0.0 }
 0x22c   :  { %3007 = vst.msk [vmem:[#allocation3 + $0x70] sm:$0xf] %vm10163_vm5, %v2965_v7  ;;  %v2967_v11 = vpop.permute.xlu0 %2966  ;;  %v3705_v53 = vpop.f32.mrf.mxu0  ;;  %vm10168_vm5 = vmmov %vm10160_vm8 }
 0x22d   :  { %3833 = vst.msk [vmem:[#allocation4 + $0x60] sm:$0xff] %vm10151_vm0, %v3800_v27  ;;  %v3706_v34 = vadd.f32 %v8795_v8, %v3705_v53  ;;  %v8922_v4 = vld [vmem:[#allocation5 + $0x8] sm:$0xf]  ;;  %vm10169_vm0 = vcmask 60448  }
 0x22e   :  { %3008 = vst.msk [vmem:[#allocation3 + $0x74] sm:$0xf] %vm10164_vm7, %v2967_v11  ;;  %v6427_v39 = vpop.f32.mrf.mxu0  ;;  %v4017_v52 = vld [vmem:[#allocation5 + $0x8] sm:$0xf]  ;;  %v4250_v42 = vrot.slane %v8922_v4, 6  ;;  %vm10170_vm7 = vmmov %vm10169_vm0 }
 0x22f   :  { %v3224_v12 = vpop.permute.xlu1 %3223  ;;  %v3801_v29 = vmax.f32 %v3706_v34, 0.0  ;;  %4022 = vst.msk [vmem:[#allocation6 + $0x10] sm:$0xf] %vm10160_vm8, %v4017_v52  ;;  %v3922_v52 = vrot.slane %v8903_v18, 4 }
 0x230   :  { %3266 = vst.msk [vmem:[#allocation3 + $0x70] sm:$0xf] %vm1606_vm13, %v3224_v12  ;;  %v3226_v15 = vpop.permute.xlu0 %3225  ;;  %v4251_v51 = vsel %vm6654_vm4, %v4249_v26, %v4250_v42 }
 0x231   :  { %3834 = vst.msk [vmem:[#allocation4 + $0x68] sm:$0xff] %vm10165_vm1, %v3801_v29  ;;  %vm10171_vm1 = vcmask 93248  }
 0x232   :  { %3267 = vst.msk [vmem:[#allocation3 + $0x74] sm:$0xf] %vm1606_vm13, %v3226_v15  ;;  %vm10172_vm8 = vmmov %vm10171_vm1 }
 0x233   :  { %v3381_v43 = vpop.permute.xlu1 %3380  ;;  %4265 = vst.msk [vmem:[#allocation6 + $0xc] sm:$0xf] %vm10168_vm5, %v4251_v51 }
 0x234   :  { %3423 = vst.msk [vmem:[#allocation3 + $0x70] sm:$0xf] %vm10166_vm6, %v3381_v43  ;;  %v3383_v41 = vpop.permute.xlu0 %3382  ;;  %vm10173_vm6 = vcmask 261120  }
 0x235   :  { %3424 = vst.msk [vmem:[#allocation3 + $0x74] sm:$0xf] %vm10167_vm2, %v3383_v41  ;;  %vm10174_vm2 = vcmask 126048  }
 0x236   :  { %vm10175_vm5 = vmmov %vm10174_vm2 }
 0x237   :  { %v2137_v40 = vpop.permute.xlu1 %2136 }
 0x238   :  { %2177 = vst.msk [vmem:[#allocation3 + $0x78] sm:$0xf] %vm10169_vm0, %v2137_v40  ;;  %v2139_v25 = vpop.permute.xlu0 %2138  ;;  %vm10176_vm0 = vcmask 158848   ;;  %v4029_v40 = vld [vmem:[#allocation5] sm:$0xf] }
 0x239   :  { %2178 = vst.msk [vmem:[#allocation3 + $0x7c] sm:$0xf] %vm10170_vm7, %v2139_v25  ;;  %vm10177_vm7 = vmmov %vm10176_vm0  ;;  %v4038_v25 = vshll.u32 %v4029_v40, 16 }
 0x23b   :  { %v2396_v61 = vpop.permute.xlu1 %2395 }
 0x23c   :  { %2436 = vst.msk [vmem:[#allocation3 + $0x78] sm:$0xf] %vm10171_vm1, %v2396_v61  ;;  %v2398_v1 = vpop.permute.xlu0 %2397  ;;  %v6497_v54 = vld [vmem:[#allocation3 + $0x70] sm:$0xff]   ;;  %vm10178_vm1 = vcmask 191648   ;;  %v4271_v61 = vld [vmem:[#allocation5] sm:$0xc] }
 0x23d   :  { %2437 = vst.msk [vmem:[#allocation3 + $0x7c] sm:$0xf] %vm10172_vm8, %v2398_v1  ;;  %6457 = vmatmul.mubr.msk.bf16.gmra.mxu0 %vm10173_vm6, %v6497_v54  ;;  %vm10179_vm8 = vmmov %vm10178_vm1  ;;  %v4277_v54 = vshrl.u32 %v4271_v61, 16 }
 0x23e   :  { %6460 = vmatprep.mubr.msk.bf16.mxu0 %vm10010_vm15, %v6584_v63 }
 0x23f   :  { %v2553_v0 = vpop.permute.xlu1 %2552 }
 0x240   :  { %2593 = vst.msk [vmem:[#allocation3 + $0x78] sm:$0xf] %vm10174_vm2, %v2553_v0  ;;  %v2555_v28 = vpop.permute.xlu0 %2554  ;;  %vm10180_vm2 = vmmov %vm10173_vm6  ;;  %v4030_v0 = vld [vmem:[#allocation5 + $0x4] sm:$0xf] }
 0x241   :  { %2594 = vst.msk [vmem:[#allocation3 + $0x7c] sm:$0xf] %vm10175_vm5, %v2555_v28  ;;  %vm10181_vm5 = vcmask 257248   ;;  %v4040_v28 = vrot.slane %v4038_v25, 5 }
 0x243   :  { %v2812_v35 = vpop.permute.xlu1 %2811 }
 0x244   :  { %2852 = vst.msk [vmem:[#allocation3 + $0x78] sm:$0xf] %vm10176_vm0, %v2812_v35  ;;  %v2814_v62 = vpop.permute.xlu0 %2813  ;;  %vm10182_vm0 = vmmov %vm10181_vm5  ;;  %v4272_v35 = vld [vmem:[#allocation5 + $0x4] sm:$0xf] }
 0x245   :  { %2853 = vst.msk [vmem:[#allocation3 + $0x7c] sm:$0xf] %vm10177_vm7, %v2814_v62  ;;  %v3710_v37 = vpop.f32.mrf.mxu0  ;;  %vm10183_vm7 = vcmask 57376  }
 0x246   :  { %v3711_v33 = vadd.f32 %v8795_v8, %v3710_v37 }
 0x247   :  { %v2969_v56 = vpop.permute.xlu1 %2968  ;;  %v6430_v30 = vpop.f32.mrf.mxu0 }
 0x248   :  { %3009 = vst.msk [vmem:[#allocation3 + $0x78] sm:$0xf] %vm10178_vm1, %v2969_v56  ;;  %v2971_v31 = vpop.permute.xlu0 %2970  ;;  %v3802_v38 = vmax.f32 %v3711_v33, 0.0  ;;  %vm10184_vm1 = vcmask 90176  }
 0x249   :  { %3010 = vst.msk [vmem:[#allocation3 + $0x7c] sm:$0xf] %vm10179_vm8, %v2971_v31  ;;  %v3713_v21 = vpop.f32.mrf.mxu0  ;;  %vm10186_vm8 = vcmask 155776  }
 0x24a   :  { %3835 = vst.msk [vmem:[#allocation4 + $0x70] sm:$0xff] %vm10173_vm6, %v3802_v38  ;;  %v3714_v47 = vadd.f32 %v8795_v8, %v3713_v21  ;;  %vm10187_vm6 = vmmov %vm10180_vm2 }
 0x24b   :  { %v3228_v60 = vpop.permute.xlu1 %3227  ;;  %v6431_v48 = vpop.f32.mrf.mxu0 }
 0x24c   :  { %3268 = vst.msk [vmem:[#allocation3 + $0x78] sm:$0xf] %vm1606_vm13, %v3228_v60  ;;  %v3230_v46 = vpop.permute.xlu0 %3229  ;;  %v3803_v17 = vmax.f32 %v3714_v47, 0.0  ;;  %v4280_v60 = vshll.u32 %v4271_v61, 16  ;;  %v4048_v48 = vshrl.u32 %v4030_v0, 16 }
 0x24d   :  { %3269 = vst.msk [vmem:[#allocation3 + $0x7c] sm:$0xf] %vm1606_vm13, %v3230_v46  ;;  %vm10185_vm13 = vcmask 122976   ;;  %v4044_v46 = vshll.u32 %v4030_v0, 16  ;;  %v4268_v0 = vld [vmem:[#allocation6 + $0x24] sm:$0x1] }
 0x24e   :  { %3836 = vst.msk [vmem:[#allocation4 + $0x78] sm:$0xff] %vm10180_vm2, %v3803_v17 }
 0x24f   :  { %v3385_v9 = vpop.permute.xlu1 %3384 }
 0x250   :  { %3425 = vst.msk [vmem:[#allocation3 + $0x78] sm:$0xf] %vm10181_vm5, %v3385_v9  ;;  %v3387_v6 = vpop.permute.xlu0 %3386  ;;  %vm10188_vm5 = vcmask 188576  }
 0x251   :  { %3426 = vst.msk [vmem:[#allocation3 + $0x7c] sm:$0xf] %vm10182_vm0, %v3387_v6  ;;  %vm10189_vm0 = vcmask 221376   ;;  %v4286_v6 = vshrl.u32 %v4272_v35, 16 }
 0x253   :  { %v2141_v24 = vpop.permute.xlu1 %2140 }
 0x254   :  { %2180 = vst.msk [vmem:[#allocation3 + $0x80] sm:$0x1] %vm10183_vm7, %v2141_v24  ;;  %v2400_v20 = vpop.permute.xlu0 %2399  ;;  %vm10190_vm7 = vmmov %vm10180_vm2 }
 0x255   :  { %2439 = vst.msk [vmem:[#allocation3 + $0x80] sm:$0x1] %vm10184_vm1, %v2400_v20  ;;  %v3866_v58 = vld [vmem:[#allocation4 + $0x60] ss:$4 sm:$0xff]  ;;  %v3874_v36 = vld [vmem:[#allocation4 + $0x61] ss:$4 sm:$0xff]  ;;  %v3718_v32 = vpop.f32.mrf.mxu0 }
 0x256   :  { %v3886_v44 = vld [vmem:[#allocation4 + $0x62] ss:$4 sm:$0xff]  ;;  %v3878_v10 = vmax.f32 %v3866_v58, %v3874_v36  ;;  %v3894_v45 = vld [vmem:[#allocation4 + $0x63] ss:$4 sm:$0xff]  ;;  %v3719_v14 = vadd.f32 %v8795_v8, %v3718_v32  ;;  %vm10191_vm1 = vcmask 254176   ;;  %v4279_v20 = vrot.slane %v4277_v54, 6 }
 0x257   :  { %v2557_v49 = vpop.permute.xlu1 %2556  ;;  %v3898_v22 = vmax.f32 %v3886_v44, %v3894_v45  ;;  %v6434_v5 = vpop.f32.mrf.mxu0  ;;  %v4289_v58 = vshll.u32 %v4272_v35, 16  ;;  %v4282_v45 = vrot.slane %v4280_v60, 7  ;;  %v4108_v60 = vld [vmem:[#allocation5 + $0x4] sm:$0xf] }
 0x258   :  { %2596 = vst.msk [vmem:[#allocation3 + $0x80] sm:$0x1] %vm10185_vm13, %v2557_v49  ;;  %v2816_v19 = vpop.permute.xlu0 %2815  ;;  %v6498_v7 = vld [vmem:[#allocation3 + $0x78] sm:$0xff]   ;;  %v3804_v23 = vmax.f32 %v3719_v14, 0.0  ;;  %vm10193_vm13 = vcmask 254976  }
 0x259   :  { %2855 = vst.msk [vmem:[#allocation3 + $0x80] sm:$0x1] %vm10186_vm8, %v2816_v19  ;;  %v3902_v27 = vmax.f32 %v3878_v10, %v3898_v22  ;;  %v3721_v53 = vpop.f32.mrf.mxu0  ;;  %6461 = vmatmul.mubr.msk.bf16.gmra.mxu0 %vm10187_vm6, %v6498_v7  ;;  %vm10194_vm8 = vmmov %vm10180_vm2  ;;  %vm4024_vm6 = vcmask 253952   ;;  %v4046_v10 = vrot.slane %v4044_v46, 5  ;;  %v4026_v22 = vld [vmem:[#allocation6 + $0x20] sm:$0x1]  ;;  %v4283_v61 = vor.u32 %v4282_v45, %v4279_v20 }
 0x25a   :  { %3837 = vst.msk [vmem:[#allocation4 + $0x80] sm:$0xff] %vm10180_vm2, %v3804_v23  ;;  %v3722_v34 = vadd.f32 %v8795_v8, %v3721_v53  ;;  %6464 = vmatprep.mubr.msk.bf16.mxu0 %vm10010_vm15, %v6584_v63  ;;  %vm10192_vm15 = vcmask 257024   ;;  %v4035_v63 = vshrl.u32 %v4029_v40, 16  ;;  %vm10195_vm2 = vsmask.f32 256 }
 0x25b   :  { %v2973_v11 = vpop.permute.xlu1 %2972  ;;  %v6264_v12 = vpack.c.bf16 %v3902_v27, %v3902_v27  ;;  %v6435_v29 = vpop.f32.mrf.mxu0  ;;  %v9012_v7 = vld [vmem:[#allocation5 + $0x8] sm:$0xf]  ;;  %v4050_v23 = vrot.slane %v4048_v48, 4  ;;  %v4288_v27 = vrot.slane %v4286_v6, 6  ;;  %v4291_v53 = vrot.slane %v4289_v58, 7 }
 0x25c   :  { %3012 = vst.msk [vmem:[#allocation3 + $0x80] sm:$0x1] %vm10188_vm5, %v2973_v11  ;;  %v3232_v39 = vpop.permute.xlu0 %3231  ;;  %v3805_v15 = vmax.f32 %v3722_v34, 0.0  ;;  %v4037_v18 = vrot.slane %v4035_v63, 4  ;;  %vm9006_vm5 = vmand %vm4024_vm6, %vm10195_vm2  ;;  %v4273_v11 = vld [vmem:[#allocation5 + $0x8] sm:$0xf] }
 0x25d   :  { %3271 = vst.msk [vmem:[#allocation3 + $0x80] sm:$0x1] %vm10189_vm0, %v3232_v39  ;;  %v3923_v43 = vrot.slane %v6264_v12, 6  ;;  %vm10198_vm0 = vmmov %vm10192_vm15  ;;  %v4299_v40 = vshll.u32 %v4273_v11, 16  ;;  %v4051_v54 = vor.u32 %v4050_v23, %v4046_v10  ;;  %v4107_v23 = vld [vmem:[#allocation5] sm:$0xe] }
 0x25e   :  { %3838 = vst.msk [vmem:[#allocation4 + $0x88] sm:$0xff] %vm10190_vm7, %v3805_v15  ;;  %v4041_v5 = vor.u32 %v4040_v28, %v4037_v18 }
 0x25f   :  { %v3389_v26 = vpop.permute.xlu1 %3388  ;;  %v3924_v41 = vsel %vm6654_vm4, %v3922_v52, %v3923_v43  ;;  %v3925_v51 = vrot.slane %v3923_v43, 4  ;;  %v4301_v20 = vrot.slane %v4299_v40, 7  ;;  %v4052_v45 = vrot.slane %v4051_v54, 4 }
 0x260   :  { %3428 = vst.msk [vmem:[#allocation3 + $0x80] sm:$0x1] %vm10191_vm1, %v3389_v26  ;;  %v4042_v25 = vrot.slane %v4041_v5, 4  ;;  %vm10199_vm1 = vmmov %vm10190_vm7  ;;  %v6136_v40 = vrot.slane %v4107_v23, 9 }
 0x261   :  { %3935 = vst.msk [vmem:[#allocation5 + $0xc] sm:$0xf] %vm10192_vm15, %v3924_v41  ;;  %v4054_v41 = vshll.u32 %v9012_v7, 16  ;;  %vm10200_vm15 = vmmov %vm10198_vm0 }
 0x262   :  { %3936 = vst.msk [vmem:[#allocation5 + $0x10] sm:$0x3] %vm10193_vm13, %v3925_v51  ;;  %v4296_v51 = vshrl.u32 %v4273_v11, 16  ;;  %vm10201_vm13 = vmmov %vm10198_vm0 }
 0x263   :  { %vm10203_vm2 = vmmov %vm10199_vm1 }
 0x264   :  { %v4298_v6 = vrot.slane %v4296_v51, 6 }
 0x267   :  { %v6499_v1 = vld [vmem:[#allocation3 + $0x80] ss:$0 sps:$4 sm:$0x11]  }
 0x268   :  { %6465 = vmatmul.mubr.msk.bf16.gmra.mxu0 %vm10194_vm8, %v6499_v1  ;;  %v4018_v12 = vld [vmem:[#allocation5 + $0xc] sm:$0xf]  ;;  %vm10202_vm8 = vmmov %vm10199_vm1 }
 0x269   :  { %v8978_v62 = vld [vmem:[#allocation5 + $0x10] sm:$0x1]  ;;  %4023 = vst.msk [vmem:[#allocation6 + $0x18] sm:$0xf] %vm10198_vm0, %v4018_v12  ;;  %v4238_v58 = vld [vmem:[#allocation5 + $0xc] sm:$0xf]  ;;  %vm10205_vm0 = vmmov %vm10199_vm1 }
 0x26a   :  { %v8980_v56 = vld [vmem:[#allocation5 + $0x10] sm:$0x7]  ;;  %v4078_v33 = vshrl.u32 %v8978_v62, 16  ;;  %v4348_v12 = vld [vmem:[#allocation5 + $0x4] sm:$0xf] }
 0x26b   :  { %v8982_v37 = vld [vmem:[#allocation5 + $0x10] sm:$0x3]  ;;  %v4316_v31 = vshrl.u32 %v8980_v56, 16 }
 0x26c   :  { %v4128_v30 = vrot.slane %v8982_v37, 5  ;;  %v8987_v38 = vld [vmem:[#allocation5 + $0x10] sm:$0xf]  ;;  %4090 = vrot.lane.b32.xlu0 %v4078_v33, %s6586_s15  ;;  %v4047_v33 = vsel %vm6749_vm11, %v4042_v25, %v4046_v10 }
 0x26d   :  { %v8989_v21 = vld [vmem:[#allocation5 + $0x10] sm:$0x3]  ;;  %v8994_v17 = vrot.slane %v4316_v31, 6  ;;  %v4368_v24 = vrot.slane %v8987_v38, 7  ;;  %v4292_v31 = vor.u32 %v4291_v53, %v4288_v27  ;;  %v4119_v27 = vrot.slane %v4108_v60, 5 }
 0x26e   :  { %v8991_v47 = vld [vmem:[#allocation5 + $0x10] sm:$0xf]  ;;  %v4201_v9 = vshrl.u32 %v8989_v21, 16  ;;  %v4130_v44 = vrot.slane %v4128_v30, 4  ;;  %v4253_v53 = vrot.slane %v4238_v58, 6 }
 0x26f   :  { %v4324_v36 = vrot.slane %v8994_v17, 4  ;;  %v4431_v32 = vshrl.u32 %v8991_v47, 16  ;;  %v4019_v19 = vld [vmem:[#allocation5 + $0x10] sm:$0x1]  ;;  %v4370_v29 = vrot.slane %v4368_v24, 4  ;;  %v4434_v11 = vshll.u32 %v8991_v47, 16 }
 0x270   :  { %v9001_v49 = vrot.slane %v4201_v9, 5  ;;  %4139 = vrot.lane.b32.xlu0 %v4130_v44, %s6587_s16  ;;  %v9014_v34 = vld [vmem:[#allocation5 + $0x10] sm:$0x7]  ;;  %v4027_v43 = vsel %vm9006_vm5, %v4019_v19, %v4026_v22  ;;  %v9031_v9 = vrot.slane %v4054_v41, 5  ;;  %v4284_v44 = vrot.slane %v4283_v61, 4 }
 0x271   :  { %4333 = vrot.lane.b32.xlu1 %v4324_v36, %s6586_s15  ;;  %v3726_v39 = vpop.f32.mrf.mxu0  ;;  %v4433_v52 = vrot.slane %v4431_v32, 7  ;;  %4028 = vst [vmem:[#allocation6 + $0x20] sm:$0x1] %v4027_v43  ;;  %v4256_v1 = vrot.slane %v9014_v34, 6  ;;  %v4157_v22 = vld [vmem:[#allocation5 + $0x4] sm:$0xf]  ;;  %v9045_v34 = vor.u32 %v4301_v20, %v4298_v6  ;;  %v4120_v54 = vsel %vm6708_vm9, %v6136_v40, %v4119_v27 }
 0x272   :  { %v4209_v15 = vrot.slane %v9001_v49, 4  ;;  %v3727_v26 = vadd.f32 %v8795_v8, %v3726_v39  ;;  %v4204_v19 = vshll.u32 %v8989_v21, 16  ;;  %v4293_v5 = vsel %vm6795_vm3, %v4284_v44, %v4292_v31  ;;  %v4158_v39 = vld [vmem:[#allocation5 + $0x8] sm:$0xf]  ;;  %v4032_v60 = vld [vmem:[#allocation5 + $0xc] sm:$0xf] }
 0x273   :  { %v6438_v63 = vpop.f32.mrf.mxu0  ;;  %v4438_v35 = vrot.slane %v4433_v52, 4  ;;  %v4258_v46 = vrot.slane %v4256_v1, 4  ;;  %v4057_v14 = vsel %vm6749_vm11, %v4052_v45, %v9031_v9  ;;  %v4252_v21 = vrot.slane %v4250_v42, 4  ;;  %v9053_v47 = vld [vmem:[#allocation5 + $0x8] sm:$0xf] }
 0x274   :  { %4218 = vrot.lane.b32.xlu0 %v4209_v15, %s6588_s17  ;;  %v3806_v18 = vmax.f32 %v3727_v26, 0.0  ;;  %v4171_v15 = vshrl.u32 %v4157_v22, 16  ;;  %v4174_v43 = vshll.u32 %v4157_v22, 16  ;;  %v9055_v26 = vor.u32 %v4434_v11, %v4433_v52  ;;  %v4347_v42 = vld [vmem:[#allocation5] sm:$0x8] }
 0x275   :  { %4379 = vrot.lane.b32.xlu1 %v4370_v29, %s6587_s16  ;;  %v3729_v28 = vpop.f32.mrf.mxu0  ;;  %v4269_v32 = vsel %vm9006_vm5, %v4258_v46, %v4268_v0  ;;  %v9047_v29 = vrot.slane %v4204_v19, 6  ;;  %v4255_v41 = vrot.slane %v4253_v53, 4  ;;  %v4294_v51 = vrot.slane %v4292_v31, 4  ;;  %v9075_v6 = vld [vmem:[#allocation5 + $0x4] sm:$0xf] }
 0x276   :  { %3839 = vst.msk [vmem:[#allocation4 + $0x90] sm:$0xff] %vm10190_vm7, %v3806_v18  ;;  %v3730_v48 = vadd.f32 %v8795_v8, %v3729_v28  ;;  %4270 = vst [vmem:[#allocation6 + $0x24] sm:$0x1] %v4269_v32  ;;  %v4254_v4 = vsel %vm6654_vm4, %v4252_v21, %v4253_v53  ;;  %v4181_v25 = vshrl.u32 %v4158_v39, 16  ;;  %v4184_v61 = vshll.u32 %v4158_v39, 16 }
 0x277   :  { %v6439_v36 = vpop.f32.mrf.mxu0  ;;  %v4207_v63 = vor.u32 %v9047_v29, %v9001_v49  ;;  %v4257_v18 = vsel %vm6654_vm4, %v4255_v41, %v4256_v1  ;;  %4266 = vst.msk [vmem:[#allocation6 + $0x14] sm:$0xf] %vm10200_vm15, %v4254_v4  ;;  %v4303_v52 = vsel %vm6795_vm3, %v4294_v51, %v9045_v34  ;;  %v4122_v0 = vrot.slane %v9053_v47, 5  ;;  %vm10206_vm7 = vmmov %vm10205_vm0 }
 0x278   :  { %4082 = vrot.lane.b32.xlu0 %v4047_v33, %s6586_s15  ;;  %v3807_v10 = vmax.f32 %v3730_v48, 0.0  ;;  %v4359_v28 = vrot.slane %v4348_v12, 7  ;;  %v4395_v33 = vld [vmem:[#allocation5 + $0x8] sm:$0xf]  ;;  %4267 = vst.msk [vmem:[#allocation6 + $0x1c] sm:$0xf] %vm10201_vm13, %v4257_v18  ;;  %vm10208_vm15 = vmmov %vm10205_vm0 }
 0x279   :  { %4447 = vrot.lane.b32.xlu1 %v4438_v35, %s6588_s17  ;;  %v9070_v35 = vld [vmem:[#allocation5 + $0x8] sm:$0xf]  ;;  %v4173_v1 = vrot.slane %v4171_v15, 5  ;;  %v4176_v31 = vrot.slane %v4174_v43, 6  ;;  %v4121_v46 = vrot.slane %v4119_v27, 4  ;;  %v6138_v48 = vrot.slane %v4347_v42, 11 }
 0x27a   :  { %3840 = vst.msk [vmem:[#allocation4 + $0x98] sm:$0xff] %vm10199_vm1, %v3807_v10  ;;  %v4362_v20 = vrot.slane %v9070_v35, 7  ;;  %v4183_v58 = vrot.slane %v4181_v25, 5  ;;  %v4186_v36 = vrot.slane %v4184_v61, 6  ;;  %v4413_v44 = vshrl.u32 %v4395_v33, 16  ;;  %vm10207_vm1 = vmmov %vm10205_vm0 }
 0x27b   :  { %v4123_v32 = vsel %vm6708_vm9, %v4121_v46, %v4122_v0  ;;  %v4360_v10 = vsel %vm6810_vm10, %v6138_v48, %v4359_v28  ;;  %v4064_v45 = vshll.u32 %v4032_v60, 16  ;;  %v4068_v22 = vshrl.u32 %v4032_v60, 16  ;;  %v4274_v27 = vld [vmem:[#allocation5 + $0xc] sm:$0xf] }
 0x27c   :  { %4325 = vrot.lane.b32.xlu0 %v4293_v5, %s6586_s15  ;;  %v4361_v19 = vrot.slane %v4359_v28, 4  ;;  %v9086_v5 = vor.u32 %v4176_v31, %v4173_v1  ;;  %v4404_v23 = vshrl.u32 %v9075_v6, 16  ;;  %v9093_v53 = vor.u32 %v4186_v36, %v4183_v58  ;;  %v9117_v48 = vld [vmem:[#allocation5 + $0xc] sm:$0xf] }
 0x27d   :  { %4084 = vrot.lane.b32.xlu1 %v4057_v14, %s6586_s15  ;;  %v9095_v14 = vrot.slane %v4413_v44, 7  ;;  %v9097_v12 = vrot.slane %v4064_v45, 5  ;;  %v4070_v39 = vrot.slane %v4068_v22, 4  ;;  %v4306_v21 = vshrl.u32 %v4274_v27, 16 }
 0x27e   :  { %v4363_v11 = vsel %vm6810_vm10, %v4361_v19, %v4362_v20  ;;  %v4309_v15 = vshll.u32 %v4274_v27, 16  ;;  %v4179_v43 = vrot.slane %v9086_v5, 4  ;;  %v9101_v41 = vrot.slane %v4404_v23, 7  ;;  %v6501_v23 = vld [vmem:[%s9949_s3 + $0x38] sm:$0xff]  }
 0x27f   :  { %v4416_v51 = vshll.u32 %v4395_v33, 16  ;;  %v4071_v42 = vor.u32 %v4070_v39, %v9097_v12  ;;  %v4308_v25 = vrot.slane %v4306_v21, 6  ;;  %v4319_v18 = vshll.u32 %v8980_v56, 16  ;;  %v6503_v39 = vld [vmem:[%s9949_s3 + $0x30] sm:$0xff]  }
 0x280   :  { %4131 = vrot.lane.b32.xlu0 %v4120_v54, %s6587_s16  ;;  %v4188_v40 = vsel %vm6767_vm14, %v4179_v43, %v9093_v53  ;;  %v4311_v61 = vrot.slane %v4309_v15, 7  ;;  %v4074_v54 = vshll.u32 %v8978_v62, 16  ;;  %v4125_v62 = vrot.slane %v9117_v48, 5  ;;  %v6504_v43 = vld [vmem:[%s9949_s3 + $0x68] sm:$0xff]  }
 0x281   :  { %4327 = vrot.lane.b32.xlu1 %v4303_v52, %s6586_s15  ;;  %v4418_v4 = vor.u32 %v4416_v51, %v9095_v14  ;;  %v4411_v52 = vrot.slane %v9101_v41, 4  ;;  %v4072_v31 = vrot.slane %v4071_v42, 4  ;;  %v4321_v46 = vrot.slane %v4319_v18, 7  ;;  %v3938_v21 = vld [vmem:[#allocation4 + $0x81] ss:$4 sm:$0xff] }
 0x282   :  { %v9115_v60 = vor.u32 %v4311_v61, %v4308_v25  ;;  %v4076_v36 = vrot.slane %v4074_v54, 5  ;;  %v4127_v15 = vrot.slane %v4125_v62, 4  ;;  %v4156_v18 = vld [vmem:[#allocation5] sm:$0xe]  ;;  %vm10204_vm5 = vcmask 257026  }
 0x283   :  { %v4419_v33 = vsel %vm6846_vm12, %v4411_v52, %v4418_v4  ;;  %v4322_v19 = vor.u32 %v4321_v46, %v8994_v17  ;;  %v3946_v17 = vld [vmem:[#allocation4 + $0x82] ss:$4 sm:$0xff]  ;;  %v4364_v47 = vrot.slane %v4362_v20, 4  ;;  %vm9983_vm13 = vcmask 516352  }
 0x284   :  { %4371 = vrot.lane.b32.xlu0 %v4360_v10, %s6587_s16  ;;  %v4077_v45 = vsel %vm6749_vm11, %v4072_v31, %v4076_v36  ;;  %v4314_v22 = vrot.slane %v9115_v60, 4  ;;  %v3953_v42 = vmax.f32 %v3938_v21, %v3946_v17  ;;  %v4129_v61 = vsel %vm6708_vm9, %v4127_v15, %v4128_v30  ;;  %v4393_v36 = vld [vmem:[#allocation5] sm:$0x8]  ;;  %v6509_v21 = vld [vmem:[%s9949_s3 + $0x18] sm:$0xff]  }
 0x285   :  { %4133 = vrot.lane.b32.xlu1 %v4123_v32, %s6587_s16  ;;  %v6500_v32 = vld [vmem:[%s9949_s3 + $0x78] sm:$0xff]   ;;  %v4165_v31 = vshll.u32 %v4156_v18, 16 }
 0x286   :  { %6294 = vmatprep.subr.bf16.mxu1 %v6500_v32  ;;  %v4323_v51 = vsel %vm6795_vm3, %v4314_v22, %v4322_v19  ;;  %v6507_v22 = vld [vmem:[%s9949_s3 + $0x20] sm:$0xff]  }
 0x287   :  { %6295 = vmatpush3.bf16.msra.mxu1 %v6501_v23  ;;  %v4167_v30 = vrot.slane %v4165_v31, 6  ;;  %v6515_v31 = vld [vmem:[%s9949_s3] sm:$0xff]  }
 0x289   :  { %4373 = vrot.lane.b32.xlu1 %v4363_v11, %s6587_s16  ;;  %v6502_v11 = vld [vmem:[%s9949_s3 + $0x70] sm:$0xff]  }
 0x28a   :  { %6296 = vmatprep.subr.bf16.mxu1 %v6502_v11 }
 0x28b   :  { %6297 = vmatpush3.bf16.msra.mxu1 %v6503_v39 }
 0x28c   :  { %6298 = vmatprep.subr.bf16.mxu1 %v6504_v43 }
 0x28d   :  { %4212 = vrot.lane.b32.xlu1 %v4188_v40, %s6588_s17  ;;  %v3734_v28 = vpop.f32.mrf.mxu0  ;;  %v3958_v40 = vld [vmem:[#allocation4 + $0x83] ss:$4 sm:$0xff] }
 0x28e   :  { %v3735_v1 = vadd.f32 %v8795_v8, %v3734_v28  ;;  %v6505_v28 = vld [vmem:[%s9949_s3 + $0x28] sm:$0xff]  }
 0x28f   :  { %v6442_v56 = vpop.f32.mrf.mxu0  ;;  %6299 = vmatpush3.bf16.msra.mxu1 %v6505_v28 }
 0x290   :  { %v3808_v58 = vmax.f32 %v3735_v1, 0.0  ;;  %v4162_v1 = vshrl.u32 %v4156_v18, 16  ;;  %v4058_v56 = vshrl.u32 %v9012_v7, 16  ;;  %v4399_v7 = vshrl.u32 %v4393_v36, 16 }
 0x291   :  { %4441 = vrot.lane.b32.xlu1 %v4419_v33, %s6588_s17  ;;  %v3737_v44 = vpop.f32.mrf.mxu0  ;;  %v6506_v33 = vld [vmem:[%s9949_s3 + $0x60] sm:$0xff]   ;;  %v4304_v18 = vrot.slane %v9045_v34, 4  ;;  %v4124_v34 = vrot.slane %v4122_v0, 4 }
 0x292   :  { %3841 = vst.msk [vmem:[#allocation4 + $0xa0] sm:$0xff] %vm10202_vm8, %v3808_v58  ;;  %v3738_v10 = vadd.f32 %v8795_v8, %v3737_v44  ;;  %6300 = vmatprep.subr.bf16.mxu1 %v6506_v33  ;;  %v4164_v37 = vrot.slane %v4162_v1, 5  ;;  %v4060_v11 = vrot.slane %v4058_v56, 4  ;;  %v6514_v33 = vld [vmem:[%s9949_s3 + $0x40] sm:$0xff]   ;;  %vm10209_vm8 = vsmask.f32 256 }
 0x293   :  { %v6443_v27 = vpop.f32.mrf.mxu0  ;;  %6301 = vmatpush3.bf16.msra.mxu1 %v6507_v22  ;;  %v4313_v28 = vsel %vm6795_vm3, %v4304_v18, %v9115_v60  ;;  %v4126_v1 = vsel %vm6708_vm9, %v4124_v34, %v4125_v62  ;;  %v4344_v34 = vld [vmem:[#allocation6 + $0x24] sm:$0x1] }
 0x294   :  { %v3809_v8 = vmax.f32 %v3738_v10, 0.0  ;;  %v4168_v58 = vor.u32 %v4167_v30, %v4164_v37  ;;  %v9168_v10 = vld [vmem:[%s9948_s2] ss:$0 sm:$0xff]  ;;  %v4407_v27 = vshll.u32 %v9075_v6, 16  ;;  %v6510_v6 = vld [vmem:[%s9949_s3 + $0x50] sm:$0xff]  }
 0x295   :  { %4088 = vrot.lane.b32.xlu1 %v4077_v45, %s6586_s15 }
 0x296   :  { %3842 = vst.msk [vmem:[#allocation4 + $0xa8] sm:$0xff] %vm10203_vm2, %v3809_v8  ;;  %v4169_v23 = vrot.slane %v4168_v58, 4  ;;  %v6508_v8 = vld [vmem:[%s9949_s3 + $0x58] sm:$0xff]   ;;  %v4409_v43 = vor.u32 %v4407_v27, %v9101_v41  ;;  %vm9250_vm2 = vmand %vm9983_vm13, %vm10209_vm8 }
 0x297   :  { %6302 = vmatprep.subr.bf16.mxu1 %v6508_v8 }
 0x298   :  { %v4178_v15 = vsel %vm6767_vm14, %v4169_v23, %v9086_v5  ;;  %6303 = vmatpush3.bf16.msra.mxu1 %v6509_v21  ;;  %v6511_v5 = vld [vmem:[%s9949_s3 + $0x10] sm:$0xff]  }
 0x299   :  { %4331 = vrot.lane.b32.xlu1 %v4323_v51, %s6586_s15  ;;  %v3966_v4 = vld [vmem:[#allocation4 + $0x84] ss:$4 sm:$0xff]  ;;  %6304 = vmatprep.subr.bf16.mxu1 %v6510_v6 }
 0x29a   :  { %v3973_v25 = vmax.f32 %v3958_v40, %v3966_v4  ;;  %v6139_v4 = vrot.slane %v4399_v7, 11 }
 0x29c   :  { %v3977_v52 = vmax.f32 %v3953_v42, %v3973_v25  ;;  %v4061_v42 = vor.u32 %v4060_v11, %v9031_v9  ;;  %v4410_v41 = vsel %vm6846_vm12, %v6139_v4, %v4409_v43  ;;  %6305 = vmatpush3.bf16.msra.mxu1 %v6511_v5  ;;  %v4104_v4 = vld [vmem:[#allocation6 + $0x20] sm:$0x1] }
 0x29d   :  { %4137 = vrot.lane.b32.xlu1 %v4129_v61, %s6587_s16 }
 0x29e   :  { %v6265_v54 = vpack.c.bf16 %v3977_v52, %v3977_v52  ;;  %v4062_v61 = vrot.slane %v4061_v42, 4  ;;  %v6512_v52 = vld [vmem:[%s9949_s3 + $0x48] sm:$0xff]  }
 0x29f   :  { %6306 = vmatprep.subr.bf16.mxu1 %v6512_v52 }
 0x2a0   :  { %v9160_v46 = vrot.slane %v6265_v54, 6  ;;  %v4067_v9 = vsel %vm6749_vm11, %v4062_v61, %v9097_v12  ;;  %v6513_v54 = vld [vmem:[%s9949_s3 + $0x8] sm:$0xff]   ;;  %v9215_v12 = vld [vmem:[#allocation5 + $0xc] sm:$0xf] }
 0x2a1   :  { %6307 = vmatpush3.bf16.msra.mxu1 %v6513_v54  ;;  %v4365_v60 = vrot.slane %v9215_v12, 7 }
 0x2a2   :  { %4010 = vst.msk [vmem:[#allocation5 + $0x14] sm:$0xc] %vm10204_vm5, %v9160_v46  ;;  %6308 = vmatprep.subr.bf16.mxu1 %v6514_v33  ;;  %v3994_v11 = vrot.slane %v9160_v46, 4  ;;  %vm10212_vm5 = vcmask 257024  }
 0x2a3   :  { %v4366_v0 = vsel %vm6810_vm10, %v4364_v47, %v4365_v60 }
 0x2a5   :  { %6309 = vmatpush3.bf16.msra.mxu1 %v6515_v31 }
 0x2a9   :  { %v3742_v44 = vpop.f32.mrf.mxu0  ;;  %v4520_v32 = vld [vmem:[#allocation5 + $0x14] sm:$0xf] }
 0x2aa   :  { %v3743_v45 = vadd.f32 %v9168_v10, %v3742_v44  ;;  %4530 = vrot.lane.b32.xlu0 %v4520_v32, %s6586_s15  ;;  %v4555_v27 = vld [vmem:[#allocation5 + $0x14] sm:$0xe] }
 0x2ab   :  { %v6446_v19 = vpop.f32.mrf.mxu0  ;;  %v4564_v21 = vshll.u32 %v4555_v27, 16  ;;  %v4795_v43 = vld [vmem:[#allocation5 + $0x14] sm:$0x8] }
 0x2ac   :  { %v3810_v39 = vmax.f32 %v3743_v45, 0.0  ;;  %v4804_v18 = vshll.u32 %v4795_v43, 16 }
 0x2ad   :  { %v3745_v17 = vpop.f32.mrf.mxu0 }
 0x2ae   :  { %3843 = vst.msk [vmem:[#allocation4 + $0xb0] sm:$0xff] %vm10205_vm0, %v3810_v39  ;;  %v3746_v51 = vadd.f32 %v9168_v10, %v3745_v17  ;;  %4210 = vrot.lane.b32.xlu0 %v4178_v15, %s6588_s17  ;;  %v4561_v39 = vshrl.u32 %v4555_v27, 16  ;;  %v4159_v17 = vld [vmem:[#allocation5 + $0xc] sm:$0xf]  ;;  %vm9982_vm0 = vcmask 778752  }
 0x2af   :  { %v6447_v40 = vpop.f32.mrf.mxu0  ;;  %v4191_v46 = vshrl.u32 %v4159_v17, 16  ;;  %v4194_v5 = vshll.u32 %v4159_v17, 16 }
 0x2b0   :  { %v3811_v25 = vmax.f32 %v3746_v51, 0.0  ;;  %v9255_v51 = vld [vmem:[#allocation5 + $0xc] sm:$0xf]  ;;  %v4563_v42 = vrot.slane %v4561_v39, 4 }
 0x2b1   :  { %v4193_v52 = vrot.slane %v4191_v46, 5  ;;  %v4422_v54 = vshrl.u32 %v9255_v51, 16  ;;  %v4196_v47 = vrot.slane %v4194_v5, 6 }
 0x2b2   :  { %3844 = vst.msk [vmem:[#allocation4 + $0xb8] sm:$0xff] %vm10206_vm7, %v3811_v25  ;;  %4439 = vrot.lane.b32.xlu0 %v4410_v41, %s6588_s17  ;;  %v4566_v25 = vrot.slane %v4564_v21, 5  ;;  %v4801_v41 = vshrl.u32 %v4795_v43, 16  ;;  %vm4097_vm7 = vcmask 519424  }
 0x2b3   :  { %v4197_v12 = vor.u32 %v4196_v47, %v4193_v52  ;;  %v4683_v47 = vld [vmem:[#allocation5 + $0x14] sm:$0xc] }
 0x2b4   :  { %v4567_v31 = vor.u32 %v4566_v25, %v4563_v42 }
 0x2b6   :  { %4086 = vrot.lane.b32.xlu0 %v4067_v9, %s6586_s15  ;;  %v4749_v9 = vld [vmem:[#allocation5 + $0x14] sm:$0xc]  ;;  %v4568_v17 = vrot.slane %v4567_v31, 4 }
 0x2b9   :  { %v3940_v36 = vld [vmem:[#allocation4 + $0xa1] ss:$4 sm:$0xff]  ;;  %v3948_v44 = vld [vmem:[#allocation4 + $0xa2] ss:$4 sm:$0xff]  ;;  %v3960_v32 = vld [vmem:[#allocation4 + $0xa3] ss:$4 sm:$0xff] }
 0x2ba   :  { %4329 = vrot.lane.b32.xlu0 %v4313_v28, %s6586_s15  ;;  %v3954_v22 = vmax.f32 %v3940_v36, %v3948_v44  ;;  %v4806_v36 = vrot.slane %v4804_v18, 7  ;;  %v9269_v44 = vld [vmem:[#allocation5 + $0x14] sm:$0xf] }
 0x2be   :  { %4135 = vrot.lane.b32.xlu0 %v4126_v1, %s6587_s16  ;;  %v6141_v1 = vrot.slane %v4749_v9, 10  ;;  %v4425_v9 = vshll.u32 %v9255_v51, 16 }
 0x2c2   :  { %4375 = vrot.lane.b32.xlu0 %v4366_v0, %s6587_s16  ;;  %v4803_v0 = vrot.slane %v4801_v41, 6 }
 0x2c4   :  { %v4807_v5 = vor.u32 %v4806_v36, %v4803_v0  ;;  %v4199_v36 = vrot.slane %v4197_v12, 4 }
 0x2c5   :  { %v3750_v48 = vpop.f32.mrf.mxu0 }
 0x2c6   :  { %v3751_v62 = vadd.f32 %v9168_v10, %v3750_v48  ;;  %v4808_v38 = vrot.slane %v4807_v5, 4 }
 0x2c7   :  { %v6450_v37 = vpop.f32.mrf.mxu0 }
 0x2c8   :  { %v3812_v30 = vmax.f32 %v3751_v62, 0.0 }
 0x2c9   :  { %v3753_v56 = vpop.f32.mrf.mxu0 }
 0x2ca   :  { %3845 = vst.msk [vmem:[#allocation4 + $0xc0] sm:$0xff] %vm10207_vm1, %v3812_v30  ;;  %v3754_v58 = vadd.f32 %v9168_v10, %v3753_v56  ;;  %vm10213_vm1 = vmmov %vm10209_vm8  ;;  %vm10216_vm8 = vcmask 261120  }
 0x2cb   :  { %v6451_v35 = vpop.f32.mrf.mxu0 }
 0x2cc   :  { %v3813_v20 = vmax.f32 %v3754_v58, 0.0 }
 0x2ce   :  { %3846 = vst.msk [vmem:[#allocation4 + $0xc8] sm:$0xff] %vm10208_vm15, %v3813_v20  ;;  %vm9273_vm15 = vmand %vm9982_vm0, %vm10213_vm1  ;;  %vm10233_vm0 = vcmask 254976  }
 0x2d1   :  { %v3968_v45 = vld [vmem:[#allocation4 + $0xa4] ss:$4 sm:$0xff] }
 0x2d2   :  { %v3974_v19 = vmax.f32 %v3960_v32, %v3968_v45 }
 0x2d4   :  { %v3978_v23 = vmax.f32 %v3954_v22, %v3974_v19  ;;  %v4367_v22 = vrot.slane %v4365_v60, 4 }
 0x2d6   :  { %v6266_v7 = vpack.c.bf16 %v3978_v23, %v3978_v23 }
 0x2d8   :  { %v9243_v8 = vrot.slane %v6266_v7, 6  ;;  %v9279_v7 = vrot.slane %v4422_v54, 7 }
 0x2da   :  { %v3996_v15 = vsel %vm6654_vm4, %v3994_v11, %v9243_v8  ;;  %v4427_v51 = vor.u32 %v4425_v9, %v9279_v7  ;;  %v4470_v9 = vshll.u32 %v9269_v44, 16 }
 0x2db   :  { %4011 = vst.msk [vmem:[#allocation5 + $0x18] sm:$0xf] %vm10212_vm5, %v3996_v15  ;;  %vm10217_vm5 = vmmov %vm10216_vm8 }
 0x2de   :  { %v4091_v40 = vpop.permute.xlu0 %4090 }
 0x2df   :  { %v4105_v61 = vsel %vm9250_vm2, %v4091_v40, %v4104_v4  ;;  %v4467_v40 = vshrl.u32 %v9269_v44, 16 }
 0x2e0   :  { %4106 = vst [vmem:[#allocation6 + $0x20] sm:$0x1] %v4105_v61  ;;  %v4189_v61 = vrot.slane %v9093_v53, 4 }
 0x2e1   :  { %v3758_v62 = vpop.f32.mrf.mxu0 }
 0x2e2   :  { %v4140_v33 = vpop.permute.xlu0 %4139  ;;  %v9262_v37 = vld [vmem:[#allocation5 + $0x18] sm:$0xf]  ;;  %v3759_v58 = vadd.f32 %v9168_v10, %v3758_v62  ;;  %v4198_v53 = vsel %vm6767_vm14, %v4189_v61, %v4197_v12 }
 0x2e3   :  { %v4334_v28 = vpop.permute.xlu1 %4333  ;;  %v9264_v30 = vld [vmem:[#allocation5 + $0x18] sm:$0xf]  ;;  %v4761_v35 = vrot.slane %v9262_v37, 6  ;;  %v6454_v45 = vpop.f32.mrf.mxu0 }
 0x2e4   :  { %v4345_v48 = vsel %vm9250_vm2, %v4334_v28, %v4344_v34  ;;  %v4796_v56 = vld [vmem:[#allocation5 + $0x18] sm:$0xf]  ;;  %v4570_v20 = vshll.u32 %v9264_v30, 16  ;;  %v3814_v27 = vmax.f32 %v3759_v58, 0.0  ;;  %v4369_v34 = vsel %vm6810_vm10, %v4367_v22, %v4368_v24 }
 0x2e5   :  { %4346 = vst [vmem:[#allocation6 + $0x24] sm:$0x1] %v4345_v48  ;;  %v4810_v19 = vshrl.u32 %v4796_v56, 16  ;;  %v4813_v23 = vshll.u32 %v4796_v56, 16  ;;  %v4762_v21 = vsel %vm6654_vm4, %v6141_v1, %v4761_v35  ;;  %v3761_v6 = vpop.f32.mrf.mxu0  ;;  %v4462_v18 = vld [vmem:[#allocation5 + $0x18] sm:$0xf] }
 0x2e6   :  { %v9281_v39 = vpop.permute.xlu0 %4218  ;;  %v9287_v15 = vrot.slane %v4570_v20, 5  ;;  %4773 = vrot.lane.b32.xlu1 %v4762_v21, %s6586_s15  ;;  %3847 = vst.msk [vmem:[#allocation4 + $0xd0] sm:$0xff] %vm10216_vm8, %v3814_v27  ;;  %v3762_v42 = vadd.f32 %v9168_v10, %v3761_v6  ;;  %vm9981_vm2 = vcmask 1041152   ;;  %v4469_v24 = vrot.slane %v4467_v40, 7  ;;  %v4684_v32 = vld [vmem:[#allocation5 + $0x18] sm:$0xf] }
 0x2e7   :  { %v4380_v11 = vpop.permute.xlu1 %4379  ;;  %v4153_v43 = vld [vmem:[#allocation6 + $0x20] sm:$0x1]  ;;  %v4812_v60 = vrot.slane %v4810_v19, 6  ;;  %v4815_v46 = vrot.slane %v4813_v23, 7  ;;  %v6455_v41 = vpop.f32.mrf.mxu0  ;;  %v4475_v0 = vshrl.u32 %v4462_v18, 16  ;;  %v4420_v48 = vrot.slane %v9095_v14, 4  ;;  %vm9319_vm8 = vmand %vm9981_vm2, %vm10213_vm1 }
 0x2e8   :  { %v4154_v4 = vsel %vm9273_vm15, %v4140_v33, %v4153_v43  ;;  %v4573_v25 = vsel %vm6749_vm11, %v4568_v17, %v9287_v15  ;;  %v3815_v52 = vmax.f32 %v3762_v42, 0.0  ;;  %v4478_v22 = vshll.u32 %v4462_v18, 16  ;;  %v4521_v49 = vld [vmem:[#allocation5 + $0x18] sm:$0xf] }
 0x2e9   :  { %4155 = vst [vmem:[#allocation6 + $0x20] sm:$0x1] %v4154_v4  ;;  %4609 = vrot.lane.b32.xlu0 %v4573_v25, %s6587_s16  ;;  %v9305_v33 = vor.u32 %v4815_v46, %v4812_v60  ;;  %v9326_v45 = vrot.slane %v4475_v0, 7  ;;  %v4689_v14 = vshrl.u32 %v4683_v47, 16  ;;  %v4692_v19 = vshll.u32 %v4683_v47, 16 }
 0x2ea   :  { %v4083_v28 = vpop.permute.xlu0 %4082  ;;  %4377 = vrot.lane.b32.xlu1 %v4369_v34, %s6587_s16  ;;  %3848 = vst.msk [vmem:[#allocation4 + $0xd8] sm:$0xff] %vm10217_vm5, %v3815_v52  ;;  %v4428_v27 = vsel %vm6846_vm12, %v4420_v48, %v4427_v51  ;;  %v4698_v43 = vshrl.u32 %v4684_v32, 16  ;;  %v4701_v6 = vshll.u32 %v4684_v32, 16  ;;  %v4208_v46 = vsel %vm6767_vm14, %v4199_v36, %v4207_v63 }
 0x2eb   :  { %v4448_v54 = vpop.permute.xlu1 %4447  ;;  %4098 = vst.msk [vmem:[#allocation6] sm:$0xf] %vm4097_vm7, %v4083_v28  ;;  %v4817_v20 = vsel %vm6795_vm3, %v4808_v38, %v9305_v33  ;;  %v4480_v21 = vor.u32 %v4478_v22, %v9326_v45  ;;  %v4429_v40 = vrot.slane %v9279_v7, 4  ;;  %v4694_v42 = vrot.slane %v4692_v19, 6 }
 0x2ec   :  { %v4390_v1 = vld [vmem:[#allocation6 + $0x24] sm:$0x1]  ;;  %vm10220_vm5 = vcmask 257024   ;;  %v4700_v63 = vrot.slane %v4698_v43, 5  ;;  %v4703_v7 = vrot.slane %v4701_v6, 6  ;;  %v4472_v52 = vor.u32 %v4470_v9, %v4469_v24 }
 0x2ed   :  { %v4391_v31 = vsel %vm9273_vm15, %v4380_v11, %v4390_v1  ;;  %4214 = vrot.lane.b32.xlu0 %v4198_v53, %s6588_s17  ;;  %vm4146_vm15 = vcmask 781824   ;;  %v4473_v11 = vrot.slane %v4469_v24, 4  ;;  %v4437_v61 = vsel %vm6846_vm12, %v4429_v40, %v9055_v26 }
 0x2ee   :  { %4392 = vst [vmem:[#allocation6 + $0x24] sm:$0x1] %v4391_v31  ;;  %v4326_v58 = vpop.permute.xlu0 %4325  ;;  %4849 = vrot.lane.b32.xlu1 %v4817_v20, %s6587_s16  ;;  %vm10221_vm1 = vsmask.f32 7938  ;;  %v9362_v28 = vor.u32 %v4703_v7, %v4700_v63  ;;  %vm4225_vm2 = vcmask 1044224   ;;  %v3997_v6 = vrot.slane %v9243_v8, 4 }
 0x2ef   :  { %v4085_v56 = vpop.permute.xlu1 %4084  ;;  %4340 = vst.msk [vmem:[#allocation6 + $0x4] sm:$0xf] %vm4097_vm7, %v4326_v58  ;;  %v4481_v4 = vsel %vm6846_vm12, %v4473_v11, %v4480_v21  ;;  %v4635_v8 = vld [vmem:[#allocation5 + $0x18] sm:$0xf]  ;;  %v4763_v7 = vrot.slane %v4761_v35, 4 }
 0x2f0   :  { %4099 = vst.msk [vmem:[#allocation6 + $0x8] sm:$0xf] %vm4097_vm7, %v4085_v56  ;;  %v4232_v23 = vld [vmem:[#allocation6 + $0x20] sm:$0x1] }
 0x2f1   :  { %v4233_v17 = vsel %vm9319_vm8, %v9281_v39, %v4232_v23  ;;  %4443 = vrot.lane.b32.xlu0 %v4428_v27, %s6588_s17  ;;  %v4691_v39 = vrot.slane %v4689_v14, 5  ;;  %4515 = vst.msk [vmem:[#allocation6 + $0x28] sm:$0xf] %vm10220_vm5, %v4481_v4  ;;  %v3942_v32 = vld [vmem:[#allocation4 + $0xc1] ss:$4 sm:$0xff] }
 0x2f2   :  { %4234 = vst [vmem:[#allocation6 + $0x20] sm:$0x1] %v4233_v17  ;;  %v4132_v60 = vpop.permute.xlu0 %4131  ;;  %4216 = vrot.lane.b32.xlu1 %v4208_v46, %s6588_s17  ;;  %v3950_v22 = vld [vmem:[#allocation4 + $0xc2] ss:$4 sm:$0xff]  ;;  %v3962_v14 = vld [vmem:[#allocation4 + $0xc3] ss:$4 sm:$0xff] }
 0x2f3   :  { %v4328_v12 = vpop.permute.xlu1 %4327  ;;  %4147 = vst.msk [vmem:[#allocation6] sm:$0xf] %vm4146_vm15, %v4132_v60  ;;  %v4695_v18 = vor.u32 %v4694_v42, %v4691_v39  ;;  %v3955_v27 = vmax.f32 %v3942_v32, %v3950_v22  ;;  %v4818_v32 = vrot.slane %v9305_v33, 4 }
 0x2f4   :  { %4341 = vst.msk [vmem:[#allocation6 + $0xc] sm:$0xf] %vm4097_vm7, %v4328_v12  ;;  %v4574_v12 = vshrl.u32 %v9264_v30, 16 }
 0x2f5   :  { %v4458_v25 = vld [vmem:[#allocation6 + $0x24] sm:$0x1]  ;;  %4532 = vrot.lane.b32.xlu0 %v4521_v49, %s6586_s15  ;;  %v4696_v26 = vrot.slane %v4695_v18, 4 }
 0x2f6   :  { %v4459_v29 = vsel %vm9319_vm8, %v4448_v54, %v4458_v25  ;;  %v4372_v41 = vpop.permute.xlu0 %4371  ;;  %4445 = vrot.lane.b32.xlu1 %v4437_v61, %s6588_s17  ;;  %vm10222_vm8 = vmmov %vm10220_vm5  ;;  %v4576_v40 = vrot.slane %v4574_v12, 4 }
 0x2f7   :  { %4460 = vst [vmem:[#allocation6 + $0x24] sm:$0x1] %v4459_v29  ;;  %v4134_v5 = vpop.permute.xlu1 %4133  ;;  %4386 = vst.msk [vmem:[#allocation6 + $0x4] sm:$0xf] %vm4146_vm15, %v4372_v41  ;;  %v4705_v53 = vsel %vm6767_vm14, %v4696_v26, %v9362_v28  ;;  %v4634_v41 = vld [vmem:[#allocation5 + $0x14] sm:$0xe] }
 0x2f8   :  { %4148 = vst.msk [vmem:[#allocation6 + $0x8] sm:$0xf] %vm4146_vm15, %v4134_v5  ;;  %vm4511_vm5 = vmand %vm10222_vm8, %vm10221_vm1  ;;  %vm10223_vm1 = vcmask 261120   ;;  %v4577_v4 = vor.u32 %v4576_v40, %v9287_v15 }
 0x2f9   :  { %v4512_v54 = vld [vmem:[#allocation6 + $0x20] sm:$0xf]  ;;  %vm10224_vm8 = vmmov %vm10223_vm1 }
 0x2fa   :  { %v4513_v1 = vsel %vm4511_vm5, %v4472_v52, %v4512_v54  ;;  %v4578_v54 = vrot.slane %v4577_v4, 4 }
 0x2fb   :  { %v4374_v34 = vpop.permute.xlu1 %4373  ;;  %4514 = vst [vmem:[#allocation6 + $0x20] sm:$0xf] %v4513_v1 }
 0x2fc   :  { %4387 = vst.msk [vmem:[#allocation6 + $0xc] sm:$0xf] %vm4146_vm15, %v4374_v34  ;;  %v4646_v34 = vrot.slane %v4635_v8, 5 }
 0x2fd   :  { %v3766_v31 = vpop.f32.mrf.mxu0 }
 0x2fe   :  { %v4742_v44 = vld [vmem:[#allocation6 + $0x24] sm:$0xf]  ;;  %v3767_v24 = vadd.f32 %v9168_v10, %v3766_v31  ;;  %v4648_v8 = vrot.slane %v4646_v34, 4 }
 0x2ff   :  { %v4213_v51 = vpop.permute.xlu1 %4212  ;;  %v4743_v38 = vsel %vm4511_vm5, %v4705_v53, %v4742_v44  ;;  %v6458_v47 = vpop.f32.mrf.mxu0  ;;  %vm10225_vm5 = vcmask 257024  }
 0x300   :  { %4227 = vst.msk [vmem:[#allocation6 + $0x8] sm:$0xf] %vm4225_vm2, %v4213_v51  ;;  %4744 = vst [vmem:[#allocation6 + $0x24] sm:$0xf] %v4743_v38  ;;  %v3816_v0 = vmax.f32 %v3767_v24, 0.0 }
 0x301   :  { %v3769_v62 = vpop.f32.mrf.mxu0  ;;  %v4872_v51 = vld [vmem:[#allocation5 + $0x18] sm:$0xf] }
 0x302   :  { %3849 = vst.msk [vmem:[#allocation4 + $0xe0] sm:$0xff] %vm10223_vm1, %v3816_v0  ;;  %v3770_v56 = vadd.f32 %v9168_v10, %v3769_v62  ;;  %vm10226_vm1 = vsmask.f32 7938  ;;  %v4547_v52 = vld [vmem:[#allocation6 + $0x20] sm:$0xf]  ;;  %v6140_v62 = vrot.slane %v4634_v41, 9 }
 0x303   :  { %v4442_v48 = vpop.permute.xlu1 %4441  ;;  %v6459_v58 = vpop.f32.mrf.mxu0 }
 0x304   :  { %4455 = vst.msk [vmem:[#allocation6 + $0xc] sm:$0xf] %vm4225_vm2, %v4442_v48  ;;  %v3817_v20 = vmax.f32 %v3770_v56, 0.0  ;;  %v4871_v56 = vld [vmem:[#allocation5 + $0x14] sm:$0x8] }
 0x305   :  { %v6142_v33 = vrot.slane %v4871_v56, 11 }
 0x306   :  { %3850 = vst.msk [vmem:[#allocation4 + $0xe8] sm:$0xff] %vm10224_vm8, %v3817_v20  ;;  %vm9388_vm8 = vmand %vm4097_vm7, %vm10226_vm1 }
 0x307   :  { %v4089_v36 = vpop.permute.xlu1 %4088 }
 0x308   :  { %4101 = vst.msk [vmem:[#allocation6 + $0x18] sm:$0xf] %vm4097_vm7, %v4089_v36 }
 0x309   :  { %v3970_v19 = vld [vmem:[#allocation4 + $0xc4] ss:$4 sm:$0xff] }
 0x30a   :  { %v3975_v11 = vmax.f32 %v3962_v14, %v3970_v19  ;;  %v4883_v14 = vrot.slane %v4872_v51, 7  ;;  %v4647_v19 = vsel %vm6708_vm9, %v6140_v62, %v4646_v34 }
 0x30b   :  { %v4332_v23 = vpop.permute.xlu1 %4331 }
 0x30c   :  { %4343 = vst.msk [vmem:[#allocation6 + $0x1c] sm:$0xf] %vm4097_vm7, %v4332_v23  ;;  %v3979_v21 = vmax.f32 %v3955_v27, %v3975_v11 }
 0x30e   :  { %v6267_v43 = vpack.c.bf16 %v3979_v21, %v3979_v21 }
 0x30f   :  { %v4138_v17 = vpop.permute.xlu1 %4137 }
 0x310   :  { %4150 = vst.msk [vmem:[#allocation6 + $0x18] sm:$0xf] %vm4146_vm15, %v4138_v17  ;;  %v9379_v60 = vrot.slane %v6267_v43, 6 }
 0x312   :  { %v3999_v46 = vsel %vm6654_vm4, %v3997_v6, %v9379_v60 }
 0x313   :  { %4012 = vst.msk [vmem:[#allocation5 + $0x1c] sm:$0xf] %vm10225_vm5, %v3999_v46  ;;  %vm10229_vm5 = vcmask 261120  }
 0x314   :  { %vm10230_vm1 = vmmov %vm10229_vm5 }
 0x319   :  { %v3774_v39 = vpop.f32.mrf.mxu0 }
 0x31a   :  { %v3775_v30 = vadd.f32 %v9168_v10, %v3774_v39  ;;  %v9393_v25 = vld [vmem:[#allocation5 + $0x1c] sm:$0xf]  ;;  %v4884_v39 = vsel %vm6810_vm10, %v6142_v33, %v4883_v14 }
 0x31b   :  { %v9395_v49 = vld [vmem:[#allocation5 + $0x1c] sm:$0xf]  ;;  %v6462_v63 = vpop.f32.mrf.mxu0  ;;  %v4764_v15 = vrot.slane %v9393_v25, 6 }
 0x31c   :  { %v4797_v29 = vld [vmem:[#allocation5 + $0x1c] sm:$0xf]  ;;  %v4580_v5 = vshll.u32 %v9395_v49, 16  ;;  %v3818_v9 = vmax.f32 %v3775_v30, 0.0  ;;  %v4531_v18 = vpop.permute.xlu0 %4530  ;;  %v4482_v30 = vrot.slane %v9326_v45, 4  ;;  %v4706_v63 = vrot.slane %v9362_v28, 4 }
 0x31d   :  { %v4820_v61 = vshrl.u32 %v4797_v29, 16  ;;  %v4823_v1 = vshll.u32 %v4797_v29, 16  ;;  %v4548_v26 = vsel %vm9388_vm8, %v4531_v18, %v4547_v52  ;;  %v3777_v44 = vpop.f32.mrf.mxu0  ;;  %v4765_v37 = vsel %vm6654_vm4, %v4763_v7, %v4764_v15  ;;  %v4685_v24 = vld [vmem:[#allocation5 + $0x1c] sm:$0xf] }
 0x31e   :  { %v9407_v35 = vrot.slane %v4580_v5, 5  ;;  %3851 = vst.msk [vmem:[#allocation4 + $0xf0] sm:$0xff] %vm10229_vm5, %v3818_v9  ;;  %4549 = vst [vmem:[#allocation6 + $0x20] sm:$0xf] %v4548_v26  ;;  %v3778_v31 = vadd.f32 %v9168_v10, %v3777_v44  ;;  %4775 = vrot.lane.b32.xlu1 %v4765_v37, %s6586_s15  ;;  %v4463_v47 = vld [vmem:[#allocation5 + $0x1c] sm:$0xf] }
 0x31f   :  { %v4822_v53 = vrot.slane %v4820_v61, 6  ;;  %v4825_v38 = vrot.slane %v4823_v1, 7  ;;  %v6463_v0 = vpop.f32.mrf.mxu0  ;;  %v9415_v58 = vld [vmem:[#allocation5 + $0x1c] sm:$0xf]  ;;  %v4708_v23 = vshrl.u32 %v4685_v24, 16  ;;  %v4711_v27 = vshll.u32 %v4685_v24, 16 }
 0x320   :  { %v4583_v48 = vsel %vm6749_vm11, %v4578_v54, %v9407_v35  ;;  %v3819_v20 = vmax.f32 %v3778_v31, 0.0  ;;  %v4211_v36 = vpop.permute.xlu0 %4210  ;;  %v4484_v11 = vshrl.u32 %v4463_v47, 16  ;;  %v4649_v17 = vrot.slane %v9415_v58, 5  ;;  %v9430_v43 = vld [vmem:[#allocation5 + $0x1c] sm:$0xf] }
 0x321   :  { %4611 = vrot.lane.b32.xlu0 %v4583_v48, %s6587_s16  ;;  %v9419_v22 = vor.u32 %v4825_v38, %v4822_v53  ;;  %4226 = vst.msk [vmem:[#allocation6] sm:$0xf] %vm4225_vm2, %v4211_v36  ;;  %v4710_v6 = vrot.slane %v4708_v23, 5  ;;  %v4713_v12 = vrot.slane %v4711_v27, 6  ;;  %v4487_v40 = vshll.u32 %v4463_v47, 16 }
 0x322   :  { %3852 = vst.msk [vmem:[#allocation4 + $0xf8] sm:$0xff] %vm10230_vm1, %v3819_v20  ;;  %4658 = vrot.lane.b32.xlu1 %v4647_v19, %s6588_s17  ;;  %v9432_v46 = vrot.slane %v4484_v11, 7  ;;  %v4886_v29 = vrot.slane %v9430_v43, 7  ;;  %v4650_v61 = vsel %vm6708_vm9, %v4648_v8, %v4649_v17  ;;  %v4885_v9 = vrot.slane %v4883_v14, 4 }
 0x323   :  { %v4827_v21 = vsel %vm6795_vm3, %v4818_v32, %v9419_v22  ;;  %v9441_v7 = vor.u32 %v4713_v12, %v4710_v6  ;;  %vm10231_vm5 = vcmask 257024   ;;  %v4000_v14 = vrot.slane %v9379_v60, 4 }
 0x324   :  { %v4440_v4 = vpop.permute.xlu0 %4439  ;;  %v4489_v5 = vor.u32 %v4487_v40, %v9432_v46  ;;  %vm10232_vm1 = vmmov %vm10231_vm5  ;;  %v4887_v34 = vsel %vm6810_vm10, %v4885_v9, %v4886_v29  ;;  %v4584_v27 = vshrl.u32 %v9395_v49, 16 }
 0x325   :  { %4851 = vrot.lane.b32.xlu0 %v4827_v21, %s6587_s16  ;;  %4454 = vst.msk [vmem:[#allocation6 + $0x4] sm:$0xf] %vm4225_vm2, %v4440_v4  ;;  %v4715_v45 = vsel %vm6767_vm14, %v4706_v63, %v9441_v7  ;;  %v4766_v21 = vrot.slane %v4764_v15, 4 }
 0x326   :  { %4895 = vrot.lane.b32.xlu1 %v4884_v39, %s6588_s17  ;;  %v4490_v28 = vsel %vm6846_vm12, %v4482_v30, %v4489_v5  ;;  %4745 = vst.msk [vmem:[#allocation6 + $0x2c] sm:$0xf] %vm10231_vm5, %v4715_v45  ;;  %vm10235_vm5 = vcmask 254976   ;;  %v4586_v11 = vrot.slane %v4584_v27, 4  ;;  %v4716_v27 = vrot.slane %v9441_v7, 4 }
 0x327   :  { %4516 = vst.msk [vmem:[#allocation6 + $0x30] sm:$0xf] %vm10232_vm1, %v4490_v28 }
 0x328   :  { %v3782_v41 = vpop.f32.mrf.mxu0  ;;  %v4087_v52 = vpop.permute.xlu0 %4086  ;;  %v6516_v37 = vld [vmem:[#allocation6] ss:$8 sps:$4 sm:$0xff]   ;;  %v4587_v4 = vor.u32 %v4586_v11, %v9407_v35 }
 0x329   :  { %v3783_v18 = vadd.f32 %v9168_v10, %v3782_v41  ;;  %4660 = vrot.lane.b32.xlu0 %v4650_v61, %s6588_s17  ;;  %4100 = vst.msk [vmem:[#allocation6 + $0x10] sm:$0xf] %vm4097_vm7, %v4087_v52  ;;  %v4522_v10 = vld [vmem:[#allocation5 + $0x1c] sm:$0xf] }
 0x32a   :  { %v6466_v54 = vpop.f32.mrf.mxu0  ;;  %4897 = vrot.lane.b32.xlu1 %v4887_v34, %s6588_s17  ;;  %v3944_v38 = vld [vmem:[#allocation4 + $0xe1] ss:$4 sm:$0xff]  ;;  %v3952_v24 = vld [vmem:[#allocation4 + $0xe2] ss:$4 sm:$0xff]  ;;  %v3964_v47 = vld [vmem:[#allocation4 + $0xe3] ss:$4 sm:$0xff] }
 0x32b   :  { %v3820_v1 = vmax.f32 %v3783_v18, 0.0  ;;  %v3956_v48 = vmax.f32 %v3944_v38, %v3952_v24  ;;  %v4588_v52 = vrot.slane %v4587_v4, 4  ;;  %v4828_v38 = vrot.slane %v9419_v22, 4 }
 0x32c   :  { %v3785_v26 = vpop.f32.mrf.mxu0  ;;  %v4330_v44 = vpop.permute.xlu0 %4329  ;;  %v6518_v53 = vld [vmem:[#allocation6 + $0x4] ss:$8 sps:$4 sm:$0xff]  }
 0x32d   :  { %3854 = vst.msk [vmem:[#allocation4 + $0x100] sm:$0x3] %vm10233_vm0, %v3820_v1  ;;  %4534 = vrot.lane.b32.xlu0 %v4522_v10, %s6586_s15  ;;  %5140 = vmatprep.mubr.bf16.mxu1 %v6518_v53  ;;  %vm10234_vm0 = vmmov %vm10232_vm1 }
 0x32e   :  { %4342 = vst.msk [vmem:[#allocation6 + $0x14] sm:$0xf] %vm4097_vm7, %v4330_v44  ;;  %v6467_v51 = vpop.f32.mrf.mxu0  ;;  %5141 = vmatmul.mubr.bf16.vlgmr.msra.gmra.mxu1 %v6516_v37  ;;  %vm10236_vm1 = vmmov %vm10234_vm0 }
 0x32f   :  { %vm10240_vm13 = vmmov %vm10236_vm1 }
 0x330   :  { %v4136_v31 = vpop.permute.xlu0 %4135 }
 0x331   :  { %4149 = vst.msk [vmem:[#allocation6 + $0x10] sm:$0xf] %vm4146_vm15, %v4136_v31 }
 0x334   :  { %v3972_v0 = vld [vmem:[#allocation4 + $0xe4] ss:$4 sm:$0xff]  ;;  %v4376_v56 = vpop.permute.xlu0 %4375 }
 0x335   :  { %v3976_v62 = vmax.f32 %v3964_v47, %v3972_v0  ;;  %4388 = vst.msk [vmem:[#allocation6 + $0x14] sm:$0xf] %vm4146_vm15, %v4376_v56 }
 0x337   :  { %v3980_v20 = vmax.f32 %v3956_v48, %v3976_v62 }
 0x339   :  { %v6268_v36 = vpack.c.bf16 %v3980_v20, %v3980_v20 }
 0x33b   :  { %v4001_v32 = vrot.slane %v6268_v36, 6 }
 0x33d   :  { %v4003_v19 = vrot.slane %v4001_v32, 4  ;;  %v4002_v23 = vsel %vm6654_vm4, %v4000_v14, %v4001_v32  ;;  %v4651_v32 = vrot.slane %v4649_v17, 4 }
 0x33e   :  { %4013 = vst.msk [vmem:[#allocation5 + $0x20] sm:$0xf] %vm10234_vm0, %v4002_v23  ;;  %v4491_v23 = vrot.slane %v9432_v46, 4  ;;  %vm10237_vm0 = vsmask.f32 7938 }
 0x33f   :  { %4014 = vst.msk [vmem:[#allocation5 + $0x24] sm:$0x3] %vm10235_vm5, %v4003_v19  ;;  %v4888_v19 = vrot.slane %v4886_v29, 4  ;;  %vm9546_vm5 = vmand %vm4146_vm15, %vm10237_vm0 }
 0x345   :  { %v4523_v33 = vld [vmem:[#allocation5 + $0x20] sm:$0xf] }
 0x346   :  { %v4752_v6 = vld [vmem:[#allocation5 + $0x20] sm:$0xf]  ;;  %4536 = vrot.lane.b32.xlu1 %v4523_v33, %s6586_s15  ;;  %v9478_v40 = vld [vmem:[#allocation5 + $0x24] sm:$0x7] }
 0x347   :  { %v4558_v12 = vld [vmem:[#allocation5 + $0x20] sm:$0xf]  ;;  %v4767_v60 = vrot.slane %v4752_v6, 6  ;;  %v4770_v8 = vrot.slane %v9478_v40, 6  ;;  %v9482_v30 = vld [vmem:[#allocation5 + $0x24] sm:$0x3] }
 0x348   :  { %v4590_v39 = vshll.u32 %v4558_v12, 16  ;;  %v4594_v49 = vshrl.u32 %v4558_v12, 16  ;;  %v4798_v63 = vld [vmem:[#allocation5 + $0x20] sm:$0xf]  ;;  %v4799_v61 = vld [vmem:[#allocation5 + $0x24] sm:$0xf] }
 0x349   :  { %v4768_v25 = vsel %vm6654_vm4, %v4766_v21, %v4767_v60  ;;  %v4769_v15 = vrot.slane %v4767_v60, 4  ;;  %v4600_v9 = vshll.u32 %v9482_v30, 16  ;;  %v4830_v45 = vshrl.u32 %v4798_v63, 16  ;;  %v4637_v1 = vld [vmem:[#allocation5 + $0x20] sm:$0xf] }
 0x34a   :  { %v4592_v5 = vrot.slane %v4590_v39, 5  ;;  %v4596_v41 = vrot.slane %v4594_v49, 4  ;;  %4777 = vrot.lane.b32.xlu0 %v4768_v25, %s6586_s15  ;;  %v4833_v35 = vshll.u32 %v4798_v63, 16  ;;  %v4840_v28 = vshrl.u32 %v4799_v61, 16  ;;  %v9504_v62 = vld [vmem:[#allocation5 + $0x24] sm:$0x3] }
 0x34b   :  { %v4771_v18 = vsel %vm6654_vm4, %v4769_v15, %v4770_v8  ;;  %v4843_v34 = vshll.u32 %v4799_v61, 16  ;;  %v4832_v26 = vrot.slane %v4830_v45, 6  ;;  %v9495_v51 = vrot.slane %v4600_v9, 5  ;;  %v4874_v56 = vld [vmem:[#allocation5 + $0x20] sm:$0xf] }
 0x34c   :  { %v4597_v54 = vor.u32 %v4596_v41, %v4592_v5  ;;  %4779 = vrot.lane.b32.xlu1 %v4771_v18, %s6586_s15  ;;  %v4835_v10 = vrot.slane %v4833_v35, 7  ;;  %v4842_v44 = vrot.slane %v4840_v28, 6  ;;  %v4593_v37 = vsel %vm6749_vm11, %v4588_v52, %v4592_v5  ;;  %v4464_v20 = vld [vmem:[#allocation5 + $0x20] sm:$0xf]  ;;  %v4687_v11 = vld [vmem:[#allocation5 + $0x24] sm:$0x7] }
 0x34d   :  { %v4845_v31 = vrot.slane %v4843_v34, 7  ;;  %v4652_v47 = vrot.slane %v4637_v1, 5  ;;  %v4686_v14 = vld [vmem:[#allocation5 + $0x20] sm:$0xf]  ;;  %v4655_v33 = vrot.slane %v9504_v62, 5  ;;  %v4889_v6 = vrot.slane %v4874_v56, 7 }
 0x34e   :  { %v4598_v53 = vrot.slane %v4597_v54, 4  ;;  %4613 = vrot.lane.b32.xlu0 %v4593_v37, %s6587_s16  ;;  %v4836_v24 = vor.u32 %v4835_v10, %v4832_v26  ;;  %v4493_v58 = vshrl.u32 %v4464_v20, 16  ;;  %v4465_v17 = vld [vmem:[#allocation5 + $0x24] sm:$0x1]  ;;  %v4604_v43 = vshrl.u32 %v9482_v30, 16 }
 0x34f   :  { %v9502_v48 = vor.u32 %v4845_v31, %v4842_v44  ;;  %v4654_v21 = vrot.slane %v4652_v47, 4  ;;  %v4718_v29 = vshrl.u32 %v4686_v14, 16  ;;  %v4721_v60 = vshll.u32 %v4686_v14, 16  ;;  %v9522_v46 = vld [vmem:[#allocation5 + $0x24] sm:$0xf] }
 0x350   :  { %v4603_v0 = vsel %vm6749_vm11, %v4598_v53, %v9495_v51  ;;  %v4838_v36 = vrot.slane %v4836_v24, 4  ;;  %v4837_v22 = vsel %vm6795_vm3, %v4828_v38, %v4836_v24  ;;  %v4495_v7 = vrot.slane %v4493_v58, 7  ;;  %v4788_v53 = vld [vmem:[#allocation6 + $0x24] sm:$0xf]  ;;  %v4626_v56 = vld [vmem:[#allocation6 + $0x20] sm:$0xf] }
 0x351   :  { %4615 = vrot.lane.b32.xlu1 %v4603_v0, %s6587_s16  ;;  %v4496_v4 = vshll.u32 %v4464_v20, 16  ;;  %v4728_v39 = vshrl.u32 %v4687_v11, 16  ;;  %v4731_v49 = vshll.u32 %v4687_v11, 16  ;;  %v4653_v63 = vsel %vm6708_vm9, %v4651_v32, %v4652_v47  ;;  %v4524_v32 = vld [vmem:[#allocation5 + $0x24] sm:$0x1] }
 0x352   :  { %4853 = vrot.lane.b32.xlu0 %v4837_v22, %s6587_s16  ;;  %v4847_v12 = vsel %vm6795_vm3, %v4838_v36, %v9502_v48  ;;  %v4720_v25 = vrot.slane %v4718_v29, 5  ;;  %v4723_v15 = vrot.slane %v4721_v60, 6  ;;  %v4502_v5 = vshll.u32 %v4465_v17, 16 }
 0x353   :  { %v4498_v41 = vor.u32 %v4496_v4, %v4495_v7  ;;  %v4730_v30 = vrot.slane %v4728_v39, 5  ;;  %v4733_v61 = vrot.slane %v4731_v49, 6  ;;  %v4500_v9 = vrot.slane %v4495_v7, 4 }
 0x354   :  { %v4656_v45 = vsel %vm6708_vm9, %v4654_v21, %v4655_v33  ;;  %v4891_v35 = vrot.slane %v4889_v6, 4  ;;  %v4892_v28 = vrot.slane %v9522_v46, 7  ;;  %v4724_v18 = vor.u32 %v4723_v15, %v4720_v25 }
 0x355   :  { %4855 = vrot.lane.b32.xlu1 %v4847_v12, %s6587_s16  ;;  %v4606_v52 = vrot.slane %v4604_v43, 4  ;;  %v4499_v54 = vsel %vm6846_vm12, %v4491_v23, %v4498_v41  ;;  %v4734_v34 = vor.u32 %v4733_v61, %v4730_v30  ;;  %v4504_v1 = vsel %vm6846_vm12, %v4500_v9, %v4502_v5 }
 0x356   :  { %4662 = vrot.lane.b32.xlu0 %v4653_v63, %s6588_s17  ;;  %v4890_v26 = vsel %vm6810_vm10, %v4888_v19, %v4889_v6  ;;  %4517 = vst.msk [vmem:[#allocation6 + $0x38] sm:$0xf] %vm10236_vm1, %v4499_v54  ;;  %v4725_v10 = vsel %vm6767_vm14, %v4716_v27, %v4724_v18  ;;  %v4726_v44 = vrot.slane %v4724_v18, 4  ;;  %v4893_v47 = vsel %vm6810_vm10, %v4891_v35, %v4892_v28 }
 0x357   :  { %4519 = vst.msk [vmem:[#allocation6 + $0x40] sm:$0x1] %vm4024_vm6, %v4504_v1  ;;  %v4736_v38 = vrot.slane %v4734_v34, 4  ;;  %v4607_v36 = vor.u32 %v4606_v52, %v9495_v51  ;;  %v4772_v22 = vrot.slane %v4770_v8, 4  ;;  %v4848_v27 = vrot.slane %v9502_v48, 4 }
 0x358   :  { %v4774_v37 = vpop.permute.xlu1 %4773  ;;  %4746 = vst.msk [vmem:[#allocation6 + $0x34] sm:$0xf] %vm10240_vm13, %v4725_v10  ;;  %v4735_v0 = vsel %vm6767_vm14, %v4726_v44, %v4734_v34  ;;  %v4657_v40 = vrot.slane %v4655_v33, 4  ;;  %v4894_v58 = vrot.slane %v4892_v28, 4 }
 0x359   :  { %4664 = vrot.lane.b32.xlu1 %v4656_v45, %s6588_s17  ;;  %v4789_v24 = vsel %vm9388_vm8, %v4774_v37, %v4788_v53  ;;  %4747 = vst.msk [vmem:[#allocation6 + $0x3c] sm:$0xf] %vm10236_vm1, %v4735_v0  ;;  %v4608_v51 = vrot.slane %v4607_v36, 4  ;;  %vm5198_vm8 = vcmask 517120  }
 0x35a   :  { %4899 = vrot.lane.b32.xlu0 %v4890_v26, %s6588_s17  ;;  %4790 = vst [vmem:[#allocation6 + $0x24] sm:$0xf] %v4789_v24  ;;  %4748 = vst.msk [vmem:[#allocation6 + $0x44] sm:$0x1] %vm4024_vm6, %v4736_v38 }
 0x35b   :  { %v4610_v20 = vpop.permute.xlu0 %4609  ;;  %vm10241_vm6 = vmmov %vm10237_vm0  ;;  %5200 = vst.msk [vmem:[#allocation8] sm:$0x3] %vm5198_vm8, %v10045_v55  ;;  %vm10244_vm0 = vcmask 778752  }
 0x35c   :  { %v4627_v42 = vsel %vm9546_vm5, %v4610_v20, %v4626_v56  ;;  %v4378_v14 = vpop.permute.xlu1 %4377  ;;  %vm4674_vm13 = vmand %vm4225_vm2, %vm10241_vm6  ;;  %5201 = vst.msk [vmem:[#allocation8 + $0x8] sm:$0x3] %vm5198_vm8, %v10045_v55  ;;  %vm5202_vm6 = vcmask 519170  }
 0x35d   :  { %4901 = vrot.lane.b32.xlu1 %v4893_v47, %s6588_s17  ;;  %4628 = vst [vmem:[#allocation6 + $0x20] sm:$0xf] %v4627_v42  ;;  %4389 = vst.msk [vmem:[#allocation6 + $0x1c] sm:$0xf] %vm4146_vm15, %v4378_v14 }
 0x35e   :  { %4538 = vrot.lane.b32.xlu0 %v4524_v32, %s6586_s15  ;;  %5203 = vst.msk [vmem:[#allocation8 + $0x4] sm:$0xc] %vm5202_vm6, %v10045_v55  ;;  %5204 = vst.msk [vmem:[#allocation8 + $0xc] sm:$0xc] %vm5202_vm6, %v10045_v55  ;;  %v9618_v32 = vld [vmem:[%s9950_s4] ss:$0 sm:$0xff] }
 0x35f   :  { %v4215_v19 = vpop.permute.xlu0 %4214 }
 0x360   :  { %4228 = vst.msk [vmem:[#allocation6 + $0x10] sm:$0xf] %vm4225_vm2, %v4215_v19  ;;  %v4850_v23 = vpop.permute.xlu1 %4849 }
 0x361   :  { %4781 = vrot.lane.b32.xlu1 %v4772_v22, %s6586_s15  ;;  %v4864_v11 = vld [vmem:[#allocation6 + $0x24] sm:$0xf] }
 0x362   :  { %4617 = vrot.lane.b32.xlu0 %v4608_v51, %s6587_s16  ;;  %v4865_v21 = vsel %vm9546_vm5, %v4850_v23, %v4864_v11  ;;  %vm10246_vm5 = vcmask 1041152  }
 0x363   :  { %v4444_v6 = vpop.permute.xlu0 %4443  ;;  %4866 = vst [vmem:[#allocation6 + $0x24] sm:$0xf] %v4865_v21  ;;  %vm10247_vm1 = vmmov %vm10246_vm5 }
 0x364   :  { %4456 = vst.msk [vmem:[#allocation6 + $0x14] sm:$0xf] %vm4225_vm2, %v4444_v6  ;;  %v4217_v8 = vpop.permute.xlu1 %4216  ;;  %v4675_v29 = vld [vmem:[#allocation6 + $0x20] sm:$0xf] }
 0x365   :  { %4857 = vrot.lane.b32.xlu1 %v4848_v27, %s6587_s16  ;;  %4229 = vst.msk [vmem:[#allocation6 + $0x18] sm:$0xf] %vm4225_vm2, %v4217_v8 }
 0x366   :  { %4666 = vrot.lane.b32.xlu0 %v4657_v40, %s6588_s17 }
 0x367   :  { %v4533_v48 = vpop.permute.xlu0 %4532 }
 0x368   :  { %4550 = vst.msk [vmem:[#allocation6 + $0x28] sm:$0xf] %vm4097_vm7, %v4533_v48  ;;  %v4446_v17 = vpop.permute.xlu1 %4445 }
 0x369   :  { %4903 = vrot.lane.b32.xlu1 %v4894_v58, %s6588_s17  ;;  %4457 = vst.msk [vmem:[#allocation6 + $0x1c] sm:$0xf] %vm4225_vm2, %v4446_v17 }
 0x36a   :  { %v4910_v4 = vld [vmem:[#allocation6 + $0x24] sm:$0xf] }
 0x36c   :  { %v6521_v62 = vld [vmem:[#allocation6 + $0x10] ss:$8 sps:$4 sm:$0xff]  }
 0x370   :  { %v6519_v12 = vld [vmem:[#allocation6 + $0x14] ss:$8 sps:$4 sm:$0xff]  }
 0x371   :  { %5148 = vmatprep.mubr.bf16.mxu1 %v6519_v12 }
 0x372   :  { %5149 = vmatmul.mubr.bf16.gmra.mxu1 %v6521_v62 }
 0x390   :  { %v4776_v33 = vpop.permute.xlu1 %4775 }
 0x391   :  { %4791 = vst.msk [vmem:[#allocation6 + $0x2c] sm:$0xf] %vm4097_vm7, %v4776_v33 }
 0x393   :  { %v4612_v43 = vpop.permute.xlu0 %4611 }
 0x394   :  { %4629 = vst.msk [vmem:[#allocation6 + $0x28] sm:$0xf] %vm4146_vm15, %v4612_v43  ;;  %v4659_v60 = vpop.permute.xlu1 %4658 }
 0x395   :  { %v4676_v46 = vsel %vm4674_vm13, %v4659_v60, %v4675_v29 }
 0x396   :  { %4677 = vst [vmem:[#allocation6 + $0x20] sm:$0xf] %v4676_v46 }
 0x397   :  { %v4852_v7 = vpop.permute.xlu0 %4851 }
 0x398   :  { %4867 = vst.msk [vmem:[#allocation6 + $0x2c] sm:$0xf] %vm4146_vm15, %v4852_v7  ;;  %v4896_v39 = vpop.permute.xlu1 %4895 }
 0x399   :  { %v4911_v49 = vsel %vm4674_vm13, %v4896_v39, %v4910_v4  ;;  %vm5189_vm13 = vcmask 523264  }
 0x39a   :  { %4912 = vst [vmem:[#allocation6 + $0x24] sm:$0xf] %v4911_v49 }
 0x39b   :  { %v4661_v63 = vpop.permute.xlu0 %4660 }
 0x39c   :  { %4678 = vst.msk [vmem:[#allocation6 + $0x28] sm:$0xf] %vm4225_vm2, %v4661_v63  ;;  %v4898_v25 = vpop.permute.xlu1 %4897 }
 0x39d   :  { %4913 = vst.msk [vmem:[#allocation6 + $0x2c] sm:$0xf] %vm4225_vm2, %v4898_v25 }
 0x39f   :  { %v4535_v15 = vpop.permute.xlu0 %4534 }
 0x3a0   :  { %4551 = vst.msk [vmem:[#allocation6 + $0x30] sm:$0xf] %vm4097_vm7, %v4535_v15 }
 0x3a3   :  { %v6524_v41 = vld [vmem:[#allocation6 + $0x20] ss:$8 sps:$4 sm:$0xff]  }
 0x3a4   :  { %v6522_v5 = vld [vmem:[#allocation6 + $0x24] ss:$8 sps:$4 sm:$0xff]  }
 0x3a5   :  { %5156 = vmatprep.mubr.bf16.mxu1 %v6522_v5 }
 0x3a6   :  { %5157 = vmatmul.mubr.bf16.gmra.mxu1 %v6524_v41 }
 0x3b8   :  { %v4537_v30 = vpop.permute.xlu1 %4536 }
 0x3b9   :  { %4552 = vst.msk [vmem:[#allocation6 + $0x38] sm:$0xf] %vm4097_vm7, %v4537_v30 }
 0x3bc   :  { %v4778_v61 = vpop.permute.xlu0 %4777 }
 0x3bd   :  { %4792 = vst.msk [vmem:[#allocation6 + $0x34] sm:$0xf] %vm4097_vm7, %v4778_v61  ;;  %v5253_v61 = vld [vmem:[#allocation9 + $0x10] sm:$0x1] }
 0x3be   :  { %v4780_v9 = vpop.permute.xlu1 %4779 }
 0x3bf   :  { %4793 = vst.msk [vmem:[#allocation6 + $0x3c] sm:$0xf] %vm4097_vm7, %v4780_v9  ;;  %vm10242_vm7 = vcmask 516352  }
 0x3c0   :  { %v4614_v45 = vpop.permute.xlu0 %4613 }
 0x3c1   :  { %4630 = vst.msk [vmem:[#allocation6 + $0x30] sm:$0xf] %vm4146_vm15, %v4614_v45 }
 0x3c3   :  { %v4616_v35 = vpop.permute.xlu1 %4615 }
 0x3c4   :  { %4631 = vst.msk [vmem:[#allocation6 + $0x38] sm:$0xf] %vm4146_vm15, %v4616_v35  ;;  %v4854_v28 = vpop.permute.xlu0 %4853 }
 0x3c5   :  { %4868 = vst.msk [vmem:[#allocation6 + $0x34] sm:$0xf] %vm4146_vm15, %v4854_v28 }
 0x3c7   :  { %v4856_v18 = vpop.permute.xlu1 %4855 }
 0x3c8   :  { %4869 = vst.msk [vmem:[#allocation6 + $0x3c] sm:$0xf] %vm4146_vm15, %v4856_v18  ;;  %v4663_v52 = vpop.permute.xlu0 %4662  ;;  %vm10243_vm15 = vmmov %vm10242_vm7 }
 0x3c9   :  { %4679 = vst.msk [vmem:[#allocation6 + $0x30] sm:$0xf] %vm4225_vm2, %v4663_v52 }
 0x3cb   :  { %v4665_v54 = vpop.permute.xlu1 %4664 }
 0x3cc   :  { %4680 = vst.msk [vmem:[#allocation6 + $0x38] sm:$0xf] %vm4225_vm2, %v4665_v54  ;;  %v4900_v34 = vpop.permute.xlu0 %4899 }
 0x3cd   :  { %4914 = vst.msk [vmem:[#allocation6 + $0x34] sm:$0xf] %vm4225_vm2, %v4900_v34 }
 0x3cf   :  { %v4902_v1 = vpop.permute.xlu1 %4901 }
 0x3d0   :  { %4915 = vst.msk [vmem:[#allocation6 + $0x3c] sm:$0xf] %vm4225_vm2, %v4902_v1  ;;  %v4539_v26 = vpop.permute.xlu0 %4538  ;;  %vm10245_vm2 = vmmov %vm10244_vm0 }
 0x3d1   :  { %4554 = vst.msk [vmem:[#allocation6 + $0x40] sm:$0x1] %vm10242_vm7, %v4539_v26  ;;  %vm5251_vm7 = vcmask 516096  }
 0x3d3   :  { %v4782_v10 = vpop.permute.xlu1 %4781 }
 0x3d4   :  { %4794 = vst.msk [vmem:[#allocation6 + $0x44] sm:$0x1] %vm10243_vm15, %v4782_v10  ;;  %v4618_v44 = vpop.permute.xlu0 %4617  ;;  %v4923_v53 = vld [vmem:[#allocation6 + $0x30] sm:$0xff]  ;;  %vm10248_vm15 = vsmask.f32 256 }
 0x3d5   :  { %4633 = vst.msk [vmem:[#allocation6 + $0x40] sm:$0x1] %vm10244_vm0, %v4618_v44  ;;  %vm9632_vm0 = vmand %vm5251_vm7, %vm10248_vm15  ;;  %v5301_v44 = vld [vmem:[#allocation9 + $0x14] sm:$0x1] }
 0x3d7   :  { %v4858_v37 = vpop.permute.xlu1 %4857  ;;  %v4924_v31 = vld [vmem:[#allocation6 + $0x38] sm:$0xff] }
 0x3d8   :  { %v6525_v38 = vld [vmem:[#allocation6 + $0x34] ss:$8 sps:$4 sm:$0xff]   ;;  %4870 = vst.msk [vmem:[#allocation6 + $0x44] sm:$0x1] %vm10245_vm2, %v4858_v37  ;;  %v6150_v24 = vcombine.low %v4923_v53, %v4924_v31  ;;  %v4667_v47 = vpop.permute.xlu0 %4666  ;;  %vm5249_vm2 = vcmask 519168  }
 0x3d9   :  { %5164 = vmatprep.mubr.bf16.mxu1 %v6525_v38  ;;  %4682 = vst.msk [vmem:[#allocation6 + $0x40] sm:$0x1] %vm10246_vm5, %v4667_v47  ;;  %v6529_v47 = vld [vmem:[%s9951_s5 + $0x78] sm:$0xff]  }
 0x3da   :  { %5165 = vmatmul.mubr.bf16.gmra.mxu1 %v6150_v24  ;;  %6340 = vmatprep.subr.bf16.mxu1 %v6529_v47 }
 0x3db   :  { %v4904_v0 = vpop.permute.xlu1 %4903 }
 0x3dc   :  { %4916 = vst.msk [vmem:[#allocation6 + $0x44] sm:$0x1] %vm10247_vm1, %v4904_v0  ;;  %v5347_v0 = vld [vmem:[#allocation9 + $0x18] sm:$0x1]  ;;  %vm10254_vm1 = vsmask.f32 7938 }
 0x3e3   :  { %v4925_v56 = vld [vmem:[#allocation6 + $0x40] sm:$0x11] }
 0x3e4   :  { %v6153_v20 = vcombine.high %v4925_v56, %v4925_v56  ;;  %v6152_v36 = vcombine.low %v4925_v56, %v4925_v56 }
 0x3e6   :  { %5172 = vmatprep.mubr.bf16.mxu1 %v6153_v20  ;;  %v6530_v20 = vld [vmem:[%s9951_s5 + $0x38] sm:$0xff]  }
 0x3e7   :  { %5173 = vmatmul.mubr.bf16.gmra.mxu1 %v6152_v36 }
 0x3e8   :  { %6341 = vmatpush3.bf16.msra.mxu1 %v6530_v20 }
 0x3ee   :  { %v6310_v42 = vpop.f32.mrf.mxu1 }
 0x3f0   :  { %v6311_v14 = vpop.f32.mrf.mxu1 }
 0x3f1   :  { %v6312_v22 = vadd.f32 %v6311_v14, %v6310_v42 }
 0x3f2   :  { %v6313_v19 = vpop.f32.mrf.mxu1 }
 0x3f3   :  { %v5143_v51 = vadd.f32 %v6312_v22, %v9618_v32  ;;  %v6531_v22 = vld [vmem:[%s9951_s5 + $0x70] sm:$0xff]  }
 0x3f4   :  { %v6314_v23 = vpop.f32.mrf.mxu1  ;;  %6342 = vmatprep.subr.bf16.mxu1 %v6531_v22 }
 0x3f5   :  { %v5180_v27 = vmax.f32 %v5143_v51, 0.0  ;;  %v6315_v11 = vadd.f32 %v6314_v23, %v6313_v19  ;;  %v6532_v19 = vld [vmem:[%s9951_s5 + $0x30] sm:$0xff]  }
 0x3f6   :  { %6343 = vmatpush3.bf16.msra.mxu1 %v6532_v19 }
 0x3f7   :  { %5190 = vst.msk [vmem:[#allocation7] sm:$0xff] %vm5189_vm13, %v5180_v27  ;;  %v5146_v55 = vadd.f32 %v6315_v11, %v9618_v32  ;;  %v6533_v11 = vld [vmem:[%s9951_s5 + $0x68] sm:$0xff]  }
 0x3f8   :  { %6344 = vmatprep.subr.bf16.mxu1 %v6533_v11 }
 0x3f9   :  { %v5181_v21 = vmax.f32 %v5146_v55, 0.0 }
 0x3fb   :  { %5191 = vst.msk [vmem:[#allocation7 + $0x8] sm:$0xff] %vm5189_vm13, %v5181_v21 }
 0x432   :  { %v6316_v6 = vpop.f32.mrf.mxu1 }
 0x434   :  { %v6317_v40 = vpop.f32.mrf.mxu1 }
 0x435   :  { %v6318_v8 = vadd.f32 %v6317_v40, %v6316_v6 }
 0x436   :  { %v6319_v58 = vpop.f32.mrf.mxu1 }
 0x437   :  { %v5151_v48 = vadd.f32 %v6318_v8, %v9618_v32 }
 0x438   :  { %v6320_v17 = vpop.f32.mrf.mxu1 }
 0x439   :  { %v5182_v12 = vmax.f32 %v5151_v48, 0.0  ;;  %v6321_v62 = vadd.f32 %v6320_v17, %v6319_v58  ;;  %v5393_v48 = vld [vmem:[#allocation9 + $0x1c] sm:$0x1] }
 0x43b   :  { %5192 = vst.msk [vmem:[#allocation7 + $0x10] sm:$0xff] %vm5189_vm13, %v5182_v12  ;;  %v5154_v33 = vadd.f32 %v6321_v62, %v9618_v32  ;;  %v6534_v62 = vld [vmem:[%s9951_s5 + $0x28] sm:$0xff]  }
 0x43c   :  { %6345 = vmatpush3.bf16.msra.mxu1 %v6534_v62 }
 0x43d   :  { %v5183_v43 = vmax.f32 %v5154_v33, 0.0 }
 0x43f   :  { %5193 = vst.msk [vmem:[#allocation7 + $0x18] sm:$0xff] %vm5189_vm13, %v5183_v43 }
 0x446   :  { %v5205_v29 = vld [vmem:[#allocation7] ss:$4 sm:$0xff]  ;;  %v5207_v60 = vld [vmem:[#allocation7 + $0x1] ss:$4 sm:$0xff]  ;;  %v5210_v46 = vld [vmem:[#allocation7 + $0x2] ss:$4 sm:$0xff] }
 0x447   :  { %v5208_v7 = vmax.f32 %v5205_v29, %v5207_v60  ;;  %v5212_v4 = vld [vmem:[#allocation7 + $0x3] ss:$4 sm:$0xff] }
 0x448   :  { %v5213_v39 = vmax.f32 %v5210_v46, %v5212_v4  ;;  %v6535_v29 = vld [vmem:[%s9951_s5 + $0x60] sm:$0xff]  }
 0x449   :  { %6346 = vmatprep.subr.bf16.mxu1 %v6535_v29 }
 0x44a   :  { %v5214_v49 = vmax.f32 %v5208_v7, %v5213_v39  ;;  %v6536_v39 = vld [vmem:[%s9951_s5 + $0x20] sm:$0xff]  }
 0x44b   :  { %6347 = vmatpush3.bf16.msra.mxu1 %v6536_v39 }
 0x44c   :  { %v6269_v63 = vpack.c.bf16 %v5214_v49, %v5214_v49 }
 0x44e   :  { %v5219_v25 = vrot.slane %v6269_v63, 6  ;;  %v6537_v63 = vld [vmem:[%s9951_s5 + $0x58] sm:$0xff]  }
 0x44f   :  { %6348 = vmatprep.subr.bf16.mxu1 %v6537_v63 }
 0x450   :  { %v5220_v15 = vrot.slane %v5219_v25, 4  ;;  %5223 = vst.msk [vmem:[#allocation8] sm:$0xc] %vm5202_vm6, %v5219_v25 }
 0x452   :  { %5224 = vst.msk [vmem:[#allocation8 + $0x4] sm:$0x3] %vm5198_vm8, %v5220_v15 }
 0x457   :  { %v5247_v34 = vld [vmem:[#allocation8] sm:$0xf] }
 0x458   :  { %5250 = vst.msk [vmem:[#allocation9] sm:$0xf] %vm5249_vm2, %v5247_v34  ;;  %v5289_v24 = vld [vmem:[#allocation8] sm:$0xe] }
 0x459   :  { %v9636_v41 = vld [vmem:[#allocation8 + $0x4] sm:$0x1]  ;;  %v5335_v42 = vld [vmem:[#allocation8] sm:$0xc]  ;;  %v6173_v55 = vrot.slane %v5289_v24, 9 }
 0x45a   :  { %v5305_v30 = vld [vmem:[#allocation8 + $0x4] sm:$0x3]  ;;  %v5272_v9 = vshrl.u32 %v9636_v41, 16  ;;  %v5381_v23 = vld [vmem:[#allocation8] sm:$0x8]  ;;  %v6174_v17 = vrot.slane %v5335_v42, 10 }
 0x45b   :  { %v5316_v45 = vshrl.u32 %v5305_v30, 16  ;;  %v5248_v35 = vld [vmem:[#allocation8 + $0x4] sm:$0x1]  ;;  %v5319_v18 = vshll.u32 %v5305_v30, 16  ;;  %v6175_v46 = vrot.slane %v5381_v23, 11 }
 0x45c   :  { %5278 = vrot.lane.b32.xlu0 %v5272_v9, %s6587_s16  ;;  %v5254_v52 = vsel %vm9632_vm0, %v5248_v35, %v5253_v61  ;;  %v5290_v54 = vld [vmem:[#allocation8 + $0x4] sm:$0x3]  ;;  %v5256_v22 = vld [vmem:[#allocation8] sm:$0xf] }
 0x45d   :  { %v9640_v28 = vrot.slane %v5316_v45, 5  ;;  %5255 = vst [vmem:[#allocation9 + $0x10] sm:$0x1] %v5254_v52  ;;  %v9646_v26 = vrot.slane %v5319_v18, 6  ;;  %v5295_v10 = vrot.slane %v5290_v54, 5  ;;  %v5262_v23 = vshll.u32 %v5256_v22, 16 }
 0x45e   :  { %v5336_v38 = vld [vmem:[#allocation8 + $0x4] sm:$0x7]  ;;  %v5304_v11 = vld [vmem:[#allocation8] sm:$0xe] }
 0x45f   :  { %v5324_v1 = vrot.slane %v9640_v28, 4  ;;  %v5322_v37 = vor.u32 %v9646_v26, %v9640_v28  ;;  %v5297_v53 = vrot.slane %v5295_v10, 4  ;;  %v5382_v56 = vld [vmem:[#allocation8 + $0x4] sm:$0xf]  ;;  %v5341_v36 = vrot.slane %v5336_v38, 6 }
 0x460   :  { %v5387_v40 = vrot.slane %v5382_v56, 7  ;;  %v5296_v58 = vsel %vm6708_vm9, %v6173_v55, %v5295_v10  ;;  %v5350_v29 = vld [vmem:[#allocation8] sm:$0xc]  ;;  %v9721_v39 = vld [vmem:[#allocation8 + $0x4] sm:$0xf] }
 0x461   :  { %5327 = vrot.lane.b32.xlu1 %v5324_v1, %s6587_s16  ;;  %v5302_v31 = vsel %vm9632_vm0, %v5297_v53, %v5301_v44  ;;  %v5343_v51 = vrot.slane %v5341_v36, 4  ;;  %5300 = vst.msk [vmem:[#allocation9 + $0x4] sm:$0xf] %vm5249_vm2, %v5296_v58  ;;  %v5342_v60 = vsel %vm6654_vm4, %v6174_v17, %v5341_v36  ;;  %v6539_v58 = vld [vmem:[%s9951_s5 + $0x50] sm:$0xff]  }
 0x462   :  { %5303 = vst [vmem:[#allocation9 + $0x14] sm:$0x1] %v5302_v31  ;;  %v5389_v33 = vrot.slane %v5387_v40, 4  ;;  %5346 = vst.msk [vmem:[#allocation9 + $0x8] sm:$0xf] %vm5249_vm2, %v5342_v60  ;;  %v5388_v25 = vsel %vm6810_vm10, %v6175_v46, %v5387_v40  ;;  %v5307_v40 = vshrl.u32 %v5304_v11, 16 }
 0x463   :  { %v5348_v6 = vsel %vm9632_vm0, %v5343_v51, %v5347_v0  ;;  %5392 = vst.msk [vmem:[#allocation9 + $0xc] sm:$0xf] %vm5249_vm2, %v5388_v25  ;;  %v5259_v51 = vshrl.u32 %v5256_v22, 16  ;;  %v6540_v17 = vld [vmem:[%s9951_s5 + $0x10] sm:$0xff]   ;;  %v6541_v60 = vld [vmem:[%s9951_s5 + $0x48] sm:$0xff]  }
 0x464   :  { %5349 = vst [vmem:[#allocation9 + $0x18] sm:$0x1] %v5348_v6  ;;  %v5394_v49 = vsel %vm9632_vm0, %v5389_v33, %v5393_v48  ;;  %v5264_v6 = vrot.slane %v5262_v23, 5  ;;  %v5309_v33 = vrot.slane %v5307_v40, 5  ;;  %v6542_v46 = vld [vmem:[%s9951_s5 + $0x8] sm:$0xff]  }
 0x465   :  { %5395 = vst [vmem:[#allocation9 + $0x1c] sm:$0x1] %v5394_v49 }
 0x466   :  { %v6322_v14 = vpop.f32.mrf.mxu1 }
 0x468   :  { %v6323_v27 = vpop.f32.mrf.mxu1 }
 0x469   :  { %v6324_v21 = vadd.f32 %v6323_v27, %v6322_v14 }
 0x46a   :  { %v6325_v8 = vpop.f32.mrf.mxu1 }
 0x46b   :  { %v5159_v12 = vadd.f32 %v6324_v21, %v9618_v32  ;;  %v5261_v21 = vrot.slane %v5259_v51, 4 }
 0x46c   :  { %v6326_v43 = vpop.f32.mrf.mxu1 }
 0x46d   :  { %v5184_v7 = vmax.f32 %v5159_v12, 0.0  ;;  %v6327_v4 = vadd.f32 %v6326_v43, %v6325_v8  ;;  %v5310_v8 = vshll.u32 %v5304_v11, 16  ;;  %v5351_v12 = vld [vmem:[#allocation8 + $0x4] sm:$0x7]  ;;  %v5265_v62 = vor.u32 %v5264_v6, %v5261_v21 }
 0x46f   :  { %5194 = vst.msk [vmem:[#allocation7 + $0x20] sm:$0xff] %vm5189_vm13, %v5184_v7  ;;  %v5162_v15 = vadd.f32 %v6327_v4, %v9618_v32  ;;  %v5312_v43 = vrot.slane %v5310_v8, 6  ;;  %v5268_v7 = vshll.u32 %v9636_v41, 16  ;;  %v5362_v4 = vshrl.u32 %v5351_v12, 16 }
 0x470   :  { %v5266_v63 = vrot.slane %v5265_v62, 4 }
 0x471   :  { %v5185_v5 = vmax.f32 %v5162_v15, 0.0  ;;  %v5313_v15 = vor.u32 %v5312_v43, %v5309_v33 }
 0x473   :  { %5195 = vst.msk [vmem:[#allocation7 + $0x28] sm:$0xff] %vm5189_vm13, %v5185_v5  ;;  %v5353_v5 = vshrl.u32 %v5350_v29, 16 }
 0x49a   :  { %v6328_v30 = vpop.f32.mrf.mxu1 }
 0x49c   :  { %v6329_v61 = vpop.f32.mrf.mxu1 }
 0x49d   :  { %v6330_v9 = vadd.f32 %v6329_v61, %v6328_v30  ;;  %v5356_v30 = vshll.u32 %v5350_v29, 16 }
 0x49e   :  { %v6331_v45 = vpop.f32.mrf.mxu1 }
 0x49f   :  { %v5167_v35 = vadd.f32 %v6330_v9, %v9618_v32  ;;  %v5270_v9 = vrot.slane %v5268_v7, 5 }
 0x4a0   :  { %v6332_v18 = vpop.f32.mrf.mxu1 }
 0x4a1   :  { %v5186_v52 = vmax.f32 %v5167_v35, 0.0  ;;  %v6333_v54 = vadd.f32 %v6332_v18, %v6331_v45  ;;  %v9728_v35 = vrot.slane %v5362_v4, 6 }
 0x4a3   :  { %5196 = vst.msk [vmem:[#allocation7 + $0x30] sm:$0xff] %vm5189_vm13, %v5186_v52  ;;  %v5170_v34 = vadd.f32 %v6333_v54, %v9618_v32  ;;  %v5404_v52 = vshrl.u32 %v9721_v39, 16 }
 0x4a5   :  { %v5187_v1 = vmax.f32 %v5170_v34, 0.0  ;;  %v5271_v34 = vsel %vm6749_vm11, %v5266_v63, %v5270_v9  ;;  %v9756_v51 = vrot.slane %v5404_v52, 7 }
 0x4a7   :  { %5197 = vst.msk [vmem:[#allocation7 + $0x38] sm:$0xff] %vm5189_vm13, %v5187_v1  ;;  %v6334_v10 = vpop.f32.mrf.mxu1  ;;  %v5314_v1 = vrot.slane %v5313_v15, 4 }
 0x4a9   :  { %v6335_v44 = vpop.f32.mrf.mxu1  ;;  %v5323_v11 = vsel %vm6767_vm14, %v5314_v1, %v5322_v37 }
 0x4aa   :  { %v6336_v53 = vadd.f32 %v6335_v44, %v6334_v10  ;;  %v5355_v10 = vrot.slane %v5353_v5, 6  ;;  %v5332_v5 = vld [vmem:[#allocation9 + $0x14] sm:$0x1] }
 0x4ab   :  { %v6337_v31 = vpop.f32.mrf.mxu1 }
 0x4ac   :  { %v5175_v38 = vadd.f32 %v6336_v53, %v9618_v32  ;;  %v6538_v32 = vld [vmem:[%s9951_s5 + $0x18] sm:$0xff]  }
 0x4ad   :  { %v6338_v24 = vpop.f32.mrf.mxu1  ;;  %6349 = vmatpush3.bf16.msra.mxu1 %v6538_v32  ;;  %v5286_v32 = vld [vmem:[#allocation9 + $0x10] sm:$0x1] }
 0x4ae   :  { %v5188_v47 = vmax.f32 %v5175_v38, 0.0  ;;  %v5226_v0 = vld [vmem:[#allocation7 + $0x21] ss:$4 sm:$0xff]  ;;  %v5228_v56 = vld [vmem:[#allocation7 + $0x22] ss:$4 sm:$0xff]  ;;  %6350 = vmatprep.subr.bf16.mxu1 %v6539_v58  ;;  %v5358_v38 = vrot.slane %v5356_v30, 7 }
 0x4af   :  { %v5231_v20 = vld [vmem:[#allocation7 + $0x23] ss:$4 sm:$0xff]  ;;  %v5229_v42 = vmax.f32 %v5226_v0, %v5228_v56  ;;  %v5365_v24 = vshll.u32 %v5351_v12, 16 }
 0x4b0   :  { %5199 = vst.msk [vmem:[#allocation7 + $0x40] sm:$0x3] %vm5198_vm8, %v5188_v47  ;;  %v6543_v0 = vld [vmem:[%s9951_s5 + $0x40] sm:$0xff]   ;;  %v5359_v21 = vor.u32 %v5358_v38, %v5355_v10  ;;  %v5396_v10 = vld [vmem:[#allocation8] sm:$0x8] }
 0x4b1   :  { %6351 = vmatpush3.bf16.msra.mxu1 %v6540_v17  ;;  %v6544_v56 = vld [vmem:[%s9951_s5] sm:$0xff]   ;;  %v9767_v6 = vrot.slane %v5365_v24, 7  ;;  %v5399_v13 = vshrl.u32 %v5396_v10, 16 }
 0x4b2   :  { %6352 = vmatprep.subr.bf16.mxu1 %v6541_v60  ;;  %v5411_v60 = vrot.slane %v9756_v51, 4 }
 0x4b3   :  { %v5368_v63 = vor.u32 %v9767_v6, %v9728_v35 }
 0x4b5   :  { %6353 = vmatpush3.bf16.msra.mxu1 %v6542_v46 }
 0x4b6   :  { %6354 = vmatprep.subr.bf16.mxu1 %v6543_v0 }
 0x4b7   :  { %v5233_v36 = vld [vmem:[#allocation7 + $0x24] ss:$4 sm:$0xff] }
 0x4b8   :  { %v5234_v14 = vmax.f32 %v5231_v20, %v5233_v36  ;;  %v5370_v36 = vrot.slane %v9728_v35, 4  ;;  %v6548_v35 = vld [vmem:[%s9951_s5 + $0xf8] sm:$0xff]  }
 0x4b9   :  { %6355 = vmatpush3.bf16.msra.mxu1 %v6544_v56 }
 0x4ba   :  { %v5235_v19 = vmax.f32 %v5229_v42, %v5234_v14  ;;  %6368 = vmatprep.subr.bf16.mxu1 %v6548_v35 }
 0x4bc   :  { %v6270_v27 = vpack.c.bf16 %v5235_v19, %v5235_v19  ;;  %v6549_v19 = vld [vmem:[%s9951_s5 + $0xb8] sm:$0xff]  }
 0x4be   :  { %v5240_v55 = vrot.slane %v6270_v27, 6 }
 0x4c0   :  { %5245 = vst.msk [vmem:[#allocation8 + $0x8] sm:$0xc] %vm5202_vm6, %v5240_v55  ;;  %v5241_v48 = vrot.slane %v5240_v55, 4  ;;  %vm9800_vm6 = vmand %vm5249_vm2, %vm10254_vm1 }
 0x4c2   :  { %5246 = vst.msk [vmem:[#allocation8 + $0xc] sm:$0x3] %vm5198_vm8, %v5241_v48  ;;  %vm5284_vm8 = vcmask 1040896  }
 0x4c7   :  { %v5445_v49 = vld [vmem:[#allocation8 + $0x8] sm:$0xf] }
 0x4c8   :  { %v5489_v25 = vld [vmem:[#allocation8 + $0x8] sm:$0xe]  ;;  %5449 = vrot.lane.b32.xlu0 %v5445_v49, %s6587_s16  ;;  %v5360_v49 = vrot.slane %v5359_v21, 4 }
 0x4c9   :  { %v9724_v61 = vld [vmem:[#allocation8 + $0x8] sm:$0xf]  ;;  %v9726_v45 = vld [vmem:[#allocation8 + $0xc] sm:$0x3]  ;;  %v6177_v41 = vrot.slane %v5489_v25, 9 }
 0x4ca   :  { %v5495_v18 = vrot.slane %v9726_v45, 5  ;;  %v5425_v54 = vshrl.u32 %v9724_v61, 16  ;;  %v5462_v44 = vld [vmem:[#allocation8 + $0x8] sm:$0xe]  ;;  %v5463_v53 = vld [vmem:[#allocation8 + $0xc] sm:$0x3] }
 0x4cb   :  { %v5423_v47 = vld [vmem:[#allocation8 + $0xc] sm:$0x1]  ;;  %v5465_v42 = vshrl.u32 %v5462_v44, 16  ;;  %v5468_v57 = vshll.u32 %v5462_v44, 16  ;;  %v5474_v14 = vshll.u32 %v5463_v53, 16  ;;  %v5478_v28 = vshrl.u32 %v5463_v53, 16 }
 0x4cc   :  { %5276 = vrot.lane.b32.xlu0 %v5271_v34, %s6587_s16  ;;  %v5496_v31 = vsel %vm6708_vm9, %v6177_v41, %v5495_v18  ;;  %v9747_v20 = vrot.slane %v5425_v54, 7  ;;  %v5509_v22 = vld [vmem:[#allocation8 + $0xc] sm:$0x7]  ;;  %vm10251_vm9 = vmmov %vm10248_vm15  ;;  %v5433_v27 = vshll.u32 %v5423_v47, 16  ;;  %v5535_v12 = vld [vmem:[#allocation8 + $0x8] sm:$0xc] }
 0x4cd   :  { %5498 = vrot.lane.b32.xlu1 %v5496_v31, %s6587_s16  ;;  %vm9752_vm5 = vmand %vm5284_vm8, %vm10251_vm9  ;;  %v9765_v55 = vld [vmem:[#allocation8 + $0xc] sm:$0x7]  ;;  %v5520_v40 = vshrl.u32 %v5509_v22, 16  ;;  %v9770_v58 = vrot.slane %v5474_v14, 5  ;;  %v5523_v17 = vshll.u32 %v5509_v22, 16  ;;  %v5467_v62 = vrot.slane %v5465_v42, 4 }
 0x4ce   :  { %v5431_v23 = vrot.slane %v9747_v20, 4  ;;  %v5279_v8 = vpop.permute.xlu0 %5278  ;;  %v5555_v26 = vld [vmem:[#allocation8 + $0xc] sm:$0xf]  ;;  %v5470_v33 = vrot.slane %v5468_v57, 5  ;;  %v5541_v46 = vrot.slane %v9765_v55, 6  ;;  %v5480_v4 = vrot.slane %v5478_v28, 4 }
 0x4cf   :  { %v5287_v37 = vsel %vm9752_vm5, %v5279_v8, %v5286_v32  ;;  %v5522_v43 = vrot.slane %v5520_v40, 5  ;;  %v5446_v29 = vld [vmem:[#allocation8 + $0xc] sm:$0x1]  ;;  %v5525_v7 = vrot.slane %v5523_v17, 6  ;;  %v5566_v25 = vshrl.u32 %v5555_v26, 16  ;;  %v6564_v8 = vld [vmem:[%s9951_s5 + $0xc8] sm:$0xff]  }
 0x4d0   :  { %5373 = vrot.lane.b32.xlu0 %v5370_v36, %s6587_s16  ;;  %v5435_v48 = vsel %vm6846_vm12, %v5431_v23, %v5433_v27  ;;  %5288 = vst [vmem:[#allocation9 + $0x10] sm:$0x1] %v5287_v37  ;;  %v5569_v15 = vshll.u32 %v5555_v26, 16  ;;  %v6178_v9 = vrot.slane %v5535_v12, 10  ;;  %v5582_v41 = vld [vmem:[#allocation8 + $0xc] sm:$0xf]  ;;  %v5481_v34 = vor.u32 %v5480_v4, %v9770_v58 }
 0x4d1   :  { %5325 = vrot.lane.b32.xlu1 %v5323_v11, %s6587_s16  ;;  %5444 = vst.msk [vmem:[#allocation9 + $0x20] sm:$0x1] %vm5251_vm7, %v5435_v48  ;;  %v5428_v52 = vshll.u32 %v9724_v61, 16  ;;  %v9784_v54 = vor.u32 %v5525_v7, %v5522_v43  ;;  %v5471_v44 = vor.u32 %v5470_v33, %v5467_v62  ;;  %v5568_v53 = vrot.slane %v5566_v25, 6  ;;  %v5581_v24 = vld [vmem:[#allocation8 + $0x8] sm:$0x8] }
 0x4d2   :  { %v5571_v31 = vrot.slane %v5569_v15, 7  ;;  %v5542_v38 = vsel %vm6654_vm4, %v6178_v9, %v5541_v46  ;;  %v5497_v61 = vrot.slane %v5495_v18, 4  ;;  %v5482_v47 = vrot.slane %v5481_v34, 4  ;;  %v5554_v37 = vld [vmem:[#allocation8 + $0x8] sm:$0x8]  ;;  %v6554_v36 = vld [vmem:[%s9951_s5 + $0xa8] sm:$0xff]  }
 0x4d3   :  { %v5328_v30 = vpop.permute.xlu1 %5327  ;;  %v5528_v0 = vrot.slane %v9784_v54, 4  ;;  %v5587_v56 = vrot.slane %v5582_v41, 7  ;;  %v5430_v45 = vor.u32 %v5428_v52, %v9747_v20  ;;  %v6179_v18 = vrot.slane %v5581_v24, 11  ;;  %v5378_v4 = vld [vmem:[#allocation9 + $0x18] sm:$0x1] }
 0x4d4   :  { %5451 = vrot.lane.b32.xlu0 %v5446_v29, %s6587_s16  ;;  %v5333_v1 = vsel %vm9752_vm5, %v5328_v30, %v5332_v5  ;;  %v9804_v42 = vor.u32 %v5571_v31, %v5568_v53  ;;  %5488 = vst.msk [vmem:[#allocation9 + $0x24] sm:$0x1] %vm5251_vm7, %v5482_v47  ;;  %v5407_v57 = vshll.u32 %v9721_v39, 16  ;;  %v5472_v22 = vrot.slane %v5471_v44, 4  ;;  %v5419_v41 = vld [vmem:[#allocation9 + $0x1c] sm:$0x1] }
 0x4d5   :  { %5414 = vrot.lane.b32.xlu1 %v5411_v60, %s6587_s16  ;;  %5334 = vst [vmem:[#allocation9 + $0x14] sm:$0x1] %v5333_v1  ;;  %5534 = vst.msk [vmem:[#allocation9 + $0x28] sm:$0x1] %vm5251_vm7, %v5528_v0  ;;  %v5369_v27 = vsel %vm6795_vm3, %v5360_v49, %v5368_v63  ;;  %v5588_v20 = vsel %vm6810_vm10, %v6179_v18, %v5587_v56  ;;  %v5543_v39 = vrot.slane %v5541_v46, 4  ;;  %v6176_v55 = vrot.slane %v5399_v13, 11 }
 0x4d6   :  { %v5574_v23 = vrot.slane %v9804_v42, 4  ;;  %v5409_v32 = vor.u32 %v5407_v57, %v9756_v51  ;;  %v5477_v6 = vsel %vm6749_vm11, %v5472_v22, %v9770_v58  ;;  %v5589_v51 = vrot.slane %v5587_v56, 4  ;;  %vm10257_vm10 = vmmov %vm10254_vm1  ;;  %v5508_v58 = vld [vmem:[#allocation8 + $0x8] sm:$0xc]  ;;  %v6553_v57 = vld [vmem:[%s9951_s5 + $0xe8] sm:$0xff]  }
 0x4d7   :  { %v5440_v14 = vld [vmem:[#allocation9 + $0x10] sm:$0xf]  ;;  %vm5282_vm4 = vcmask 1043968   ;;  %v5511_v28 = vshrl.u32 %v5508_v58, 16  ;;  %v5514_v26 = vshll.u32 %v5508_v58, 16  ;;  %v5557_v46 = vshrl.u32 %v5554_v37, 16 }
 0x4d8   :  { %5544 = vrot.lane.b32.xlu0 %v5542_v38, %s6587_s16  ;;  %v5441_v11 = vsel %vm9800_vm6, %v5430_v45, %v5440_v14  ;;  %5580 = vst.msk [vmem:[#allocation9 + $0x2c] sm:$0x1] %vm5251_vm7, %v5574_v23  ;;  %v5410_v2 = vsel %vm6846_vm12, %v6176_v55, %v5409_v32  ;;  %vm9834_vm13 = vmand %vm5282_vm4, %vm10257_vm10  ;;  %v5560_v7 = vshll.u32 %v5554_v37, 16  ;;  %v6551_v45 = vld [vmem:[%s9951_s5 + $0xb0] sm:$0xff]  }
 0x4d9   :  { %5500 = vrot.lane.b32.xlu1 %v5497_v61, %s6587_s16  ;;  %5442 = vst [vmem:[#allocation9 + $0x10] sm:$0xf] %v5441_v11  ;;  %v5513_v43 = vrot.slane %v5511_v28, 5  ;;  %v5516_v29 = vrot.slane %v5514_v26, 6  ;;  %v5559_v5 = vrot.slane %v5557_v46, 6 }
 0x4da   :  { %v5562_v30 = vrot.slane %v5560_v7, 7 }
 0x4db   :  { %v5517_v15 = vor.u32 %v5516_v29, %v5513_v43 }
 0x4dc   :  { %5371 = vrot.lane.b32.xlu0 %v5369_v27, %s6587_s16  ;;  %v5485_v21 = vld [vmem:[#allocation9 + $0x14] sm:$0xf]  ;;  %v5563_v10 = vor.u32 %v5562_v30, %v5559_v5 }
 0x4dd   :  { %5590 = vrot.lane.b32.xlu1 %v5588_v20, %s6587_s16  ;;  %v5486_v40 = vsel %vm9800_vm6, %v5477_v6, %v5485_v21  ;;  %v5518_v34 = vrot.slane %v5517_v15, 4  ;;  %v6555_v20 = vld [vmem:[%s9951_s5 + $0xe0] sm:$0xff]   ;;  %v6557_v21 = vld [vmem:[%s9951_s5 + $0xd8] sm:$0xff]  }
 0x4de   :  { %5487 = vst [vmem:[#allocation9 + $0x14] sm:$0xf] %v5486_v40  ;;  %v5564_v47 = vrot.slane %v5563_v10, 4  ;;  %v6558_v40 = vld [vmem:[%s9951_s5 + $0x98] sm:$0xff]  }
 0x4df   :  { %v5527_v35 = vsel %vm6767_vm14, %v5518_v34, %v9784_v54  ;;  %vm10260_vm14 = vmmov %vm10251_vm9 }
 0x4e0   :  { %5546 = vrot.lane.b32.xlu0 %v5543_v39, %s6587_s16  ;;  %v5457_v17 = vld [vmem:[#allocation9 + $0x10] sm:$0xf]  ;;  %v5573_v56 = vsel %vm6795_vm3, %v5564_v47, %v9804_v42  ;;  %v6556_v39 = vld [vmem:[%s9951_s5 + $0xa0] sm:$0xff]   ;;  %vm10261_vm3 = vcmask 1040384  }
 0x4e1   :  { %5412 = vrot.lane.b32.xlu1 %v5410_v2, %s6587_s16  ;;  %v6559_v2 = vld [vmem:[%s9951_s5 + $0xd0] sm:$0xff]   ;;  %vm9921_vm12 = vmand %vm10261_vm3, %vm10260_vm14 }
 0x4e5   :  { %5592 = vrot.lane.b32.xlu1 %v5589_v51, %s6587_s16  ;;  %v5504_v33 = vld [vmem:[#allocation9 + $0x14] sm:$0xf] }
 0x4e6   :  { %v6560_v51 = vld [vmem:[%s9951_s5 + $0x90] sm:$0xff]  }
 0x53a   :  { %v5450_v48 = vpop.permute.xlu0 %5449 }
 0x53b   :  { %v5458_v59 = vsel %vm9834_vm13, %v5450_v48, %v5457_v17  ;;  %v6565_v48 = vld [vmem:[%s9951_s5 + $0x88] sm:$0xff]   ;;  %v6566_v17 = vld [vmem:[%s9951_s5 + $0xc0] sm:$0xff]  }
 0x53c   :  { %5459 = vst [vmem:[#allocation9 + $0x10] sm:$0xf] %v5458_v59  ;;  %v6567_v59 = vld [vmem:[%s9951_s5 + $0x80] sm:$0xff]  }
 0x53e   :  { %v5277_v12 = vpop.permute.xlu0 %5276 }
 0x53f   :  { %5283 = vst.msk [vmem:[#allocation9] sm:$0xf] %vm5282_vm4, %v5277_v12  ;;  %v5499_v62 = vpop.permute.xlu1 %5498 }
 0x540   :  { %v5505_v60 = vsel %vm9834_vm13, %v5499_v62, %v5504_v33 }
 0x541   :  { %5506 = vst [vmem:[#allocation9 + $0x14] sm:$0xf] %v5505_v60 }
 0x542   :  { %v5374_v49 = vpop.permute.xlu0 %5373 }
 0x543   :  { %v5379_v63 = vsel %vm9752_vm5, %v5374_v49, %v5378_v4  ;;  %v5326_v25 = vpop.permute.xlu1 %5325 }
 0x544   :  { %5380 = vst [vmem:[#allocation9 + $0x18] sm:$0x1] %v5379_v63  ;;  %5331 = vst.msk [vmem:[#allocation9 + $0x4] sm:$0xf] %vm5282_vm4, %v5326_v25  ;;  %v6180_v63 = vld [vmem:[%s9952_s6] ss:$0 sm:$0xff] }
 0x546   :  { %v5452_v9 = vpop.permute.xlu0 %5451  ;;  %v6545_v38 = vld [vmem:[#allocation9] ss:$16 sps:$4 sm:$0xff]  }
 0x547   :  { %5461 = vst.msk [vmem:[#allocation9 + $0x20] sm:$0x1] %vm5284_vm8, %v5452_v9  ;;  %v5415_v52 = vpop.permute.xlu1 %5414 }
 0x548   :  { %v5420_v1 = vsel %vm9752_vm5, %v5415_v52, %v5419_v41 }
 0x549   :  { %5421 = vst [vmem:[#allocation9 + $0x1c] sm:$0x1] %v5420_v1 }
 0x54a   :  { %v5545_v44 = vpop.permute.xlu0 %5544 }
 0x54b   :  { %v5531_v53 = vld [vmem:[#allocation9 + $0x18] sm:$0xf]  ;;  %v5501_v31 = vpop.permute.xlu1 %5500  ;;  %v6547_v24 = vld [vmem:[#allocation9 + $0x4] ss:$16 sps:$4 sm:$0xff]  }
 0x54c   :  { %v5532_v61 = vsel %vm9800_vm6, %v5527_v35, %v5531_v53  ;;  %5507 = vst.msk [vmem:[#allocation9 + $0x24] sm:$0x1] %vm5284_vm8, %v5501_v31  ;;  %5935 = vmatprep.mubr.bf16.mxu1 %v6547_v24 }
 0x54d   :  { %5533 = vst [vmem:[#allocation9 + $0x18] sm:$0xf] %v5532_v61  ;;  %5936 = vmatmul.mubr.bf16.vlgmr.msra.gmra.mxu1 %v6545_v38 }
 0x54e   :  { %v5372_v54 = vpop.permute.xlu0 %5371  ;;  %6369 = vmatpush3.bf16.msra.mxu1 %v6549_v19 }
 0x54f   :  { %5377 = vst.msk [vmem:[#allocation9 + $0x8] sm:$0xf] %vm5282_vm4, %v5372_v54  ;;  %v5591_v0 = vpop.permute.xlu1 %5590  ;;  %6370 = vmatprep.subr.bf16.mxu1 %v6550_v16  ;;  %v6012_v54 = vld [vmem:[%s9953_s7 + $0x4] sm:$0x1] }
 0x550   :  { %v5577_v13 = vld [vmem:[#allocation9 + $0x1c] sm:$0xf] }
 0x551   :  { %v5578_v18 = vsel %vm9800_vm6, %v5573_v56, %v5577_v13 }
 0x552   :  { %5579 = vst [vmem:[#allocation9 + $0x1c] sm:$0xf] %v5578_v18  ;;  %v5547_v14 = vpop.permute.xlu0 %5546  ;;  %6371 = vmatpush3.bf16.msra.mxu1 %v6551_v45 }
 0x553   :  { %5553 = vst.msk [vmem:[#allocation9 + $0x28] sm:$0x1] %vm5284_vm8, %v5547_v14  ;;  %v5413_v3 = vpop.permute.xlu1 %5412  ;;  %v5604_v42 = vld [vmem:[#allocation9 + $0x20] sm:$0x11]  ;;  %6372 = vmatprep.subr.bf16.mxu1 %v6553_v57 }
 0x554   :  { %v5550_v22 = vld [vmem:[#allocation9 + $0x18] sm:$0xf]  ;;  %5418 = vst.msk [vmem:[#allocation9 + $0xc] sm:$0xf] %vm5282_vm4, %v5413_v3  ;;  %v6186_v23 = vcombine.high %v5604_v42, %v5604_v42  ;;  %v6185_v27 = vcombine.low %v5604_v42, %v5604_v42 }
 0x555   :  { %v5551_v11 = vsel %vm9834_vm13, %v5545_v44, %v5550_v22 }
 0x556   :  { %5552 = vst [vmem:[#allocation9 + $0x18] sm:$0xf] %v5551_v11  ;;  %5943 = vmatprep.mubr.bf16.mxu1 %v6186_v23  ;;  %6373 = vmatpush3.bf16.msra.mxu1 %v6554_v36 }
 0x557   :  { %v5593_v32 = vpop.permute.xlu1 %5592  ;;  %5944 = vmatmul.mubr.bf16.gmra.mxu1 %v6185_v27  ;;  %6374 = vmatprep.subr.bf16.mxu1 %v6555_v20  ;;  %v6227_v27 = vld [vmem:[%s9953_s7 + $0xc] sm:$0x1] }
 0x558   :  { %5599 = vst.msk [vmem:[#allocation9 + $0x2c] sm:$0x1] %vm5284_vm8, %v5593_v32 }
 0x559   :  { %v5596_v55 = vld [vmem:[#allocation9 + $0x1c] sm:$0xf] }
 0x55a   :  { %v5597_v6 = vsel %vm9834_vm13, %v5591_v0, %v5596_v55  ;;  %6375 = vmatpush3.bf16.msra.mxu1 %v6556_v39 }
 0x55b   :  { %5598 = vst [vmem:[#allocation9 + $0x1c] sm:$0xf] %v5597_v6  ;;  %6376 = vmatprep.subr.bf16.mxu1 %v6557_v21 }
 0x55d   :  { %v6561_v26 = vld [vmem:[#allocation9 + $0x8] ss:$16 sps:$4 sm:$0xff]  }
 0x55e   :  { %6377 = vmatpush3.bf16.msra.mxu1 %v6558_v40 }
 0x55f   :  { %6378 = vmatprep.subr.bf16.mxu1 %v6559_v2  ;;  %v5605_v28 = vld [vmem:[#allocation9 + $0x28] sm:$0x11] }
 0x560   :  { %v6188_v37 = vcombine.high %v5605_v28, %v5605_v28  ;;  %v6187_v12 = vcombine.low %v5605_v28, %v5605_v28 }
 0x562   :  { %v6563_v58 = vld [vmem:[#allocation9 + $0xc] ss:$16 sps:$4 sm:$0xff]   ;;  %6379 = vmatpush3.bf16.msra.mxu1 %v6560_v51 }
 0x563   :  { %5983 = vmatprep.mubr.bf16.mxu1 %v6563_v58  ;;  %6380 = vmatprep.subr.bf16.mxu1 %v6564_v8 }
 0x566   :  { %6381 = vmatpush3.bf16.msra.mxu1 %v6565_v48 }
 0x567   :  { %6382 = vmatprep.subr.bf16.mxu1 %v6566_v17 }
 0x56a   :  { %6383 = vmatpush3.bf16.msra.mxu1 %v6567_v59 }
 0x56d   :  { %5984 = vmatmul.mubr.bf16.vlgmr.msra.gmra.mxu1 %v6561_v26 }
 0x56e   :  { %5991 = vmatprep.mubr.bf16.mxu1 %v6188_v37 }
 0x575   :  { %5992 = vmatmul.mubr.bf16.gmra.mxu1 %v6187_v12 }
 0x60d   :  { %v6356_v62 = vpop.f32.mrf.mxu1 }
 0x60f   :  { %v6357_v33 = vpop.f32.mrf.mxu1 }
 0x610   :  { %v6358_v49 = vadd.f32 %v6357_v33, %v6356_v62 }
 0x611   :  { %v6359_v43 = vpop.f32.mrf.mxu1 }
 0x612   :  { %v5938_v5 = vadd.f32 %v6358_v49, %v6180_v63 }
 0x613   :  { %v6360_v29 = vpop.f32.mrf.mxu1 }
 0x614   :  { %v6361_v30 = vadd.f32 %v6360_v29, %v6359_v43 }
 0x616   :  { %v5941_v1 = vadd.f32 %v6361_v30, %v6180_v63 }
 0x617   :  { %v6362_v60 = vpop.f32.mrf.mxu1 }
 0x619   :  { %v6363_v46 = vpop.f32.mrf.mxu1 }
 0x61a   :  { %v6364_v10 = vadd.f32 %v6363_v46, %v6362_v60 }
 0x61b   :  { %v6365_v7 = vpop.f32.mrf.mxu1 }
 0x61c   :  { %v5946_v24 = vadd.f32 %v6364_v10, %v6180_v63 }
 0x61d   :  { %v6366_v4 = vpop.f32.mrf.mxu1 }
 0x62d   :  { %v6384_v25 = vpop.f32.mrf.mxu1 }
 0x62f   :  { %v6385_v15 = vpop.f32.mrf.mxu1 }
 0x630   :  { %v6386_v9 = vadd.f32 %v6385_v15, %v6384_v25 }
 0x631   :  { %v6387_v41 = vpop.f32.mrf.mxu1 }
 0x632   :  { %v5986_v52 = vadd.f32 %v6386_v9, %v5938_v5 }
 0x633   :  { %v6388_v34 = vpop.f32.mrf.mxu1 }
 0x634   :  { %v5999_v44 = vmax.f32 %v5986_v52, 0.0  ;;  %v6389_v35 = vadd.f32 %v6388_v34, %v6387_v41 }
 0x635   :  { %v6390_v53 = vpop.f32.mrf.mxu1 }
 0x636   :  { %v6271_v31 = vpack.c.bf16 %v5999_v44, %v5999_v44  ;;  %v5989_v38 = vadd.f32 %v6389_v35, %v5941_v1 }
 0x637   :  { %v6391_v61 = vpop.f32.mrf.mxu1 }
 0x638   :  { %6010 = vst [vmem:[%s9953_s7] sm:$0xf] %v6271_v31  ;;  %v6000_v47 = vmax.f32 %v5989_v38, 0.0  ;;  %v6392_v19 = vadd.f32 %v6391_v61, %v6390_v53 }
 0x639   :  { %v6393_v0 = vpop.f32.mrf.mxu1 }
 0x63a   :  { %v6272_v56 = vpack.c.bf16 %v6000_v47, %v6000_v47  ;;  %v5994_v13 = vadd.f32 %v6392_v19, %v5946_v24 }
 0x63b   :  { %v6394_v45 = vpop.f32.mrf.mxu1 }
 0x63c   :  { %v6013_v18 = vsel %vm9921_vm12, %v6272_v56, %v6012_v54  ;;  %v6022_v57 = vshrl.u32 %v6272_v56, 16  ;;  %v6025_v14 = vshll.u32 %v6272_v56, 16  ;;  %v6001_v3 = vmax.f32 %v5994_v13, 0.0 }
 0x63d   :  { %6014 = vst [vmem:[%s9953_s7 + $0x4] sm:$0x1] %v6013_v18 }
 0x63e   :  { %v6024_v42 = vrot.slane %v6022_v57, 4  ;;  %v6027_v22 = vrot.slane %v6025_v14, 5  ;;  %v6274_v23 = vpack.c.bf16 %v6001_v3, %v6001_v3 }
 0x640   :  { %v6028_v36 = vor.u32 %v6027_v22, %v6024_v42  ;;  %v6031_v11 = vshll.u32 %v6274_v23, 16  ;;  %v6035_v20 = vshrl.u32 %v6274_v23, 16 }
 0x642   :  { %v6029_v32 = vrot.slane %v6028_v36, 4  ;;  %v6033_v39 = vrot.slane %v6031_v11, 5  ;;  %v6044_v55 = vsel %vm9921_vm12, %v6035_v20, %v6227_v27 }
 0x643   :  { %6228 = vst [vmem:[%s9953_s7 + $0xc] sm:$0x1] %v6044_v55 }
 0x644   :  { %v6034_v21 = vsel %vm6749_vm11, %v6029_v32, %v6033_v39 }
 0x645   :  { %6226 = vst [vmem:[%s9953_s7 + $0x8] sm:$0xf] %v6034_v21 }

</bundles_post_ra>
